<compile_context>
chip_gen: v7x
topology: tpu7x:2x2x1
jax: 0.10.0
libtpu: 0.0.40
codegen_flags: <defaults>
</compile_context>

<pallas_src>
import functools

import jax
import jax.numpy as jnp
import numpy as np
from jax.experimental import pallas as pl
from jax.experimental.pallas import tpu as pltpu


def _cdiv(a, b):
    return -(-a // b)


def _round_up(a, b):
    return _cdiv(a, b) * b


# ----------------------------- Pallas kernel ------------------------------- #

def _conv_stats_kernel(base_ref, halo_ref, w_ref, mask_ref,
                       out_ref, stats_ref, xbuf_ref, slab_ref,
                       *, offsets, cin, k_used):
    """Fused Conv3d tile (single MXU matmul, K = Cin*kvol) + BN partial stats.

    base_ref : (Cin, T)         current flat-input slab (channel-major)
    halo_ref : (Cin, halo_w)    narrow halo (next round_up(off_max,128) columns)
    w_ref    : (Cout, K_pad)    weights, tap-major / channel-minor, K zero-padded
    mask_ref : (1, T)           1.0 where this flat position is a real output voxel
    out_ref  : (Cout, T)        lane-dense conv output tile (f32)
    stats_ref: (1, Cout, 2)     per-tile BN partials: [..,0]=sum, [..,1]=sum of squares
    xbuf_ref : (Cin, T+halo_w)  VMEM scratch: contiguous input window
    slab_ref : (K_pad, T)       VMEM scratch: lazy im2col slab
    """
    t = out_ref.shape[1]

    # contiguous input window = current tile + narrow halo
    xbuf_ref[:, :t] = base_ref[...]
    xbuf_ref[:, t:] = halo_ref[...]

    # lazy im2col: one (K, T) slab from statically shifted views (no HBM blow-up)
    for k, off in enumerate(offsets):
        slab_ref[k * cin:(k + 1) * cin, :] = xbuf_ref[:, off:off + t]
    if slab_ref.shape[0] > k_used:                        # zero the K padding rows
        slab_ref[k_used:, :] = jnp.zeros(
            (slab_ref.shape[0] - k_used, t), slab_ref.dtype)

    # single fused MXU matmul over the whole K = Cin*kvol contraction
    acc = jnp.dot(w_ref[...], slab_ref[...], preferred_element_type=jnp.float32)
    out_ref[...] = acc.astype(out_ref.dtype)

    # fused per-channel BatchNorm batch statistics over valid voxels only
    masked = acc * mask_ref[...]                          # (Cout, T)
    s1 = jnp.sum(masked, axis=1, keepdims=True)           # (Cout, 1)
    s2 = jnp.sum(masked * acc, axis=1, keepdims=True)     # (Cout, 1)
    stats_ref[...] = jnp.concatenate([s1, s2], axis=1).reshape(stats_ref.shape)


# ------------------------------- Wrapper ----------------------------------- #

def basic_conv3d(x, weight, gamma, beta, *, stride, padding, eps=1e-3,
                 tile_target=4096, compute_dtype=jnp.float32,
                 vmem_budget=40 * 1024 * 1024):
    """Conv3d(bias=False) + BatchNorm3d(training-mode batch stats) + ReLU."""
    N, Cin, D, H, W = x.shape
    Cout, Cin_w, kD, kH, kW = weight.shape
    assert Cin == Cin_w
    s = int(stride)
    p = int(padding)

    Do = (D + 2 * p - kD) // s + 1
    Ho = (H + 2 * p - kH) // s + 1
    Wo = (W + 2 * p - kW) // s + 1

    Dp, Hp, Wp = D + 2 * p, H + 2 * p, W + 2 * p
    vol = Dp * Hp * Wp
    F = N * vol                                    # flat padded-volume length

    # flat, channel-major padded input (no materialized im2col)
    xp = jnp.pad(x, ((0, 0), (0, 0), (p, p), (p, p), (p, p)))
    Xf = xp.transpose(1, 0, 2, 3, 4).reshape(Cin, F).astype(compute_dtype)

    kvol = kD * kH * kW
    offsets = tuple(kd * Hp * Wp + kh * Wp + kw
                    for kd in range(kD) for kh in range(kH) for kw in range(kW))
    off_max = offsets[-1]

    # tile geometry: halo covers every tap offset; tile_m is a multiple of the halo
    # width (so the halo BlockSpec block index is exact), targeting ~tile_target cols.
    halo_w = max(128, _round_up(off_max, 128))
    itemsize = jnp.dtype(compute_dtype).itemsize
    K = kvol * Cin
    K_pad = _round_up(K, 8)
    n_goal = max(2, _cdiv(F, tile_target))         # >= 2 tiles: both v7x TCs get work
    tile_m = _round_up(_cdiv(F, n_goal), halo_w)

    def _vmem_bytes(tm):                           # double-buffered ins/outs + scratch
        return (2 * Cin * tm * itemsize            # base slab
                + 2 * Cin * halo_w * itemsize      # halo slab
                + 2 * tm * 4                       # mask
                + 2 * Cout * K_pad * itemsize      # weights
                + 2 * Cout * tm * 4                # conv output tile
                + Cin * (tm + halo_w) * itemsize   # xbuf scratch
                + K_pad * tm * itemsize)           # im2col slab scratch

    while tile_m > halo_w and _vmem_bytes(tile_m) > vmem_budget:
        tile_m -= halo_w                           # shrink to fit (v7x: 64 MiB VMEM)

    tiles = _cdiv(F, tile_m)
    M_pad = tiles * tile_m
    ratio = tile_m // halo_w

    # pad so the narrow halo of the last tile exists (all zeros)
    X_in = jnp.pad(Xf, ((0, 0), (0, M_pad + halo_w - F)))

    # weights as (Cout, kvol*Cin): tap-major, channel-minor; K zero-padded to K_pad
    Wl = weight.transpose(0, 2, 3, 4, 1).reshape(Cout, K).astype(compute_dtype)
    Wl = jnp.pad(Wl, ((0, 0), (0, K_pad - K)))

    # 0/1 mask of flat positions that are real (stride-valid) output voxels
    f = jnp.arange(M_pad, dtype=jnp.int32)
    n_idx = f // vol
    r = f % vol
    dp = r // (Hp * Wp)
    r2 = r % (Hp * Wp)
    hq = r2 // Wp
    wq = r2 % Wp
    valid = ((n_idx < N)
             & (dp % s == 0) & (dp < Do * s)
             & (hq % s == 0) & (hq < Ho * s)
             & (wq % s == 0) & (wq < Wo * s))
    mask = valid.astype(jnp.float32).reshape(1, M_pad)

    kernel = functools.partial(_conv_stats_kernel,
                               offsets=offsets, cin=Cin, k_used=K)
    conv_out, stats = pl.pallas_call(
        kernel,
        out_shape=(
            jax.ShapeDtypeStruct((Cout, M_pad), jnp.float32),
            jax.ShapeDtypeStruct((tiles, Cout, 2), jnp.float32),
        ),
        grid=(tiles,),
        in_specs=[
            pl.BlockSpec((Cin, tile_m), lambda i: (0, i)),               # current slab
            pl.BlockSpec((Cin, halo_w), lambda i: (0, (i + 1) * ratio)),  # narrow halo
            pl.BlockSpec((Cout, K_pad), lambda i: (0, 0)),                # weights
            pl.BlockSpec((1, tile_m), lambda i: (0, i)),                  # mask
        ],
        out_specs=(
            pl.BlockSpec((Cout, tile_m), lambda i: (0, i)),               # lane-dense
            pl.BlockSpec((1, Cout, 2), lambda i: (i, 0, 0)),              # BN partials
        ),
        scratch_shapes=[
            pltpu.VMEM((Cin, tile_m + halo_w), compute_dtype),            # input window
            pltpu.VMEM((K_pad, tile_m), compute_dtype),                   # im2col slab
        ],
        compiler_params=pltpu.CompilerParams(
            dimension_semantics=("parallel",),      # shards tiles across v7x's 2 TCs
            vmem_limit_bytes=48 * 1024 * 1024),     # <= v7x 64 MiB; ample on v5e/v6e
    )(X_in, X_in, Wl, mask)

    # BatchNorm (training mode: biased batch stats) folded to per-channel scale/shift.
    # TODO(synk): running_mean/running_var momentum update is a training-time side
    # effect with no influence on the returned tensor; not reproduced here.
    count = jnp.float32(N * Do * Ho * Wo)
    ch_sum = jnp.sum(stats[:, :, 0], axis=0)                  # (Cout,)
    ch_ssq = jnp.sum(stats[:, :, 1], axis=0)                  # (Cout,)
    mean = ch_sum / count
    var = jnp.maximum(ch_ssq / count - mean * mean, 0.0)      # biased var, clamped
    inv = jax.lax.rsqrt(var + eps)
    scale = gamma.astype(jnp.float32) * inv                   # (Cout,)
    shift = beta.astype(jnp.float32) - mean * scale           # (Cout,)

    # Fused epilogue: scale/shift + ReLU + crop to valid voxels + stride subsample
    # + NCDHW restore, all in one XLA pass over the conv output (no second kernel).
    y = jnp.maximum(conv_out * scale[:, None] + shift[:, None], 0.0)
    y = y[:, :F].reshape(Cout, N, Dp, Hp, Wp)
    y = y[:, :, 0:(Do - 1) * s + 1:s, 0:(Ho - 1) * s + 1:s, 0:(Wo - 1) * s + 1:s]
    return y.transpose(1, 0, 2, 3, 4)                         # (N, Cout, Do, Ho, Wo)


# ------------------------------ Reference ---------------------------------- #

def basic_conv3d_ref(x, weight, gamma, beta, *, stride, padding, eps=1e-3):
    s = int(stride)
    p = int(padding)
    conv = jax.lax.conv_general_dilated(
        x.astype(jnp.float32), weight.astype(jnp.float32),
        window_strides=(s, s, s), padding=[(p, p)] * 3,
        dimension_numbers=("NCDHW", "OIDHW", "NCDHW"))
    mean = jnp.mean(conv, axis=(0, 2, 3, 4), keepdims=True)
    var = jnp.mean((conv - mean) ** 2, axis=(0, 2, 3, 4), keepdims=True)  # biased
    g = gamma.reshape(1, -1, 1, 1, 1)
    b = beta.reshape(1, -1, 1, 1, 1)
    y = (conv - mean) * jax.lax.rsqrt(var + eps) * g + b
    return jnp.maximum(y, 0.0)


# --------------------------------- Main ------------------------------------ #

if __name__ == "__main__":
    key = jax.random.PRNGKey(0)
    k_x, k_w, k_g, k_b = jax.random.split(key, 4)

    # BasicConv3d(in_planes=4, out_planes=8, kernel_size=3, stride=1, padding=1)
    in_planes, out_planes, kernel_size, stride, padding = 4, 8, 3, 1, 1
    N, D, H, W = 2, 8, 16, 16

    x = jax.random.normal(k_x, (N, in_planes, D, H, W), dtype=jnp.float32)
    weight = jax.random.normal(
        k_w, (out_planes, in_planes, kernel_size, kernel_size, kernel_size),
        dtype=jnp.float32) * 0.1
    gamma = 1.0 + 0.5 * jax.random.normal(k_g, (out_planes,), dtype=jnp.float32)
    beta = 0.1 * jax.random.normal(k_b, (out_planes,), dtype=jnp.float32)

    out = basic_conv3d(x, weight, gamma, beta, stride=stride, padding=padding)
    out = jax.block_until_ready(out)

    ref = basic_conv3d_ref(x, weight, gamma, beta, stride=stride, padding=padding)
    ref = jax.block_until_ready(ref)

    assert out.shape == (N, out_planes, D, H, W), out.shape
    np.testing.assert_allclose(np.asarray(out), np.asarray(ref), rtol=1e-4, atol=1e-4)

    print("KERNEL_OK")
</pallas_src>

<mosaic_0001>
module attributes {stable_mosaic.version = 11 : i64} {
  func.func @_conv_stats_kernel(%arg0: i32, %arg1: memref<4x3840xf32, #tpu.memory_space<vmem>>, %arg2: memref<4x768xf32, #tpu.memory_space<vmem>>, %arg3: memref<8x112xf32, #tpu.memory_space<vmem>>, %arg4: memref<1x3840xf32, #tpu.memory_space<vmem>>, %arg5: memref<8x3840xf32, #tpu.memory_space<vmem>>, %arg6: memref<1x8x2xf32, #tpu.memory_space<vmem>>, %arg7: memref<4x4608xf32, #tpu.memory_space<vmem>>, %arg8: memref<112x3840xf32, #tpu.memory_space<vmem>>) attributes {dimension_semantics = [#tpu.dimension_semantics<parallel>], iteration_bounds = array<i64: 2>, scalar_prefetch = 0 : i64, scratch_operands = 2 : i64, tpu.core_type = #tpu.core_type<tc>, window_params = [{transform_indices = @transform_0, window_bounds = array<i64: 4, 3840>}, {transform_indices = @transform_1, window_bounds = array<i64: 4, 768>}, {pipeline_mode = #tpu.pipeline_mode<synchronous>, transform_indices = @transform_2, window_bounds = array<i64: 8, 112>}, {transform_indices = @transform_3, window_bounds = array<i64: 1, 3840>}, {transform_indices = @transform_4, window_bounds = array<i64: 8, 3840>}, {transform_indices = @transform_5, window_bounds = array<i64: 1, 8, 2>}]} {
    %c0 = arith.constant 0 : index
    %c0_0 = arith.constant 0 : index
    %0 = vector.load %arg1[%c0, %c0_0] : memref<4x3840xf32, #tpu.memory_space<vmem>>, vector<4x3840xf32>
    %c0_1 = arith.constant 0 : index
    %c0_2 = arith.constant 0 : index
    %1 = vector.load %arg7[%c0_1, %c0_2] : memref<4x4608xf32, #tpu.memory_space<vmem>>, vector<4x3840xf32>
    tpu.vector_store %arg7[%c0_1, %c0_2], %0 {strides = array<i32>} : memref<4x4608xf32, #tpu.memory_space<vmem>>, vector<4x3840xf32>,
    %c0_3 = arith.constant 0 : index
    %c0_4 = arith.constant 0 : index
    %2 = vector.load %arg2[%c0_3, %c0_4] : memref<4x768xf32, #tpu.memory_space<vmem>>, vector<4x768xf32>
    %c0_5 = arith.constant 0 : index
    %c3840 = arith.constant 3840 : index
    %3 = vector.load %arg7[%c0_5, %c3840] : memref<4x4608xf32, #tpu.memory_space<vmem>>, vector<4x768xf32>
    tpu.vector_store %arg7[%c0_5, %c3840], %2 {strides = array<i32>} : memref<4x4608xf32, #tpu.memory_space<vmem>>, vector<4x768xf32>,
    %c0_6 = arith.constant 0 : index
    %c0_7 = arith.constant 0 : index
    %4 = vector.load %arg7[%c0_6, %c0_7] : memref<4x4608xf32, #tpu.memory_space<vmem>>, vector<4x3840xf32>
    %c0_8 = arith.constant 0 : index
    %c0_9 = arith.constant 0 : index
    %5 = vector.load %arg8[%c0_8, %c0_9] : memref<112x3840xf32, #tpu.memory_space<vmem>>, vector<4x3840xf32>
    tpu.vector_store %arg8[%c0_8, %c0_9], %4 {strides = array<i32>} : memref<112x3840xf32, #tpu.memory_space<vmem>>, vector<4x3840xf32>,
    %c0_10 = arith.constant 0 : index
    %c1 = arith.constant 1 : index
    %6 = vector.load %arg7[%c0_10, %c1] : memref<4x4608xf32, #tpu.memory_space<vmem>>, vector<4x3840xf32>
    %c4 = arith.constant 4 : index
    %c0_11 = arith.constant 0 : index
    %7 = vector.load %arg8[%c4, %c0_11] : memref<112x3840xf32, #tpu.memory_space<vmem>>, vector<4x3840xf32>
    tpu.vector_store %arg8[%c4, %c0_11], %6 {strides = array<i32>} : memref<112x3840xf32, #tpu.memory_space<vmem>>, vector<4x3840xf32>,
    %c0_12 = arith.constant 0 : index
    %c2 = arith.constant 2 : index
    %8 = vector.load %arg7[%c0_12, %c2] : memref<4x4608xf32, #tpu.memory_space<vmem>>, vector<4x3840xf32>
    %c8 = arith.constant 8 : index
    %c0_13 = arith.constant 0 : index
    %9 = vector.load %arg8[%c8, %c0_13] : memref<112x3840xf32, #tpu.memory_space<vmem>>, vector<4x3840xf32>
    tpu.vector_store %arg8[%c8, %c0_13], %8 {strides = array<i32>} : memref<112x3840xf32, #tpu.memory_space<vmem>>, vector<4x3840xf32>,
    %c0_14 = arith.constant 0 : index
    %c18 = arith.constant 18 : index
    %10 = vector.load %arg7[%c0_14, %c18] : memref<4x4608xf32, #tpu.memory_space<vmem>>, vector<4x3840xf32>
    %c12 = arith.constant 12 : index
    %c0_15 = arith.constant 0 : index
    %11 = vector.load %arg8[%c12, %c0_15] : memref<112x3840xf32, #tpu.memory_space<vmem>>, vector<4x3840xf32>
    tpu.vector_store %arg8[%c12, %c0_15], %10 {strides = array<i32>} : memref<112x3840xf32, #tpu.memory_space<vmem>>, vector<4x3840xf32>,
    %c0_16 = arith.constant 0 : index
    %c19 = arith.constant 19 : index
    %12 = vector.load %arg7[%c0_16, %c19] : memref<4x4608xf32, #tpu.memory_space<vmem>>, vector<4x3840xf32>
    %c16 = arith.constant 16 : index
    %c0_17 = arith.constant 0 : index
    %13 = vector.load %arg8[%c16, %c0_17] : memref<112x3840xf32, #tpu.memory_space<vmem>>, vector<4x3840xf32>
    tpu.vector_store %arg8[%c16, %c0_17], %12 {strides = array<i32>} : memref<112x3840xf32, #tpu.memory_space<vmem>>, vector<4x3840xf32>,
    %c0_18 = arith.constant 0 : index
    %c20 = arith.constant 20 : index
    %14 = vector.load %arg7[%c0_18, %c20] : memref<4x4608xf32, #tpu.memory_space<vmem>>, vector<4x3840xf32>
    %c20_19 = arith.constant 20 : index
    %c0_20 = arith.constant 0 : index
    %15 = vector.load %arg8[%c20_19, %c0_20] : memref<112x3840xf32, #tpu.memory_space<vmem>>, vector<4x3840xf32>
    tpu.vector_store %arg8[%c20_19, %c0_20], %14 {strides = array<i32>} : memref<112x3840xf32, #tpu.memory_space<vmem>>, vector<4x3840xf32>,
    %c0_21 = arith.constant 0 : index
    %c36 = arith.constant 36 : index
    %16 = vector.load %arg7[%c0_21, %c36] : memref<4x4608xf32, #tpu.memory_space<vmem>>, vector<4x3840xf32>
    %c24 = arith.constant 24 : index
    %c0_22 = arith.constant 0 : index
    %17 = vector.load %arg8[%c24, %c0_22] : memref<112x3840xf32, #tpu.memory_space<vmem>>, vector<4x3840xf32>
    tpu.vector_store %arg8[%c24, %c0_22], %16 {strides = array<i32>} : memref<112x3840xf32, #tpu.memory_space<vmem>>, vector<4x3840xf32>,
    %c0_23 = arith.constant 0 : index
    %c37 = arith.constant 37 : index
    %18 = vector.load %arg7[%c0_23, %c37] : memref<4x4608xf32, #tpu.memory_space<vmem>>, vector<4x3840xf32>
    %c28 = arith.constant 28 : index
    %c0_24 = arith.constant 0 : index
    %19 = vector.load %arg8[%c28, %c0_24] : memref<112x3840xf32, #tpu.memory_space<vmem>>, vector<4x3840xf32>
    tpu.vector_store %arg8[%c28, %c0_24], %18 {strides = array<i32>} : memref<112x3840xf32, #tpu.memory_space<vmem>>, vector<4x3840xf32>,
    %c0_25 = arith.constant 0 : index
    %c38 = arith.constant 38 : index
    %20 = vector.load %arg7[%c0_25, %c38] : memref<4x4608xf32, #tpu.memory_space<vmem>>, vector<4x3840xf32>
    %c32 = arith.constant 32 : index
    %c0_26 = arith.constant 0 : index
    %21 = vector.load %arg8[%c32, %c0_26] : memref<112x3840xf32, #tpu.memory_space<vmem>>, vector<4x3840xf32>
    tpu.vector_store %arg8[%c32, %c0_26], %20 {strides = array<i32>} : memref<112x3840xf32, #tpu.memory_space<vmem>>, vector<4x3840xf32>,
    %c0_27 = arith.constant 0 : index
    %c324 = arith.constant 324 : index
    %22 = vector.load %arg7[%c0_27, %c324] : memref<4x4608xf32, #tpu.memory_space<vmem>>, vector<4x3840xf32>
    %c36_28 = arith.constant 36 : index
    %c0_29 = arith.constant 0 : index
    %23 = vector.load %arg8[%c36_28, %c0_29] : memref<112x3840xf32, #tpu.memory_space<vmem>>, vector<4x3840xf32>
    tpu.vector_store %arg8[%c36_28, %c0_29], %22 {strides = array<i32>} : memref<112x3840xf32, #tpu.memory_space<vmem>>, vector<4x3840xf32>,
    %c0_30 = arith.constant 0 : index
    %c325 = arith.constant 325 : index
    %24 = vector.load %arg7[%c0_30, %c325] : memref<4x4608xf32, #tpu.memory_space<vmem>>, vector<4x3840xf32>
    %c40 = arith.constant 40 : index
    %c0_31 = arith.constant 0 : index
    %25 = vector.load %arg8[%c40, %c0_31] : memref<112x3840xf32, #tpu.memory_space<vmem>>, vector<4x3840xf32>
    tpu.vector_store %arg8[%c40, %c0_31], %24 {strides = array<i32>} : memref<112x3840xf32, #tpu.memory_space<vmem>>, vector<4x3840xf32>,
    %c0_32 = arith.constant 0 : index
    %c326 = arith.constant 326 : index
    %26 = vector.load %arg7[%c0_32, %c326] : memref<4x4608xf32, #tpu.memory_space<vmem>>, vector<4x3840xf32>
    %c44 = arith.constant 44 : index
    %c0_33 = arith.constant 0 : index
    %27 = vector.load %arg8[%c44, %c0_33] : memref<112x3840xf32, #tpu.memory_space<vmem>>, vector<4x3840xf32>
    tpu.vector_store %arg8[%c44, %c0_33], %26 {strides = array<i32>} : memref<112x3840xf32, #tpu.memory_space<vmem>>, vector<4x3840xf32>,
    %c0_34 = arith.constant 0 : index
    %c342 = arith.constant 342 : index
    %28 = vector.load %arg7[%c0_34, %c342] : memref<4x4608xf32, #tpu.memory_space<vmem>>, vector<4x3840xf32>
    %c48 = arith.constant 48 : index
    %c0_35 = arith.constant 0 : index
    %29 = vector.load %arg8[%c48, %c0_35] : memref<112x3840xf32, #tpu.memory_space<vmem>>, vector<4x3840xf32>
    tpu.vector_store %arg8[%c48, %c0_35], %28 {strides = array<i32>} : memref<112x3840xf32, #tpu.memory_space<vmem>>, vector<4x3840xf32>,
    %c0_36 = arith.constant 0 : index
    %c343 = arith.constant 343 : index
    %30 = vector.load %arg7[%c0_36, %c343] : memref<4x4608xf32, #tpu.memory_space<vmem>>, vector<4x3840xf32>
    %c52 = arith.constant 52 : index
    %c0_37 = arith.constant 0 : index
    %31 = vector.load %arg8[%c52, %c0_37] : memref<112x3840xf32, #tpu.memory_space<vmem>>, vector<4x3840xf32>
    tpu.vector_store %arg8[%c52, %c0_37], %30 {strides = array<i32>} : memref<112x3840xf32, #tpu.memory_space<vmem>>, vector<4x3840xf32>,
    %c0_38 = arith.constant 0 : index
    %c344 = arith.constant 344 : index
    %32 = vector.load %arg7[%c0_38, %c344] : memref<4x4608xf32, #tpu.memory_space<vmem>>, vector<4x3840xf32>
    %c56 = arith.constant 56 : index
    %c0_39 = arith.constant 0 : index
    %33 = vector.load %arg8[%c56, %c0_39] : memref<112x3840xf32, #tpu.memory_space<vmem>>, vector<4x3840xf32>
    tpu.vector_store %arg8[%c56, %c0_39], %32 {strides = array<i32>} : memref<112x3840xf32, #tpu.memory_space<vmem>>, vector<4x3840xf32>,
    %c0_40 = arith.constant 0 : index
    %c360 = arith.constant 360 : index
    %34 = vector.load %arg7[%c0_40, %c360] : memref<4x4608xf32, #tpu.memory_space<vmem>>, vector<4x3840xf32>
    %c60 = arith.constant 60 : index
    %c0_41 = arith.constant 0 : index
    %35 = vector.load %arg8[%c60, %c0_41] : memref<112x3840xf32, #tpu.memory_space<vmem>>, vector<4x3840xf32>
    tpu.vector_store %arg8[%c60, %c0_41], %34 {strides = array<i32>} : memref<112x3840xf32, #tpu.memory_space<vmem>>, vector<4x3840xf32>,
    %c0_42 = arith.constant 0 : index
    %c361 = arith.constant 361 : index
    %36 = vector.load %arg7[%c0_42, %c361] : memref<4x4608xf32, #tpu.memory_space<vmem>>, vector<4x3840xf32>
    %c64 = arith.constant 64 : index
    %c0_43 = arith.constant 0 : index
    %37 = vector.load %arg8[%c64, %c0_43] : memref<112x3840xf32, #tpu.memory_space<vmem>>, vector<4x3840xf32>
    tpu.vector_store %arg8[%c64, %c0_43], %36 {strides = array<i32>} : memref<112x3840xf32, #tpu.memory_space<vmem>>, vector<4x3840xf32>,
    %c0_44 = arith.constant 0 : index
    %c362 = arith.constant 362 : index
    %38 = vector.load %arg7[%c0_44, %c362] : memref<4x4608xf32, #tpu.memory_space<vmem>>, vector<4x3840xf32>
    %c68 = arith.constant 68 : index
    %c0_45 = arith.constant 0 : index
    %39 = vector.load %arg8[%c68, %c0_45] : memref<112x3840xf32, #tpu.memory_space<vmem>>, vector<4x3840xf32>
    tpu.vector_store %arg8[%c68, %c0_45], %38 {strides = array<i32>} : memref<112x3840xf32, #tpu.memory_space<vmem>>, vector<4x3840xf32>,
    %c0_46 = arith.constant 0 : index
    %c648 = arith.constant 648 : index
    %40 = vector.load %arg7[%c0_46, %c648] : memref<4x4608xf32, #tpu.memory_space<vmem>>, vector<4x3840xf32>
    %c72 = arith.constant 72 : index
    %c0_47 = arith.constant 0 : index
    %41 = vector.load %arg8[%c72, %c0_47] : memref<112x3840xf32, #tpu.memory_space<vmem>>, vector<4x3840xf32>
    tpu.vector_store %arg8[%c72, %c0_47], %40 {strides = array<i32>} : memref<112x3840xf32, #tpu.memory_space<vmem>>, vector<4x3840xf32>,
    %c0_48 = arith.constant 0 : index
    %c649 = arith.constant 649 : index
    %42 = vector.load %arg7[%c0_48, %c649] : memref<4x4608xf32, #tpu.memory_space<vmem>>, vector<4x3840xf32>
    %c76 = arith.constant 76 : index
    %c0_49 = arith.constant 0 : index
    %43 = vector.load %arg8[%c76, %c0_49] : memref<112x3840xf32, #tpu.memory_space<vmem>>, vector<4x3840xf32>
    tpu.vector_store %arg8[%c76, %c0_49], %42 {strides = array<i32>} : memref<112x3840xf32, #tpu.memory_space<vmem>>, vector<4x3840xf32>,
    %c0_50 = arith.constant 0 : index
    %c650 = arith.constant 650 : index
    %44 = vector.load %arg7[%c0_50, %c650] : memref<4x4608xf32, #tpu.memory_space<vmem>>, vector<4x3840xf32>
    %c80 = arith.constant 80 : index
    %c0_51 = arith.constant 0 : index
    %45 = vector.load %arg8[%c80, %c0_51] : memref<112x3840xf32, #tpu.memory_space<vmem>>, vector<4x3840xf32>
    tpu.vector_store %arg8[%c80, %c0_51], %44 {strides = array<i32>} : memref<112x3840xf32, #tpu.memory_space<vmem>>, vector<4x3840xf32>,
    %c0_52 = arith.constant 0 : index
    %c666 = arith.constant 666 : index
    %46 = vector.load %arg7[%c0_52, %c666] : memref<4x4608xf32, #tpu.memory_space<vmem>>, vector<4x3840xf32>
    %c84 = arith.constant 84 : index
    %c0_53 = arith.constant 0 : index
    %47 = vector.load %arg8[%c84, %c0_53] : memref<112x3840xf32, #tpu.memory_space<vmem>>, vector<4x3840xf32>
    tpu.vector_store %arg8[%c84, %c0_53], %46 {strides = array<i32>} : memref<112x3840xf32, #tpu.memory_space<vmem>>, vector<4x3840xf32>,
    %c0_54 = arith.constant 0 : index
    %c667 = arith.constant 667 : index
    %48 = vector.load %arg7[%c0_54, %c667] : memref<4x4608xf32, #tpu.memory_space<vmem>>, vector<4x3840xf32>
    %c88 = arith.constant 88 : index
    %c0_55 = arith.constant 0 : index
    %49 = vector.load %arg8[%c88, %c0_55] : memref<112x3840xf32, #tpu.memory_space<vmem>>, vector<4x3840xf32>
    tpu.vector_store %arg8[%c88, %c0_55], %48 {strides = array<i32>} : memref<112x3840xf32, #tpu.memory_space<vmem>>, vector<4x3840xf32>,
    %c0_56 = arith.constant 0 : index
    %c668 = arith.constant 668 : index
    %50 = vector.load %arg7[%c0_56, %c668] : memref<4x4608xf32, #tpu.memory_space<vmem>>, vector<4x3840xf32>
    %c92 = arith.constant 92 : index
    %c0_57 = arith.constant 0 : index
    %51 = vector.load %arg8[%c92, %c0_57] : memref<112x3840xf32, #tpu.memory_space<vmem>>, vector<4x3840xf32>
    tpu.vector_store %arg8[%c92, %c0_57], %50 {strides = array<i32>} : memref<112x3840xf32, #tpu.memory_space<vmem>>, vector<4x3840xf32>,
    %c0_58 = arith.constant 0 : index
    %c684 = arith.constant 684 : index
    %52 = vector.load %arg7[%c0_58, %c684] : memref<4x4608xf32, #tpu.memory_space<vmem>>, vector<4x3840xf32>
    %c96 = arith.constant 96 : index
    %c0_59 = arith.constant 0 : index
    %53 = vector.load %arg8[%c96, %c0_59] : memref<112x3840xf32, #tpu.memory_space<vmem>>, vector<4x3840xf32>
    tpu.vector_store %arg8[%c96, %c0_59], %52 {strides = array<i32>} : memref<112x3840xf32, #tpu.memory_space<vmem>>, vector<4x3840xf32>,
    %c0_60 = arith.constant 0 : index
    %c685 = arith.constant 685 : index
    %54 = vector.load %arg7[%c0_60, %c685] : memref<4x4608xf32, #tpu.memory_space<vmem>>, vector<4x3840xf32>
    %c100 = arith.constant 100 : index
    %c0_61 = arith.constant 0 : index
    %55 = vector.load %arg8[%c100, %c0_61] : memref<112x3840xf32, #tpu.memory_space<vmem>>, vector<4x3840xf32>
    tpu.vector_store %arg8[%c100, %c0_61], %54 {strides = array<i32>} : memref<112x3840xf32, #tpu.memory_space<vmem>>, vector<4x3840xf32>,
    %c0_62 = arith.constant 0 : index
    %c686 = arith.constant 686 : index
    %56 = vector.load %arg7[%c0_62, %c686] : memref<4x4608xf32, #tpu.memory_space<vmem>>, vector<4x3840xf32>
    %c104 = arith.constant 104 : index
    %c0_63 = arith.constant 0 : index
    %57 = vector.load %arg8[%c104, %c0_63] : memref<112x3840xf32, #tpu.memory_space<vmem>>, vector<4x3840xf32>
    tpu.vector_store %arg8[%c104, %c0_63], %56 {strides = array<i32>} : memref<112x3840xf32, #tpu.memory_space<vmem>>, vector<4x3840xf32>,
    %cst = arith.constant 0.000000e+00 : f32
    %58 = vector.broadcast %cst : f32 to vector<4x3840xf32>
    %c108 = arith.constant 108 : index
    %c0_64 = arith.constant 0 : index
    %59 = vector.load %arg8[%c108, %c0_64] : memref<112x3840xf32, #tpu.memory_space<vmem>>, vector<4x3840xf32>
    tpu.vector_store %arg8[%c108, %c0_64], %58 {strides = array<i32>} : memref<112x3840xf32, #tpu.memory_space<vmem>>, vector<4x3840xf32>,
    %c0_65 = arith.constant 0 : index
    %c0_66 = arith.constant 0 : index
    %60 = vector.load %arg3[%c0_65, %c0_66] : memref<8x112xf32, #tpu.memory_space<vmem>>, vector<8x112xf32>
    %c0_67 = arith.constant 0 : index
    %c0_68 = arith.constant 0 : index
    %61 = vector.load %arg8[%c0_67, %c0_68] : memref<112x3840xf32, #tpu.memory_space<vmem>>, vector<112x3840xf32>
    %cst_69 = arith.constant dense<0.000000e+00> : vector<8x3840xf32>
    %62 = tpu.matmul %60, %61, %cst_69 {dimension_numbers = #tpu.dot_dimension_numbers<[1], [0], [0], [1], [0, 0, 1, 1], [], []>} : vector<8x112xf32>, vector<112x3840xf32>, vector<8x3840xf32> -> vector<8x3840xf32>
    %c0_70 = arith.constant 0 : index
    %c0_71 = arith.constant 0 : index
    %63 = vector.load %arg5[%c0_70, %c0_71] : memref<8x3840xf32, #tpu.memory_space<vmem>>, vector<8x3840xf32>
    tpu.vector_store %arg5[%c0_70, %c0_71], %62 {strides = array<i32>} : memref<8x3840xf32, #tpu.memory_space<vmem>>, vector<8x3840xf32>,
    %c0_72 = arith.constant 0 : index
    %c0_73 = arith.constant 0 : index
    %64 = vector.load %arg4[%c0_72, %c0_73] : memref<1x3840xf32, #tpu.memory_space<vmem>>, vector<1x3840xf32>
    %65 = vector.broadcast %64 : vector<1x3840xf32> to vector<8x3840xf32>
    %66 = arith.mulf %62, %65 : vector<8x3840xf32>
    %cst_74 = arith.constant dense<0.000000e+00> : vector<8xf32>
    %67 = vector.multi_reduction <add>, %66, %cst_74 [1] : vector<8x3840xf32> to vector<8xf32>
    %68 = vector.shape_cast %67 : vector<8xf32> to vector<8x1xf32>
    %69 = arith.mulf %66, %62 : vector<8x3840xf32>
    %cst_75 = arith.constant dense<0.000000e+00> : vector<8xf32>
    %70 = vector.multi_reduction <add>, %69, %cst_75 [1] : vector<8x3840xf32> to vector<8xf32>
    %71 = vector.shape_cast %70 : vector<8xf32> to vector<8x1xf32>
    %72 = tpu.concatenate %68, %71 in 1 : vector<8x1xf32>, vector<8x1xf32> -> vector<8x2xf32>
    %73 = vector.shape_cast %72 : vector<8x2xf32> to vector<1x8x2xf32>
    %c0_76 = arith.constant 0 : index
    %c0_77 = arith.constant 0 : index
    %c0_78 = arith.constant 0 : index
    %74 = vector.load %arg6[%c0_76, %c0_77, %c0_78] : memref<1x8x2xf32, #tpu.memory_space<vmem>>, vector<1x8x2xf32>
    tpu.vector_store %arg6[%c0_76, %c0_77, %c0_78], %73 {strides = array<i32>} : memref<1x8x2xf32, #tpu.memory_space<vmem>>, vector<1x8x2xf32>,
    return
  }
  func.func @transform_0(%arg0: i32) -> (i32, i32) {
    %c0_i32 = arith.constant 0 : i32
    %c0_i32_0 = arith.constant 0 : i32
    return %c0_i32, %arg0 : i32, i32
  }
  func.func @transform_1(%arg0: i32) -> (i32, i32) {
    %c1_i32 = arith.constant 1 : i32
    %0 = arith.addi %arg0, %c1_i32 : i32
    %c5_i32 = arith.constant 5 : i32
    %1 = arith.muli %0, %c5_i32 : i32
    %c0_i32 = arith.constant 0 : i32
    %c0_i32_0 = arith.constant 0 : i32
    return %c0_i32, %1 : i32, i32
  }
  func.func @transform_2(%arg0: i32) -> (i32, i32) {
    %c0_i32 = arith.constant 0 : i32
    %c0_i32_0 = arith.constant 0 : i32
    %c0_i32_1 = arith.constant 0 : i32
    return %c0_i32, %c0_i32_0 : i32, i32
  }
  func.func @transform_3(%arg0: i32) -> (i32, i32) {
    %c0_i32 = arith.constant 0 : i32
    %c0_i32_0 = arith.constant 0 : i32
    return %c0_i32, %arg0 : i32, i32
  }
  func.func @transform_4(%arg0: i32) -> (i32, i32) {
    %c0_i32 = arith.constant 0 : i32
    %c0_i32_0 = arith.constant 0 : i32
    return %c0_i32, %arg0 : i32, i32
  }
  func.func @transform_5(%arg0: i32) -> (i32, i32, i32) {
    %c0_i32 = arith.constant 0 : i32
    %c0_i32_0 = arith.constant 0 : i32
    %c0_i32_1 = arith.constant 0 : i32
    return %arg0, %c0_i32, %c0_i32_0 : i32, i32, i32
  }
}

</mosaic_0001>

<bundles_post_ra>
// kernel: tpu_custom_call.1
= control target key start
LH: loop header
LB: loop body
LE: loop exit
PB: predicated region body
PF: predicated region fallthrough
CT: control target
= control target key end

     0   :  { %s12710_s0 = inlined_call_operand.hbm [shape: f32[4,8448], index: 0, kind: input, shape index: {}]   ;;  %s12711_s1 = inlined_call_operand.hbm [shape: f32[4,8448], index: 1, kind: input, shape index: {}]   ;;  %s12712_s2 = inlined_call_operand.hbm [shape: f32[8,112], index: 2, kind: input, shape index: {}]   ;;  %s12713_s3 = inlined_call_operand.hbm [shape: f32[1,7680], index: 3, kind: input, shape index: {}]   ;;  %s12714_s4 = inlined_call_operand.hbm [shape: f32[8,7680], index: 4, kind: output, shape index: {0}]   ;;  %s12715_s5 = inlined_call_operand.vmem [shape: f32[2,8,2], index: 5, kind: output, shape index: {1}]  }
   0x1   :  { %12729 = sst [smem:[#allocation23_spill]] %s12710_s0 }
   0x2   :  { %12730 = sst [smem:[#allocation24_spill]] %s12712_s2 }
   0x3   :  { %11 = vsyncpa [#allocation5], 0 }
   0x4   :  { %13 = vsyncpa [#allocation5 + $0x1], 0 }
   0x5   :  { %14 = vsyncpa [#allocation8], 0 }
   0x6   :  { %16 = vsyncpa [#allocation8 + $0x1], 0 }
   0x7   :  { %17 = vsyncpa [#allocation11], 0 }
   0x8   :  { %19 = vsyncpa [#allocation11 + $0x1], 0 }
   0x9   :  { %20 = vsyncpa [#allocation6], 0 }
   0xa   :  { %22 = vsyncpa [#allocation6 + $0x1], 0  ;;  %s8746_s18 = smov 0   ;;  %s8748_s19 = smov 0  }
   0xb   :  { %s8750_s20 = smov 0   ;;  %s8752_s21 = smov 0  }
   0xc   :  { %s8754_s22 = smov 0   ;;  %s8756_s23 = smov 0  }
   0xd   :  { %s8758_s24 = smov 0  }
   0xe LB: > { %12731 = sst [smem:[#allocation18_spill]] %s8670_s21  ;;  %s8782_s25 = sadd.s32 4294967295, %s8682_s24   ;;  %s8682_s24 = sphi %s8758_s24, %s12760_s24   ;;  %s8678_s23 = sphi %s8756_s23, %s12768_s23   ;;  %s8674_s22 = sphi %s8754_s22, %s12767_s22   ;;  %s8670_s21 = sphi %s8752_s21, %s12766_s21   ;;  %s8666_s20 = sphi %s8750_s20, %s12765_s20   ;;  %s8662_s19 = sphi %s8748_s19, %s12764_s19   ;;  %s8658_s18 = sphi %s8746_s18, %s12763_s18  }
   0xf   : > { %s7707_s26 = sadd.s32 4294967294, %s8682_s24   ;;  %s8786_s27 = sadd.s32 1, %s8682_s24  }
  0x10   : > { %12732 = sst [smem:[#allocation19_spill]] %s8786_s27  ;;  %s35_s28 = sadd.s32 1, %s8678_s23 }
  0x11   : > { %s32_s29 = ssub.s32 %s8682_s24, %s8786_s27  ;;  %p42_p0 = scmp.ne.s32.totalorder %s8678_s23, %s8674_s22 }
  0x12   : > { %p33_p1 = scmp.eq.s32.totalorder %s32_s29, 0  ;;  %p43_p2 = scmp.eq.s32.totalorder %s8682_s24, 0 }
  0x13   : > { %p12716_p3 = scmp.ne.s32.totalorder %s8674_s22, %s8670_s21  ;;  %p12719_p4 = scmp.eq.s32.totalorder %s8782_s25, 0 }
  0x14   : > { %s8798_s30 = scalar_select %p33_p1, %s8678_s23, %s35_s28  }
  0x15   : > { %p8805_p5 = por %p43_p2, %p42_p0  ;;  %p8814_p6 = por %p12719_p4, %p12716_p3 }
  0x16   : > { %12733 = sst [smem:[#allocation20_spill]] %s8798_s30  ;;  %s59_s8 = smul.u32 5, %s8786_s27 }
  0x17   : > { %s12734_s6 = scalar_select %p8805_p5, 1, 0 }
  0x18   : > { %s12735_s7 = scalar_select %p8814_p6, 1, 0 }
  0x19   : > { %s60_s9 = sadd.s32 1, %s8786_s27  ;;  %s65_s11 = sadd.s32 1, %s8666_s20 }
  0x1a   : > { %s61_s10 = smul.u32 5, %s60_s9  ;;  %p72_p7 = scmp.ne.s32.totalorder %s8666_s20, %s8662_s19 }
  0x1b   : > { %p78_p8 = scmp.ne.s32.totalorder %s8662_s19, %s8658_s18  ;;  %p149_p9 = scmp.eq.s32.totalorder %s8782_s25, 1 }
  0x1c   : > { %s62_s12 = ssub.s32 %s59_s8, %s61_s10  ;;  %p8828_p11 = por %p72_p7, %p43_p2 }
  0x1d   : > { %p63_p10 = scmp.eq.s32.totalorder %s62_s12, 0  ;;  %p8834_p12 = por %p78_p8, %p12719_p4 }
  0x1e   : > { %s12736_s13 = scalar_select %p8828_p11, 1, 0 }
  0x1f   : > { %s12737_s14 = scalar_select %p8834_p12, 1, 0 }
  0x20   : > { %p8841_p13 = por %p149_p9, %p42_p0  ;;  %p155_p1 = scmp.eq.s32.totalorder %s7707_s26, 1 }
  0x21   : > { %s8846_s16 = scalar_select %p63_p10, %s8666_s20, %s65_s11  }
  0x22   : > { %s12738_s15 = scalar_select %p8841_p13, 1, 0 }
  0x23   : > { %12739 = sst [smem:[#allocation21_spill]] %s8846_s16  ;;  %p7708_p3 = scmp.ge.s32.totalorder %s8682_s24, 1 }
  0x24   : > { %p188_p6 = scmp.lt.s32.totalorder %s8682_s24, 3  ;;  %p12740_p5 = scmp.ne.s32.totalorder %s8674_s22, %s8670_s21 }
  0x25   : > { %s8684_s28 = smov [#allocation9]   ;;  %s12745_s2 = sld [smem:[#allocation24_spill]] }
  0x26   : > { %p8853_p2 = por %p155_p1, %p12740_p5  ;;  %p8857_p7 = pnand %p7708_p3, %p188_p6 }
  0x27   : > { %s201_s29 = sshll.u32 %s8684_s28, 4  ;;  %s202_s29 = int_to_ptr.vmem [resolvable:$true] %s201_s29 }
  0x28   : > { %s12741_s17 = scalar_select %p8853_p2, 1, 0 }
  0x29   : > { %s12743_s18 = scalar_select %p8857_p7, 1, 0 }
  0x2a   : > { %12742 = sst [smem:[#allocation22_spill]] %s12741_s17  ;;  %p8179_p0 = pneg %p8857_p7 }
  0x2b   : > { %s8467_s10 = scalar_lea.hbm %s12745_s2, 128 }
  0x2c   : > { %p8865_p8 = pnand %p8179_p0, %p12719_p4  ;;  %p8468_p3 = scmp.ne.s32.totalorder %s12745_s2, %s8467_s10 }
  0x2d   : > { %p8474_p10 = scmp.lt.u32.totalorder %s8467_s10, %s12745_s2 }
  0x2e   : > { %p8469_p5 = pneg %p8865_p8 }
  0x30   : > { %p8470_p6 = pnand %p8469_p5, %p8468_p3 }
  0x32   : > { %p8471_p9 = pneg %p8470_p6 }
  0x34   : > { %p8476_p1 = pnand %p8474_p10, %p8471_p9 }
  0x36   : > { %8479 = shalt.err (!%p8476_p1)
}
  0x37   : > { %s8480_s16 = scalar_lea.vmem %s202_s29, 128  ;;  %p8488_p13 = scmp.lt.s32.totalorder %s202_s29, %s202_s29 }
  0x38   : > { %p8481_p0 = scmp.ne.s32.totalorder %s202_s29, %s8480_s16  ;;  %p8489_p12 = scmp.lt.s32.totalorder %s8480_s16, %s8480_s16 }
  0x3a   : > { %p8483_p4 = pnand %p8481_p0, %p8469_p5  ;;  %p8490_p7 = por %p8489_p12, %p8488_p13 }
  0x3c   : > { %p8484_p2 = pneg %p8483_p4 }
  0x3e   : > { %p8491_p11 = pnand %p8490_p7, %p8484_p2 }
  0x40   : > { %8494 = shalt.err (!%p8491_p11)
}
  0x41   : > { %8182 = dma.hbm_to_vmem [thread:$0]  (!%p8865_p8), %s12745_s2, 128, %s202_s29, [#allocation8]  }
  0x42   : > { %p12727_p3 = scmp.ge.s32.totalorder %s8682_s24, 2 }
  0x43   : > { %p12746_p6 = scmp.ne.s32.totalorder (!%p12727_p3), %s12734_s6, 0 }
  0x44   : > { %208 = sbr.rel (%p12727_p3) target bundleno = 166 (0xa6), region = 20 }
  0x4b   : > { %211 = sbr.rel (!%p12746_p6) target bundleno = 114 (0x72), region = 24  ;;  %s212_s30 = sand.u32 (%p12746_p6), 1, %s8678_s23  }
  0x4c   : > { %s217_s16 = smul.u32 (%p12746_p6), 30, %s8682_s24  ;;  %s8895_s12 = scalar_lea.sflag (%p12746_p6), [#allocation5], %s212_s30 }
  0x4d   : > { %s8161_s10 = smul.u32 (%p12746_p6), 120, %s212_s30 }
  0x4e   : > { %s218_s11 = ssub.s32 (%p12746_p6), 66, %s217_s16 }
  0x4f   : > { %p219_p4 = scmp.lt.s32.totalorder (%p12746_p6), %s218_s11, 30  ;;  %s216_s28 = scalar_lea.vmem (%p12746_p6), [#allocation4], %s8161_s10 }
  0x52   : > { %s12770_s11 = smov (!%p219_p4, %s218_s11), 30 }
  0x53   : > { %s8892_s26 = sshll.u32 %s12770_s11, 6 }
  0x54   : > { %s223_s29 = ssub.s32 1920, %s8892_s26 }
  0x55   : > { %224 = vsyncadd %s8895_s12, %s223_s29  ;;  %p7712_p11 = scmp.ne.s32.totalorder %s8892_s26, 0  ;;  %s7738_s8 = smul.u32 1920, %s8682_s24 }
  0x56   : > { %s230_s9 = sshll.u32 %s216_s28, 4  ;;  %s12747_s0 = sld [smem:[#allocation23_spill]]  ;;  %s231_s9 = int_to_ptr.vmem [resolvable:$true] %s230_s9 }
  0x5c   : > { %s8903_s27 = scalar_lea.hbm %s12747_s0, %s7738_s8  ;;  %s8499_s29 = scalar_lea.hbm %s12747_s0, 4224 }
  0x5d   : > { %s8495_s30 = scalar_lea.hbm %s8903_s27, %s8892_s26  ;;  %p8500_p7 = scmp.lt.u32.totalorder %s8903_s27, %s12747_s0 }
  0x5e   : > { %p8496_p12 = scmp.ne.s32.totalorder %s8903_s27, %s8495_s30  ;;  %p8501_p8 = scmp.lt.u32.totalorder %s8499_s29, %s8495_s30 }
  0x5f   : > { %p8503_p9 = scmp.lt.u32.totalorder %s8495_s30, %s8903_s27 }
  0x60   : > { %p8497_p13 = pnand %p8496_p12, %p7712_p11  ;;  %p8502_p5 = por %p8501_p8, %p8500_p7 }
  0x62   : > { %p8498_p2 = pneg %p8497_p13  ;;  %p8504_p10 = por %p8503_p9, %p8502_p5 }
  0x64   : > { %p8505_p1 = pnand %p8504_p10, %p8498_p2 }
  0x66   : > { %8508 = shalt.err (!%p8505_p1)
}
  0x67   : > { %s8509_s2 = scalar_lea.vmem %s231_s9, %s8892_s26  ;;  %s8685_s8 = smov [#allocation4]  }
  0x68   : > { %p8510_p0 = scmp.ne.s32.totalorder %s231_s9, %s8509_s2  ;;  %s8513_s16 = sshll.u32 %s8685_s8, 4  ;;  %s8514_s16 = int_to_ptr.vmem [resolvable:$false] %s8513_s16 }
  0x69   : > { %s8515_s10 = scalar_lea.vmem %s8514_s16, 3840  ;;  %p8516_p12 = scmp.lt.s32.totalorder %s231_s9, %s8514_s16 }
  0x6a   : > { %p8511_p6 = pnand %p8510_p0, %p7712_p11  ;;  %p8517_p13 = scmp.lt.s32.totalorder %s8515_s10, %s8509_s2 }
  0x6c   : > { %p8512_p4 = pneg %p8511_p6  ;;  %p8518_p3 = por %p8517_p13, %p8516_p12 }
  0x6e   : > { %p8519_p7 = pnand %p8518_p3, %p8512_p4 }
  0x70   : > { %8522 = shalt.err (!%p8519_p7)
}
  0x71   : > { %233 = dma.hbm_to_vmem [thread:$0]  (%p7712_p11), %s8903_s27, %s8892_s26, %s231_s9, %s8895_s12  }
  0x72 PF: > { %s237_s17 = sand.u32 1, %s8682_s24   ;;  %s239_s30 = sand.u32 1, %s8666_s20  }
  0x73   : > { %s8162_s11 = smul.u32 24, %s239_s30  ;;  %s258_s28 = sand.u32 1, %s8678_s23  }
  0x74   : > { %s7602_s29 = smul.u32 1920, %s8682_s24  ;;  %s238_s27 = scalar_lea.sflag [#allocation8], %s237_s17 }
  0x75   : > { %s241_s10 = scalar_lea.vmem [#allocation7], %s8162_s11  ;;  %p12748_p11 = scmp.ne.s32.totalorder %s12736_s13, 0 }
  0x76   : > { %s7603_s16 = scalar_lea.hbm %s12711_s1, %s7602_s29  ;;  %s251_s0 = sshll.u32 %s241_s10, 4  ;;  %s252_s0 = int_to_ptr.vmem [resolvable:$true] %s251_s0 }
  0x77   : > { %s8933_s21 = scalar_lea.hbm %s7603_s16, 1920  ;;  %s8551_s26 = scalar_lea.hbm %s7603_s16, 2304 }
  0x78   : > { %p8524_p3 = scmp.ne.s32.totalorder %s8933_s21, %s8551_s26  ;;  %s8527_s30 = scalar_lea.hbm %s12711_s1, 4224 }
  0x79   : > { %p8528_p5 = scmp.lt.u32.totalorder %s8933_s21, %s12711_s1  ;;  %p8529_p9 = scmp.lt.u32.totalorder %s8527_s30, %s8551_s26 }
  0x7a   : > { %p8525_p2 = pnand %p8524_p3, %p12748_p11  ;;  %p8531_p1 = scmp.lt.u32.totalorder %s8551_s26, %s8933_s21 }
  0x7b   : > { %p8530_p10 = por %p8529_p9, %p8528_p5 }
  0x7c   : > { %p8526_p8 = pneg %p8525_p2 }
  0x7d   : > { %p8532_p0 = por %p8531_p1, %p8530_p10 }
  0x7f   : > { %p8533_p6 = pnand %p8532_p0, %p8526_p8 }
  0x81   : > { %8536 = shalt.err (!%p8533_p6)
}
  0x82   : > { %s8537_s17 = scalar_lea.vmem %s252_s0, 384  ;;  %s8686_s11 = smov [#allocation7]  }
  0x83   : > { %p8538_p4 = scmp.ne.s32.totalorder %s252_s0, %s8537_s17  ;;  %s8541_s8 = sshll.u32 %s8686_s11, 4  ;;  %s8542_s8 = int_to_ptr.vmem [resolvable:$false] %s8541_s8 }
  0x84   : > { %s8543_s16 = scalar_lea.vmem %s8542_s8, 768  ;;  %p8544_p7 = scmp.lt.s32.totalorder %s252_s0, %s8542_s8 }
  0x85   : > { %p8539_p12 = pnand %p8538_p4, %p12748_p11  ;;  %p8545_p3 = scmp.lt.s32.totalorder %s8543_s16, %s8537_s17 }
  0x87   : > { %p8540_p13 = pneg %p8539_p12  ;;  %p8546_p2 = por %p8545_p3, %p8544_p7 }
  0x89   : > { %p8547_p5 = pnand %p8546_p2, %p8540_p13 }
  0x8b   : > { %8550 = shalt.err (!%p8547_p5)
}
  0x8c   : > { %8170 = dma.hbm_to_vmem [thread:$0]  (%p12748_p11), %s8933_s21, 384, %s252_s0, %s238_s27  }
  0x8d   : > { %s8163_s10 = smul.u32 30, %s258_s28  ;;  %s259_s29 = scalar_lea.sflag [#allocation11], %s258_s28 }
  0x8e   : > { %s7739_s26 = smul.u32 480, %s8682_s24  ;;  %p12749_p11 = scmp.ne.s32.totalorder %s12734_s6, 0 }
  0x8f   : > { %s262_s2 = scalar_lea.vmem [#allocation10], %s8163_s10  ;;  %s8556_s27 = scalar_lea.hbm %s12713_s3, 960 }
  0x90   : > { %s8957_s30 = scalar_lea.hbm %s12713_s3, %s7739_s26  ;;  %s270_s13 = sshll.u32 %s262_s2, 4  ;;  %s271_s13 = int_to_ptr.vmem [resolvable:$true] %s270_s13 }
  0x91   : > { %s8552_s17 = scalar_lea.hbm %s8957_s30, 480  ;;  %p8557_p1 = scmp.lt.u32.totalorder %s8957_s30, %s12713_s3 }
  0x92   : > { %p8553_p8 = scmp.ne.s32.totalorder %s8957_s30, %s8552_s17  ;;  %p8558_p0 = scmp.lt.u32.totalorder %s8556_s27, %s8552_s17 }
  0x93   : > { %p8560_p4 = scmp.lt.u32.totalorder %s8552_s17, %s8957_s30 }
  0x94   : > { %p8554_p9 = pnand %p8553_p8, %p12749_p11  ;;  %p8559_p6 = por %p8558_p0, %p8557_p1 }
  0x96   : > { %p8555_p10 = pneg %p8554_p9  ;;  %p8561_p12 = por %p8560_p4, %p8559_p6 }
  0x98   : > { %p8562_p13 = pnand %p8561_p12, %p8555_p10 }
  0x9a   : > { %8565 = shalt.err (!%p8562_p13)
}
  0x9b   : > { %s8566_s28 = scalar_lea.vmem %s271_s13, 480  ;;  %s8687_s16 = smov [#allocation10]  }
  0x9c   : > { %p8567_p7 = scmp.ne.s32.totalorder %s271_s13, %s8566_s28  ;;  %s8570_s10 = sshll.u32 %s8687_s16, 4  ;;  %s8571_s10 = int_to_ptr.vmem [resolvable:$false] %s8570_s10 }
  0x9d   : > { %s8572_s26 = scalar_lea.vmem %s8571_s10, 960  ;;  %p8573_p5 = scmp.lt.s32.totalorder %s271_s13, %s8571_s10 }
  0x9e   : > { %p8568_p3 = pnand %p8567_p7, %p12749_p11  ;;  %p8574_p8 = scmp.lt.s32.totalorder %s8572_s26, %s8566_s28 }
  0xa0   : > { %p8569_p2 = pneg %p8568_p3  ;;  %p8575_p9 = por %p8574_p8, %p8573_p5 }
  0xa2   : > { %p8576_p0 = pnand %p8575_p9, %p8569_p2 }
  0xa4   : > { %8579 = shalt.err (!%p8576_p0)
}
  0xa5   : > { %8171 = dma.hbm_to_vmem [thread:$0]  (%p12749_p11), %s8957_s30, 480, %s271_s13, %s259_s29  }
  0xa6 PF: > { %p12750_p10 = scmp.ne.s32.totalorder %s12743_s18, 0 }
  0xa7   : > { %s8981_s12 = sand.u32 (!%p12750_p10), 1, %s8674_s22   ;;  %p12751_p1 = scmp.ne.s32.totalorder (!%p12750_p10), %s12735_s7, 0 }
  0xa8   : > { %279 = sbr.rel (%p12750_p10) target bundleno = 2291 (0x8f3), region = 36  ;;  %s282_s2 = scalar_lea.sflag (!%p12750_p10), [#allocation5], %s8981_s12 }
  0xa9   : > { %s8164_s9 = smul.u32 (!%p12750_p10), 120, %s8981_s12 }
  0xab   : > { %s8985_s17 = scalar_lea.vmem (!%p12750_p10), [#allocation4], %s8164_s9 }
  0xaf   : > { %8637 = dma.done.wait (%p12751_p1), %s282_s2, 1920  }
  0xb0   : > { %8639 = vsyncadd (%p12751_p1), %s282_s2, 4294965376  ;;  %s290_s6 = sand.u32 1, %s8782_s25   ;;  %s292_s18 = sand.u32 1, %s8662_s19  }
  0xb1   : > { %s8165_s30 = smul.u32 24, %s292_s18  ;;  %s291_s13 = scalar_lea.sflag [#allocation8], %s290_s6 }
  0xb2   : > { %p12752_p11 = scmp.ne.s32.totalorder %s12737_s14, 0 }
  0xb3   : > { %s8993_s29 = scalar_lea.vmem [#allocation7], %s8165_s30 }
  0xb4   : > { %8641 = dma.done.wait (%p12752_p11), %s291_s13, 384  }
  0xb5   : > { %8643 = vsyncadd (%p12752_p11), %s291_s13, 4294966912  ;;  %p12753_p6 = scmp.eq.s32.totalorder %s8782_s25, 0 }
  0xb7   : > { %8645 = dma.done.wait (%p12753_p6), [#allocation8], 128   ;;  %p12754_p4 = pmov %p12753_p6 }
  0xb8   : > { %s8166_s0 = smul.u32 30, %s8981_s12  ;;  %s304_s21 = scalar_lea.sflag [#allocation11], %s8981_s12 }
  0xb9   : > { %8647 = vsyncadd (%p12754_p4), [#allocation8], 4294967168 }
  0xba   : > { %s9005_s27 = scalar_lea.vmem [#allocation10], %s8166_s0 }
  0xbb   : > { %8649 = dma.done.wait (%p12751_p1), %s304_s21, 480  }
  0xbc   : > { %8651 = vsyncadd (%p12751_p1), %s304_s21, 4294966816  ;;  %v9012_v0 = vld [vmem:[%s8985_s17 + $0x8] sm:$0xff]  ;;  %v9015_v1 = vld [vmem:[%s8985_s17] sm:$0xff]  ;;  %s8688_s14 = smov 127   ;;  %s8689_s7 = smov 126   ;;  %vm598_vm0 = vcmask 1039360  }
  0xbd   : > { %v9018_v2 = vld [vmem:[%s8985_s17 + $0x10] sm:$0xff]  ;;  %378 = vst [vmem:[#allocation2 + $0x8] sm:$0xff] %v9012_v0  ;;  %542 = vrot.lane.b32.xlu1 %v9012_v0, %s8688_s14  ;;  %377 = vst [vmem:[#allocation2] sm:$0xff] %v9015_v1  ;;  %538 = vrot.lane.b32.xlu0 %v9015_v1, %s8688_s14  ;;  %v9028_v3 = vcombine.low %v9015_v1, %v9015_v1  ;;  %v9032_v4 = vld [vmem:[%s8985_s17 + $0x18] sm:$0xff]  ;;  %v9051_v9 = vcombine.high %v9015_v1, %v9015_v1  ;;  %s8690_s11 = smov 110   ;;  %vm798_vm1 = vcmask 1031168  }
  0xbe   : > { %379 = vst [vmem:[#allocation2 + $0x10] sm:$0xff] %v9018_v2  ;;  %v9035_v5 = vld [vmem:[%s8985_s17 + $0x20] sm:$0xff]  ;;  %458 = vst [vmem:[#allocation3] sm:$0xf] %v9015_v1  ;;  %v9041_v6 = vld [vmem:[%s8985_s17 + $0x28] sm:$0xff]  ;;  %v9080_v16 = vcombine.low %v9018_v2, %v9018_v2  ;;  %v9098_v21 = vcombine.low %v9032_v4, %v9032_v4  ;;  %v9112_v30 = vcombine.low %v9012_v0, %v9012_v0  ;;  %s8691_s8 = smov 109  }
  0xbf   : > { %380 = vst [vmem:[#allocation2 + $0x18] sm:$0xff] %v9032_v4  ;;  %381 = vst [vmem:[#allocation2 + $0x20] sm:$0xff] %v9035_v5  ;;  %v9044_v7 = vld [vmem:[%s8985_s17 + $0x30] sm:$0xff]  ;;  %v9047_v8 = vld [vmem:[%s8985_s17 + $0x38] sm:$0xff]  ;;  %v9116_v31 = vcombine.low %v9035_v5, %v9035_v5  ;;  %v9128_v34 = vcombine.low %v9041_v6, %v9041_v6  ;;  %v9211_v61 = vcombine.high %v9012_v0, %v9012_v0  ;;  %vm999_vm2 = vcmask 900096   ;;  %s8692_s28 = smov 108  }
  0xc0   : > { %382 = vst [vmem:[#allocation2 + $0x28] sm:$0xff] %v9041_v6  ;;  %383 = vst [vmem:[#allocation2 + $0x30] sm:$0xff] %v9044_v7  ;;  %v9057_v10 = vld [vmem:[%s8985_s17 + $0x40] sm:$0xff]  ;;  %v9060_v11 = vld [vmem:[%s8985_s17 + $0x48] sm:$0xff]  ;;  %v9136_v37 = vcombine.low %v9044_v7, %v9044_v7  ;;  %v9144_v40 = vcombine.low %v9047_v8, %v9047_v8  ;;  %v9219_v62 = vcombine.high %v9018_v2, %v9018_v2  ;;  %vm1199_vm3 = vcmask 891904   ;;  %s8693_s16 = smov 92  }
  0xc1   : > { %384 = vst [vmem:[#allocation2 + $0x38] sm:$0xff] %v9047_v8  ;;  %v9063_v12 = vld [vmem:[%s8985_s17 + $0x50] sm:$0xff]  ;;  %385 = vst [vmem:[#allocation2 + $0x40] sm:$0xff] %v9057_v10  ;;  %v9069_v13 = vld [vmem:[%s8985_s17 + $0x58] sm:$0xff]  ;;  %546 = vrot.lane.b32.xlu1 %v9018_v2, %s8688_s14  ;;  %536 = vrot.lane.b32.xlu0 %v9028_v3, %s8688_s14  ;;  %v9152_v43 = vcombine.low %v9057_v10, %v9057_v10  ;;  %v9160_v46 = vcombine.low %v9060_v11, %v9060_v11  ;;  %vm1400_vm4 = vcmask 883712   ;;  %s8694_s10 = smov 91  }
  0xc2   : > { %386 = vst [vmem:[#allocation2 + $0x48] sm:$0xff] %v9060_v11  ;;  %387 = vst [vmem:[#allocation2 + $0x50] sm:$0xff] %v9063_v12  ;;  %v9072_v14 = vld [vmem:[%s8985_s17 + $0x60] sm:$0xff]  ;;  %v9075_v15 = vld [vmem:[%s8985_s17 + $0x68] sm:$0xff]  ;;  %v9168_v49 = vcombine.low %v9063_v12, %v9063_v12  ;;  %v9176_v52 = vcombine.low %v9069_v13, %v9069_v13  ;;  %v9227_v63 = vcombine.high %v9032_v4, %v9032_v4  ;;  %vm1600_vm5 = vcmask 752640   ;;  %s8695_s26 = smov 90  }
  0xc3   : > { %459 = vst [vmem:[#allocation3 + $0x8] sm:$0xf] %v9051_v9  ;;  %388 = vst [vmem:[#allocation2 + $0x58] sm:$0xff] %v9069_v13  ;;  %v9090_v17 = vld [vmem:[%s8985_s17 + $0x70] sm:$0xff]  ;;  %v9184_v55 = vcombine.low %v9072_v14, %v9072_v14  ;;  %v9192_v58 = vcombine.low %v9075_v15, %v9075_v15  ;;  %vm1801_vm6 = vcmask 744448   ;;  %s8696_s9 = smov 60  }
  0xc4   : > { %389 = vst [vmem:[#allocation2 + $0x60] sm:$0xff] %v9072_v14  ;;  %390 = vst [vmem:[#allocation2 + $0x68] sm:$0xff] %v9075_v15  ;;  %v392_v18 = vld [vmem:[%s8993_s29] sm:$0xff]  ;;  %v9094_v19 = vld [vmem:[#allocation2 + $0x8] sm:$0xff]  ;;  %v9200_v59 = vcombine.low %v9090_v17, %v9090_v17  ;;  %vm2001_vm7 = vcmask 736256   ;;  %s8697_s2 = smov 59  }
  0xc5   : > { %391 = vst [vmem:[#allocation2 + $0x70] sm:$0xff] %v9090_v17  ;;  %395 = vst [vmem:[#allocation2 + $0x78] sm:$0xff] %v392_v18  ;;  %v400_v20 = vld [vmem:[#allocation2 + $0x10] sm:$0xff]  ;;  %550 = vrot.lane.b32.xlu1 %v9032_v4, %s8688_s14  ;;  %544 = vrot.lane.b32.xlu0 %v9080_v16, %s8688_s14  ;;  %v9106_v22 = vcombine.high %v9094_v19, %v9094_v19  ;;  %v9235_v18 = vcombine.high %v9035_v5, %v9035_v5  ;;  %vm2202_vm8 = vcmask 490496   ;;  %s8698_s17 = smov 58   ;;  %vm2402_vm9 = vcmask 482304  }
  0xc6   : > { %460 = vst [vmem:[#allocation3 + $0x10] sm:$0xf] %v9094_v19  ;;  %v430_v23 = vcombine.high %v400_v20, %v400_v20  ;;  %462 = vst [vmem:[#allocation3 + $0x20] sm:$0xf] %v400_v20  ;;  %v401_v24 = vld [vmem:[#allocation2 + $0x18] sm:$0xff]  ;;  %v402_v25 = vld [vmem:[#allocation2 + $0x20] sm:$0xff]  ;;  %v9243_v20 = vcombine.high %v9041_v6, %v9041_v6 }
  0xc7   : > { %v431_v26 = vcombine.high %v401_v24, %v401_v24  ;;  %464 = vst [vmem:[#allocation3 + $0x30] sm:$0xf] %v401_v24  ;;  %v432_v27 = vcombine.high %v402_v25, %v402_v25  ;;  %466 = vst [vmem:[#allocation3 + $0x40] sm:$0xf] %v402_v25  ;;  %v403_v28 = vld [vmem:[#allocation2 + $0x28] sm:$0xff]  ;;  %v404_v32 = vld [vmem:[#allocation2 + $0x30] sm:$0xff]  ;;  %v9259_v24 = vcombine.high %v9047_v8, %v9047_v8 }
  0xc8   : > { %461 = vst [vmem:[#allocation3 + $0x18] sm:$0xf] %v9106_v22  ;;  %463 = vst [vmem:[#allocation3 + $0x28] sm:$0xf] %v430_v23  ;;  %v433_v29 = vcombine.high %v403_v28, %v403_v28  ;;  %v434_v33 = vcombine.high %v404_v32, %v404_v32  ;;  %v405_v35 = vld [vmem:[#allocation2 + $0x38] sm:$0xff]  ;;  %v406_v38 = vld [vmem:[#allocation2 + $0x40] sm:$0xff]  ;;  %v9251_v23 = vcombine.high %v9044_v7, %v9044_v7 }
  0xc9   : > { %468 = vst [vmem:[#allocation3 + $0x50] sm:$0xf] %v403_v28  ;;  %465 = vst [vmem:[#allocation3 + $0x38] sm:$0xf] %v431_v26  ;;  %554 = vrot.lane.b32.xlu1 %v9035_v5, %s8688_s14  ;;  %548 = vrot.lane.b32.xlu0 %v9098_v21, %s8688_s14  ;;  %v435_v36 = vcombine.high %v405_v35, %v405_v35  ;;  %v436_v39 = vcombine.high %v406_v38, %v406_v38  ;;  %v407_v41 = vld [vmem:[#allocation2 + $0x48] sm:$0xff]  ;;  %v408_v44 = vld [vmem:[#allocation2 + $0x50] sm:$0xff] }
  0xca   : > { %467 = vst [vmem:[#allocation3 + $0x48] sm:$0xf] %v432_v27  ;;  %469 = vst [vmem:[#allocation3 + $0x58] sm:$0xf] %v433_v29  ;;  %v437_v42 = vcombine.high %v407_v41, %v407_v41  ;;  %v438_v45 = vcombine.high %v408_v44, %v408_v44  ;;  %v409_v47 = vld [vmem:[#allocation2 + $0x58] sm:$0xff]  ;;  %v9267_v25 = vcombine.high %v9057_v10, %v9057_v10  ;;  %s8699_s6 = smov 42  }
  0xcb   : > { %470 = vst [vmem:[#allocation3 + $0x60] sm:$0xf] %v404_v32  ;;  %471 = vst [vmem:[#allocation3 + $0x68] sm:$0xf] %v434_v33  ;;  %v439_v48 = vcombine.high %v409_v47, %v409_v47  ;;  %v410_v50 = vld [vmem:[#allocation2 + $0x60] sm:$0xff]  ;;  %v411_v53 = vld [vmem:[#allocation2 + $0x68] sm:$0xff]  ;;  %v9275_v26 = vcombine.high %v9060_v11, %v9060_v11  ;;  %v9283_v27 = vcombine.high %v9063_v12, %v9063_v12 }
  0xcc   : > { %472 = vst [vmem:[#allocation3 + $0x70] sm:$0xf] %v405_v35  ;;  %473 = vst [vmem:[#allocation3 + $0x78] sm:$0xf] %v435_v36  ;;  %v440_v51 = vcombine.high %v410_v50, %v410_v50  ;;  %v441_v54 = vcombine.high %v411_v53, %v411_v53  ;;  %v412_v56 = vld [vmem:[#allocation2 + $0x70] sm:$0xff]  ;;  %v9291_v28 = vcombine.high %v9069_v13, %v9069_v13  ;;  %vm2603_vm10 = vcmask 474112  }
  0xcd   : > { %540 = vrot.lane.b32.xlu1 %v9112_v30, %s8688_s14  ;;  %552 = vrot.lane.b32.xlu0 %v9116_v31, %s8688_s14  ;;  %474 = vst [vmem:[#allocation3 + $0x80] sm:$0xf] %v406_v38  ;;  %475 = vst [vmem:[#allocation3 + $0x88] sm:$0xf] %v436_v39  ;;  %v442_v57 = vcombine.high %v412_v56, %v412_v56  ;;  %v8290_v60 = vld [vmem:[#allocation2 + $0x78] ss:$0 sps:$4 sm:$0xff]   ;;  %v9299_v29 = vcombine.high %v9072_v14, %v9072_v14 }
  0xce   : > { %476 = vst [vmem:[#allocation3 + $0x90] sm:$0xf] %v407_v41  ;;  %477 = vst [vmem:[#allocation3 + $0x98] sm:$0xf] %v437_v42  ;;  %v9307_v32 = vcombine.high %v9075_v15, %v9075_v15  ;;  %v9315_v36 = vcombine.high %v9090_v17, %v9090_v17  ;;  %v704_v38 = vld [vmem:[#allocation2 + $0x78] sm:$0xf] }
  0xcf   : > { %478 = vst [vmem:[#allocation3 + $0xa0] sm:$0xf] %v408_v44  ;;  %479 = vst [vmem:[#allocation3 + $0xa8] sm:$0xf] %v438_v45  ;;  %s8700_s18 = smov 41   ;;  %vm2803_vm11 = vcmask 343040  }
  0xd0   : > { %480 = vst [vmem:[#allocation3 + $0xb0] sm:$0xf] %v409_v47  ;;  %481 = vst [vmem:[#allocation3 + $0xb8] sm:$0xf] %v439_v48  ;;  %s8701_s30 = smov 40   ;;  %vm3004_vm12 = vcmask 334848  }
  0xd1   : > { %558 = vrot.lane.b32.xlu1 %v9041_v6, %s8688_s14  ;;  %556 = vrot.lane.b32.xlu0 %v9128_v34, %s8688_s14  ;;  %482 = vst [vmem:[#allocation3 + $0xc0] sm:$0xf] %v410_v50  ;;  %483 = vst [vmem:[#allocation3 + $0xc8] sm:$0xf] %v440_v51  ;;  %s8702_s13 = smov 24   ;;  %vm3204_vm13 = vcmask 326656  }
  0xd2   : > { %484 = vst [vmem:[#allocation3 + $0xd0] sm:$0xf] %v411_v53  ;;  %485 = vst [vmem:[#allocation3 + $0xd8] sm:$0xf] %v441_v54  ;;  %s8703_s0 = smov 23   ;;  %vm3405_vm14 = vcmask 195584  }
  0xd3   : > { %486 = vst [vmem:[#allocation3 + $0xe0] sm:$0xf] %v412_v56  ;;  %487 = vst [vmem:[#allocation3 + $0xe8] sm:$0xf] %v442_v57  ;;  %s8704_s21 = smov 22   ;;  %vm3605_vm15 = vcmask 187392  }
  0xd4   : > { %p12755_p13 = scmp.ne.s32.totalorder %s12738_s15, 0 }
  0xd5   : > { %562 = vrot.lane.b32.xlu1 %v9044_v7, %s8688_s14  ;;  %560 = vrot.lane.b32.xlu0 %v9136_v37, %s8688_s14 }
  0xd9   : > { %566 = vrot.lane.b32.xlu1 %v9047_v8, %s8688_s14  ;;  %564 = vrot.lane.b32.xlu0 %v9144_v40, %s8688_s14 }
  0xdd   : > { %570 = vrot.lane.b32.xlu1 %v9057_v10, %s8688_s14  ;;  %568 = vrot.lane.b32.xlu0 %v9152_v43, %s8688_s14 }
  0xe1   : > { %574 = vrot.lane.b32.xlu1 %v9060_v11, %s8688_s14  ;;  %572 = vrot.lane.b32.xlu0 %v9160_v46, %s8688_s14 }
  0xe5   : > { %578 = vrot.lane.b32.xlu1 %v9063_v12, %s8688_s14  ;;  %576 = vrot.lane.b32.xlu0 %v9168_v49, %s8688_s14 }
  0xe9   : > { %582 = vrot.lane.b32.xlu1 %v9069_v13, %s8688_s14  ;;  %580 = vrot.lane.b32.xlu0 %v9176_v52, %s8688_s14 }
  0xed   : > { %586 = vrot.lane.b32.xlu1 %v9072_v14, %s8688_s14  ;;  %584 = vrot.lane.b32.xlu0 %v9184_v55, %s8688_s14 }
  0xf1   : > { %590 = vrot.lane.b32.xlu1 %v9075_v15, %s8688_s14  ;;  %588 = vrot.lane.b32.xlu0 %v9192_v58, %s8688_s14 }
  0xf5   : > { %594 = vrot.lane.b32.xlu1 %v9090_v17, %s8688_s14  ;;  %592 = vrot.lane.b32.xlu0 %v9200_v59, %s8688_s14 }
  0xf9   : > { %736 = vrot.lane.b32.xlu1 %v9015_v1, %s8689_s7  ;;  %596 = vrot.lane.b32.xlu0 %v8290_v60, %s8688_s14  ;;  %s8705_s14 = smov 120  }
  0xfd   : > { %740 = vrot.lane.b32.xlu1 %v9012_v0, %s8689_s7  ;;  %738 = vrot.lane.b32.xlu0 %v9051_v9, %s8689_s7 }
 0x101   : > { %744 = vrot.lane.b32.xlu1 %v9018_v2, %s8689_s7  ;;  %742 = vrot.lane.b32.xlu0 %v9211_v61, %s8689_s7 }
 0x105   : > { %748 = vrot.lane.b32.xlu1 %v9032_v4, %s8689_s7  ;;  %746 = vrot.lane.b32.xlu0 %v9219_v62, %s8689_s7 }
 0x109   : > { %752 = vrot.lane.b32.xlu1 %v9035_v5, %s8689_s7  ;;  %750 = vrot.lane.b32.xlu0 %v9227_v63, %s8689_s7 }
 0x10d   : > { %756 = vrot.lane.b32.xlu1 %v9041_v6, %s8689_s7  ;;  %754 = vrot.lane.b32.xlu0 %v9235_v18, %s8689_s7 }
 0x111   : > { %760 = vrot.lane.b32.xlu1 %v9044_v7, %s8689_s7  ;;  %758 = vrot.lane.b32.xlu0 %v9243_v20, %s8689_s7 }
 0x115   : > { %764 = vrot.lane.b32.xlu1 %v9047_v8, %s8689_s7  ;;  %762 = vrot.lane.b32.xlu0 %v9251_v23, %s8689_s7 }
 0x119   : > { %768 = vrot.lane.b32.xlu1 %v9057_v10, %s8689_s7  ;;  %766 = vrot.lane.b32.xlu0 %v9259_v24, %s8689_s7 }
 0x11d   : > { %772 = vrot.lane.b32.xlu1 %v9060_v11, %s8689_s7  ;;  %770 = vrot.lane.b32.xlu0 %v9267_v25, %s8689_s7 }
 0x121   : > { %776 = vrot.lane.b32.xlu1 %v9063_v12, %s8689_s7  ;;  %774 = vrot.lane.b32.xlu0 %v9275_v26, %s8689_s7 }
 0x125   : > { %780 = vrot.lane.b32.xlu1 %v9069_v13, %s8689_s7  ;;  %778 = vrot.lane.b32.xlu0 %v9283_v27, %s8689_s7 }
 0x129   : > { %784 = vrot.lane.b32.xlu1 %v9072_v14, %s8689_s7  ;;  %782 = vrot.lane.b32.xlu0 %v9291_v28, %s8689_s7 }
 0x12d   : > { %788 = vrot.lane.b32.xlu1 %v9075_v15, %s8689_s7  ;;  %786 = vrot.lane.b32.xlu0 %v9299_v29, %s8689_s7 }
 0x12f   : > { %v543_v33 = vpop.permute.xlu1 %542  ;;  %v539_v35 = vpop.permute.xlu0 %538 }
 0x131   : > { %792 = vrot.lane.b32.xlu1 %v9090_v17, %s8689_s7  ;;  %790 = vrot.lane.b32.xlu0 %v9307_v32, %s8689_s7 }
 0x133   : > { %v547_v39 = vpop.permute.xlu1 %546  ;;  %v537_v41 = vpop.permute.xlu0 %536 }
 0x134   : > { %v599_v42 = vsel %vm598_vm0, %v537_v41, %v539_v35 }
 0x135   : > { %659 = vst [vmem:[#allocation3] sm:$0xf0] %v599_v42  ;;  %796 = vrot.lane.b32.xlu1 %v704_v38, %s8689_s7  ;;  %794 = vrot.lane.b32.xlu0 %v9315_v36, %s8689_s7  ;;  %s8706_s7 = smov 119  }
 0x137   : > { %v551_v44 = vpop.permute.xlu1 %550  ;;  %v545_v45 = vpop.permute.xlu0 %544 }
 0x138   : > { %v602_v47 = vsel %vm598_vm0, %v543_v33, %v545_v45  ;;  %v603_v48 = vsel %vm598_vm0, %v545_v45, %v547_v39 }
 0x139   : > { %662 = vst [vmem:[#allocation3 + $0x18] sm:$0xf0] %v602_v47  ;;  %663 = vst [vmem:[#allocation3 + $0x20] sm:$0xf0] %v603_v48  ;;  %939 = vrot.lane.b32.xlu1 %v9015_v1, %s8690_s11  ;;  %937 = vrot.lane.b32.xlu0 %v9028_v3, %s8690_s11 }
 0x13b   : > { %v555_v50 = vpop.permute.xlu1 %554  ;;  %v549_v51 = vpop.permute.xlu0 %548 }
 0x13c   : > { %v604_v53 = vsel %vm598_vm0, %v547_v39, %v549_v51  ;;  %v605_v54 = vsel %vm598_vm0, %v549_v51, %v551_v44 }
 0x13d   : > { %664 = vst [vmem:[#allocation3 + $0x28] sm:$0xf0] %v604_v53  ;;  %665 = vst [vmem:[#allocation3 + $0x30] sm:$0xf0] %v605_v54  ;;  %943 = vrot.lane.b32.xlu1 %v9012_v0, %s8690_s11  ;;  %941 = vrot.lane.b32.xlu0 %v9112_v30, %s8690_s11 }
 0x13f   : > { %v541_v56 = vpop.permute.xlu1 %540  ;;  %v553_v57 = vpop.permute.xlu0 %552 }
 0x140   : > { %v600_v60 = vsel %vm598_vm0, %v539_v35, %v541_v56  ;;  %v601_v38 = vsel %vm598_vm0, %v541_v56, %v543_v33  ;;  %v606_v41 = vsel %vm598_vm0, %v551_v44, %v553_v57  ;;  %v607_v39 = vsel %vm598_vm0, %v553_v57, %v555_v50 }
 0x141   : > { %660 = vst [vmem:[#allocation3 + $0x8] sm:$0xf0] %v600_v60  ;;  %661 = vst [vmem:[#allocation3 + $0x10] sm:$0xf0] %v601_v38  ;;  %947 = vrot.lane.b32.xlu1 %v9018_v2, %s8690_s11  ;;  %945 = vrot.lane.b32.xlu0 %v9080_v16, %s8690_s11 }
 0x142   : > { %666 = vst [vmem:[#allocation3 + $0x38] sm:$0xf0] %v606_v41  ;;  %667 = vst [vmem:[#allocation3 + $0x40] sm:$0xf0] %v607_v39 }
 0x143   : > { %v559_v42 = vpop.permute.xlu1 %558  ;;  %v557_v45 = vpop.permute.xlu0 %556 }
 0x144   : > { %v608_v35 = vsel %vm598_vm0, %v555_v50, %v557_v45  ;;  %v609_v33 = vsel %vm598_vm0, %v557_v45, %v559_v42 }
 0x145   : > { %668 = vst [vmem:[#allocation3 + $0x48] sm:$0xf0] %v608_v35  ;;  %669 = vst [vmem:[#allocation3 + $0x50] sm:$0xf0] %v609_v33  ;;  %951 = vrot.lane.b32.xlu1 %v9032_v4, %s8690_s11  ;;  %949 = vrot.lane.b32.xlu0 %v9098_v21, %s8690_s11 }
 0x147   : > { %v563_v44 = vpop.permute.xlu1 %562  ;;  %v561_v47 = vpop.permute.xlu0 %560 }
 0x148   : > { %v610_v48 = vsel %vm598_vm0, %v559_v42, %v561_v47  ;;  %v611_v51 = vsel %vm598_vm0, %v561_v47, %v563_v44 }
 0x149   : > { %670 = vst [vmem:[#allocation3 + $0x58] sm:$0xf0] %v610_v48  ;;  %671 = vst [vmem:[#allocation3 + $0x60] sm:$0xf0] %v611_v51  ;;  %955 = vrot.lane.b32.xlu1 %v9035_v5, %s8690_s11  ;;  %953 = vrot.lane.b32.xlu0 %v9116_v31, %s8690_s11 }
 0x14b   : > { %v567_v50 = vpop.permute.xlu1 %566  ;;  %v565_v53 = vpop.permute.xlu0 %564 }
 0x14c   : > { %v612_v54 = vsel %vm598_vm0, %v563_v44, %v565_v53  ;;  %v613_v21 = vsel %vm598_vm0, %v565_v53, %v567_v50 }
 0x14d   : > { %672 = vst [vmem:[#allocation3 + $0x68] sm:$0xf0] %v612_v54  ;;  %673 = vst [vmem:[#allocation3 + $0x70] sm:$0xf0] %v613_v21  ;;  %959 = vrot.lane.b32.xlu1 %v9041_v6, %s8690_s11  ;;  %957 = vrot.lane.b32.xlu0 %v9128_v34, %s8690_s11 }
 0x14f   : > { %v571_v56 = vpop.permute.xlu1 %570  ;;  %v569_v57 = vpop.permute.xlu0 %568 }
 0x150   : > { %v614_v60 = vsel %vm598_vm0, %v567_v50, %v569_v57  ;;  %v615_v31 = vsel %vm598_vm0, %v569_v57, %v571_v56 }
 0x151   : > { %674 = vst [vmem:[#allocation3 + $0x78] sm:$0xf0] %v614_v60  ;;  %675 = vst [vmem:[#allocation3 + $0x80] sm:$0xf0] %v615_v31  ;;  %963 = vrot.lane.b32.xlu1 %v9044_v7, %s8690_s11  ;;  %961 = vrot.lane.b32.xlu0 %v9136_v37, %s8690_s11 }
 0x153   : > { %v575_v38 = vpop.permute.xlu1 %574  ;;  %v573_v41 = vpop.permute.xlu0 %572 }
 0x154   : > { %v616_v39 = vsel %vm598_vm0, %v571_v56, %v573_v41  ;;  %v617_v34 = vsel %vm598_vm0, %v573_v41, %v575_v38 }
 0x155   : > { %676 = vst [vmem:[#allocation3 + $0x88] sm:$0xf0] %v616_v39  ;;  %677 = vst [vmem:[#allocation3 + $0x90] sm:$0xf0] %v617_v34  ;;  %967 = vrot.lane.b32.xlu1 %v9047_v8, %s8690_s11  ;;  %965 = vrot.lane.b32.xlu0 %v9144_v40, %s8690_s11 }
 0x157   : > { %v579_v42 = vpop.permute.xlu1 %578  ;;  %v577_v45 = vpop.permute.xlu0 %576 }
 0x158   : > { %v618_v35 = vsel %vm598_vm0, %v575_v38, %v577_v45  ;;  %v619_v37 = vsel %vm598_vm0, %v577_v45, %v579_v42 }
 0x159   : > { %678 = vst [vmem:[#allocation3 + $0x98] sm:$0xf0] %v618_v35  ;;  %679 = vst [vmem:[#allocation3 + $0xa0] sm:$0xf0] %v619_v37  ;;  %971 = vrot.lane.b32.xlu1 %v9057_v10, %s8690_s11  ;;  %969 = vrot.lane.b32.xlu0 %v9152_v43, %s8690_s11 }
 0x15b   : > { %v583_v33 = vpop.permute.xlu1 %582  ;;  %v581_v44 = vpop.permute.xlu0 %580 }
 0x15c   : > { %v620_v47 = vsel %vm598_vm0, %v579_v42, %v581_v44  ;;  %v621_v40 = vsel %vm598_vm0, %v581_v44, %v583_v33 }
 0x15d   : > { %680 = vst [vmem:[#allocation3 + $0xa8] sm:$0xf0] %v620_v47  ;;  %681 = vst [vmem:[#allocation3 + $0xb0] sm:$0xf0] %v621_v40  ;;  %975 = vrot.lane.b32.xlu1 %v9060_v11, %s8690_s11  ;;  %973 = vrot.lane.b32.xlu0 %v9160_v46, %s8690_s11 }
 0x15f   : > { %v587_v48 = vpop.permute.xlu1 %586  ;;  %v585_v51 = vpop.permute.xlu0 %584 }
 0x160   : > { %v622_v50 = vsel %vm598_vm0, %v583_v33, %v585_v51  ;;  %v623_v43 = vsel %vm598_vm0, %v585_v51, %v587_v48 }
 0x161   : > { %682 = vst [vmem:[#allocation3 + $0xb8] sm:$0xf0] %v622_v50  ;;  %683 = vst [vmem:[#allocation3 + $0xc0] sm:$0xf0] %v623_v43  ;;  %979 = vrot.lane.b32.xlu1 %v9063_v12, %s8690_s11  ;;  %977 = vrot.lane.b32.xlu0 %v9168_v49, %s8690_s11 }
 0x163   : > { %v591_v53 = vpop.permute.xlu1 %590  ;;  %v589_v54 = vpop.permute.xlu0 %588 }
 0x164   : > { %v624_v21 = vsel %vm598_vm0, %v587_v48, %v589_v54  ;;  %v625_v46 = vsel %vm598_vm0, %v589_v54, %v591_v53 }
 0x165   : > { %684 = vst [vmem:[#allocation3 + $0xc8] sm:$0xf0] %v624_v21  ;;  %685 = vst [vmem:[#allocation3 + $0xd0] sm:$0xf0] %v625_v46  ;;  %983 = vrot.lane.b32.xlu1 %v9069_v13, %s8690_s11  ;;  %981 = vrot.lane.b32.xlu0 %v9176_v52, %s8690_s11 }
 0x167   : > { %v595_v56 = vpop.permute.xlu1 %594  ;;  %v593_v57 = vpop.permute.xlu0 %592 }
 0x168   : > { %v626_v60 = vsel %vm598_vm0, %v591_v53, %v593_v57  ;;  %v627_v49 = vsel %vm598_vm0, %v593_v57, %v595_v56 }
 0x169   : > { %686 = vst [vmem:[#allocation3 + $0xd8] sm:$0xf0] %v626_v60  ;;  %687 = vst [vmem:[#allocation3 + $0xe0] sm:$0xf0] %v627_v49  ;;  %987 = vrot.lane.b32.xlu1 %v9072_v14, %s8690_s11  ;;  %985 = vrot.lane.b32.xlu0 %v9184_v55, %s8690_s11  ;;  %v8305_v55 = vld [vmem:[#allocation2 + $0x78] ss:$0 sps:$4 sm:$0xff]  }
 0x16b   : > { %v737_v31 = vpop.permute.xlu1 %736  ;;  %v597_v38 = vpop.permute.xlu0 %596 }
 0x16c   : > { %v628_v41 = vsel %vm598_vm0, %v595_v56, %v597_v38  ;;  %vm3806_vm0 = vcmask 179200  }
 0x16d   : > { %688 = vst [vmem:[#allocation3 + $0xe8] sm:$0xf0] %v628_v41  ;;  %991 = vrot.lane.b32.xlu1 %v9075_v15, %s8690_s11  ;;  %989 = vrot.lane.b32.xlu0 %v9192_v58, %s8690_s11 }
 0x16f   : > { %v741_v52 = vpop.permute.xlu1 %740  ;;  %v739_v39 = vpop.permute.xlu0 %738 }
 0x170   : > { %v799_v34 = vsel %vm798_vm1, %v737_v31, %v739_v39  ;;  %v800_v42 = vsel %vm798_vm1, %v739_v39, %v741_v52 }
 0x171   : > { %859 = vst [vmem:[#allocation3 + $0xf0] sm:$0xf] %v799_v34  ;;  %860 = vst [vmem:[#allocation3 + $0xf8] sm:$0xf] %v800_v42  ;;  %995 = vrot.lane.b32.xlu1 %v9090_v17, %s8690_s11  ;;  %993 = vrot.lane.b32.xlu0 %v9200_v59, %s8690_s11 }
 0x173   : > { %v745_v45 = vpop.permute.xlu1 %744  ;;  %v743_v35 = vpop.permute.xlu0 %742 }
 0x174   : > { %v801_v58 = vsel %vm798_vm1, %v741_v52, %v743_v35  ;;  %v802_v37 = vsel %vm798_vm1, %v743_v35, %v745_v45 }
 0x175   : > { %861 = vst [vmem:[#allocation3 + $0x100] sm:$0xf] %v801_v58  ;;  %862 = vst [vmem:[#allocation3 + $0x108] sm:$0xf] %v802_v37  ;;  %1137 = vrot.lane.b32.xlu1 %v9015_v1, %s8691_s8  ;;  %997 = vrot.lane.b32.xlu0 %v8305_v55, %s8690_s11  ;;  %s8707_s11 = smov 118  }
 0x177   : > { %v749_v33 = vpop.permute.xlu1 %748  ;;  %v747_v44 = vpop.permute.xlu0 %746 }
 0x178   : > { %v803_v47 = vsel %vm798_vm1, %v745_v45, %v747_v44  ;;  %v804_v59 = vsel %vm798_vm1, %v747_v44, %v749_v33 }
 0x179   : > { %863 = vst [vmem:[#allocation3 + $0x110] sm:$0xf] %v803_v47  ;;  %864 = vst [vmem:[#allocation3 + $0x118] sm:$0xf] %v804_v59  ;;  %1141 = vrot.lane.b32.xlu1 %v9012_v0, %s8691_s8  ;;  %1139 = vrot.lane.b32.xlu0 %v9051_v9, %s8691_s8 }
 0x17b   : > { %v753_v40 = vpop.permute.xlu1 %752  ;;  %v751_v48 = vpop.permute.xlu0 %750 }
 0x17c   : > { %v805_v51 = vsel %vm798_vm1, %v749_v33, %v751_v48  ;;  %v806_v50 = vsel %vm798_vm1, %v751_v48, %v753_v40 }
 0x17d   : > { %865 = vst [vmem:[#allocation3 + $0x120] sm:$0xf] %v805_v51  ;;  %866 = vst [vmem:[#allocation3 + $0x128] sm:$0xf] %v806_v50  ;;  %1145 = vrot.lane.b32.xlu1 %v9018_v2, %s8691_s8  ;;  %1143 = vrot.lane.b32.xlu0 %v9211_v61, %s8691_s8 }
 0x17f   : > { %v757_v43 = vpop.permute.xlu1 %756  ;;  %v755_v53 = vpop.permute.xlu0 %754 }
 0x180   : > { %v807_v54 = vsel %vm798_vm1, %v753_v40, %v755_v53  ;;  %v808_v9 = vsel %vm798_vm1, %v755_v53, %v757_v43 }
 0x181   : > { %867 = vst [vmem:[#allocation3 + $0x130] sm:$0xf] %v807_v54  ;;  %868 = vst [vmem:[#allocation3 + $0x138] sm:$0xf] %v808_v9  ;;  %1149 = vrot.lane.b32.xlu1 %v9032_v4, %s8691_s8  ;;  %1147 = vrot.lane.b32.xlu0 %v9219_v62, %s8691_s8 }
 0x183   : > { %v761_v21 = vpop.permute.xlu1 %760  ;;  %v759_v46 = vpop.permute.xlu0 %758 }
 0x184   : > { %v809_v56 = vsel %vm798_vm1, %v757_v43, %v759_v46  ;;  %v810_v61 = vsel %vm798_vm1, %v759_v46, %v761_v21  ;;  %v5733_v46 = vld [vmem:[#allocation3 + $0x8] sm:$0xff] }
 0x185   : > { %869 = vst [vmem:[#allocation3 + $0x140] sm:$0xf] %v809_v56  ;;  %870 = vst [vmem:[#allocation3 + $0x148] sm:$0xf] %v810_v61  ;;  %1153 = vrot.lane.b32.xlu1 %v9035_v5, %s8691_s8  ;;  %1151 = vrot.lane.b32.xlu0 %v9227_v63, %s8691_s8  ;;  %v5732_v61 = vld [vmem:[#allocation3] sm:$0xff] }
 0x187   : > { %v765_v57 = vpop.permute.xlu1 %764  ;;  %v763_v60 = vpop.permute.xlu0 %762 }
 0x188   : > { %v811_v4 = vsel %vm798_vm1, %v761_v21, %v763_v60  ;;  %v812_v62 = vsel %vm798_vm1, %v763_v60, %v765_v57 }
 0x189   : > { %871 = vst [vmem:[#allocation3 + $0x150] sm:$0xf] %v811_v4  ;;  %872 = vst [vmem:[#allocation3 + $0x158] sm:$0xf] %v812_v62  ;;  %1157 = vrot.lane.b32.xlu1 %v9041_v6, %s8691_s8  ;;  %1155 = vrot.lane.b32.xlu0 %v9235_v18, %s8691_s8 }
 0x18b   : > { %v769_v49 = vpop.permute.xlu1 %768  ;;  %v767_v31 = vpop.permute.xlu0 %766 }
 0x18c   : > { %v813_v5 = vsel %vm798_vm1, %v765_v57, %v767_v31  ;;  %v814_v63 = vsel %vm798_vm1, %v767_v31, %v769_v49  ;;  %v9521_v57 = vld [vmem:[#allocation2 + $0x18] sm:$0xff] }
 0x18d   : > { %873 = vst [vmem:[#allocation3 + $0x160] sm:$0xf] %v813_v5  ;;  %874 = vst [vmem:[#allocation3 + $0x168] sm:$0xf] %v814_v63  ;;  %1161 = vrot.lane.b32.xlu1 %v9044_v7, %s8691_s8  ;;  %1159 = vrot.lane.b32.xlu0 %v9243_v20, %s8691_s8  ;;  %v5735_v5 = vld [vmem:[#allocation3 + $0x18] sm:$0xff] }
 0x18f   : > { %v773_v38 = vpop.permute.xlu1 %772  ;;  %v771_v41 = vpop.permute.xlu0 %770 }
 0x190   : > { %v815_v6 = vsel %vm798_vm1, %v769_v49, %v771_v41  ;;  %v816_v18 = vsel %vm798_vm1, %v771_v41, %v773_v38 }
 0x191   : > { %875 = vst [vmem:[#allocation3 + $0x170] sm:$0xf] %v815_v6  ;;  %876 = vst [vmem:[#allocation3 + $0x178] sm:$0xf] %v816_v18  ;;  %1165 = vrot.lane.b32.xlu1 %v9047_v8, %s8691_s8  ;;  %1163 = vrot.lane.b32.xlu0 %v9251_v23, %s8691_s8  ;;  %v9533_v6 = vld [vmem:[#allocation2 + $0x20] sm:$0xff] }
 0x193   : > { %v777_v52 = vpop.permute.xlu1 %776  ;;  %v775_v39 = vpop.permute.xlu0 %774 }
 0x194   : > { %v817_v7 = vsel %vm798_vm1, %v773_v38, %v775_v39  ;;  %v818_v20 = vsel %vm798_vm1, %v775_v39, %v777_v52  ;;  %v9531_v38 = vcombine.low %v9521_v57, %v9521_v57 }
 0x195   : > { %877 = vst [vmem:[#allocation3 + $0x180] sm:$0xf] %v817_v7  ;;  %878 = vst [vmem:[#allocation3 + $0x188] sm:$0xf] %v818_v20  ;;  %1169 = vrot.lane.b32.xlu1 %v9057_v10, %s8691_s8  ;;  %1167 = vrot.lane.b32.xlu0 %v9259_v24, %s8691_s8 }
 0x197   : > { %v781_v34 = vpop.permute.xlu1 %780  ;;  %v779_v42 = vpop.permute.xlu0 %778 }
 0x198   : > { %v819_v8 = vsel %vm798_vm1, %v777_v52, %v779_v42  ;;  %v820_v23 = vsel %vm798_vm1, %v779_v42, %v781_v34 }
 0x199   : > { %879 = vst [vmem:[#allocation3 + $0x190] sm:$0xf] %v819_v8  ;;  %880 = vst [vmem:[#allocation3 + $0x198] sm:$0xf] %v820_v23  ;;  %1173 = vrot.lane.b32.xlu1 %v9060_v11, %s8691_s8  ;;  %1171 = vrot.lane.b32.xlu0 %v9267_v25, %s8691_s8 }
 0x19b   : > { %v785_v55 = vpop.permute.xlu1 %784  ;;  %v783_v45 = vpop.permute.xlu0 %782 }
 0x19c   : > { %v821_v10 = vsel %vm798_vm1, %v781_v34, %v783_v45  ;;  %v822_v24 = vsel %vm798_vm1, %v783_v45, %v785_v55 }
 0x19d   : > { %881 = vst [vmem:[#allocation3 + $0x1a0] sm:$0xf] %v821_v10  ;;  %882 = vst [vmem:[#allocation3 + $0x1a8] sm:$0xf] %v822_v24  ;;  %1177 = vrot.lane.b32.xlu1 %v9063_v12, %s8691_s8  ;;  %1175 = vrot.lane.b32.xlu0 %v9275_v26, %s8691_s8 }
 0x19f   : > { %v789_v35 = vpop.permute.xlu1 %788  ;;  %v787_v58 = vpop.permute.xlu0 %786 }
 0x1a0   : > { %v823_v11 = vsel %vm798_vm1, %v785_v55, %v787_v58  ;;  %v824_v25 = vsel %vm798_vm1, %v787_v58, %v789_v35  ;;  %v9557_v55 = vld [vmem:[#allocation2 + $0x30] sm:$0xff] }
 0x1a1   : > { %883 = vst [vmem:[#allocation3 + $0x1b0] sm:$0xf] %v823_v11  ;;  %884 = vst [vmem:[#allocation3 + $0x1b8] sm:$0xf] %v824_v25  ;;  %1181 = vrot.lane.b32.xlu1 %v9069_v13, %s8691_s8  ;;  %1179 = vrot.lane.b32.xlu0 %v9283_v27, %s8691_s8  ;;  %v9567_v58 = vcombine.low %v9557_v55, %v9557_v55  ;;  %v9569_v11 = vld [vmem:[#allocation2 + $0x38] sm:$0xff] }
 0x1a3   : > { %v793_v37 = vpop.permute.xlu1 %792  ;;  %v791_v33 = vpop.permute.xlu0 %790 }
 0x1a4   : > { %v825_v12 = vsel %vm798_vm1, %v789_v35, %v791_v33  ;;  %v826_v26 = vsel %vm798_vm1, %v791_v33, %v793_v37 }
 0x1a5   : > { %885 = vst [vmem:[#allocation3 + $0x1c0] sm:$0xf] %v825_v12  ;;  %886 = vst [vmem:[#allocation3 + $0x1c8] sm:$0xf] %v826_v26  ;;  %1185 = vrot.lane.b32.xlu1 %v9072_v14, %s8691_s8  ;;  %1183 = vrot.lane.b32.xlu0 %v9291_v28, %s8691_s8  ;;  %v1105_v28 = vld [vmem:[#allocation2 + $0x78] sm:$0xf]  ;;  %v9579_v26 = vcombine.low %v9569_v11, %v9569_v11 }
 0x1a7   : > { %v797_v44 = vpop.permute.xlu1 %796  ;;  %v795_v47 = vpop.permute.xlu0 %794 }
 0x1a8   : > { %v827_v13 = vsel %vm798_vm1, %v793_v37, %v795_v47  ;;  %v828_v27 = vsel %vm798_vm1, %v795_v47, %v797_v44  ;;  %v9581_v44 = vld [vmem:[#allocation2 + $0x40] sm:$0xff]  ;;  %vm4006_vm1 = vcmask 982016  }
 0x1a9   : > { %887 = vst [vmem:[#allocation3 + $0x1d0] sm:$0xf] %v827_v13  ;;  %888 = vst [vmem:[#allocation3 + $0x1d8] sm:$0xf] %v828_v27  ;;  %1189 = vrot.lane.b32.xlu1 %v9075_v15, %s8691_s8  ;;  %1187 = vrot.lane.b32.xlu0 %v9299_v29, %s8691_s8 }
 0x1ab   : > { %v940_v59 = vpop.permute.xlu1 %939  ;;  %v938_v14 = vpop.permute.xlu0 %937 }
 0x1ac   : > { %v1000_v40 = vsel %vm999_vm2, %v938_v14, %v940_v59  ;;  %v9591_v14 = vcombine.low %v9581_v44, %v9581_v44 }
 0x1ad   : > { %1060 = vst [vmem:[#allocation3 + $0xf0] sm:$0xf0] %v1000_v40  ;;  %1193 = vrot.lane.b32.xlu1 %v9090_v17, %s8691_s8  ;;  %1191 = vrot.lane.b32.xlu0 %v9307_v32, %s8691_s8  ;;  %v9593_v40 = vld [vmem:[#allocation2 + $0x48] sm:$0xff] }
 0x1af   : > { %v944_v48 = vpop.permute.xlu1 %943  ;;  %v942_v51 = vpop.permute.xlu0 %941 }
 0x1b0   : > { %v1001_v15 = vsel %vm999_vm2, %v940_v59, %v942_v51  ;;  %v1002_v50 = vsel %vm999_vm2, %v942_v51, %v944_v48 }
 0x1b1   : > { %1061 = vst [vmem:[#allocation3 + $0xf8] sm:$0xf0] %v1001_v15  ;;  %1062 = vst [vmem:[#allocation3 + $0x100] sm:$0xf0] %v1002_v50  ;;  %1197 = vrot.lane.b32.xlu1 %v1105_v28, %s8691_s8  ;;  %1195 = vrot.lane.b32.xlu0 %v9315_v36, %s8691_s8  ;;  %v9603_v50 = vcombine.low %v9593_v40, %v9593_v40  ;;  %s8708_s8 = smov 102  }
 0x1b3   : > { %v948_v29 = vpop.permute.xlu1 %947  ;;  %v946_v43 = vpop.permute.xlu0 %945 }
 0x1b4   : > { %v1003_v17 = vsel %vm999_vm2, %v944_v48, %v946_v43  ;;  %v1004_v32 = vsel %vm999_vm2, %v946_v43, %v948_v29  ;;  %v5762_v9 = vld [vmem:[#allocation3 + $0xf0] sm:$0xff] }
 0x1b5   : > { %1063 = vst [vmem:[#allocation3 + $0x108] sm:$0xf0] %v1003_v17  ;;  %1064 = vst [vmem:[#allocation3 + $0x110] sm:$0xf0] %v1004_v32  ;;  %1340 = vrot.lane.b32.xlu1 %v9015_v1, %s8692_s28  ;;  %1338 = vrot.lane.b32.xlu0 %v9028_v3, %s8692_s28  ;;  %v7743_v3 = vpack.c.bf16 %v5762_v9, %v5732_v61  ;;  %v9617_v9 = vld [vmem:[#allocation2 + $0x58] sm:$0xff]  ;;  %v9629_v61 = vld [vmem:[#allocation2 + $0x60] sm:$0xff] }
 0x1b7   : > { %v952_v53 = vpop.permute.xlu1 %951  ;;  %v950_v54 = vpop.permute.xlu0 %949 }
 0x1b8   : > { %v1005_v36 = vsel %vm999_vm2, %v948_v29, %v950_v54  ;;  %v1006_v21 = vsel %vm999_vm2, %v950_v54, %v952_v53  ;;  %v5763_v56 = vld [vmem:[#allocation3 + $0xf8] sm:$0xff]  ;;  %v5764_v62 = vld [vmem:[#allocation3 + $0x100] sm:$0xff] }
 0x1b9   : > { %1065 = vst [vmem:[#allocation3 + $0x118] sm:$0xf0] %v1005_v36  ;;  %1066 = vst [vmem:[#allocation3 + $0x120] sm:$0xf0] %v1006_v21  ;;  %1344 = vrot.lane.b32.xlu1 %v9012_v0, %s8692_s28  ;;  %1342 = vrot.lane.b32.xlu0 %v9112_v30, %s8692_s28  ;;  %v7741_v1 = vpack.c.bf16 %v5763_v56, %v5733_v46  ;;  %v5734_v30 = vld [vmem:[#allocation3 + $0x10] sm:$0xff]  ;;  %v9605_v29 = vld [vmem:[#allocation2 + $0x50] sm:$0xff] }
 0x1ba   : > { %v7771_v41 = vpack.c.bf16 %v5764_v62, %v5734_v30  ;;  %v9615_v54 = vcombine.low %v9605_v29, %v9605_v29 }
 0x1bb   : > { %v956_v60 = vpop.permute.xlu1 %955  ;;  %v954_v4 = vpop.permute.xlu0 %953  ;;  %7742 = vmatprep.subr.bf16.mxu0 %v7741_v1  ;;  %v9627_v1 = vcombine.low %v9617_v9, %v9617_v9 }
 0x1bc   : > { %v1007_v49 = vsel %vm999_vm2, %v952_v53, %v954_v4  ;;  %v1008_v31 = vsel %vm999_vm2, %v954_v4, %v956_v60  ;;  %7744 = vmatpush1.bf16.msra.mxu0 %v7743_v3  ;;  %v5765_v63 = vld [vmem:[#allocation3 + $0x108] sm:$0xff] }
 0x1bd   : > { %1067 = vst [vmem:[#allocation3 + $0x128] sm:$0xf0] %v1007_v49  ;;  %1068 = vst [vmem:[#allocation3 + $0x130] sm:$0xf0] %v1008_v31  ;;  %1348 = vrot.lane.b32.xlu1 %v9018_v2, %s8692_s28  ;;  %1346 = vrot.lane.b32.xlu0 %v9080_v16, %s8692_s28  ;;  %v7769_v0 = vpack.c.bf16 %v5765_v63, %v5735_v5  ;;  %v9543_v2 = vcombine.low %v9533_v6, %v9533_v6  ;;  %v9545_v16 = vld [vmem:[#allocation2 + $0x28] sm:$0xff] }
 0x1be   : > { %v9555_v23 = vcombine.low %v9545_v16, %v9545_v16  ;;  %v9639_v49 = vcombine.low %v9629_v61, %v9629_v61  ;;  %v9641_v31 = vld [vmem:[#allocation2 + $0x68] sm:$0xff] }
 0x1bf   : > { %v960_v18 = vpop.permute.xlu1 %959  ;;  %7770 = vmatprep.subr.bf16.mxu1 %v7769_v0  ;;  %v958_v52 = vpop.permute.xlu0 %957 }
 0x1c0   : > { %v1009_v39 = vsel %vm999_vm2, %v956_v60, %v958_v52  ;;  %v1010_v7 = vsel %vm999_vm2, %v958_v52, %v960_v18  ;;  %7772 = vmatpush1.bf16.msra.mxu1 %v7771_v41  ;;  %v9651_v41 = vcombine.low %v9641_v31, %v9641_v31 }
 0x1c1   : > { %1069 = vst [vmem:[#allocation3 + $0x138] sm:$0xf0] %v1009_v39  ;;  %1070 = vst [vmem:[#allocation3 + $0x140] sm:$0xf0] %v1010_v7  ;;  %1352 = vrot.lane.b32.xlu1 %v9521_v57, %s8692_s28  ;;  %1350 = vrot.lane.b32.xlu0 %v9531_v38, %s8692_s28 }
 0x1c3   : > { %v964_v20 = vpop.permute.xlu1 %963  ;;  %v962_v34 = vpop.permute.xlu0 %961 }
 0x1c4   : > { %v1011_v42 = vsel %vm999_vm2, %v960_v18, %v962_v34  ;;  %v1012_v8 = vsel %vm999_vm2, %v962_v34, %v964_v20  ;;  %v9653_v18 = vld [vmem:[#allocation2 + $0x70] sm:$0xff] }
 0x1c5   : > { %1071 = vst [vmem:[#allocation3 + $0x148] sm:$0xf0] %v1011_v42  ;;  %1072 = vst [vmem:[#allocation3 + $0x150] sm:$0xf0] %v1012_v8  ;;  %1356 = vrot.lane.b32.xlu1 %v9533_v6, %s8692_s28  ;;  %1354 = vrot.lane.b32.xlu0 %v9543_v2, %s8692_s28 }
 0x1c7   : > { %v968_v45 = vpop.permute.xlu1 %967  ;;  %v966_v10 = vpop.permute.xlu0 %965 }
 0x1c8   : > { %v1013_v24 = vsel %vm999_vm2, %v964_v20, %v966_v10  ;;  %v1014_v35 = vsel %vm999_vm2, %v966_v10, %v968_v45  ;;  %v9662_v20 = vcombine.low %v9653_v18, %v9653_v18  ;;  %v8320_v10 = vld [vmem:[#allocation2 + $0x78] ss:$0 sps:$4 sm:$0xff]  }
 0x1c9   : > { %1073 = vst [vmem:[#allocation3 + $0x158] sm:$0xf0] %v1013_v24  ;;  %1074 = vst [vmem:[#allocation3 + $0x160] sm:$0xf0] %v1014_v35  ;;  %1360 = vrot.lane.b32.xlu1 %v9545_v16, %s8692_s28  ;;  %1358 = vrot.lane.b32.xlu0 %v9555_v23, %s8692_s28  ;;  %v9670_v24 = vld [vmem:[#allocation2] sm:$0xff] }
 0x1cb   : > { %v972_v25 = vpop.permute.xlu1 %971  ;;  %v970_v37 = vpop.permute.xlu0 %969 }
 0x1cc   : > { %v1015_v33 = vsel %vm999_vm2, %v968_v45, %v970_v37  ;;  %v1016_v12 = vsel %vm999_vm2, %v970_v37, %v972_v25 }
 0x1cd   : > { %1075 = vst [vmem:[#allocation3 + $0x168] sm:$0xf0] %v1015_v33  ;;  %1076 = vst [vmem:[#allocation3 + $0x170] sm:$0xf0] %v1016_v12  ;;  %1364 = vrot.lane.b32.xlu1 %v9557_v55, %s8692_s28  ;;  %1362 = vrot.lane.b32.xlu0 %v9567_v58, %s8692_s28  ;;  %v9676_v12 = vcombine.high %v9670_v24, %v9670_v24 }
 0x1cf   : > { %v976_v47 = vpop.permute.xlu1 %975  ;;  %v974_v13 = vpop.permute.xlu0 %973 }
 0x1d0   : > { %v1017_v27 = vsel %vm999_vm2, %v972_v25, %v974_v13  ;;  %v1018_v59 = vsel %vm999_vm2, %v974_v13, %v976_v47 }
 0x1d1   : > { %1077 = vst [vmem:[#allocation3 + $0x178] sm:$0xf0] %v1017_v27  ;;  %1078 = vst [vmem:[#allocation3 + $0x180] sm:$0xf0] %v1018_v59  ;;  %1368 = vrot.lane.b32.xlu1 %v9569_v11, %s8692_s28  ;;  %1366 = vrot.lane.b32.xlu0 %v9579_v26, %s8692_s28 }
 0x1d3   : > { %v980_v28 = vpop.permute.xlu1 %979  ;;  %v978_v48 = vpop.permute.xlu0 %977 }
 0x1d4   : > { %v1019_v51 = vsel %vm999_vm2, %v976_v47, %v978_v48  ;;  %v1020_v15 = vsel %vm999_vm2, %v978_v48, %v980_v28 }
 0x1d5   : > { %1079 = vst [vmem:[#allocation3 + $0x188] sm:$0xf0] %v1019_v51  ;;  %1080 = vst [vmem:[#allocation3 + $0x190] sm:$0xf0] %v1020_v15  ;;  %1372 = vrot.lane.b32.xlu1 %v9581_v44, %s8692_s28  ;;  %1370 = vrot.lane.b32.xlu0 %v9591_v14, %s8692_s28 }
 0x1d7   : > { %v984_v43 = vpop.permute.xlu1 %983  ;;  %v982_v17 = vpop.permute.xlu0 %981 }
 0x1d8   : > { %v1021_v32 = vsel %vm999_vm2, %v980_v28, %v982_v17  ;;  %v1022_v53 = vsel %vm999_vm2, %v982_v17, %v984_v43  ;;  %v9687_v28 = vld [vmem:[#allocation2 + $0x10] sm:$0xff] }
 0x1d9   : > { %1081 = vst [vmem:[#allocation3 + $0x198] sm:$0xf0] %v1021_v32  ;;  %1082 = vst [vmem:[#allocation3 + $0x1a0] sm:$0xf0] %v1022_v53  ;;  %1376 = vrot.lane.b32.xlu1 %v9593_v40, %s8692_s28  ;;  %1374 = vrot.lane.b32.xlu0 %v9603_v50, %s8692_s28  ;;  %v9693_v17 = vcombine.high %v9687_v28, %v9687_v28 }
 0x1db   : > { %v988_v36 = vpop.permute.xlu1 %987  ;;  %v986_v21 = vpop.permute.xlu0 %985 }
 0x1dc   : > { %v1023_v46 = vsel %vm999_vm2, %v984_v43, %v986_v21  ;;  %v1024_v56 = vsel %vm999_vm2, %v986_v21, %v988_v36 }
 0x1dd   : > { %1083 = vst [vmem:[#allocation3 + $0x1a8] sm:$0xf0] %v1023_v46  ;;  %1084 = vst [vmem:[#allocation3 + $0x1b0] sm:$0xf0] %v1024_v56  ;;  %1380 = vrot.lane.b32.xlu1 %v9605_v29, %s8692_s28  ;;  %1378 = vrot.lane.b32.xlu0 %v9615_v54, %s8692_s28  ;;  %v9703_v46 = vcombine.high %v9521_v57, %v9521_v57 }
 0x1df   : > { %v992_v3 = vpop.permute.xlu1 %991  ;;  %v990_v60 = vpop.permute.xlu0 %989 }
 0x1e0   : > { %v1025_v4 = vsel %vm999_vm2, %v988_v36, %v990_v60  ;;  %v1026_v62 = vsel %vm999_vm2, %v990_v60, %v992_v3 }
 0x1e1   : > { %1085 = vst [vmem:[#allocation3 + $0x1b8] sm:$0xf0] %v1025_v4  ;;  %1086 = vst [vmem:[#allocation3 + $0x1c0] sm:$0xf0] %v1026_v62  ;;  %1384 = vrot.lane.b32.xlu1 %v9617_v9, %s8692_s28  ;;  %1382 = vrot.lane.b32.xlu0 %v9627_v1, %s8692_s28  ;;  %v9713_v62 = vcombine.high %v9533_v6, %v9533_v6 }
 0x1e3   : > { %v996_v5 = vpop.permute.xlu1 %995  ;;  %v994_v63 = vpop.permute.xlu0 %993 }
 0x1e4   : > { %v1027_v0 = vsel %vm999_vm2, %v992_v3, %v994_v63  ;;  %v1028_v30 = vsel %vm999_vm2, %v994_v63, %v996_v5 }
 0x1e5   : > { %1087 = vst [vmem:[#allocation3 + $0x1c8] sm:$0xf0] %v1027_v0  ;;  %1088 = vst [vmem:[#allocation3 + $0x1d0] sm:$0xf0] %v1028_v30  ;;  %1388 = vrot.lane.b32.xlu1 %v9629_v61, %s8692_s28  ;;  %1386 = vrot.lane.b32.xlu0 %v9639_v49, %s8692_s28 }
 0x1e7   : > { %v1138_v52 = vpop.permute.xlu1 %1137  ;;  %v998_v39 = vpop.permute.xlu0 %997 }
 0x1e8   : > { %v1029_v7 = vsel %vm999_vm2, %v996_v5, %v998_v39  ;;  %vm4207_vm2 = vcmask 973824  }
 0x1e9   : > { %1089 = vst [vmem:[#allocation3 + $0x1d8] sm:$0xf0] %v1029_v7  ;;  %1392 = vrot.lane.b32.xlu1 %v9641_v31, %s8692_s28  ;;  %1390 = vrot.lane.b32.xlu0 %v9651_v41, %s8692_s28 }
 0x1eb   : > { %v1142_v34 = vpop.permute.xlu1 %1141  ;;  %v1140_v42 = vpop.permute.xlu0 %1139 }
 0x1ec   : > { %v1200_v8 = vsel %vm1199_vm3, %v1138_v52, %v1140_v42  ;;  %v1201_v45 = vsel %vm1199_vm3, %v1140_v42, %v1142_v34  ;;  %v9723_v52 = vcombine.high %v9545_v16, %v9545_v16 }
 0x1ed   : > { %1260 = vst [vmem:[#allocation3 + $0x1e0] sm:$0xf] %v1200_v8  ;;  %1261 = vst [vmem:[#allocation3 + $0x1e8] sm:$0xf] %v1201_v45  ;;  %1396 = vrot.lane.b32.xlu1 %v9653_v18, %s8692_s28  ;;  %1394 = vrot.lane.b32.xlu0 %v9662_v20, %s8692_s28  ;;  %v9733_v8 = vcombine.high %v9557_v55, %v9557_v55 }
 0x1ef   : > { %v1146_v35 = vpop.permute.xlu1 %1145  ;;  %v1144_v25 = vpop.permute.xlu0 %1143 }
 0x1f0   : > { %v1202_v37 = vsel %vm1199_vm3, %v1142_v34, %v1144_v25  ;;  %v1203_v33 = vsel %vm1199_vm3, %v1144_v25, %v1146_v35 }
 0x1f1   : > { %1262 = vst [vmem:[#allocation3 + $0x1f0] sm:$0xf] %v1202_v37  ;;  %1263 = vst [vmem:[#allocation3 + $0x1f8] sm:$0xf] %v1203_v33  ;;  %1538 = vrot.lane.b32.xlu1 %v9670_v24, %s8693_s16  ;;  %1398 = vrot.lane.b32.xlu0 %v8320_v10, %s8692_s28  ;;  %v9743_v37 = vcombine.high %v9569_v11, %v9569_v11  ;;  %s8709_s28 = smov 101  }
 0x1f3   : > { %v1150_v47 = vpop.permute.xlu1 %1149  ;;  %v1148_v13 = vpop.permute.xlu0 %1147 }
 0x1f4   : > { %v1204_v27 = vsel %vm1199_vm3, %v1146_v35, %v1148_v13  ;;  %v1205_v59 = vsel %vm1199_vm3, %v1148_v13, %v1150_v47 }
 0x1f5   : > { %1264 = vst [vmem:[#allocation3 + $0x200] sm:$0xf] %v1204_v27  ;;  %1265 = vst [vmem:[#allocation3 + $0x208] sm:$0xf] %v1205_v59  ;;  %1542 = vrot.lane.b32.xlu1 %v9094_v19, %s8693_s16  ;;  %1540 = vrot.lane.b32.xlu0 %v9676_v12, %s8693_s16  ;;  %v9753_v59 = vcombine.high %v9581_v44, %v9581_v44 }
 0x1f7   : > { %v1154_v48 = vpop.permute.xlu1 %1153  ;;  %v1152_v51 = vpop.permute.xlu0 %1151 }
 0x1f8   : > { %v1206_v15 = vsel %vm1199_vm3, %v1150_v47, %v1152_v51  ;;  %v1207_v43 = vsel %vm1199_vm3, %v1152_v51, %v1154_v48 }
 0x1f9   : > { %1266 = vst [vmem:[#allocation3 + $0x210] sm:$0xf] %v1206_v15  ;;  %1267 = vst [vmem:[#allocation3 + $0x218] sm:$0xf] %v1207_v43  ;;  %1546 = vrot.lane.b32.xlu1 %v9687_v28, %s8693_s16  ;;  %1544 = vrot.lane.b32.xlu0 %v9106_v22, %s8693_s16 }
 0x1fb   : > { %v1158_v32 = vpop.permute.xlu1 %1157  ;;  %v1156_v53 = vpop.permute.xlu0 %1155 }
 0x1fc   : > { %v1208_v36 = vsel %vm1199_vm3, %v1154_v48, %v1156_v53  ;;  %v1209_v21 = vsel %vm1199_vm3, %v1156_v53, %v1158_v32 }
 0x1fd   : > { %1268 = vst [vmem:[#allocation3 + $0x220] sm:$0xf] %v1208_v36  ;;  %1269 = vst [vmem:[#allocation3 + $0x228] sm:$0xf] %v1209_v21  ;;  %1550 = vrot.lane.b32.xlu1 %v9521_v57, %s8693_s16  ;;  %1548 = vrot.lane.b32.xlu0 %v9693_v17, %s8693_s16 }
 0x1ff   : > { %v1162_v56 = vpop.permute.xlu1 %1161  ;;  %v1160_v3 = vpop.permute.xlu0 %1159 }
 0x200   : > { %v1210_v60 = vsel %vm1199_vm3, %v1158_v32, %v1160_v3  ;;  %v1211_v4 = vsel %vm1199_vm3, %v1160_v3, %v1162_v56  ;;  %v9763_v32 = vcombine.high %v9593_v40, %v9593_v40  ;;  %v9773_v3 = vcombine.high %v9605_v29, %v9605_v29 }
 0x201   : > { %1270 = vst [vmem:[#allocation3 + $0x230] sm:$0xf] %v1210_v60  ;;  %1271 = vst [vmem:[#allocation3 + $0x238] sm:$0xf] %v1211_v4  ;;  %1554 = vrot.lane.b32.xlu1 %v9533_v6, %s8693_s16  ;;  %1552 = vrot.lane.b32.xlu0 %v9703_v46, %s8693_s16 }
 0x203   : > { %v1166_v5 = vpop.permute.xlu1 %1165  ;;  %v1164_v63 = vpop.permute.xlu0 %1163 }
 0x204   : > { %v1212_v0 = vsel %vm1199_vm3, %v1162_v56, %v1164_v63  ;;  %v1213_v30 = vsel %vm1199_vm3, %v1164_v63, %v1166_v5 }
 0x205   : > { %1272 = vst [vmem:[#allocation3 + $0x240] sm:$0xf] %v1212_v0  ;;  %1273 = vst [vmem:[#allocation3 + $0x248] sm:$0xf] %v1213_v30  ;;  %1558 = vrot.lane.b32.xlu1 %v9545_v16, %s8693_s16  ;;  %1556 = vrot.lane.b32.xlu0 %v9713_v62, %s8693_s16  ;;  %v9783_v0 = vcombine.high %v9617_v9, %v9617_v9 }
 0x207   : > { %v1170_v39 = vpop.permute.xlu1 %1169  ;;  %v1168_v7 = vpop.permute.xlu0 %1167 }
 0x208   : > { %v1214_v34 = vsel %vm1199_vm3, %v1166_v5, %v1168_v7  ;;  %v1215_v42 = vsel %vm1199_vm3, %v1168_v7, %v1170_v39 }
 0x209   : > { %1274 = vst [vmem:[#allocation3 + $0x250] sm:$0xf] %v1214_v34  ;;  %1275 = vst [vmem:[#allocation3 + $0x258] sm:$0xf] %v1215_v42  ;;  %1562 = vrot.lane.b32.xlu1 %v9557_v55, %s8693_s16  ;;  %1560 = vrot.lane.b32.xlu0 %v9723_v52, %s8693_s16  ;;  %v9793_v42 = vcombine.high %v9629_v61, %v9629_v61 }
 0x20b   : > { %v1174_v45 = vpop.permute.xlu1 %1173  ;;  %v1172_v10 = vpop.permute.xlu0 %1171 }
 0x20c   : > { %v1216_v35 = vsel %vm1199_vm3, %v1170_v39, %v1172_v10  ;;  %v1217_v25 = vsel %vm1199_vm3, %v1172_v10, %v1174_v45 }
 0x20d   : > { %1276 = vst [vmem:[#allocation3 + $0x260] sm:$0xf] %v1216_v35  ;;  %1277 = vst [vmem:[#allocation3 + $0x268] sm:$0xf] %v1217_v25  ;;  %1566 = vrot.lane.b32.xlu1 %v9569_v11, %s8693_s16  ;;  %1564 = vrot.lane.b32.xlu0 %v9733_v8, %s8693_s16 }
 0x20f   : > { %v1178_v33 = vpop.permute.xlu1 %1177  ;;  %v1176_v47 = vpop.permute.xlu0 %1175 }
 0x210   : > { %v1218_v13 = vsel %vm1199_vm3, %v1174_v45, %v1176_v47  ;;  %v1219_v27 = vsel %vm1199_vm3, %v1176_v47, %v1178_v33 }
 0x211   : > { %1278 = vst [vmem:[#allocation3 + $0x270] sm:$0xf] %v1218_v13  ;;  %1279 = vst [vmem:[#allocation3 + $0x278] sm:$0xf] %v1219_v27  ;;  %1570 = vrot.lane.b32.xlu1 %v9581_v44, %s8693_s16  ;;  %1568 = vrot.lane.b32.xlu0 %v9743_v37, %s8693_s16 }
 0x213   : > { %v1182_v48 = vpop.permute.xlu1 %1181  ;;  %v1180_v51 = vpop.permute.xlu0 %1179 }
 0x214   : > { %v1220_v15 = vsel %vm1199_vm3, %v1178_v33, %v1180_v51  ;;  %v1221_v43 = vsel %vm1199_vm3, %v1180_v51, %v1182_v48  ;;  %v9803_v33 = vcombine.high %v9641_v31, %v9641_v31  ;;  %v1506_v51 = vld [vmem:[#allocation2 + $0x78] sm:$0xf] }
 0x215   : > { %1280 = vst [vmem:[#allocation3 + $0x280] sm:$0xf] %v1220_v15  ;;  %1281 = vst [vmem:[#allocation3 + $0x288] sm:$0xf] %v1221_v43  ;;  %1574 = vrot.lane.b32.xlu1 %v9593_v40, %s8693_s16  ;;  %1572 = vrot.lane.b32.xlu0 %v9753_v59, %s8693_s16 }
 0x217   : > { %v1186_v53 = vpop.permute.xlu1 %1185  ;;  %v1184_v36 = vpop.permute.xlu0 %1183 }
 0x218   : > { %v1222_v21 = vsel %vm1199_vm3, %v1182_v48, %v1184_v36  ;;  %v1223_v56 = vsel %vm1199_vm3, %v1184_v36, %v1186_v53  ;;  %v9812_v48 = vcombine.high %v9653_v18, %v9653_v18 }
 0x219   : > { %1282 = vst [vmem:[#allocation3 + $0x290] sm:$0xf] %v1222_v21  ;;  %1283 = vst [vmem:[#allocation3 + $0x298] sm:$0xf] %v1223_v56  ;;  %1578 = vrot.lane.b32.xlu1 %v9605_v29, %s8693_s16  ;;  %1576 = vrot.lane.b32.xlu0 %v9763_v32, %s8693_s16  ;;  %v1723_v21 = vcombine.low %v9670_v24, %v9670_v24 }
 0x21b   : > { %v1190_v60 = vpop.permute.xlu1 %1189  ;;  %v1188_v4 = vpop.permute.xlu0 %1187 }
 0x21c   : > { %v1224_v5 = vsel %vm1199_vm3, %v1186_v53, %v1188_v4  ;;  %v1225_v63 = vsel %vm1199_vm3, %v1188_v4, %v1190_v60 }
 0x21d   : > { %1284 = vst [vmem:[#allocation3 + $0x2a0] sm:$0xf] %v1224_v5  ;;  %1285 = vst [vmem:[#allocation3 + $0x2a8] sm:$0xf] %v1225_v63  ;;  %1582 = vrot.lane.b32.xlu1 %v9617_v9, %s8693_s16  ;;  %1580 = vrot.lane.b32.xlu0 %v9773_v3, %s8693_s16  ;;  %v1724_v63 = vcombine.low %v9094_v19, %v9094_v19 }
 0x21f   : > { %v1194_v30 = vpop.permute.xlu1 %1193  ;;  %v1192_v39 = vpop.permute.xlu0 %1191 }
 0x220   : > { %v1226_v7 = vsel %vm1199_vm3, %v1190_v60, %v1192_v39  ;;  %v1227_v34 = vsel %vm1199_vm3, %v1192_v39, %v1194_v30 }
 0x221   : > { %1286 = vst [vmem:[#allocation3 + $0x2b0] sm:$0xf] %v1226_v7  ;;  %1287 = vst [vmem:[#allocation3 + $0x2b8] sm:$0xf] %v1227_v34  ;;  %1586 = vrot.lane.b32.xlu1 %v9629_v61, %s8693_s16  ;;  %1584 = vrot.lane.b32.xlu0 %v9783_v0, %s8693_s16 }
 0x223   : > { %v1198_v45 = vpop.permute.xlu1 %1197  ;;  %v1196_v10 = vpop.permute.xlu0 %1195 }
 0x224   : > { %v1228_v35 = vsel %vm1199_vm3, %v1194_v30, %v1196_v10  ;;  %v1229_v25 = vsel %vm1199_vm3, %v1196_v10, %v1198_v45  ;;  %v9839_v45 = vcombine.low %v9687_v28, %v9687_v28  ;;  %vm4407_vm3 = vcmask 965632  }
 0x225   : > { %1288 = vst [vmem:[#allocation3 + $0x2c0] sm:$0xf] %v1228_v35  ;;  %1289 = vst [vmem:[#allocation3 + $0x2c8] sm:$0xf] %v1229_v25  ;;  %1590 = vrot.lane.b32.xlu1 %v9641_v31, %s8693_s16  ;;  %1588 = vrot.lane.b32.xlu0 %v9793_v42, %s8693_s16 }
 0x227   : > { %v1341_v47 = vpop.permute.xlu1 %1340  ;;  %v1339_v13 = vpop.permute.xlu0 %1338 }
 0x228   : > { %v1401_v27 = vsel %vm1400_vm4, %v1339_v13, %v1341_v47 }
 0x229   : > { %1461 = vst [vmem:[#allocation3 + $0x1e0] sm:$0xf0] %v1401_v27  ;;  %1594 = vrot.lane.b32.xlu1 %v9653_v18, %s8693_s16  ;;  %1592 = vrot.lane.b32.xlu0 %v9803_v33, %s8693_s16 }
 0x22b   : > { %v1345_v15 = vpop.permute.xlu1 %1344  ;;  %v1343_v43 = vpop.permute.xlu0 %1342 }
 0x22c   : > { %v1402_v53 = vsel %vm1400_vm4, %v1341_v47, %v1343_v43  ;;  %v1403_v36 = vsel %vm1400_vm4, %v1343_v43, %v1345_v15 }
 0x22d   : > { %1462 = vst [vmem:[#allocation3 + $0x1e8] sm:$0xf0] %v1402_v53  ;;  %1463 = vst [vmem:[#allocation3 + $0x1f0] sm:$0xf0] %v1403_v36  ;;  %1598 = vrot.lane.b32.xlu1 %v1506_v51, %s8693_s16  ;;  %1596 = vrot.lane.b32.xlu0 %v9812_v48, %s8693_s16  ;;  %s8710_s16 = smov 100  }
 0x22f   : > { %v1349_v56 = vpop.permute.xlu1 %1348  ;;  %v1347_v60 = vpop.permute.xlu0 %1346 }
 0x230   : > { %v1404_v4 = vsel %vm1400_vm4, %v1345_v15, %v1347_v60  ;;  %v1405_v5 = vsel %vm1400_vm4, %v1347_v60, %v1349_v56 }
 0x231   : > { %1464 = vst [vmem:[#allocation3 + $0x1f8] sm:$0xf0] %v1404_v4  ;;  %1465 = vst [vmem:[#allocation3 + $0x200] sm:$0xf0] %v1405_v5  ;;  %1741 = vrot.lane.b32.xlu1 %v9670_v24, %s8694_s10  ;;  %1739 = vrot.lane.b32.xlu0 %v1723_v21, %s8694_s10 }
 0x233   : > { %v1353_v30 = vpop.permute.xlu1 %1352  ;;  %v1351_v39 = vpop.permute.xlu0 %1350 }
 0x234   : > { %v1406_v7 = vsel %vm1400_vm4, %v1349_v56, %v1351_v39  ;;  %v1407_v34 = vsel %vm1400_vm4, %v1351_v39, %v1353_v30 }
 0x235   : > { %1466 = vst [vmem:[#allocation3 + $0x208] sm:$0xf0] %v1406_v7  ;;  %1467 = vst [vmem:[#allocation3 + $0x210] sm:$0xf0] %v1407_v34  ;;  %1745 = vrot.lane.b32.xlu1 %v9094_v19, %s8694_s10  ;;  %1743 = vrot.lane.b32.xlu0 %v1724_v63, %s8694_s10 }
 0x237   : > { %v1357_v10 = vpop.permute.xlu1 %1356  ;;  %v1355_v35 = vpop.permute.xlu0 %1354 }
 0x238   : > { %v1408_v25 = vsel %vm1400_vm4, %v1353_v30, %v1355_v35  ;;  %v1409_v47 = vsel %vm1400_vm4, %v1355_v35, %v1357_v10 }
 0x239   : > { %1468 = vst [vmem:[#allocation3 + $0x218] sm:$0xf0] %v1408_v25  ;;  %1469 = vst [vmem:[#allocation3 + $0x220] sm:$0xf0] %v1409_v47  ;;  %1749 = vrot.lane.b32.xlu1 %v9687_v28, %s8694_s10  ;;  %1747 = vrot.lane.b32.xlu0 %v9839_v45, %s8694_s10 }
 0x23b   : > { %v1361_v13 = vpop.permute.xlu1 %1360  ;;  %v1359_v27 = vpop.permute.xlu0 %1358 }
 0x23c   : > { %v1410_v51 = vsel %vm1400_vm4, %v1357_v10, %v1359_v27  ;;  %v1411_v15 = vsel %vm1400_vm4, %v1359_v27, %v1361_v13 }
 0x23d   : > { %1470 = vst [vmem:[#allocation3 + $0x228] sm:$0xf0] %v1410_v51  ;;  %1471 = vst [vmem:[#allocation3 + $0x230] sm:$0xf0] %v1411_v15  ;;  %1753 = vrot.lane.b32.xlu1 %v9521_v57, %s8694_s10  ;;  %1751 = vrot.lane.b32.xlu0 %v9531_v38, %s8694_s10 }
 0x23f   : > { %v1365_v43 = vpop.permute.xlu1 %1364  ;;  %v1363_v53 = vpop.permute.xlu0 %1362 }
 0x240   : > { %v1412_v36 = vsel %vm1400_vm4, %v1361_v13, %v1363_v53  ;;  %v1413_v21 = vsel %vm1400_vm4, %v1363_v53, %v1365_v43 }
 0x241   : > { %1472 = vst [vmem:[#allocation3 + $0x238] sm:$0xf0] %v1412_v36  ;;  %1473 = vst [vmem:[#allocation3 + $0x240] sm:$0xf0] %v1413_v21  ;;  %1757 = vrot.lane.b32.xlu1 %v9533_v6, %s8694_s10  ;;  %1755 = vrot.lane.b32.xlu0 %v9543_v2, %s8694_s10 }
 0x243   : > { %v1369_v56 = vpop.permute.xlu1 %1368  ;;  %v1367_v60 = vpop.permute.xlu0 %1366 }
 0x244   : > { %v1414_v4 = vsel %vm1400_vm4, %v1365_v43, %v1367_v60  ;;  %v1415_v38 = vsel %vm1400_vm4, %v1367_v60, %v1369_v56 }
 0x245   : > { %1474 = vst [vmem:[#allocation3 + $0x248] sm:$0xf0] %v1414_v4  ;;  %1475 = vst [vmem:[#allocation3 + $0x250] sm:$0xf0] %v1415_v38  ;;  %1761 = vrot.lane.b32.xlu1 %v9545_v16, %s8694_s10  ;;  %1759 = vrot.lane.b32.xlu0 %v9555_v23, %s8694_s10  ;;  %v393_v4 = vld [vmem:[%s8993_s29 + $0x8] sm:$0xff] }
 0x246   : > { %396 = vst [vmem:[#allocation2 + $0x80] sm:$0xff] %v393_v4 }
 0x247   : > { %v1373_v5 = vpop.permute.xlu1 %1372  ;;  %v1371_v63 = vpop.permute.xlu0 %1370 }
 0x248   : > { %v1416_v30 = vsel %vm1400_vm4, %v1369_v56, %v1371_v63  ;;  %v1417_v2 = vsel %vm1400_vm4, %v1371_v63, %v1373_v5 }
 0x249   : > { %1476 = vst [vmem:[#allocation3 + $0x258] sm:$0xf0] %v1416_v30  ;;  %1477 = vst [vmem:[#allocation3 + $0x260] sm:$0xf0] %v1417_v2  ;;  %1765 = vrot.lane.b32.xlu1 %v9557_v55, %s8694_s10  ;;  %1763 = vrot.lane.b32.xlu0 %v9567_v58, %s8694_s10 }
 0x24b   : > { %v1377_v39 = vpop.permute.xlu1 %1376  ;;  %v1375_v7 = vpop.permute.xlu0 %1374 }
 0x24c   : > { %v1418_v34 = vsel %vm1400_vm4, %v1373_v5, %v1375_v7  ;;  %v1419_v23 = vsel %vm1400_vm4, %v1375_v7, %v1377_v39 }
 0x24d   : > { %1478 = vst [vmem:[#allocation3 + $0x268] sm:$0xf0] %v1418_v34  ;;  %1479 = vst [vmem:[#allocation3 + $0x270] sm:$0xf0] %v1419_v23  ;;  %1769 = vrot.lane.b32.xlu1 %v9569_v11, %s8694_s10  ;;  %1767 = vrot.lane.b32.xlu0 %v9579_v26, %s8694_s10 }
 0x24f   : > { %v1381_v10 = vpop.permute.xlu1 %1380  ;;  %v1379_v35 = vpop.permute.xlu0 %1378 }
 0x250   : > { %v1420_v25 = vsel %vm1400_vm4, %v1377_v39, %v1379_v35  ;;  %v1421_v58 = vsel %vm1400_vm4, %v1379_v35, %v1381_v10 }
 0x251   : > { %1480 = vst [vmem:[#allocation3 + $0x278] sm:$0xf0] %v1420_v25  ;;  %1481 = vst [vmem:[#allocation3 + $0x280] sm:$0xf0] %v1421_v58  ;;  %1773 = vrot.lane.b32.xlu1 %v9581_v44, %s8694_s10  ;;  %1771 = vrot.lane.b32.xlu0 %v9591_v14, %s8694_s10 }
 0x253   : > { %v1385_v47 = vpop.permute.xlu1 %1384  ;;  %v1383_v13 = vpop.permute.xlu0 %1382 }
 0x254   : > { %v1422_v27 = vsel %vm1400_vm4, %v1381_v10, %v1383_v13  ;;  %v1423_v26 = vsel %vm1400_vm4, %v1383_v13, %v1385_v47 }
 0x255   : > { %1482 = vst [vmem:[#allocation3 + $0x288] sm:$0xf0] %v1422_v27  ;;  %1483 = vst [vmem:[#allocation3 + $0x290] sm:$0xf0] %v1423_v26  ;;  %1777 = vrot.lane.b32.xlu1 %v9593_v40, %s8694_s10  ;;  %1775 = vrot.lane.b32.xlu0 %v9603_v50, %s8694_s10 }
 0x257   : > { %v1389_v51 = vpop.permute.xlu1 %1388  ;;  %v1387_v15 = vpop.permute.xlu0 %1386 }
 0x258   : > { %v1424_v43 = vsel %vm1400_vm4, %v1385_v47, %v1387_v15  ;;  %v1425_v14 = vsel %vm1400_vm4, %v1387_v15, %v1389_v51 }
 0x259   : > { %1484 = vst [vmem:[#allocation3 + $0x298] sm:$0xf0] %v1424_v43  ;;  %1485 = vst [vmem:[#allocation3 + $0x2a0] sm:$0xf0] %v1425_v14  ;;  %1781 = vrot.lane.b32.xlu1 %v9605_v29, %s8694_s10  ;;  %1779 = vrot.lane.b32.xlu0 %v9615_v54, %s8694_s10 }
 0x25b   : > { %v1393_v53 = vpop.permute.xlu1 %1392  ;;  %v1391_v36 = vpop.permute.xlu0 %1390 }
 0x25c   : > { %v1426_v21 = vsel %vm1400_vm4, %v1389_v51, %v1391_v36  ;;  %v1427_v50 = vsel %vm1400_vm4, %v1391_v36, %v1393_v53 }
 0x25d   : > { %1486 = vst [vmem:[#allocation3 + $0x2a8] sm:$0xf0] %v1426_v21  ;;  %1487 = vst [vmem:[#allocation3 + $0x2b0] sm:$0xf0] %v1427_v50  ;;  %1785 = vrot.lane.b32.xlu1 %v9617_v9, %s8694_s10  ;;  %1783 = vrot.lane.b32.xlu0 %v9627_v1, %s8694_s10 }
 0x25f   : > { %v1397_v56 = vpop.permute.xlu1 %1396  ;;  %v1395_v60 = vpop.permute.xlu0 %1394 }
 0x260   : > { %v1428_v38 = vsel %vm1400_vm4, %v1393_v53, %v1395_v60  ;;  %v1429_v54 = vsel %vm1400_vm4, %v1395_v60, %v1397_v56 }
 0x261   : > { %1488 = vst [vmem:[#allocation3 + $0x2b8] sm:$0xf0] %v1428_v38  ;;  %1489 = vst [vmem:[#allocation3 + $0x2c0] sm:$0xf0] %v1429_v54  ;;  %1789 = vrot.lane.b32.xlu1 %v9629_v61, %s8694_s10  ;;  %1787 = vrot.lane.b32.xlu0 %v9639_v49, %s8694_s10  ;;  %v8337_v49 = vld [vmem:[#allocation2 + $0x78] ss:$0 sps:$4 sm:$0xff]  }
 0x263   : > { %v1539_v5 = vpop.permute.xlu1 %1538  ;;  %v1399_v63 = vpop.permute.xlu0 %1398 }
 0x264   : > { %v1430_v1 = vsel %vm1400_vm4, %v1397_v56, %v1399_v63  ;;  %vm4608_vm4 = vcmask 834560  }
 0x265   : > { %1490 = vst [vmem:[#allocation3 + $0x2c8] sm:$0xf0] %v1430_v1  ;;  %1793 = vrot.lane.b32.xlu1 %v9641_v31, %s8694_s10  ;;  %1791 = vrot.lane.b32.xlu0 %v9651_v41, %s8694_s10 }
 0x267   : > { %v1543_v30 = vpop.permute.xlu1 %1542  ;;  %v1541_v2 = vpop.permute.xlu0 %1540 }
 0x268   : > { %v1601_v39 = vsel %vm1600_vm5, %v1539_v5, %v1541_v2  ;;  %v1602_v7 = vsel %vm1600_vm5, %v1541_v2, %v1543_v30 }
 0x269   : > { %1661 = vst [vmem:[#allocation3 + $0x2d0] sm:$0xf] %v1601_v39  ;;  %1662 = vst [vmem:[#allocation3 + $0x2d8] sm:$0xf] %v1602_v7  ;;  %1797 = vrot.lane.b32.xlu1 %v9653_v18, %s8694_s10  ;;  %1795 = vrot.lane.b32.xlu0 %v9662_v20, %s8694_s10 }
 0x26b   : > { %v1547_v34 = vpop.permute.xlu1 %1546  ;;  %v1545_v23 = vpop.permute.xlu0 %1544 }
 0x26c   : > { %v1603_v41 = vsel %vm1600_vm5, %v1543_v30, %v1545_v23  ;;  %v1604_v10 = vsel %vm1600_vm5, %v1545_v23, %v1547_v34 }
 0x26d   : > { %1663 = vst [vmem:[#allocation3 + $0x2e0] sm:$0xf] %v1603_v41  ;;  %1664 = vst [vmem:[#allocation3 + $0x2e8] sm:$0xf] %v1604_v10  ;;  %1939 = vrot.lane.b32.xlu1 %v9670_v24, %s8695_s26  ;;  %1799 = vrot.lane.b32.xlu0 %v8337_v49, %s8694_s10  ;;  %v10007_v10 = vld [vmem:[#allocation2 + $0x8] sm:$0xff]  ;;  %s8711_s10 = smov 84  }
 0x26f   : > { %v1551_v35 = vpop.permute.xlu1 %1550  ;;  %v1549_v25 = vpop.permute.xlu0 %1548 }
 0x270   : > { %v1605_v58 = vsel %vm1600_vm5, %v1547_v34, %v1549_v25  ;;  %v1606_v20 = vsel %vm1600_vm5, %v1549_v25, %v1551_v35 }
 0x271   : > { %1665 = vst [vmem:[#allocation3 + $0x2f0] sm:$0xf] %v1605_v58  ;;  %1666 = vst [vmem:[#allocation3 + $0x2f8] sm:$0xf] %v1606_v20  ;;  %1943 = vrot.lane.b32.xlu1 %v9094_v19, %s8695_s26  ;;  %1941 = vrot.lane.b32.xlu0 %v9676_v12, %s8695_s26 }
 0x273   : > { %v1555_v47 = vpop.permute.xlu1 %1554  ;;  %v1553_v13 = vpop.permute.xlu0 %1552 }
 0x274   : > { %v1607_v24 = vsel %vm1600_vm5, %v1551_v35, %v1553_v13  ;;  %v1608_v27 = vsel %vm1600_vm5, %v1553_v13, %v1555_v47 }
 0x275   : > { %1667 = vst [vmem:[#allocation3 + $0x300] sm:$0xf] %v1607_v24  ;;  %1668 = vst [vmem:[#allocation3 + $0x308] sm:$0xf] %v1608_v27  ;;  %1947 = vrot.lane.b32.xlu1 %v9687_v28, %s8695_s26  ;;  %1945 = vrot.lane.b32.xlu0 %v9106_v22, %s8695_s26 }
 0x277   : > { %v1559_v26 = vpop.permute.xlu1 %1558  ;;  %v1557_v51 = vpop.permute.xlu0 %1556 }
 0x278   : > { %v1609_v19 = vsel %vm1600_vm5, %v1555_v47, %v1557_v51  ;;  %v1610_v12 = vsel %vm1600_vm5, %v1557_v51, %v1559_v26 }
 0x279   : > { %1669 = vst [vmem:[#allocation3 + $0x310] sm:$0xf] %v1609_v19  ;;  %1670 = vst [vmem:[#allocation3 + $0x318] sm:$0xf] %v1610_v12  ;;  %1951 = vrot.lane.b32.xlu1 %v9521_v57, %s8695_s26  ;;  %1949 = vrot.lane.b32.xlu0 %v9693_v17, %s8695_s26  ;;  %v5793_v19 = vld [vmem:[#allocation3 + $0x1e8] sm:$0xff] }
 0x27b   : > { %v1563_v15 = vpop.permute.xlu1 %1562  ;;  %v1561_v43 = vpop.permute.xlu0 %1560 }
 0x27c   : > { %v1611_v14 = vsel %vm1600_vm5, %v1559_v26, %v1561_v43  ;;  %v1612_v22 = vsel %vm1600_vm5, %v1561_v43, %v1563_v15  ;;  %v5792_v43 = vld [vmem:[#allocation3 + $0x1e0] sm:$0xff] }
 0x27d   : > { %1671 = vst [vmem:[#allocation3 + $0x320] sm:$0xf] %v1611_v14  ;;  %1672 = vst [vmem:[#allocation3 + $0x328] sm:$0xf] %v1612_v22  ;;  %1955 = vrot.lane.b32.xlu1 %v9533_v6, %s8695_s26  ;;  %1953 = vrot.lane.b32.xlu0 %v9703_v46, %s8695_s26 }
 0x27f   : > { %v1567_v53 = vpop.permute.xlu1 %1566  ;;  %v1565_v36 = vpop.permute.xlu0 %1564 }
 0x280   : > { %v1613_v57 = vsel %vm1600_vm5, %v1563_v15, %v1565_v36  ;;  %v1614_v17 = vsel %vm1600_vm5, %v1565_v36, %v1567_v53 }
 0x281   : > { %1673 = vst [vmem:[#allocation3 + $0x330] sm:$0xf] %v1613_v57  ;;  %1674 = vst [vmem:[#allocation3 + $0x338] sm:$0xf] %v1614_v17  ;;  %1959 = vrot.lane.b32.xlu1 %v9545_v16, %s8695_s26  ;;  %1957 = vrot.lane.b32.xlu0 %v9713_v62, %s8695_s26 }
 0x283   : > { %v1571_v21 = vpop.permute.xlu1 %1570  ;;  %v1569_v50 = vpop.permute.xlu0 %1568 }
 0x284   : > { %v1615_v6 = vsel %vm1600_vm5, %v1567_v53, %v1569_v50  ;;  %v1616_v46 = vsel %vm1600_vm5, %v1569_v50, %v1571_v21  ;;  %v10036_v53 = vld [vmem:[#allocation2 + $0x20] sm:$0xff]  ;;  %v5795_v50 = vld [vmem:[#allocation3 + $0x1f8] sm:$0xff] }
 0x285   : > { %1675 = vst [vmem:[#allocation3 + $0x340] sm:$0xf] %v1615_v6  ;;  %1676 = vst [vmem:[#allocation3 + $0x348] sm:$0xf] %v1616_v46  ;;  %1963 = vrot.lane.b32.xlu1 %v9557_v55, %s8695_s26  ;;  %1961 = vrot.lane.b32.xlu0 %v9723_v52, %s8695_s26  ;;  %v5794_v46 = vld [vmem:[#allocation3 + $0x1f0] sm:$0xff] }
 0x287   : > { %v1575_v56 = vpop.permute.xlu1 %1574  ;;  %v1573_v60 = vpop.permute.xlu0 %1572 }
 0x288   : > { %v1617_v16 = vsel %vm1600_vm5, %v1571_v21, %v1573_v60  ;;  %v1618_v62 = vsel %vm1600_vm5, %v1573_v60, %v1575_v56 }
 0x289   : > { %1677 = vst [vmem:[#allocation3 + $0x350] sm:$0xf] %v1617_v16  ;;  %1678 = vst [vmem:[#allocation3 + $0x358] sm:$0xf] %v1618_v62  ;;  %1967 = vrot.lane.b32.xlu1 %v9569_v11, %s8695_s26  ;;  %1965 = vrot.lane.b32.xlu0 %v9733_v8, %s8695_s26  ;;  %v10048_v16 = vld [vmem:[#allocation2 + $0x28] sm:$0xff] }
 0x28b   : > { %v1579_v4 = vpop.permute.xlu1 %1578  ;;  %v1577_v38 = vpop.permute.xlu0 %1576 }
 0x28c   : > { %v1619_v55 = vsel %vm1600_vm5, %v1575_v56, %v1577_v38  ;;  %v1620_v52 = vsel %vm1600_vm5, %v1577_v38, %v1579_v4  ;;  %v10046_v56 = vcombine.low %v10036_v53, %v10036_v53 }
 0x28d   : > { %1679 = vst [vmem:[#allocation3 + $0x360] sm:$0xf] %v1619_v55  ;;  %1680 = vst [vmem:[#allocation3 + $0x368] sm:$0xf] %v1620_v52  ;;  %1971 = vrot.lane.b32.xlu1 %v9581_v44, %s8695_s26  ;;  %1969 = vrot.lane.b32.xlu0 %v9743_v37, %s8695_s26  ;;  %v10058_v52 = vcombine.low %v10048_v16, %v10048_v16 }
 0x28f   : > { %v1583_v54 = vpop.permute.xlu1 %1582  ;;  %v1581_v5 = vpop.permute.xlu0 %1580 }
 0x290   : > { %v1621_v11 = vsel %vm1600_vm5, %v1579_v4, %v1581_v5  ;;  %v1622_v8 = vsel %vm1600_vm5, %v1581_v5, %v1583_v54 }
 0x291   : > { %1681 = vst [vmem:[#allocation3 + $0x370] sm:$0xf] %v1621_v11  ;;  %1682 = vst [vmem:[#allocation3 + $0x378] sm:$0xf] %v1622_v8  ;;  %1975 = vrot.lane.b32.xlu1 %v9593_v40, %s8695_s26  ;;  %1973 = vrot.lane.b32.xlu0 %v9753_v59, %s8695_s26 }
 0x293   : > { %v1587_v63 = vpop.permute.xlu1 %1586  ;;  %v1585_v1 = vpop.permute.xlu0 %1584 }
 0x294   : > { %v1623_v44 = vsel %vm1600_vm5, %v1583_v54, %v1585_v1  ;;  %v1624_v37 = vsel %vm1600_vm5, %v1585_v1, %v1587_v63  ;;  %v10060_v54 = vld [vmem:[#allocation2 + $0x30] sm:$0xff] }
 0x295   : > { %1683 = vst [vmem:[#allocation3 + $0x380] sm:$0xf] %v1623_v44  ;;  %1684 = vst [vmem:[#allocation3 + $0x388] sm:$0xf] %v1624_v37  ;;  %1979 = vrot.lane.b32.xlu1 %v9605_v29, %s8695_s26  ;;  %1977 = vrot.lane.b32.xlu0 %v9763_v32, %s8695_s26  ;;  %v10070_v1 = vcombine.low %v10060_v54, %v10060_v54  ;;  %v10072_v44 = vld [vmem:[#allocation2 + $0x38] sm:$0xff] }
 0x297   : > { %v1591_v30 = vpop.permute.xlu1 %1590  ;;  %v1589_v2 = vpop.permute.xlu0 %1588 }
 0x298   : > { %v1625_v40 = vsel %vm1600_vm5, %v1587_v63, %v1589_v2  ;;  %v1626_v59 = vsel %vm1600_vm5, %v1589_v2, %v1591_v30 }
 0x299   : > { %1685 = vst [vmem:[#allocation3 + $0x390] sm:$0xf] %v1625_v40  ;;  %1686 = vst [vmem:[#allocation3 + $0x398] sm:$0xf] %v1626_v59  ;;  %1983 = vrot.lane.b32.xlu1 %v9617_v9, %s8695_s26  ;;  %1981 = vrot.lane.b32.xlu0 %v9773_v3, %s8695_s26  ;;  %v10082_v59 = vcombine.low %v10072_v44, %v10072_v44 }
 0x29b   : > { %v1595_v39 = vpop.permute.xlu1 %1594  ;;  %v1593_v7 = vpop.permute.xlu0 %1592 }
 0x29c   : > { %v1627_v29 = vsel %vm1600_vm5, %v1591_v30, %v1593_v7  ;;  %v1628_v32 = vsel %vm1600_vm5, %v1593_v7, %v1595_v39 }
 0x29d   : > { %1687 = vst [vmem:[#allocation3 + $0x3a0] sm:$0xf] %v1627_v29  ;;  %1688 = vst [vmem:[#allocation3 + $0x3a8] sm:$0xf] %v1628_v32  ;;  %1987 = vrot.lane.b32.xlu1 %v9629_v61, %s8695_s26  ;;  %1985 = vrot.lane.b32.xlu0 %v9783_v0, %s8695_s26  ;;  %v1907_v0 = vld [vmem:[#allocation2 + $0x78] sm:$0xf] }
 0x29f   : > { %v1599_v49 = vpop.permute.xlu1 %1598  ;;  %v1597_v34 = vpop.permute.xlu0 %1596 }
 0x2a0   : > { %v1629_v9 = vsel %vm1600_vm5, %v1595_v39, %v1597_v34  ;;  %v1630_v3 = vsel %vm1600_vm5, %v1597_v34, %v1599_v49  ;;  %v10084_v39 = vld [vmem:[#allocation2 + $0x40] sm:$0xff]  ;;  %vm4808_vm5 = vcmask 826368  }
 0x2a1   : > { %1689 = vst [vmem:[#allocation3 + $0x3b0] sm:$0xf] %v1629_v9  ;;  %1690 = vst [vmem:[#allocation3 + $0x3b8] sm:$0xf] %v1630_v3  ;;  %1991 = vrot.lane.b32.xlu1 %v9641_v31, %s8695_s26  ;;  %1989 = vrot.lane.b32.xlu0 %v9793_v42, %s8695_s26  ;;  %v10094_v34 = vcombine.low %v10084_v39, %v10084_v39  ;;  %v10096_v9 = vld [vmem:[#allocation2 + $0x48] sm:$0xff] }
 0x2a3   : > { %v1742_v23 = vpop.permute.xlu1 %1741  ;;  %v1740_v61 = vpop.permute.xlu0 %1739 }
 0x2a4   : > { %v1802_v41 = vsel %vm1801_vm6, %v1740_v61, %v1742_v23 }
 0x2a5   : > { %1862 = vst [vmem:[#allocation3 + $0x2d0] sm:$0xf0] %v1802_v41  ;;  %1995 = vrot.lane.b32.xlu1 %v9653_v18, %s8695_s26  ;;  %1993 = vrot.lane.b32.xlu0 %v9803_v33, %s8695_s26  ;;  %v10016_v18 = vcombine.low %v10007_v10, %v10007_v10 }
 0x2a7   : > { %v1746_v35 = vpop.permute.xlu1 %1745  ;;  %v1744_v31 = vpop.permute.xlu0 %1743 }
 0x2a8   : > { %v1803_v25 = vsel %vm1801_vm6, %v1742_v23, %v1744_v31  ;;  %v1804_v42 = vsel %vm1801_vm6, %v1744_v31, %v1746_v35 }
 0x2a9   : > { %1863 = vst [vmem:[#allocation3 + $0x2d8] sm:$0xf0] %v1803_v25  ;;  %1864 = vst [vmem:[#allocation3 + $0x2e0] sm:$0xf0] %v1804_v42  ;;  %1999 = vrot.lane.b32.xlu1 %v1907_v0, %s8695_s26  ;;  %1997 = vrot.lane.b32.xlu0 %v9812_v48, %s8695_s26  ;;  %v10024_v48 = vld [vmem:[#allocation2 + $0x18] sm:$0xff]  ;;  %v10106_v0 = vcombine.low %v10096_v9, %v10096_v9  ;;  %s8713_s26 = smov 83  }
 0x2aa   : > { %v10034_v14 = vcombine.low %v10024_v48, %v10024_v48 }
 0x2ab   : > { %v1750_v33 = vpop.permute.xlu1 %1749  ;;  %v1748_v58 = vpop.permute.xlu0 %1747 }
 0x2ac   : > { %v1805_v20 = vsel %vm1801_vm6, %v1746_v35, %v1748_v58  ;;  %v1806_v47 = vsel %vm1801_vm6, %v1748_v58, %v1750_v33  ;;  %v5822_v27 = vld [vmem:[#allocation3 + $0x2d0] sm:$0xff]  ;;  %v10108_v35 = vld [vmem:[#allocation2 + $0x50] sm:$0xff] }
 0x2ad   : > { %1865 = vst [vmem:[#allocation3 + $0x2e8] sm:$0xf0] %v1805_v20  ;;  %1866 = vst [vmem:[#allocation3 + $0x2f0] sm:$0xf0] %v1806_v47  ;;  %2142 = vrot.lane.b32.xlu1 %v10007_v10, %s8696_s9  ;;  %2140 = vrot.lane.b32.xlu0 %v10016_v18, %s8696_s9  ;;  %v7747_v22 = vpack.c.bf16 %v5822_v27, %v5792_v43  ;;  %v10118_v58 = vcombine.low %v10108_v35, %v10108_v35  ;;  %v10120_v20 = vld [vmem:[#allocation2 + $0x58] sm:$0xff] }
 0x2af   : > { %v1754_v13 = vpop.permute.xlu1 %1753  ;;  %v1752_v24 = vpop.permute.xlu0 %1751 }
 0x2b0   : > { %v1807_v26 = vsel %vm1801_vm6, %v1750_v33, %v1752_v24  ;;  %v1808_v51 = vsel %vm1801_vm6, %v1752_v24, %v1754_v13  ;;  %v5823_v12 = vld [vmem:[#allocation3 + $0x2d8] sm:$0xff]  ;;  %v5824_v17 = vld [vmem:[#allocation3 + $0x2e0] sm:$0xff] }
 0x2b1   : > { %1867 = vst [vmem:[#allocation3 + $0x2f8] sm:$0xf0] %v1807_v26  ;;  %1868 = vst [vmem:[#allocation3 + $0x300] sm:$0xf0] %v1808_v51  ;;  %2146 = vrot.lane.b32.xlu1 %v9687_v28, %s8696_s9  ;;  %2144 = vrot.lane.b32.xlu0 %v9839_v45, %s8696_s9  ;;  %v7745_v15 = vpack.c.bf16 %v5823_v12, %v5793_v19  ;;  %v7775_v60 = vpack.c.bf16 %v5824_v17, %v5794_v46  ;;  %v10132_v51 = vld [vmem:[#allocation2 + $0x60] sm:$0xff] }
 0x2b2   : > { %v10130_v26 = vcombine.low %v10120_v20, %v10120_v20 }
 0x2b3   : > { %v1758_v36 = vpop.permute.xlu1 %1757  ;;  %v1756_v57 = vpop.permute.xlu0 %1755  ;;  %7746 = vmatprep.subr.bf16.mxu0 %v7745_v15 }
 0x2b4   : > { %v1809_v21 = vsel %vm1801_vm6, %v1754_v13, %v1756_v57  ;;  %v1810_v28 = vsel %vm1801_vm6, %v1756_v57, %v1758_v36  ;;  %7748 = vmatpush1.bf16.msra.mxu0 %v7747_v22  ;;  %v5825_v45 = vld [vmem:[#allocation3 + $0x2e8] sm:$0xff]  ;;  %v10142_v22 = vcombine.low %v10132_v51, %v10132_v51 }
 0x2b5   : > { %1869 = vst [vmem:[#allocation3 + $0x308] sm:$0xf0] %v1809_v21  ;;  %1870 = vst [vmem:[#allocation3 + $0x310] sm:$0xf0] %v1810_v28  ;;  %2150 = vrot.lane.b32.xlu1 %v10024_v48, %s8696_s9  ;;  %2148 = vrot.lane.b32.xlu0 %v10034_v14, %s8696_s9  ;;  %v7773_v6 = vpack.c.bf16 %v5825_v45, %v5795_v50  ;;  %v10156_v45 = vld [vmem:[#allocation2 + $0x70] sm:$0xff] }
 0x2b7   : > { %v1762_v62 = vpop.permute.xlu1 %1761  ;;  %7774 = vmatprep.subr.bf16.mxu1 %v7773_v6  ;;  %v1760_v4 = vpop.permute.xlu0 %1759 }
 0x2b8   : > { %v1811_v38 = vsel %vm1801_vm6, %v1758_v36, %v1760_v4  ;;  %v1812_v55 = vsel %vm1801_vm6, %v1760_v4, %v1762_v62  ;;  %7776 = vmatpush1.bf16.msra.mxu1 %v7775_v60  ;;  %v10144_v36 = vld [vmem:[#allocation2 + $0x68] sm:$0xff]  ;;  %v10166_v4 = vcombine.low %v10156_v45, %v10156_v45 }
 0x2b9   : > { %1871 = vst [vmem:[#allocation3 + $0x318] sm:$0xf0] %v1811_v38  ;;  %1872 = vst [vmem:[#allocation3 + $0x320] sm:$0xf0] %v1812_v55  ;;  %2154 = vrot.lane.b32.xlu1 %v10036_v53, %s8696_s9  ;;  %2152 = vrot.lane.b32.xlu0 %v10046_v56, %s8696_s9  ;;  %v10154_v50 = vcombine.low %v10144_v36, %v10144_v36  ;;  %v10168_v38 = vld [vmem:[#allocation2 + $0x78] sm:$0xff] }
 0x2bb   : > { %v1766_v5 = vpop.permute.xlu1 %1765  ;;  %v1764_v11 = vpop.permute.xlu0 %1763 }
 0x2bc   : > { %v1813_v8 = vsel %vm1801_vm6, %v1762_v62, %v1764_v11  ;;  %v1814_v63 = vsel %vm1801_vm6, %v1764_v11, %v1766_v5 }
 0x2bd   : > { %1873 = vst [vmem:[#allocation3 + $0x328] sm:$0xf0] %v1813_v8  ;;  %1874 = vst [vmem:[#allocation3 + $0x330] sm:$0xf0] %v1814_v63  ;;  %2158 = vrot.lane.b32.xlu1 %v10048_v16, %s8696_s9  ;;  %2156 = vrot.lane.b32.xlu0 %v10058_v52, %s8696_s9  ;;  %v10177_v8 = vcombine.low %v10168_v38, %v10168_v38 }
 0x2bf   : > { %v1770_v37 = vpop.permute.xlu1 %1769  ;;  %v1768_v30 = vpop.permute.xlu0 %1767 }
 0x2c0   : > { %v1815_v2 = vsel %vm1801_vm6, %v1766_v5, %v1768_v30  ;;  %v1816_v40 = vsel %vm1801_vm6, %v1768_v30, %v1770_v37 }
 0x2c1   : > { %1875 = vst [vmem:[#allocation3 + $0x338] sm:$0xf0] %v1815_v2  ;;  %1876 = vst [vmem:[#allocation3 + $0x340] sm:$0xf0] %v1816_v40  ;;  %2162 = vrot.lane.b32.xlu1 %v10060_v54, %s8696_s9  ;;  %2160 = vrot.lane.b32.xlu0 %v10070_v1, %s8696_s9  ;;  %v8353_v40 = vld [vmem:[#allocation2 + $0x80] ss:$0 sps:$4 sm:$0xff]  }
 0x2c3   : > { %v1774_v7 = vpop.permute.xlu1 %1773  ;;  %v1772_v29 = vpop.permute.xlu0 %1771 }
 0x2c4   : > { %v1817_v32 = vsel %vm1801_vm6, %v1770_v37, %v1772_v29  ;;  %v1818_v49 = vsel %vm1801_vm6, %v1772_v29, %v1774_v7 }
 0x2c5   : > { %1877 = vst [vmem:[#allocation3 + $0x348] sm:$0xf0] %v1817_v32  ;;  %1878 = vst [vmem:[#allocation3 + $0x350] sm:$0xf0] %v1818_v49  ;;  %2166 = vrot.lane.b32.xlu1 %v10072_v44, %s8696_s9  ;;  %2164 = vrot.lane.b32.xlu0 %v10082_v59, %s8696_s9 }
 0x2c7   : > { %v1778_v3 = vpop.permute.xlu1 %1777  ;;  %v1776_v23 = vpop.permute.xlu0 %1775 }
 0x2c8   : > { %v1819_v61 = vsel %vm1801_vm6, %v1774_v7, %v1776_v23  ;;  %v1820_v41 = vsel %vm1801_vm6, %v1776_v23, %v1778_v3  ;;  %v10194_v23 = vld [vmem:[#allocation2 + $0x10] sm:$0xff] }
 0x2c9   : > { %1879 = vst [vmem:[#allocation3 + $0x358] sm:$0xf0] %v1819_v61  ;;  %1880 = vst [vmem:[#allocation3 + $0x360] sm:$0xf0] %v1820_v41  ;;  %2170 = vrot.lane.b32.xlu1 %v10084_v39, %s8696_s9  ;;  %2168 = vrot.lane.b32.xlu0 %v10094_v34, %s8696_s9 }
 0x2cb   : > { %v1782_v31 = vpop.permute.xlu1 %1781  ;;  %v1780_v25 = vpop.permute.xlu0 %1779 }
 0x2cc   : > { %v1821_v42 = vsel %vm1801_vm6, %v1778_v3, %v1780_v25  ;;  %v1822_v33 = vsel %vm1801_vm6, %v1780_v25, %v1782_v31  ;;  %v10189_v3 = vcombine.high %v10007_v10, %v10007_v10 }
 0x2cd   : > { %1881 = vst [vmem:[#allocation3 + $0x368] sm:$0xf0] %v1821_v42  ;;  %1882 = vst [vmem:[#allocation3 + $0x370] sm:$0xf0] %v1822_v33  ;;  %2174 = vrot.lane.b32.xlu1 %v10096_v9, %s8696_s9  ;;  %2172 = vrot.lane.b32.xlu0 %v10106_v0, %s8696_s9  ;;  %v10200_v42 = vcombine.high %v10194_v23, %v10194_v23 }
 0x2cf   : > { %v1786_v47 = vpop.permute.xlu1 %1785  ;;  %v1784_v13 = vpop.permute.xlu0 %1783 }
 0x2d0   : > { %v1823_v24 = vsel %vm1801_vm6, %v1782_v31, %v1784_v13  ;;  %v1824_v27 = vsel %vm1801_vm6, %v1784_v13, %v1786_v47 }
 0x2d1   : > { %1883 = vst [vmem:[#allocation3 + $0x378] sm:$0xf0] %v1823_v24  ;;  %1884 = vst [vmem:[#allocation3 + $0x380] sm:$0xf0] %v1824_v27  ;;  %2178 = vrot.lane.b32.xlu1 %v10108_v35, %s8696_s9  ;;  %2176 = vrot.lane.b32.xlu0 %v10118_v58, %s8696_s9  ;;  %v10210_v27 = vcombine.high %v10024_v48, %v10024_v48 }
 0x2d3   : > { %v1790_v19 = vpop.permute.xlu1 %1789  ;;  %v1788_v12 = vpop.permute.xlu0 %1787 }
 0x2d4   : > { %v1825_v15 = vsel %vm1801_vm6, %v1786_v47, %v1788_v12  ;;  %v1826_v43 = vsel %vm1801_vm6, %v1788_v12, %v1790_v19 }
 0x2d5   : > { %1885 = vst [vmem:[#allocation3 + $0x388] sm:$0xf0] %v1825_v15  ;;  %1886 = vst [vmem:[#allocation3 + $0x390] sm:$0xf0] %v1826_v43  ;;  %2182 = vrot.lane.b32.xlu1 %v10120_v20, %s8696_s9  ;;  %2180 = vrot.lane.b32.xlu0 %v10130_v26, %s8696_s9 }
 0x2d7   : > { %v1794_v57 = vpop.permute.xlu1 %1793  ;;  %v1792_v17 = vpop.permute.xlu0 %1791 }
 0x2d8   : > { %v1827_v21 = vsel %vm1801_vm6, %v1790_v19, %v1792_v17  ;;  %v1828_v28 = vsel %vm1801_vm6, %v1792_v17, %v1794_v57 }
 0x2d9   : > { %1887 = vst [vmem:[#allocation3 + $0x398] sm:$0xf0] %v1827_v21  ;;  %1888 = vst [vmem:[#allocation3 + $0x3a0] sm:$0xf0] %v1828_v28  ;;  %2186 = vrot.lane.b32.xlu1 %v10132_v51, %s8696_s9  ;;  %2184 = vrot.lane.b32.xlu0 %v10142_v22, %s8696_s9 }
 0x2db   : > { %v1798_v6 = vpop.permute.xlu1 %1797  ;;  %v1796_v46 = vpop.permute.xlu0 %1795 }
 0x2dc   : > { %v1829_v60 = vsel %vm1801_vm6, %v1794_v57, %v1796_v46  ;;  %v1830_v62 = vsel %vm1801_vm6, %v1796_v46, %v1798_v6  ;;  %v10220_v57 = vcombine.high %v10036_v53, %v10036_v53  ;;  %v10230_v46 = vcombine.high %v10048_v16, %v10048_v16 }
 0x2dd   : > { %1889 = vst [vmem:[#allocation3 + $0x3a8] sm:$0xf0] %v1829_v60  ;;  %1890 = vst [vmem:[#allocation3 + $0x3b0] sm:$0xf0] %v1830_v62  ;;  %2190 = vrot.lane.b32.xlu1 %v10144_v36, %s8696_s9  ;;  %2188 = vrot.lane.b32.xlu0 %v10154_v50, %s8696_s9 }
 0x2df   : > { %v1940_v55 = vpop.permute.xlu1 %1939  ;;  %v1800_v5 = vpop.permute.xlu0 %1799 }
 0x2e0   : > { %v1831_v11 = vsel %vm1801_vm6, %v1798_v6, %v1800_v5  ;;  %vm5009_vm6 = vcmask 818176  }
 0x2e1   : > { %1891 = vst [vmem:[#allocation3 + $0x3b8] sm:$0xf0] %v1831_v11  ;;  %2194 = vrot.lane.b32.xlu1 %v10156_v45, %s8696_s9  ;;  %2192 = vrot.lane.b32.xlu0 %v10166_v4, %s8696_s9  ;;  %v10240_v11 = vcombine.high %v10060_v54, %v10060_v54 }
 0x2e3   : > { %v1944_v63 = vpop.permute.xlu1 %1943  ;;  %v1942_v37 = vpop.permute.xlu0 %1941 }
 0x2e4   : > { %v2002_v30 = vsel %vm2001_vm7, %v1940_v55, %v1942_v37  ;;  %v2003_v2 = vsel %vm2001_vm7, %v1942_v37, %v1944_v63 }
 0x2e5   : > { %2062 = vst [vmem:[#allocation3 + $0x3c0] sm:$0xf] %v2002_v30  ;;  %2063 = vst [vmem:[#allocation3 + $0x3c8] sm:$0xf] %v2003_v2  ;;  %2198 = vrot.lane.b32.xlu1 %v10168_v38, %s8696_s9  ;;  %2196 = vrot.lane.b32.xlu0 %v10177_v8, %s8696_s9 }
 0x2e7   : > { %v1948_v7 = vpop.permute.xlu1 %1947  ;;  %v1946_v29 = vpop.permute.xlu0 %1945 }
 0x2e8   : > { %v2004_v32 = vsel %vm2001_vm7, %v1944_v63, %v1946_v29  ;;  %v2005_v49 = vsel %vm2001_vm7, %v1946_v29, %v1948_v7 }
 0x2e9   : > { %2064 = vst [vmem:[#allocation3 + $0x3d0] sm:$0xf] %v2004_v32  ;;  %2065 = vst [vmem:[#allocation3 + $0x3d8] sm:$0xf] %v2005_v49  ;;  %2340 = vrot.lane.b32.xlu1 %v10007_v10, %s8697_s2  ;;  %2200 = vrot.lane.b32.xlu0 %v8353_v40, %s8696_s9  ;;  %v10250_v40 = vcombine.high %v10072_v44, %v10072_v44  ;;  %s8714_s9 = smov 82  }
 0x2eb   : > { %v1952_v61 = vpop.permute.xlu1 %1951  ;;  %v1950_v41 = vpop.permute.xlu0 %1949 }
 0x2ec   : > { %v2006_v31 = vsel %vm2001_vm7, %v1948_v7, %v1950_v41  ;;  %v2007_v25 = vsel %vm2001_vm7, %v1950_v41, %v1952_v61 }
 0x2ed   : > { %2066 = vst [vmem:[#allocation3 + $0x3e0] sm:$0xf] %v2006_v31  ;;  %2067 = vst [vmem:[#allocation3 + $0x3e8] sm:$0xf] %v2007_v25  ;;  %2344 = vrot.lane.b32.xlu1 %v10194_v23, %s8697_s2  ;;  %2342 = vrot.lane.b32.xlu0 %v10189_v3, %s8697_s2 }
 0x2ef   : > { %v1956_v33 = vpop.permute.xlu1 %1955  ;;  %v1954_v47 = vpop.permute.xlu0 %1953 }
 0x2f0   : > { %v2008_v13 = vsel %vm2001_vm7, %v1952_v61, %v1954_v47  ;;  %v2009_v24 = vsel %vm2001_vm7, %v1954_v47, %v1956_v33  ;;  %v10260_v61 = vcombine.high %v10084_v39, %v10084_v39  ;;  %v10270_v47 = vcombine.high %v10096_v9, %v10096_v9 }
 0x2f1   : > { %2068 = vst [vmem:[#allocation3 + $0x3f0] sm:$0xf] %v2008_v13  ;;  %2069 = vst [vmem:[#allocation3 + $0x3f8] sm:$0xf] %v2009_v24  ;;  %2348 = vrot.lane.b32.xlu1 %v10024_v48, %s8697_s2  ;;  %2346 = vrot.lane.b32.xlu0 %v10200_v42, %s8697_s2 }
 0x2f3   : > { %v1960_v19 = vpop.permute.xlu1 %1959  ;;  %v1958_v12 = vpop.permute.xlu0 %1957 }
 0x2f4   : > { %v2010_v15 = vsel %vm2001_vm7, %v1956_v33, %v1958_v12  ;;  %v2011_v43 = vsel %vm2001_vm7, %v1958_v12, %v1960_v19 }
 0x2f5   : > { %2070 = vst [vmem:[#allocation3 + $0x400] sm:$0xf] %v2010_v15  ;;  %2071 = vst [vmem:[#allocation3 + $0x408] sm:$0xf] %v2011_v43  ;;  %2352 = vrot.lane.b32.xlu1 %v10036_v53, %s8697_s2  ;;  %2350 = vrot.lane.b32.xlu0 %v10210_v27, %s8697_s2  ;;  %v10280_v15 = vcombine.high %v10108_v35, %v10108_v35 }
 0x2f7   : > { %v1964_v17 = vpop.permute.xlu1 %1963  ;;  %v1962_v21 = vpop.permute.xlu0 %1961 }
 0x2f8   : > { %v2012_v28 = vsel %vm2001_vm7, %v1960_v19, %v1962_v21  ;;  %v2013_v6 = vsel %vm2001_vm7, %v1962_v21, %v1964_v17 }
 0x2f9   : > { %2072 = vst [vmem:[#allocation3 + $0x410] sm:$0xf] %v2012_v28  ;;  %2073 = vst [vmem:[#allocation3 + $0x418] sm:$0xf] %v2013_v6  ;;  %2356 = vrot.lane.b32.xlu1 %v10048_v16, %s8697_s2  ;;  %2354 = vrot.lane.b32.xlu0 %v10220_v57, %s8697_s2  ;;  %v10290_v6 = vcombine.high %v10120_v20, %v10120_v20 }
 0x2fb   : > { %v1968_v60 = vpop.permute.xlu1 %1967  ;;  %v1966_v62 = vpop.permute.xlu0 %1965 }
 0x2fc   : > { %v2014_v55 = vsel %vm2001_vm7, %v1964_v17, %v1966_v62  ;;  %v2015_v5 = vsel %vm2001_vm7, %v1966_v62, %v1968_v60 }
 0x2fd   : > { %2074 = vst [vmem:[#allocation3 + $0x420] sm:$0xf] %v2014_v55  ;;  %2075 = vst [vmem:[#allocation3 + $0x428] sm:$0xf] %v2015_v5  ;;  %2360 = vrot.lane.b32.xlu1 %v10060_v54, %s8697_s2  ;;  %2358 = vrot.lane.b32.xlu0 %v10230_v46, %s8697_s2 }
 0x2ff   : > { %v1972_v63 = vpop.permute.xlu1 %1971  ;;  %v1970_v37 = vpop.permute.xlu0 %1969 }
 0x300   : > { %v2016_v30 = vsel %vm2001_vm7, %v1968_v60, %v1970_v37  ;;  %v2017_v2 = vsel %vm2001_vm7, %v1970_v37, %v1972_v63 }
 0x301   : > { %2076 = vst [vmem:[#allocation3 + $0x430] sm:$0xf] %v2016_v30  ;;  %2077 = vst [vmem:[#allocation3 + $0x438] sm:$0xf] %v2017_v2  ;;  %2364 = vrot.lane.b32.xlu1 %v10072_v44, %s8697_s2  ;;  %2362 = vrot.lane.b32.xlu0 %v10240_v11, %s8697_s2 }
 0x303   : > { %v1976_v7 = vpop.permute.xlu1 %1975  ;;  %v1974_v29 = vpop.permute.xlu0 %1973 }
 0x304   : > { %v2018_v32 = vsel %vm2001_vm7, %v1972_v63, %v1974_v29  ;;  %v2019_v49 = vsel %vm2001_vm7, %v1974_v29, %v1976_v7  ;;  %v10300_v63 = vcombine.high %v10132_v51, %v10132_v51  ;;  %v10310_v29 = vcombine.high %v10144_v36, %v10144_v36 }
 0x305   : > { %2078 = vst [vmem:[#allocation3 + $0x440] sm:$0xf] %v2018_v32  ;;  %2079 = vst [vmem:[#allocation3 + $0x448] sm:$0xf] %v2019_v49  ;;  %2368 = vrot.lane.b32.xlu1 %v10084_v39, %s8697_s2  ;;  %2366 = vrot.lane.b32.xlu0 %v10250_v40, %s8697_s2 }
 0x307   : > { %v1980_v41 = vpop.permute.xlu1 %1979  ;;  %v1978_v31 = vpop.permute.xlu0 %1977 }
 0x308   : > { %v2020_v25 = vsel %vm2001_vm7, %v1976_v7, %v1978_v31  ;;  %v2021_v33 = vsel %vm2001_vm7, %v1978_v31, %v1980_v41 }
 0x309   : > { %2080 = vst [vmem:[#allocation3 + $0x450] sm:$0xf] %v2020_v25  ;;  %2081 = vst [vmem:[#allocation3 + $0x458] sm:$0xf] %v2021_v33  ;;  %2372 = vrot.lane.b32.xlu1 %v10096_v9, %s8697_s2  ;;  %2370 = vrot.lane.b32.xlu0 %v10260_v61, %s8697_s2  ;;  %v10320_v25 = vcombine.high %v10156_v45, %v10156_v45 }
 0x30b   : > { %v1984_v13 = vpop.permute.xlu1 %1983  ;;  %v1982_v24 = vpop.permute.xlu0 %1981 }
 0x30c   : > { %v2022_v19 = vsel %vm2001_vm7, %v1980_v41, %v1982_v24  ;;  %v2023_v12 = vsel %vm2001_vm7, %v1982_v24, %v1984_v13 }
 0x30d   : > { %2082 = vst [vmem:[#allocation3 + $0x460] sm:$0xf] %v2022_v19  ;;  %2083 = vst [vmem:[#allocation3 + $0x468] sm:$0xf] %v2023_v12  ;;  %2376 = vrot.lane.b32.xlu1 %v10108_v35, %s8697_s2  ;;  %2374 = vrot.lane.b32.xlu0 %v10270_v47, %s8697_s2  ;;  %v10329_v19 = vcombine.high %v10168_v38, %v10168_v38  ;;  %v2308_v12 = vld [vmem:[#allocation2 + $0x80] sm:$0xf] }
 0x30f   : > { %v1988_v43 = vpop.permute.xlu1 %1987  ;;  %v1986_v17 = vpop.permute.xlu0 %1985 }
 0x310   : > { %v2024_v21 = vsel %vm2001_vm7, %v1984_v13, %v1986_v17  ;;  %v2025_v28 = vsel %vm2001_vm7, %v1986_v17, %v1988_v43 }
 0x311   : > { %2084 = vst [vmem:[#allocation3 + $0x470] sm:$0xf] %v2024_v21  ;;  %2085 = vst [vmem:[#allocation3 + $0x478] sm:$0xf] %v2025_v28  ;;  %2380 = vrot.lane.b32.xlu1 %v10120_v20, %s8697_s2  ;;  %2378 = vrot.lane.b32.xlu0 %v10280_v15, %s8697_s2 }
 0x313   : > { %v1992_v60 = vpop.permute.xlu1 %1991  ;;  %v1990_v62 = vpop.permute.xlu0 %1989 }
 0x314   : > { %v2026_v55 = vsel %vm2001_vm7, %v1988_v43, %v1990_v62  ;;  %v2027_v5 = vsel %vm2001_vm7, %v1990_v62, %v1992_v60 }
 0x315   : > { %2086 = vst [vmem:[#allocation3 + $0x480] sm:$0xf] %v2026_v55  ;;  %2087 = vst [vmem:[#allocation3 + $0x488] sm:$0xf] %v2027_v5  ;;  %2384 = vrot.lane.b32.xlu1 %v10132_v51, %s8697_s2  ;;  %2382 = vrot.lane.b32.xlu0 %v10290_v6, %s8697_s2 }
 0x317   : > { %v1996_v37 = vpop.permute.xlu1 %1995  ;;  %v1994_v30 = vpop.permute.xlu0 %1993 }
 0x318   : > { %v2028_v2 = vsel %vm2001_vm7, %v1992_v60, %v1994_v30  ;;  %v2029_v7 = vsel %vm2001_vm7, %v1994_v30, %v1996_v37 }
 0x319   : > { %2088 = vst [vmem:[#allocation3 + $0x490] sm:$0xf] %v2028_v2  ;;  %2089 = vst [vmem:[#allocation3 + $0x498] sm:$0xf] %v2029_v7  ;;  %2388 = vrot.lane.b32.xlu1 %v10144_v36, %s8697_s2  ;;  %2386 = vrot.lane.b32.xlu0 %v10300_v63, %s8697_s2 }
 0x31b   : > { %v2000_v32 = vpop.permute.xlu1 %1999  ;;  %v1998_v49 = vpop.permute.xlu0 %1997 }
 0x31c   : > { %v2030_v41 = vsel %vm2001_vm7, %v1996_v37, %v1998_v49  ;;  %v2031_v31 = vsel %vm2001_vm7, %v1998_v49, %v2000_v32  ;;  %v10348_v37 = vcombine.low %v10194_v23, %v10194_v23  ;;  %vm5209_vm7 = vcmask 687104  }
 0x31d   : > { %2090 = vst [vmem:[#allocation3 + $0x4a0] sm:$0xf] %v2030_v41  ;;  %2091 = vst [vmem:[#allocation3 + $0x4a8] sm:$0xf] %v2031_v31  ;;  %2392 = vrot.lane.b32.xlu1 %v10156_v45, %s8697_s2  ;;  %2390 = vrot.lane.b32.xlu0 %v10310_v29, %s8697_s2 }
 0x31f   : > { %v2143_v33 = vpop.permute.xlu1 %2142  ;;  %v2141_v13 = vpop.permute.xlu0 %2140 }
 0x320   : > { %v2203_v24 = vsel %vm2202_vm8, %v2141_v13, %v2143_v33 }
 0x321   : > { %2263 = vst [vmem:[#allocation3 + $0x3c0] sm:$0xf0] %v2203_v24  ;;  %2396 = vrot.lane.b32.xlu1 %v10168_v38, %s8697_s2  ;;  %2394 = vrot.lane.b32.xlu0 %v10320_v25, %s8697_s2 }
 0x323   : > { %v2147_v43 = vpop.permute.xlu1 %2146  ;;  %v2145_v17 = vpop.permute.xlu0 %2144 }
 0x324   : > { %v2204_v21 = vsel %vm2202_vm8, %v2143_v33, %v2145_v17  ;;  %v2205_v28 = vsel %vm2202_vm8, %v2145_v17, %v2147_v43 }
 0x325   : > { %2264 = vst [vmem:[#allocation3 + $0x3c8] sm:$0xf0] %v2204_v21  ;;  %2265 = vst [vmem:[#allocation3 + $0x3d0] sm:$0xf0] %v2205_v28  ;;  %2400 = vrot.lane.b32.xlu1 %v2308_v12, %s8697_s2  ;;  %2398 = vrot.lane.b32.xlu0 %v10329_v19, %s8697_s2 }
 0x327   : > { %v2151_v60 = vpop.permute.xlu1 %2150  ;;  %v2149_v62 = vpop.permute.xlu0 %2148 }
 0x328   : > { %v2206_v55 = vsel %vm2202_vm8, %v2147_v43, %v2149_v62  ;;  %v2207_v5 = vsel %vm2202_vm8, %v2149_v62, %v2151_v60 }
 0x329   : > { %2266 = vst [vmem:[#allocation3 + $0x3d8] sm:$0xf0] %v2206_v55  ;;  %2267 = vst [vmem:[#allocation3 + $0x3e0] sm:$0xf0] %v2207_v5  ;;  %2543 = vrot.lane.b32.xlu1 %v10007_v10, %s8698_s17  ;;  %2541 = vrot.lane.b32.xlu0 %v10016_v18, %s8698_s17 }
 0x32b   : > { %v2155_v30 = vpop.permute.xlu1 %2154  ;;  %v2153_v2 = vpop.permute.xlu0 %2152 }
 0x32c   : > { %v2208_v7 = vsel %vm2202_vm8, %v2151_v60, %v2153_v2  ;;  %v2209_v32 = vsel %vm2202_vm8, %v2153_v2, %v2155_v30 }
 0x32d   : > { %2268 = vst [vmem:[#allocation3 + $0x3e8] sm:$0xf0] %v2208_v7  ;;  %2269 = vst [vmem:[#allocation3 + $0x3f0] sm:$0xf0] %v2209_v32  ;;  %2547 = vrot.lane.b32.xlu1 %v10194_v23, %s8698_s17  ;;  %2545 = vrot.lane.b32.xlu0 %v10348_v37, %s8698_s17 }
 0x32f   : > { %v2159_v49 = vpop.permute.xlu1 %2158  ;;  %v2157_v18 = vpop.permute.xlu0 %2156 }
 0x330   : > { %v2210_v41 = vsel %vm2202_vm8, %v2155_v30, %v2157_v18  ;;  %v2211_v31 = vsel %vm2202_vm8, %v2157_v18, %v2159_v49 }
 0x331   : > { %2270 = vst [vmem:[#allocation3 + $0x3f8] sm:$0xf0] %v2210_v41  ;;  %2271 = vst [vmem:[#allocation3 + $0x400] sm:$0xf0] %v2211_v31  ;;  %2551 = vrot.lane.b32.xlu1 %v10024_v48, %s8698_s17  ;;  %2549 = vrot.lane.b32.xlu0 %v10034_v14, %s8698_s17 }
 0x333   : > { %v2163_v33 = vpop.permute.xlu1 %2162  ;;  %v2161_v13 = vpop.permute.xlu0 %2160 }
 0x334   : > { %v2212_v24 = vsel %vm2202_vm8, %v2159_v49, %v2161_v13  ;;  %v2213_v12 = vsel %vm2202_vm8, %v2161_v13, %v2163_v33 }
 0x335   : > { %2272 = vst [vmem:[#allocation3 + $0x408] sm:$0xf0] %v2212_v24  ;;  %2273 = vst [vmem:[#allocation3 + $0x410] sm:$0xf0] %v2213_v12  ;;  %2555 = vrot.lane.b32.xlu1 %v10036_v53, %s8698_s17  ;;  %2553 = vrot.lane.b32.xlu0 %v10046_v56, %s8698_s17 }
 0x337   : > { %v2167_v43 = vpop.permute.xlu1 %2166  ;;  %v2165_v17 = vpop.permute.xlu0 %2164 }
 0x338   : > { %v2214_v21 = vsel %vm2202_vm8, %v2163_v33, %v2165_v17  ;;  %v2215_v14 = vsel %vm2202_vm8, %v2165_v17, %v2167_v43 }
 0x339   : > { %2274 = vst [vmem:[#allocation3 + $0x418] sm:$0xf0] %v2214_v21  ;;  %2275 = vst [vmem:[#allocation3 + $0x420] sm:$0xf0] %v2215_v14  ;;  %2559 = vrot.lane.b32.xlu1 %v10048_v16, %s8698_s17  ;;  %2557 = vrot.lane.b32.xlu0 %v10058_v52, %s8698_s17 }
 0x33b   : > { %v2171_v28 = vpop.permute.xlu1 %2170  ;;  %v2169_v60 = vpop.permute.xlu0 %2168 }
 0x33c   : > { %v2216_v62 = vsel %vm2202_vm8, %v2167_v43, %v2169_v60  ;;  %v2217_v56 = vsel %vm2202_vm8, %v2169_v60, %v2171_v28 }
 0x33d   : > { %2276 = vst [vmem:[#allocation3 + $0x428] sm:$0xf0] %v2216_v62  ;;  %2277 = vst [vmem:[#allocation3 + $0x430] sm:$0xf0] %v2217_v56  ;;  %2563 = vrot.lane.b32.xlu1 %v10060_v54, %s8698_s17  ;;  %2561 = vrot.lane.b32.xlu0 %v10070_v1, %s8698_s17 }
 0x33f   : > { %v2175_v55 = vpop.permute.xlu1 %2174  ;;  %v2173_v5 = vpop.permute.xlu0 %2172 }
 0x340   : > { %v2218_v30 = vsel %vm2202_vm8, %v2171_v28, %v2173_v5  ;;  %v2219_v52 = vsel %vm2202_vm8, %v2173_v5, %v2175_v55 }
 0x341   : > { %2278 = vst [vmem:[#allocation3 + $0x438] sm:$0xf0] %v2218_v30  ;;  %2279 = vst [vmem:[#allocation3 + $0x440] sm:$0xf0] %v2219_v52  ;;  %2567 = vrot.lane.b32.xlu1 %v10072_v44, %s8698_s17  ;;  %2565 = vrot.lane.b32.xlu0 %v10082_v59, %s8698_s17 }
 0x343   : > { %v2179_v2 = vpop.permute.xlu1 %2178  ;;  %v2177_v7 = vpop.permute.xlu0 %2176 }
 0x344   : > { %v2220_v32 = vsel %vm2202_vm8, %v2175_v55, %v2177_v7  ;;  %v2221_v1 = vsel %vm2202_vm8, %v2177_v7, %v2179_v2 }
 0x345   : > { %2280 = vst [vmem:[#allocation3 + $0x448] sm:$0xf0] %v2220_v32  ;;  %2281 = vst [vmem:[#allocation3 + $0x450] sm:$0xf0] %v2221_v1  ;;  %2571 = vrot.lane.b32.xlu1 %v10084_v39, %s8698_s17  ;;  %2569 = vrot.lane.b32.xlu0 %v10094_v34, %s8698_s17 }
 0x347   : > { %v2183_v49 = vpop.permute.xlu1 %2182  ;;  %v2181_v18 = vpop.permute.xlu0 %2180 }
 0x348   : > { %v2222_v41 = vsel %vm2202_vm8, %v2179_v2, %v2181_v18  ;;  %v2223_v59 = vsel %vm2202_vm8, %v2181_v18, %v2183_v49 }
 0x349   : > { %2282 = vst [vmem:[#allocation3 + $0x458] sm:$0xf0] %v2222_v41  ;;  %2283 = vst [vmem:[#allocation3 + $0x460] sm:$0xf0] %v2223_v59  ;;  %2575 = vrot.lane.b32.xlu1 %v10096_v9, %s8698_s17  ;;  %2573 = vrot.lane.b32.xlu0 %v10106_v0, %s8698_s17 }
 0x34b   : > { %v2187_v31 = vpop.permute.xlu1 %2186  ;;  %v2185_v33 = vpop.permute.xlu0 %2184 }
 0x34c   : > { %v2224_v13 = vsel %vm2202_vm8, %v2183_v49, %v2185_v33  ;;  %v2225_v34 = vsel %vm2202_vm8, %v2185_v33, %v2187_v31 }
 0x34d   : > { %2284 = vst [vmem:[#allocation3 + $0x468] sm:$0xf0] %v2224_v13  ;;  %2285 = vst [vmem:[#allocation3 + $0x470] sm:$0xf0] %v2225_v34  ;;  %2579 = vrot.lane.b32.xlu1 %v10108_v35, %s8698_s17  ;;  %2577 = vrot.lane.b32.xlu0 %v10118_v58, %s8698_s17 }
 0x34f   : > { %v2191_v24 = vpop.permute.xlu1 %2190  ;;  %v2189_v12 = vpop.permute.xlu0 %2188 }
 0x350   : > { %v2226_v43 = vsel %vm2202_vm8, %v2187_v31, %v2189_v12  ;;  %v2227_v0 = vsel %vm2202_vm8, %v2189_v12, %v2191_v24 }
 0x351   : > { %2286 = vst [vmem:[#allocation3 + $0x478] sm:$0xf0] %v2226_v43  ;;  %2287 = vst [vmem:[#allocation3 + $0x480] sm:$0xf0] %v2227_v0  ;;  %2583 = vrot.lane.b32.xlu1 %v10120_v20, %s8698_s17  ;;  %2581 = vrot.lane.b32.xlu0 %v10130_v26, %s8698_s17 }
 0x353   : > { %v2195_v17 = vpop.permute.xlu1 %2194  ;;  %v2193_v21 = vpop.permute.xlu0 %2192 }
 0x354   : > { %v2228_v14 = vsel %vm2202_vm8, %v2191_v24, %v2193_v21  ;;  %v2229_v58 = vsel %vm2202_vm8, %v2193_v21, %v2195_v17 }
 0x355   : > { %2288 = vst [vmem:[#allocation3 + $0x488] sm:$0xf0] %v2228_v14  ;;  %2289 = vst [vmem:[#allocation3 + $0x490] sm:$0xf0] %v2229_v58  ;;  %2587 = vrot.lane.b32.xlu1 %v10132_v51, %s8698_s17  ;;  %2585 = vrot.lane.b32.xlu0 %v10142_v22, %s8698_s17 }
 0x357   : > { %v2199_v28 = vpop.permute.xlu1 %2198  ;;  %v2197_v60 = vpop.permute.xlu0 %2196 }
 0x358   : > { %v2230_v62 = vsel %vm2202_vm8, %v2195_v17, %v2197_v60  ;;  %v2231_v26 = vsel %vm2202_vm8, %v2197_v60, %v2199_v28 }
 0x359   : > { %2290 = vst [vmem:[#allocation3 + $0x498] sm:$0xf0] %v2230_v62  ;;  %2291 = vst [vmem:[#allocation3 + $0x4a0] sm:$0xf0] %v2231_v26  ;;  %2591 = vrot.lane.b32.xlu1 %v10144_v36, %s8698_s17  ;;  %2589 = vrot.lane.b32.xlu0 %v10154_v50, %s8698_s17  ;;  %v8369_v50 = vld [vmem:[#allocation2 + $0x80] ss:$0 sps:$4 sm:$0xff]  }
 0x35b   : > { %v2341_v56 = vpop.permute.xlu1 %2340  ;;  %v2201_v55 = vpop.permute.xlu0 %2200 }
 0x35c   : > { %v2232_v5 = vsel %vm2202_vm8, %v2199_v28, %v2201_v55  ;;  %vm5410_vm8 = vcmask 678912  }
 0x35d   : > { %2292 = vst [vmem:[#allocation3 + $0x4a8] sm:$0xf0] %v2232_v5  ;;  %2595 = vrot.lane.b32.xlu1 %v10156_v45, %s8698_s17  ;;  %2593 = vrot.lane.b32.xlu0 %v10166_v4, %s8698_s17 }
 0x35f   : > { %v2345_v22 = vpop.permute.xlu1 %2344  ;;  %v2343_v30 = vpop.permute.xlu0 %2342 }
 0x360   : > { %v2403_v52 = vsel %vm2402_vm9, %v2341_v56, %v2343_v30  ;;  %v2404_v2 = vsel %vm2402_vm9, %v2343_v30, %v2345_v22 }
 0x361   : > { %2463 = vst [vmem:[#allocation3 + $0x4b0] sm:$0xf] %v2403_v52  ;;  %2464 = vst [vmem:[#allocation3 + $0x4b8] sm:$0xf] %v2404_v2  ;;  %2599 = vrot.lane.b32.xlu1 %v10168_v38, %s8698_s17  ;;  %2597 = vrot.lane.b32.xlu0 %v10177_v8, %s8698_s17 }
 0x363   : > { %v2349_v7 = vpop.permute.xlu1 %2348  ;;  %v2347_v32 = vpop.permute.xlu0 %2346 }
 0x364   : > { %v2405_v4 = vsel %vm2402_vm9, %v2345_v22, %v2347_v32  ;;  %v2406_v1 = vsel %vm2402_vm9, %v2347_v32, %v2349_v7 }
 0x365   : > { %2465 = vst [vmem:[#allocation3 + $0x4c0] sm:$0xf] %v2405_v4  ;;  %2466 = vst [vmem:[#allocation3 + $0x4c8] sm:$0xf] %v2406_v1  ;;  %2741 = vrot.lane.b32.xlu1 %v10007_v10, %s8699_s6  ;;  %2601 = vrot.lane.b32.xlu0 %v8369_v50, %s8698_s17  ;;  %v10521_v1 = vld [vmem:[#allocation2 + $0x8] sm:$0xff] }
 0x367   : > { %v2353_v49 = vpop.permute.xlu1 %2352  ;;  %v2351_v18 = vpop.permute.xlu0 %2350 }
 0x368   : > { %v2407_v41 = vsel %vm2402_vm9, %v2349_v7, %v2351_v18  ;;  %v2408_v8 = vsel %vm2402_vm9, %v2351_v18, %v2353_v49 }
 0x369   : > { %2467 = vst [vmem:[#allocation3 + $0x4d0] sm:$0xf] %v2407_v41  ;;  %2468 = vst [vmem:[#allocation3 + $0x4d8] sm:$0xf] %v2408_v8  ;;  %2745 = vrot.lane.b32.xlu1 %v10194_v23, %s8699_s6  ;;  %2743 = vrot.lane.b32.xlu0 %v10189_v3, %s8699_s6 }
 0x36b   : > { %v2357_v59 = vpop.permute.xlu1 %2356  ;;  %v2355_v31 = vpop.permute.xlu0 %2354 }
 0x36c   : > { %v2409_v10 = vsel %vm2402_vm9, %v2353_v49, %v2355_v31  ;;  %v2410_v33 = vsel %vm2402_vm9, %v2355_v31, %v2357_v59 }
 0x36d   : > { %2469 = vst [vmem:[#allocation3 + $0x4e0] sm:$0xf] %v2409_v10  ;;  %2470 = vst [vmem:[#allocation3 + $0x4e8] sm:$0xf] %v2410_v33  ;;  %2749 = vrot.lane.b32.xlu1 %v10024_v48, %s8699_s6  ;;  %2747 = vrot.lane.b32.xlu0 %v10200_v42, %s8699_s6 }
 0x36f   : > { %v2361_v13 = vpop.permute.xlu1 %2360  ;;  %v2359_v34 = vpop.permute.xlu0 %2358 }
 0x370   : > { %v2411_v24 = vsel %vm2402_vm9, %v2357_v59, %v2359_v34  ;;  %v2412_v3 = vsel %vm2402_vm9, %v2359_v34, %v2361_v13 }
 0x371   : > { %2471 = vst [vmem:[#allocation3 + $0x4f0] sm:$0xf] %v2411_v24  ;;  %2472 = vst [vmem:[#allocation3 + $0x4f8] sm:$0xf] %v2412_v3  ;;  %2753 = vrot.lane.b32.xlu1 %v10036_v53, %s8699_s6  ;;  %2751 = vrot.lane.b32.xlu0 %v10210_v27, %s8699_s6  ;;  %v5853_v24 = vld [vmem:[#allocation3 + $0x3c8] sm:$0xff] }
 0x373   : > { %v2365_v12 = vpop.permute.xlu1 %2364  ;;  %v2363_v43 = vpop.permute.xlu0 %2362 }
 0x374   : > { %v2413_v48 = vsel %vm2402_vm9, %v2361_v13, %v2363_v43  ;;  %v2414_v42 = vsel %vm2402_vm9, %v2363_v43, %v2365_v12  ;;  %v5852_v43 = vld [vmem:[#allocation3 + $0x3c0] sm:$0xff] }
 0x375   : > { %2473 = vst [vmem:[#allocation3 + $0x500] sm:$0xf] %v2413_v48  ;;  %2474 = vst [vmem:[#allocation3 + $0x508] sm:$0xf] %v2414_v42  ;;  %2757 = vrot.lane.b32.xlu1 %v10048_v16, %s8699_s6  ;;  %2755 = vrot.lane.b32.xlu0 %v10220_v57, %s8699_s6 }
 0x377   : > { %v2369_v0 = vpop.permute.xlu1 %2368  ;;  %v2367_v17 = vpop.permute.xlu0 %2366 }
 0x378   : > { %v2415_v53 = vsel %vm2402_vm9, %v2365_v12, %v2367_v17  ;;  %v2416_v27 = vsel %vm2402_vm9, %v2367_v17, %v2369_v0 }
 0x379   : > { %2475 = vst [vmem:[#allocation3 + $0x510] sm:$0xf] %v2415_v53  ;;  %2476 = vst [vmem:[#allocation3 + $0x518] sm:$0xf] %v2416_v27  ;;  %2761 = vrot.lane.b32.xlu1 %v10060_v54, %s8699_s6  ;;  %2759 = vrot.lane.b32.xlu0 %v10230_v46, %s8699_s6 }
 0x37b   : > { %v2373_v21 = vpop.permute.xlu1 %2372  ;;  %v2371_v14 = vpop.permute.xlu0 %2370 }
 0x37c   : > { %v2417_v16 = vsel %vm2402_vm9, %v2369_v0, %v2371_v14  ;;  %v2418_v57 = vsel %vm2402_vm9, %v2371_v14, %v2373_v21  ;;  %v10550_v0 = vld [vmem:[#allocation2 + $0x20] sm:$0xff]  ;;  %v5855_v14 = vld [vmem:[#allocation3 + $0x3d8] sm:$0xff] }
 0x37d   : > { %2477 = vst [vmem:[#allocation3 + $0x520] sm:$0xf] %v2417_v16  ;;  %2478 = vst [vmem:[#allocation3 + $0x528] sm:$0xf] %v2418_v57  ;;  %2765 = vrot.lane.b32.xlu1 %v10072_v44, %s8699_s6  ;;  %2763 = vrot.lane.b32.xlu0 %v10240_v11, %s8699_s6  ;;  %v5854_v57 = vld [vmem:[#allocation3 + $0x3d0] sm:$0xff] }
 0x37f   : > { %v2377_v58 = vpop.permute.xlu1 %2376  ;;  %v2375_v28 = vpop.permute.xlu0 %2374 }
 0x380   : > { %v2419_v54 = vsel %vm2402_vm9, %v2373_v21, %v2375_v28  ;;  %v2420_v46 = vsel %vm2402_vm9, %v2375_v28, %v2377_v58 }
 0x381   : > { %2479 = vst [vmem:[#allocation3 + $0x530] sm:$0xf] %v2419_v54  ;;  %2480 = vst [vmem:[#allocation3 + $0x538] sm:$0xf] %v2420_v46  ;;  %2769 = vrot.lane.b32.xlu1 %v10084_v39, %s8699_s6  ;;  %2767 = vrot.lane.b32.xlu0 %v10250_v40, %s8699_s6  ;;  %v10562_v54 = vld [vmem:[#allocation2 + $0x28] sm:$0xff] }
 0x383   : > { %v2381_v60 = vpop.permute.xlu1 %2380  ;;  %v2379_v62 = vpop.permute.xlu0 %2378 }
 0x384   : > { %v2421_v44 = vsel %vm2402_vm9, %v2377_v58, %v2379_v62  ;;  %v2422_v11 = vsel %vm2402_vm9, %v2379_v62, %v2381_v60  ;;  %v10560_v58 = vcombine.low %v10550_v0, %v10550_v0 }
 0x385   : > { %2481 = vst [vmem:[#allocation3 + $0x540] sm:$0xf] %v2421_v44  ;;  %2482 = vst [vmem:[#allocation3 + $0x548] sm:$0xf] %v2422_v11  ;;  %2773 = vrot.lane.b32.xlu1 %v10096_v9, %s8699_s6  ;;  %2771 = vrot.lane.b32.xlu0 %v10260_v61, %s8699_s6  ;;  %v10572_v11 = vcombine.low %v10562_v54, %v10562_v54 }
 0x387   : > { %v2385_v26 = vpop.permute.xlu1 %2384  ;;  %v2383_v56 = vpop.permute.xlu0 %2382 }
 0x388   : > { %v2423_v39 = vsel %vm2402_vm9, %v2381_v60, %v2383_v56  ;;  %v2424_v40 = vsel %vm2402_vm9, %v2383_v56, %v2385_v26 }
 0x389   : > { %2483 = vst [vmem:[#allocation3 + $0x550] sm:$0xf] %v2423_v39  ;;  %2484 = vst [vmem:[#allocation3 + $0x558] sm:$0xf] %v2424_v40  ;;  %2777 = vrot.lane.b32.xlu1 %v10108_v35, %s8699_s6  ;;  %2775 = vrot.lane.b32.xlu0 %v10270_v47, %s8699_s6 }
 0x38b   : > { %v2389_v55 = vpop.permute.xlu1 %2388  ;;  %v2387_v5 = vpop.permute.xlu0 %2386 }
 0x38c   : > { %v2425_v9 = vsel %vm2402_vm9, %v2385_v26, %v2387_v5  ;;  %v2426_v61 = vsel %vm2402_vm9, %v2387_v5, %v2389_v55  ;;  %v10574_v26 = vld [vmem:[#allocation2 + $0x30] sm:$0xff] }
 0x38d   : > { %2485 = vst [vmem:[#allocation3 + $0x560] sm:$0xf] %v2425_v9  ;;  %2486 = vst [vmem:[#allocation3 + $0x568] sm:$0xf] %v2426_v61  ;;  %2781 = vrot.lane.b32.xlu1 %v10120_v20, %s8699_s6  ;;  %2779 = vrot.lane.b32.xlu0 %v10280_v15, %s8699_s6  ;;  %v10584_v5 = vcombine.low %v10574_v26, %v10574_v26  ;;  %v10586_v9 = vld [vmem:[#allocation2 + $0x38] sm:$0xff] }
 0x38f   : > { %v2393_v22 = vpop.permute.xlu1 %2392  ;;  %v2391_v30 = vpop.permute.xlu0 %2390 }
 0x390   : > { %v2427_v35 = vsel %vm2402_vm9, %v2389_v55, %v2391_v30  ;;  %v2428_v47 = vsel %vm2402_vm9, %v2391_v30, %v2393_v22 }
 0x391   : > { %2487 = vst [vmem:[#allocation3 + $0x570] sm:$0xf] %v2427_v35  ;;  %2488 = vst [vmem:[#allocation3 + $0x578] sm:$0xf] %v2428_v47  ;;  %2785 = vrot.lane.b32.xlu1 %v10132_v51, %s8699_s6  ;;  %2783 = vrot.lane.b32.xlu0 %v10290_v6, %s8699_s6  ;;  %v10596_v47 = vcombine.low %v10586_v9, %v10586_v9 }
 0x393   : > { %v2397_v52 = vpop.permute.xlu1 %2396  ;;  %v2395_v2 = vpop.permute.xlu0 %2394 }
 0x394   : > { %v2429_v20 = vsel %vm2402_vm9, %v2393_v22, %v2395_v2  ;;  %v2430_v15 = vsel %vm2402_vm9, %v2395_v2, %v2397_v52 }
 0x395   : > { %2489 = vst [vmem:[#allocation3 + $0x580] sm:$0xf] %v2429_v20  ;;  %2490 = vst [vmem:[#allocation3 + $0x588] sm:$0xf] %v2430_v15  ;;  %2789 = vrot.lane.b32.xlu1 %v10144_v36, %s8699_s6  ;;  %2787 = vrot.lane.b32.xlu0 %v10300_v63, %s8699_s6  ;;  %v2709_v63 = vld [vmem:[#allocation2 + $0x80] sm:$0xf] }
 0x397   : > { %v2401_v50 = vpop.permute.xlu1 %2400  ;;  %v2399_v7 = vpop.permute.xlu0 %2398 }
 0x398   : > { %v2431_v51 = vsel %vm2402_vm9, %v2397_v52, %v2399_v7  ;;  %v2432_v6 = vsel %vm2402_vm9, %v2399_v7, %v2401_v50  ;;  %v10598_v52 = vld [vmem:[#allocation2 + $0x40] sm:$0xff]  ;;  %vm5610_vm9 = vcmask 670720  }
 0x399   : > { %2491 = vst [vmem:[#allocation3 + $0x590] sm:$0xf] %v2431_v51  ;;  %2492 = vst [vmem:[#allocation3 + $0x598] sm:$0xf] %v2432_v6  ;;  %2793 = vrot.lane.b32.xlu1 %v10156_v45, %s8699_s6  ;;  %2791 = vrot.lane.b32.xlu0 %v10310_v29, %s8699_s6  ;;  %v10608_v7 = vcombine.low %v10598_v52, %v10598_v52  ;;  %v10610_v51 = vld [vmem:[#allocation2 + $0x48] sm:$0xff] }
 0x39b   : > { %v2544_v32 = vpop.permute.xlu1 %2543  ;;  %v2542_v36 = vpop.permute.xlu0 %2541 }
 0x39c   : > { %v2604_v4 = vsel %vm2603_vm10, %v2542_v36, %v2544_v32 }
 0x39d   : > { %2664 = vst [vmem:[#allocation3 + $0x4b0] sm:$0xf0] %v2604_v4  ;;  %2797 = vrot.lane.b32.xlu1 %v10168_v38, %s8699_s6  ;;  %2795 = vrot.lane.b32.xlu0 %v10320_v25, %s8699_s6  ;;  %v10530_v38 = vcombine.low %v10521_v1, %v10521_v1 }
 0x39f   : > { %v2548_v49 = vpop.permute.xlu1 %2547  ;;  %v2546_v45 = vpop.permute.xlu0 %2545 }
 0x3a0   : > { %v2605_v18 = vsel %vm2603_vm10, %v2544_v32, %v2546_v45  ;;  %v2606_v29 = vsel %vm2603_vm10, %v2546_v45, %v2548_v49 }
 0x3a1   : > { %2665 = vst [vmem:[#allocation3 + $0x4b8] sm:$0xf0] %v2605_v18  ;;  %2666 = vst [vmem:[#allocation3 + $0x4c0] sm:$0xf0] %v2606_v29  ;;  %2801 = vrot.lane.b32.xlu1 %v2709_v63, %s8699_s6  ;;  %2799 = vrot.lane.b32.xlu0 %v10329_v19, %s8699_s6  ;;  %v10538_v19 = vld [vmem:[#allocation2 + $0x18] sm:$0xff]  ;;  %v10620_v63 = vcombine.low %v10610_v51, %v10610_v51 }
 0x3a2   : > { %v10548_v48 = vcombine.low %v10538_v19, %v10538_v19 }
 0x3a3   : > { %v2552_v25 = vpop.permute.xlu1 %2551  ;;  %v2550_v41 = vpop.permute.xlu0 %2549 }
 0x3a4   : > { %v2607_v8 = vsel %vm2603_vm10, %v2548_v49, %v2550_v41  ;;  %v2608_v59 = vsel %vm2603_vm10, %v2550_v41, %v2552_v25  ;;  %v5882_v33 = vld [vmem:[#allocation3 + $0x4b0] sm:$0xff]  ;;  %v10622_v49 = vld [vmem:[#allocation2 + $0x50] sm:$0xff] }
 0x3a5   : > { %2667 = vst [vmem:[#allocation3 + $0x4c8] sm:$0xf0] %v2607_v8  ;;  %2668 = vst [vmem:[#allocation3 + $0x4d0] sm:$0xf0] %v2608_v59  ;;  %2944 = vrot.lane.b32.xlu1 %v10521_v1, %s8700_s18  ;;  %2942 = vrot.lane.b32.xlu0 %v10530_v38, %s8700_s18  ;;  %v7751_v42 = vpack.c.bf16 %v5882_v33, %v5852_v43  ;;  %v10632_v41 = vcombine.low %v10622_v49, %v10622_v49  ;;  %v10634_v8 = vld [vmem:[#allocation2 + $0x58] sm:$0xff] }
 0x3a7   : > { %v2556_v31 = vpop.permute.xlu1 %2555  ;;  %v2554_v10 = vpop.permute.xlu0 %2553 }
 0x3a8   : > { %v2609_v13 = vsel %vm2603_vm10, %v2552_v25, %v2554_v10  ;;  %v2610_v34 = vsel %vm2603_vm10, %v2554_v10, %v2556_v31  ;;  %v5883_v3 = vld [vmem:[#allocation3 + $0x4b8] sm:$0xff]  ;;  %v5884_v27 = vld [vmem:[#allocation3 + $0x4c0] sm:$0xff] }
 0x3a9   : > { %2669 = vst [vmem:[#allocation3 + $0x4d8] sm:$0xf0] %v2609_v13  ;;  %2670 = vst [vmem:[#allocation3 + $0x4e0] sm:$0xf0] %v2610_v34  ;;  %2948 = vrot.lane.b32.xlu1 %v10194_v23, %s8700_s18  ;;  %2946 = vrot.lane.b32.xlu0 %v10348_v37, %s8700_s18  ;;  %v7749_v12 = vpack.c.bf16 %v5883_v3, %v5853_v24  ;;  %v7779_v28 = vpack.c.bf16 %v5884_v27, %v5854_v57  ;;  %v10646_v34 = vld [vmem:[#allocation2 + $0x60] sm:$0xff] }
 0x3aa   : > { %v10644_v13 = vcombine.low %v10634_v8, %v10634_v8 }
 0x3ab   : > { %v2560_v17 = vpop.permute.xlu1 %2559  ;;  %v2558_v53 = vpop.permute.xlu0 %2557  ;;  %7750 = vmatprep.subr.bf16.mxu0 %v7749_v12 }
 0x3ac   : > { %v2611_v21 = vsel %vm2603_vm10, %v2556_v31, %v2558_v53  ;;  %v2612_v23 = vsel %vm2603_vm10, %v2558_v53, %v2560_v17  ;;  %7752 = vmatpush1.bf16.msra.mxu0 %v7751_v42  ;;  %v5885_v37 = vld [vmem:[#allocation3 + $0x4c8] sm:$0xff]  ;;  %v10656_v42 = vcombine.low %v10646_v34, %v10646_v34 }
 0x3ad   : > { %2671 = vst [vmem:[#allocation3 + $0x4e8] sm:$0xf0] %v2611_v21  ;;  %2672 = vst [vmem:[#allocation3 + $0x4f0] sm:$0xf0] %v2612_v23  ;;  %2952 = vrot.lane.b32.xlu1 %v10538_v19, %s8700_s18  ;;  %2950 = vrot.lane.b32.xlu0 %v10548_v48, %s8700_s18  ;;  %v7777_v16 = vpack.c.bf16 %v5885_v37, %v5855_v14  ;;  %v10670_v37 = vld [vmem:[#allocation2 + $0x70] sm:$0xff] }
 0x3af   : > { %v2564_v46 = vpop.permute.xlu1 %2563  ;;  %7778 = vmatprep.subr.bf16.mxu1 %v7777_v16  ;;  %v2562_v60 = vpop.permute.xlu0 %2561 }
 0x3b0   : > { %v2613_v62 = vsel %vm2603_vm10, %v2560_v17, %v2562_v60  ;;  %v2614_v44 = vsel %vm2603_vm10, %v2562_v60, %v2564_v46  ;;  %7780 = vmatpush1.bf16.msra.mxu1 %v7779_v28  ;;  %v10658_v17 = vld [vmem:[#allocation2 + $0x68] sm:$0xff]  ;;  %v10680_v60 = vcombine.low %v10670_v37, %v10670_v37 }
 0x3b1   : > { %2673 = vst [vmem:[#allocation3 + $0x4f8] sm:$0xf0] %v2613_v62  ;;  %2674 = vst [vmem:[#allocation3 + $0x500] sm:$0xf0] %v2614_v44  ;;  %2956 = vrot.lane.b32.xlu1 %v10550_v0, %s8700_s18  ;;  %2954 = vrot.lane.b32.xlu0 %v10560_v58, %s8700_s18  ;;  %v10668_v14 = vcombine.low %v10658_v17, %v10658_v17  ;;  %v10682_v62 = vld [vmem:[#allocation2 + $0x78] sm:$0xff] }
 0x3b3   : > { %v2568_v56 = vpop.permute.xlu1 %2567  ;;  %v2566_v39 = vpop.permute.xlu0 %2565 }
 0x3b4   : > { %v2615_v40 = vsel %vm2603_vm10, %v2564_v46, %v2566_v39  ;;  %v2616_v55 = vsel %vm2603_vm10, %v2566_v39, %v2568_v56 }
 0x3b5   : > { %2675 = vst [vmem:[#allocation3 + $0x508] sm:$0xf0] %v2615_v40  ;;  %2676 = vst [vmem:[#allocation3 + $0x510] sm:$0xf0] %v2616_v55  ;;  %2960 = vrot.lane.b32.xlu1 %v10562_v54, %s8700_s18  ;;  %2958 = vrot.lane.b32.xlu0 %v10572_v11, %s8700_s18  ;;  %v10691_v40 = vcombine.low %v10682_v62, %v10682_v62 }
 0x3b7   : > { %v2572_v61 = vpop.permute.xlu1 %2571  ;;  %v2570_v22 = vpop.permute.xlu0 %2569 }
 0x3b8   : > { %v2617_v30 = vsel %vm2603_vm10, %v2568_v56, %v2570_v22  ;;  %v2618_v35 = vsel %vm2603_vm10, %v2570_v22, %v2572_v61 }
 0x3b9   : > { %2677 = vst [vmem:[#allocation3 + $0x518] sm:$0xf0] %v2617_v30  ;;  %2678 = vst [vmem:[#allocation3 + $0x520] sm:$0xf0] %v2618_v35  ;;  %2964 = vrot.lane.b32.xlu1 %v10574_v26, %s8700_s18  ;;  %2962 = vrot.lane.b32.xlu0 %v10584_v5, %s8700_s18  ;;  %v8385_v35 = vld [vmem:[#allocation2 + $0x80] ss:$0 sps:$4 sm:$0xff]  }
 0x3bb   : > { %v2576_v2 = vpop.permute.xlu1 %2575  ;;  %v2574_v20 = vpop.permute.xlu0 %2573 }
 0x3bc   : > { %v2619_v15 = vsel %vm2603_vm10, %v2572_v61, %v2574_v20  ;;  %v2620_v50 = vsel %vm2603_vm10, %v2574_v20, %v2576_v2 }
 0x3bd   : > { %2679 = vst [vmem:[#allocation3 + $0x528] sm:$0xf0] %v2619_v15  ;;  %2680 = vst [vmem:[#allocation3 + $0x530] sm:$0xf0] %v2620_v50  ;;  %2968 = vrot.lane.b32.xlu1 %v10586_v9, %s8700_s18  ;;  %2966 = vrot.lane.b32.xlu0 %v10596_v47, %s8700_s18 }
 0x3bf   : > { %v2580_v6 = vpop.permute.xlu1 %2579  ;;  %v2578_v32 = vpop.permute.xlu0 %2577 }
 0x3c0   : > { %v2621_v36 = vsel %vm2603_vm10, %v2576_v2, %v2578_v32  ;;  %v2622_v4 = vsel %vm2603_vm10, %v2578_v32, %v2580_v6  ;;  %v10708_v32 = vld [vmem:[#allocation2 + $0x10] sm:$0xff] }
 0x3c1   : > { %2681 = vst [vmem:[#allocation3 + $0x538] sm:$0xf0] %v2621_v36  ;;  %2682 = vst [vmem:[#allocation3 + $0x540] sm:$0xf0] %v2622_v4  ;;  %2972 = vrot.lane.b32.xlu1 %v10598_v52, %s8700_s18  ;;  %2970 = vrot.lane.b32.xlu0 %v10608_v7, %s8700_s18 }
 0x3c3   : > { %v2584_v45 = vpop.permute.xlu1 %2583  ;;  %v2582_v18 = vpop.permute.xlu0 %2581 }
 0x3c4   : > { %v2623_v29 = vsel %vm2603_vm10, %v2580_v6, %v2582_v18  ;;  %v2624_v25 = vsel %vm2603_vm10, %v2582_v18, %v2584_v45  ;;  %v10703_v6 = vcombine.high %v10521_v1, %v10521_v1 }
 0x3c5   : > { %2683 = vst [vmem:[#allocation3 + $0x548] sm:$0xf0] %v2623_v29  ;;  %2684 = vst [vmem:[#allocation3 + $0x550] sm:$0xf0] %v2624_v25  ;;  %2976 = vrot.lane.b32.xlu1 %v10610_v51, %s8700_s18  ;;  %2974 = vrot.lane.b32.xlu0 %v10620_v63, %s8700_s18  ;;  %v10714_v29 = vcombine.high %v10708_v32, %v10708_v32 }
 0x3c7   : > { %v2588_v59 = vpop.permute.xlu1 %2587  ;;  %v2586_v31 = vpop.permute.xlu0 %2585 }
 0x3c8   : > { %v2625_v10 = vsel %vm2603_vm10, %v2584_v45, %v2586_v31  ;;  %v2626_v33 = vsel %vm2603_vm10, %v2586_v31, %v2588_v59 }
 0x3c9   : > { %2685 = vst [vmem:[#allocation3 + $0x558] sm:$0xf0] %v2625_v10  ;;  %2686 = vst [vmem:[#allocation3 + $0x560] sm:$0xf0] %v2626_v33  ;;  %2980 = vrot.lane.b32.xlu1 %v10622_v49, %s8700_s18  ;;  %2978 = vrot.lane.b32.xlu0 %v10632_v41, %s8700_s18  ;;  %v10724_v33 = vcombine.high %v10538_v19, %v10538_v19 }
 0x3cb   : > { %v2592_v24 = vpop.permute.xlu1 %2591  ;;  %v2590_v3 = vpop.permute.xlu0 %2589 }
 0x3cc   : > { %v2627_v12 = vsel %vm2603_vm10, %v2588_v59, %v2590_v3  ;;  %v2628_v43 = vsel %vm2603_vm10, %v2590_v3, %v2592_v24 }
 0x3cd   : > { %2687 = vst [vmem:[#allocation3 + $0x568] sm:$0xf0] %v2627_v12  ;;  %2688 = vst [vmem:[#allocation3 + $0x570] sm:$0xf0] %v2628_v43  ;;  %2984 = vrot.lane.b32.xlu1 %v10634_v8, %s8700_s18  ;;  %2982 = vrot.lane.b32.xlu0 %v10644_v13, %s8700_s18 }
 0x3cf   : > { %v2596_v53 = vpop.permute.xlu1 %2595  ;;  %v2594_v27 = vpop.permute.xlu0 %2593 }
 0x3d0   : > { %v2629_v21 = vsel %vm2603_vm10, %v2592_v24, %v2594_v27  ;;  %v2630_v23 = vsel %vm2603_vm10, %v2594_v27, %v2596_v53 }
 0x3d1   : > { %2689 = vst [vmem:[#allocation3 + $0x578] sm:$0xf0] %v2629_v21  ;;  %2690 = vst [vmem:[#allocation3 + $0x580] sm:$0xf0] %v2630_v23  ;;  %2988 = vrot.lane.b32.xlu1 %v10646_v34, %s8700_s18  ;;  %2986 = vrot.lane.b32.xlu0 %v10656_v42, %s8700_s18 }
 0x3d3   : > { %v2600_v16 = vpop.permute.xlu1 %2599  ;;  %v2598_v57 = vpop.permute.xlu0 %2597 }
 0x3d4   : > { %v2631_v28 = vsel %vm2603_vm10, %v2596_v53, %v2598_v57  ;;  %v2632_v46 = vsel %vm2603_vm10, %v2598_v57, %v2600_v16  ;;  %v10734_v53 = vcombine.high %v10550_v0, %v10550_v0  ;;  %v10744_v57 = vcombine.high %v10562_v54, %v10562_v54 }
 0x3d5   : > { %2691 = vst [vmem:[#allocation3 + $0x588] sm:$0xf0] %v2631_v28  ;;  %2692 = vst [vmem:[#allocation3 + $0x590] sm:$0xf0] %v2632_v46  ;;  %2992 = vrot.lane.b32.xlu1 %v10658_v17, %s8700_s18  ;;  %2990 = vrot.lane.b32.xlu0 %v10668_v14, %s8700_s18 }
 0x3d7   : > { %v2742_v44 = vpop.permute.xlu1 %2741  ;;  %v2602_v56 = vpop.permute.xlu0 %2601 }
 0x3d8   : > { %v2633_v39 = vsel %vm2603_vm10, %v2600_v16, %v2602_v56  ;;  %vm6152_vm10 = vcmask 916480  }
 0x3d9   : > { %2693 = vst [vmem:[#allocation3 + $0x598] sm:$0xf0] %v2633_v39  ;;  %2996 = vrot.lane.b32.xlu1 %v10670_v37, %s8700_s18  ;;  %2994 = vrot.lane.b32.xlu0 %v10680_v60, %s8700_s18  ;;  %v10754_v39 = vcombine.high %v10574_v26, %v10574_v26 }
 0x3db   : > { %v2746_v55 = vpop.permute.xlu1 %2745  ;;  %v2744_v61 = vpop.permute.xlu0 %2743 }
 0x3dc   : > { %v2804_v22 = vsel %vm2803_vm11, %v2742_v44, %v2744_v61  ;;  %v2805_v30 = vsel %vm2803_vm11, %v2744_v61, %v2746_v55 }
 0x3dd   : > { %2864 = vst [vmem:[#allocation3 + $0x5a0] sm:$0xf] %v2804_v22  ;;  %2865 = vst [vmem:[#allocation3 + $0x5a8] sm:$0xf] %v2805_v30  ;;  %3000 = vrot.lane.b32.xlu1 %v10682_v62, %s8700_s18  ;;  %2998 = vrot.lane.b32.xlu0 %v10691_v40, %s8700_s18 }
 0x3df   : > { %v2750_v2 = vpop.permute.xlu1 %2749  ;;  %v2748_v20 = vpop.permute.xlu0 %2747 }
 0x3e0   : > { %v2806_v15 = vsel %vm2803_vm11, %v2746_v55, %v2748_v20  ;;  %v2807_v50 = vsel %vm2803_vm11, %v2748_v20, %v2750_v2 }
 0x3e1   : > { %2866 = vst [vmem:[#allocation3 + $0x5b0] sm:$0xf] %v2806_v15  ;;  %2867 = vst [vmem:[#allocation3 + $0x5b8] sm:$0xf] %v2807_v50  ;;  %3142 = vrot.lane.b32.xlu1 %v10521_v1, %s8701_s30  ;;  %3002 = vrot.lane.b32.xlu0 %v8385_v35, %s8700_s18  ;;  %v10764_v35 = vcombine.high %v10586_v9, %v10586_v9 }
 0x3e3   : > { %v2754_v36 = vpop.permute.xlu1 %2753  ;;  %v2752_v4 = vpop.permute.xlu0 %2751 }
 0x3e4   : > { %v2808_v45 = vsel %vm2803_vm11, %v2750_v2, %v2752_v4  ;;  %v2809_v18 = vsel %vm2803_vm11, %v2752_v4, %v2754_v36 }
 0x3e5   : > { %2868 = vst [vmem:[#allocation3 + $0x5c0] sm:$0xf] %v2808_v45  ;;  %2869 = vst [vmem:[#allocation3 + $0x5c8] sm:$0xf] %v2809_v18  ;;  %3146 = vrot.lane.b32.xlu1 %v10708_v32, %s8701_s30  ;;  %3144 = vrot.lane.b32.xlu0 %v10703_v6, %s8701_s30 }
 0x3e7   : > { %v2758_v25 = vpop.permute.xlu1 %2757  ;;  %v2756_v59 = vpop.permute.xlu0 %2755 }
 0x3e8   : > { %v2810_v31 = vsel %vm2803_vm11, %v2754_v36, %v2756_v59  ;;  %v2811_v10 = vsel %vm2803_vm11, %v2756_v59, %v2758_v25  ;;  %v10774_v36 = vcombine.high %v10598_v52, %v10598_v52  ;;  %v10784_v59 = vcombine.high %v10610_v51, %v10610_v51 }
 0x3e9   : > { %2870 = vst [vmem:[#allocation3 + $0x5d0] sm:$0xf] %v2810_v31  ;;  %2871 = vst [vmem:[#allocation3 + $0x5d8] sm:$0xf] %v2811_v10  ;;  %3150 = vrot.lane.b32.xlu1 %v10538_v19, %s8701_s30  ;;  %3148 = vrot.lane.b32.xlu0 %v10714_v29, %s8701_s30 }
 0x3eb   : > { %v2762_v24 = vpop.permute.xlu1 %2761  ;;  %v2760_v3 = vpop.permute.xlu0 %2759 }
 0x3ec   : > { %v2812_v12 = vsel %vm2803_vm11, %v2758_v25, %v2760_v3  ;;  %v2813_v43 = vsel %vm2803_vm11, %v2760_v3, %v2762_v24 }
 0x3ed   : > { %2872 = vst [vmem:[#allocation3 + $0x5e0] sm:$0xf] %v2812_v12  ;;  %2873 = vst [vmem:[#allocation3 + $0x5e8] sm:$0xf] %v2813_v43  ;;  %3154 = vrot.lane.b32.xlu1 %v10550_v0, %s8701_s30  ;;  %3152 = vrot.lane.b32.xlu0 %v10724_v33, %s8701_s30  ;;  %v10794_v12 = vcombine.high %v10622_v49, %v10622_v49 }
 0x3ef   : > { %v2766_v27 = vpop.permute.xlu1 %2765  ;;  %v2764_v21 = vpop.permute.xlu0 %2763 }
 0x3f0   : > { %v2814_v23 = vsel %vm2803_vm11, %v2762_v24, %v2764_v21  ;;  %v2815_v16 = vsel %vm2803_vm11, %v2764_v21, %v2766_v27 }
 0x3f1   : > { %2874 = vst [vmem:[#allocation3 + $0x5f0] sm:$0xf] %v2814_v23  ;;  %2875 = vst [vmem:[#allocation3 + $0x5f8] sm:$0xf] %v2815_v16  ;;  %3158 = vrot.lane.b32.xlu1 %v10562_v54, %s8701_s30  ;;  %3156 = vrot.lane.b32.xlu0 %v10734_v53, %s8701_s30  ;;  %v10804_v16 = vcombine.high %v10634_v8, %v10634_v8 }
 0x3f3   : > { %v2770_v28 = vpop.permute.xlu1 %2769  ;;  %v2768_v46 = vpop.permute.xlu0 %2767 }
 0x3f4   : > { %v2816_v44 = vsel %vm2803_vm11, %v2766_v27, %v2768_v46  ;;  %v2817_v56 = vsel %vm2803_vm11, %v2768_v46, %v2770_v28 }
 0x3f5   : > { %2876 = vst [vmem:[#allocation3 + $0x600] sm:$0xf] %v2816_v44  ;;  %2877 = vst [vmem:[#allocation3 + $0x608] sm:$0xf] %v2817_v56  ;;  %3162 = vrot.lane.b32.xlu1 %v10574_v26, %s8701_s30  ;;  %3160 = vrot.lane.b32.xlu0 %v10744_v57, %s8701_s30 }
 0x3f7   : > { %v2774_v55 = vpop.permute.xlu1 %2773  ;;  %v2772_v61 = vpop.permute.xlu0 %2771 }
 0x3f8   : > { %v2818_v22 = vsel %vm2803_vm11, %v2770_v28, %v2772_v61  ;;  %v2819_v30 = vsel %vm2803_vm11, %v2772_v61, %v2774_v55 }
 0x3f9   : > { %2878 = vst [vmem:[#allocation3 + $0x610] sm:$0xf] %v2818_v22  ;;  %2879 = vst [vmem:[#allocation3 + $0x618] sm:$0xf] %v2819_v30  ;;  %3166 = vrot.lane.b32.xlu1 %v10586_v9, %s8701_s30  ;;  %3164 = vrot.lane.b32.xlu0 %v10754_v39, %s8701_s30 }
 0x3fb   : > { %v2778_v2 = vpop.permute.xlu1 %2777  ;;  %v2776_v20 = vpop.permute.xlu0 %2775 }
 0x3fc   : > { %v2820_v15 = vsel %vm2803_vm11, %v2774_v55, %v2776_v20  ;;  %v2821_v50 = vsel %vm2803_vm11, %v2776_v20, %v2778_v2  ;;  %v10814_v55 = vcombine.high %v10646_v34, %v10646_v34  ;;  %v10824_v20 = vcombine.high %v10658_v17, %v10658_v17 }
 0x3fd   : > { %2880 = vst [vmem:[#allocation3 + $0x620] sm:$0xf] %v2820_v15  ;;  %2881 = vst [vmem:[#allocation3 + $0x628] sm:$0xf] %v2821_v50  ;;  %3170 = vrot.lane.b32.xlu1 %v10598_v52, %s8701_s30  ;;  %3168 = vrot.lane.b32.xlu0 %v10764_v35, %s8701_s30 }
 0x3ff   : > { %v2782_v4 = vpop.permute.xlu1 %2781  ;;  %v2780_v45 = vpop.permute.xlu0 %2779 }
 0x400   : > { %v2822_v18 = vsel %vm2803_vm11, %v2778_v2, %v2780_v45  ;;  %v2823_v25 = vsel %vm2803_vm11, %v2780_v45, %v2782_v4 }
 0x401   : > { %2882 = vst [vmem:[#allocation3 + $0x630] sm:$0xf] %v2822_v18  ;;  %2883 = vst [vmem:[#allocation3 + $0x638] sm:$0xf] %v2823_v25  ;;  %3174 = vrot.lane.b32.xlu1 %v10610_v51, %s8701_s30  ;;  %3172 = vrot.lane.b32.xlu0 %v10774_v36, %s8701_s30  ;;  %v10834_v18 = vcombine.high %v10670_v37, %v10670_v37 }
 0x403   : > { %v2786_v31 = vpop.permute.xlu1 %2785  ;;  %v2784_v10 = vpop.permute.xlu0 %2783 }
 0x404   : > { %v2824_v24 = vsel %vm2803_vm11, %v2782_v4, %v2784_v10  ;;  %v2825_v3 = vsel %vm2803_vm11, %v2784_v10, %v2786_v31 }
 0x405   : > { %2884 = vst [vmem:[#allocation3 + $0x640] sm:$0xf] %v2824_v24  ;;  %2885 = vst [vmem:[#allocation3 + $0x648] sm:$0xf] %v2825_v3  ;;  %3178 = vrot.lane.b32.xlu1 %v10622_v49, %s8701_s30  ;;  %3176 = vrot.lane.b32.xlu0 %v10784_v59, %s8701_s30  ;;  %v10843_v24 = vcombine.high %v10682_v62, %v10682_v62  ;;  %v3110_v3 = vld [vmem:[#allocation2 + $0x80] sm:$0xf] }
 0x407   : > { %v2790_v43 = vpop.permute.xlu1 %2789  ;;  %v2788_v27 = vpop.permute.xlu0 %2787 }
 0x408   : > { %v2826_v21 = vsel %vm2803_vm11, %v2786_v31, %v2788_v27  ;;  %v2827_v23 = vsel %vm2803_vm11, %v2788_v27, %v2790_v43 }
 0x409   : > { %2886 = vst [vmem:[#allocation3 + $0x650] sm:$0xf] %v2826_v21  ;;  %2887 = vst [vmem:[#allocation3 + $0x658] sm:$0xf] %v2827_v23  ;;  %3182 = vrot.lane.b32.xlu1 %v10634_v8, %s8701_s30  ;;  %3180 = vrot.lane.b32.xlu0 %v10794_v12, %s8701_s30 }
 0x40b   : > { %v2794_v28 = vpop.permute.xlu1 %2793  ;;  %v2792_v46 = vpop.permute.xlu0 %2791 }
 0x40c   : > { %v2828_v44 = vsel %vm2803_vm11, %v2790_v43, %v2792_v46  ;;  %v2829_v56 = vsel %vm2803_vm11, %v2792_v46, %v2794_v28 }
 0x40d   : > { %2888 = vst [vmem:[#allocation3 + $0x660] sm:$0xf] %v2828_v44  ;;  %2889 = vst [vmem:[#allocation3 + $0x668] sm:$0xf] %v2829_v56  ;;  %3186 = vrot.lane.b32.xlu1 %v10646_v34, %s8701_s30  ;;  %3184 = vrot.lane.b32.xlu0 %v10804_v16, %s8701_s30 }
 0x40f   : > { %v2798_v61 = vpop.permute.xlu1 %2797  ;;  %v2796_v22 = vpop.permute.xlu0 %2795 }
 0x410   : > { %v2830_v30 = vsel %vm2803_vm11, %v2794_v28, %v2796_v22  ;;  %v2831_v2 = vsel %vm2803_vm11, %v2796_v22, %v2798_v61 }
 0x411   : > { %2890 = vst [vmem:[#allocation3 + $0x670] sm:$0xf] %v2830_v30  ;;  %2891 = vst [vmem:[#allocation3 + $0x678] sm:$0xf] %v2831_v2  ;;  %3190 = vrot.lane.b32.xlu1 %v10658_v17, %s8701_s30  ;;  %3188 = vrot.lane.b32.xlu0 %v10814_v55, %s8701_s30 }
 0x413   : > { %v2802_v15 = vpop.permute.xlu1 %2801  ;;  %v2800_v50 = vpop.permute.xlu0 %2799 }
 0x414   : > { %v2832_v4 = vsel %vm2803_vm11, %v2798_v61, %v2800_v50  ;;  %v2833_v45 = vsel %vm2803_vm11, %v2800_v50, %v2802_v15  ;;  %v10862_v61 = vcombine.low %v10708_v32, %v10708_v32 }
 0x415   : > { %2892 = vst [vmem:[#allocation3 + $0x680] sm:$0xf] %v2832_v4  ;;  %2893 = vst [vmem:[#allocation3 + $0x688] sm:$0xf] %v2833_v45  ;;  %3194 = vrot.lane.b32.xlu1 %v10670_v37, %s8701_s30  ;;  %3192 = vrot.lane.b32.xlu0 %v10824_v20, %s8701_s30 }
 0x417   : > { %v2945_v25 = vpop.permute.xlu1 %2944  ;;  %v2943_v31 = vpop.permute.xlu0 %2942 }
 0x418   : > { %v3005_v10 = vsel %vm3004_vm12, %v2943_v31, %v2945_v25 }
 0x419   : > { %3065 = vst [vmem:[#allocation3 + $0x5a0] sm:$0xf0] %v3005_v10  ;;  %3198 = vrot.lane.b32.xlu1 %v10682_v62, %s8701_s30  ;;  %3196 = vrot.lane.b32.xlu0 %v10834_v18, %s8701_s30 }
 0x41b   : > { %v2949_v43 = vpop.permute.xlu1 %2948  ;;  %v2947_v27 = vpop.permute.xlu0 %2946 }
 0x41c   : > { %v3006_v21 = vsel %vm3004_vm12, %v2945_v25, %v2947_v27  ;;  %v3007_v23 = vsel %vm3004_vm12, %v2947_v27, %v2949_v43 }
 0x41d   : > { %3066 = vst [vmem:[#allocation3 + $0x5a8] sm:$0xf0] %v3006_v21  ;;  %3067 = vst [vmem:[#allocation3 + $0x5b0] sm:$0xf0] %v3007_v23  ;;  %3202 = vrot.lane.b32.xlu1 %v3110_v3, %s8701_s30  ;;  %3200 = vrot.lane.b32.xlu0 %v10843_v24, %s8701_s30 }
 0x41f   : > { %v2953_v28 = vpop.permute.xlu1 %2952  ;;  %v2951_v46 = vpop.permute.xlu0 %2950 }
 0x420   : > { %v3008_v44 = vsel %vm3004_vm12, %v2949_v43, %v2951_v46  ;;  %v3009_v56 = vsel %vm3004_vm12, %v2951_v46, %v2953_v28 }
 0x421   : > { %3068 = vst [vmem:[#allocation3 + $0x5b8] sm:$0xf0] %v3008_v44  ;;  %3069 = vst [vmem:[#allocation3 + $0x5c0] sm:$0xf0] %v3009_v56  ;;  %3345 = vrot.lane.b32.xlu1 %v10521_v1, %s8702_s13  ;;  %3343 = vrot.lane.b32.xlu0 %v10530_v38, %s8702_s13 }
 0x423   : > { %v2957_v22 = vpop.permute.xlu1 %2956  ;;  %v2955_v30 = vpop.permute.xlu0 %2954 }
 0x424   : > { %v3010_v2 = vsel %vm3004_vm12, %v2953_v28, %v2955_v30  ;;  %v3011_v15 = vsel %vm3004_vm12, %v2955_v30, %v2957_v22 }
 0x425   : > { %3070 = vst [vmem:[#allocation3 + $0x5c8] sm:$0xf0] %v3010_v2  ;;  %3071 = vst [vmem:[#allocation3 + $0x5d0] sm:$0xf0] %v3011_v15  ;;  %3349 = vrot.lane.b32.xlu1 %v10708_v32, %s8702_s13  ;;  %3347 = vrot.lane.b32.xlu0 %v10862_v61, %s8702_s13 }
 0x427   : > { %v2961_v50 = vpop.permute.xlu1 %2960  ;;  %v2959_v38 = vpop.permute.xlu0 %2958 }
 0x428   : > { %v3012_v4 = vsel %vm3004_vm12, %v2957_v22, %v2959_v38  ;;  %v3013_v45 = vsel %vm3004_vm12, %v2959_v38, %v2961_v50 }
 0x429   : > { %3072 = vst [vmem:[#allocation3 + $0x5d8] sm:$0xf0] %v3012_v4  ;;  %3073 = vst [vmem:[#allocation3 + $0x5e0] sm:$0xf0] %v3013_v45  ;;  %3353 = vrot.lane.b32.xlu1 %v10538_v19, %s8702_s13  ;;  %3351 = vrot.lane.b32.xlu0 %v10548_v48, %s8702_s13 }
 0x42b   : > { %v2965_v25 = vpop.permute.xlu1 %2964  ;;  %v2963_v31 = vpop.permute.xlu0 %2962 }
 0x42c   : > { %v3014_v10 = vsel %vm3004_vm12, %v2961_v50, %v2963_v31  ;;  %v3015_v3 = vsel %vm3004_vm12, %v2963_v31, %v2965_v25 }
 0x42d   : > { %3074 = vst [vmem:[#allocation3 + $0x5e8] sm:$0xf0] %v3014_v10  ;;  %3075 = vst [vmem:[#allocation3 + $0x5f0] sm:$0xf0] %v3015_v3  ;;  %3357 = vrot.lane.b32.xlu1 %v10550_v0, %s8702_s13  ;;  %3355 = vrot.lane.b32.xlu0 %v10560_v58, %s8702_s13 }
 0x42f   : > { %v2969_v43 = vpop.permute.xlu1 %2968  ;;  %v2967_v27 = vpop.permute.xlu0 %2966 }
 0x430   : > { %v3016_v21 = vsel %vm3004_vm12, %v2965_v25, %v2967_v27  ;;  %v3017_v48 = vsel %vm3004_vm12, %v2967_v27, %v2969_v43 }
 0x431   : > { %3076 = vst [vmem:[#allocation3 + $0x5f8] sm:$0xf0] %v3016_v21  ;;  %3077 = vst [vmem:[#allocation3 + $0x600] sm:$0xf0] %v3017_v48  ;;  %3361 = vrot.lane.b32.xlu1 %v10562_v54, %s8702_s13  ;;  %3359 = vrot.lane.b32.xlu0 %v10572_v11, %s8702_s13 }
 0x433   : > { %v2973_v23 = vpop.permute.xlu1 %2972  ;;  %v2971_v28 = vpop.permute.xlu0 %2970 }
 0x434   : > { %v3018_v46 = vsel %vm3004_vm12, %v2969_v43, %v2971_v28  ;;  %v3019_v58 = vsel %vm3004_vm12, %v2971_v28, %v2973_v23 }
 0x435   : > { %3078 = vst [vmem:[#allocation3 + $0x608] sm:$0xf0] %v3018_v46  ;;  %3079 = vst [vmem:[#allocation3 + $0x610] sm:$0xf0] %v3019_v58  ;;  %3365 = vrot.lane.b32.xlu1 %v10574_v26, %s8702_s13  ;;  %3363 = vrot.lane.b32.xlu0 %v10584_v5, %s8702_s13 }
 0x437   : > { %v2977_v44 = vpop.permute.xlu1 %2976  ;;  %v2975_v56 = vpop.permute.xlu0 %2974 }
 0x438   : > { %v3020_v22 = vsel %vm3004_vm12, %v2973_v23, %v2975_v56  ;;  %v3021_v11 = vsel %vm3004_vm12, %v2975_v56, %v2977_v44 }
 0x439   : > { %3080 = vst [vmem:[#allocation3 + $0x618] sm:$0xf0] %v3020_v22  ;;  %3081 = vst [vmem:[#allocation3 + $0x620] sm:$0xf0] %v3021_v11  ;;  %3369 = vrot.lane.b32.xlu1 %v10586_v9, %s8702_s13  ;;  %3367 = vrot.lane.b32.xlu0 %v10596_v47, %s8702_s13 }
 0x43b   : > { %v2981_v30 = vpop.permute.xlu1 %2980  ;;  %v2979_v2 = vpop.permute.xlu0 %2978 }
 0x43c   : > { %v3022_v15 = vsel %vm3004_vm12, %v2977_v44, %v2979_v2  ;;  %v3023_v5 = vsel %vm3004_vm12, %v2979_v2, %v2981_v30 }
 0x43d   : > { %3082 = vst [vmem:[#allocation3 + $0x628] sm:$0xf0] %v3022_v15  ;;  %3083 = vst [vmem:[#allocation3 + $0x630] sm:$0xf0] %v3023_v5  ;;  %3373 = vrot.lane.b32.xlu1 %v10598_v52, %s8702_s13  ;;  %3371 = vrot.lane.b32.xlu0 %v10608_v7, %s8702_s13 }
 0x43f   : > { %v2985_v50 = vpop.permute.xlu1 %2984  ;;  %v2983_v38 = vpop.permute.xlu0 %2982 }
 0x440   : > { %v3024_v4 = vsel %vm3004_vm12, %v2981_v30, %v2983_v38  ;;  %v3025_v47 = vsel %vm3004_vm12, %v2983_v38, %v2985_v50 }
 0x441   : > { %3084 = vst [vmem:[#allocation3 + $0x638] sm:$0xf0] %v3024_v4  ;;  %3085 = vst [vmem:[#allocation3 + $0x640] sm:$0xf0] %v3025_v47  ;;  %3377 = vrot.lane.b32.xlu1 %v10610_v51, %s8702_s13  ;;  %3375 = vrot.lane.b32.xlu0 %v10620_v63, %s8702_s13 }
 0x443   : > { %v2989_v45 = vpop.permute.xlu1 %2988  ;;  %v2987_v25 = vpop.permute.xlu0 %2986 }
 0x444   : > { %v3026_v31 = vsel %vm3004_vm12, %v2985_v50, %v2987_v25  ;;  %v3027_v7 = vsel %vm3004_vm12, %v2987_v25, %v2989_v45 }
 0x445   : > { %3086 = vst [vmem:[#allocation3 + $0x648] sm:$0xf0] %v3026_v31  ;;  %3087 = vst [vmem:[#allocation3 + $0x650] sm:$0xf0] %v3027_v7  ;;  %3381 = vrot.lane.b32.xlu1 %v10622_v49, %s8702_s13  ;;  %3379 = vrot.lane.b32.xlu0 %v10632_v41, %s8702_s13 }
 0x447   : > { %v2993_v10 = vpop.permute.xlu1 %2992  ;;  %v2991_v3 = vpop.permute.xlu0 %2990 }
 0x448   : > { %v3028_v43 = vsel %vm3004_vm12, %v2989_v45, %v2991_v3  ;;  %v3029_v63 = vsel %vm3004_vm12, %v2991_v3, %v2993_v10 }
 0x449   : > { %3088 = vst [vmem:[#allocation3 + $0x658] sm:$0xf0] %v3028_v43  ;;  %3089 = vst [vmem:[#allocation3 + $0x660] sm:$0xf0] %v3029_v63  ;;  %3385 = vrot.lane.b32.xlu1 %v10634_v8, %s8702_s13  ;;  %3383 = vrot.lane.b32.xlu0 %v10644_v13, %s8702_s13 }
 0x44b   : > { %v2997_v27 = vpop.permute.xlu1 %2996  ;;  %v2995_v21 = vpop.permute.xlu0 %2994 }
 0x44c   : > { %v3030_v48 = vsel %vm3004_vm12, %v2993_v10, %v2995_v21  ;;  %v3031_v41 = vsel %vm3004_vm12, %v2995_v21, %v2997_v27 }
 0x44d   : > { %3090 = vst [vmem:[#allocation3 + $0x668] sm:$0xf0] %v3030_v48  ;;  %3091 = vst [vmem:[#allocation3 + $0x670] sm:$0xf0] %v3031_v41  ;;  %3389 = vrot.lane.b32.xlu1 %v10646_v34, %s8702_s13  ;;  %3387 = vrot.lane.b32.xlu0 %v10656_v42, %s8702_s13 }
 0x44f   : > { %v3001_v23 = vpop.permute.xlu1 %3000  ;;  %v2999_v28 = vpop.permute.xlu0 %2998 }
 0x450   : > { %v3032_v46 = vsel %vm3004_vm12, %v2997_v27, %v2999_v28  ;;  %v3033_v13 = vsel %vm3004_vm12, %v2999_v28, %v3001_v23 }
 0x451   : > { %3092 = vst [vmem:[#allocation3 + $0x678] sm:$0xf0] %v3032_v46  ;;  %3093 = vst [vmem:[#allocation3 + $0x680] sm:$0xf0] %v3033_v13  ;;  %3393 = vrot.lane.b32.xlu1 %v10658_v17, %s8702_s13  ;;  %3391 = vrot.lane.b32.xlu0 %v10668_v14, %s8702_s13  ;;  %v8401_v14 = vld [vmem:[#allocation2 + $0x80] ss:$0 sps:$4 sm:$0xff]  }
 0x453   : > { %v3143_v58 = vpop.permute.xlu1 %3142  ;;  %v3003_v44 = vpop.permute.xlu0 %3002 }
 0x454   : > { %v3034_v56 = vsel %vm3004_vm12, %v3001_v23, %v3003_v44 }
 0x455   : > { %3094 = vst [vmem:[#allocation3 + $0x688] sm:$0xf0] %v3034_v56  ;;  %3397 = vrot.lane.b32.xlu1 %v10670_v37, %s8702_s13  ;;  %3395 = vrot.lane.b32.xlu0 %v10680_v60, %s8702_s13 }
 0x457   : > { %v3147_v42 = vpop.permute.xlu1 %3146  ;;  %v3145_v22 = vpop.permute.xlu0 %3144 }
 0x458   : > { %v3205_v11 = vsel %vm3204_vm13, %v3143_v58, %v3145_v22  ;;  %v3206_v30 = vsel %vm3204_vm13, %v3145_v22, %v3147_v42 }
 0x459   : > { %3265 = vst [vmem:[#allocation3 + $0x690] sm:$0xf] %v3205_v11  ;;  %3266 = vst [vmem:[#allocation3 + $0x698] sm:$0xf] %v3206_v30  ;;  %3401 = vrot.lane.b32.xlu1 %v10682_v62, %s8702_s13  ;;  %3399 = vrot.lane.b32.xlu0 %v10691_v40, %s8702_s13 }
 0x45b   : > { %v3151_v2 = vpop.permute.xlu1 %3150  ;;  %v3149_v15 = vpop.permute.xlu0 %3148 }
 0x45c   : > { %v3207_v60 = vsel %vm3204_vm13, %v3147_v42, %v3149_v15  ;;  %v3208_v5 = vsel %vm3204_vm13, %v3149_v15, %v3151_v2 }
 0x45d   : > { %3267 = vst [vmem:[#allocation3 + $0x6a0] sm:$0xf] %v3207_v60  ;;  %3268 = vst [vmem:[#allocation3 + $0x6a8] sm:$0xf] %v3208_v5  ;;  %3543 = vrot.lane.b32.xlu1 %v10521_v1, %s8703_s0  ;;  %3403 = vrot.lane.b32.xlu0 %v8401_v14, %s8702_s13  ;;  %v3696_v5 = vld [vmem:[#allocation2 + $0x8] sm:$0xff]  ;;  %s7536_s13 = scalar_lea.sflag [#allocation6], %s8981_s12 }
 0x45f   : > { %v3155_v50 = vpop.permute.xlu1 %3154  ;;  %v3153_v38 = vpop.permute.xlu0 %3152 }
 0x460   : > { %v3209_v4 = vsel %vm3204_vm13, %v3151_v2, %v3153_v38  ;;  %v3210_v40 = vsel %vm3204_vm13, %v3153_v38, %v3155_v50 }
 0x461   : > { %3269 = vst [vmem:[#allocation3 + $0x6b0] sm:$0xf] %v3209_v4  ;;  %3270 = vst [vmem:[#allocation3 + $0x6b8] sm:$0xf] %v3210_v40  ;;  %3547 = vrot.lane.b32.xlu1 %v10708_v32, %s8703_s0  ;;  %3545 = vrot.lane.b32.xlu0 %v10703_v6, %s8703_s0  ;;  %v3728_v4 = vcombine.low %v3696_v5, %v3696_v5 }
 0x463   : > { %v3159_v47 = vpop.permute.xlu1 %3158  ;;  %v3157_v45 = vpop.permute.xlu0 %3156 }
 0x464   : > { %v3211_v1 = vsel %vm3204_vm13, %v3155_v50, %v3157_v45  ;;  %v3212_v25 = vsel %vm3204_vm13, %v3157_v45, %v3159_v47  ;;  %v3698_v45 = vld [vmem:[#allocation2 + $0x18] sm:$0xff] }
 0x465   : > { %3271 = vst [vmem:[#allocation3 + $0x6c0] sm:$0xf] %v3211_v1  ;;  %3272 = vst [vmem:[#allocation3 + $0x6c8] sm:$0xf] %v3212_v25  ;;  %3551 = vrot.lane.b32.xlu1 %v10538_v19, %s8703_s0  ;;  %3549 = vrot.lane.b32.xlu0 %v10714_v29, %s8703_s0 }
 0x467   : > { %v3163_v31 = vpop.permute.xlu1 %3162  ;;  %v3161_v7 = vpop.permute.xlu0 %3160 }
 0x468   : > { %v3213_v10 = vsel %vm3204_vm13, %v3159_v47, %v3161_v7  ;;  %v3214_v6 = vsel %vm3204_vm13, %v3161_v7, %v3163_v31 }
 0x469   : > { %3273 = vst [vmem:[#allocation3 + $0x6d0] sm:$0xf] %v3213_v10  ;;  %3274 = vst [vmem:[#allocation3 + $0x6d8] sm:$0xf] %v3214_v6  ;;  %3555 = vrot.lane.b32.xlu1 %v10550_v0, %s8703_s0  ;;  %3553 = vrot.lane.b32.xlu0 %v10724_v33, %s8703_s0  ;;  %v5913_v10 = vld [vmem:[#allocation3 + $0x5a8] sm:$0xff] }
 0x46b   : > { %v3167_v3 = vpop.permute.xlu1 %3166  ;;  %v3165_v43 = vpop.permute.xlu0 %3164 }
 0x46c   : > { %v3215_v19 = vsel %vm3204_vm13, %v3163_v31, %v3165_v43  ;;  %v3216_v29 = vsel %vm3204_vm13, %v3165_v43, %v3167_v3  ;;  %v5912_v43 = vld [vmem:[#allocation3 + $0x5a0] sm:$0xff] }
 0x46d   : > { %3275 = vst [vmem:[#allocation3 + $0x6e0] sm:$0xf] %v3215_v19  ;;  %3276 = vst [vmem:[#allocation3 + $0x6e8] sm:$0xf] %v3216_v29  ;;  %3559 = vrot.lane.b32.xlu1 %v10562_v54, %s8703_s0  ;;  %3557 = vrot.lane.b32.xlu0 %v10734_v53, %s8703_s0  ;;  %v3730_v19 = vcombine.low %v3698_v45, %v3698_v45 }
 0x46f   : > { %v3171_v63 = vpop.permute.xlu1 %3170  ;;  %v3169_v27 = vpop.permute.xlu0 %3168 }
 0x470   : > { %v3217_v0 = vsel %vm3204_vm13, %v3167_v3, %v3169_v27  ;;  %v3218_v33 = vsel %vm3204_vm13, %v3169_v27, %v3171_v63 }
 0x471   : > { %3277 = vst [vmem:[#allocation3 + $0x6f0] sm:$0xf] %v3217_v0  ;;  %3278 = vst [vmem:[#allocation3 + $0x6f8] sm:$0xf] %v3218_v33  ;;  %3563 = vrot.lane.b32.xlu1 %v10574_v26, %s8703_s0  ;;  %3561 = vrot.lane.b32.xlu0 %v10744_v57, %s8703_s0 }
 0x473   : > { %v3175_v21 = vpop.permute.xlu1 %3174  ;;  %v3173_v48 = vpop.permute.xlu0 %3172 }
 0x474   : > { %v3219_v54 = vsel %vm3204_vm13, %v3171_v63, %v3173_v48  ;;  %v3220_v53 = vsel %vm3204_vm13, %v3173_v48, %v3175_v21  ;;  %v3699_v63 = vld [vmem:[#allocation2 + $0x20] sm:$0xff] }
 0x475   : > { %3279 = vst [vmem:[#allocation3 + $0x700] sm:$0xf] %v3219_v54  ;;  %3280 = vst [vmem:[#allocation3 + $0x708] sm:$0xf] %v3220_v53  ;;  %3567 = vrot.lane.b32.xlu1 %v10586_v9, %s8703_s0  ;;  %3565 = vrot.lane.b32.xlu0 %v10754_v39, %s8703_s0  ;;  %v5915_v54 = vld [vmem:[#allocation3 + $0x5b8] sm:$0xff] }
 0x477   : > { %v3179_v41 = vpop.permute.xlu1 %3178  ;;  %v3177_v23 = vpop.permute.xlu0 %3176 }
 0x478   : > { %v3221_v26 = vsel %vm3204_vm13, %v3175_v21, %v3177_v23  ;;  %v3222_v57 = vsel %vm3204_vm13, %v3177_v23, %v3179_v41 }
 0x479   : > { %3281 = vst [vmem:[#allocation3 + $0x710] sm:$0xf] %v3221_v26  ;;  %3282 = vst [vmem:[#allocation3 + $0x718] sm:$0xf] %v3222_v57  ;;  %3571 = vrot.lane.b32.xlu1 %v10598_v52, %s8703_s0  ;;  %3569 = vrot.lane.b32.xlu0 %v10764_v35, %s8703_s0  ;;  %v3700_v26 = vld [vmem:[#allocation2 + $0x28] sm:$0xff] }
 0x47b   : > { %v3183_v28 = vpop.permute.xlu1 %3182  ;;  %v3181_v46 = vpop.permute.xlu0 %3180 }
 0x47c   : > { %v3223_v9 = vsel %vm3204_vm13, %v3179_v41, %v3181_v46  ;;  %v3224_v39 = vsel %vm3204_vm13, %v3181_v46, %v3183_v28  ;;  %v3731_v41 = vcombine.low %v3699_v63, %v3699_v63 }
 0x47d   : > { %3283 = vst [vmem:[#allocation3 + $0x720] sm:$0xf] %v3223_v9  ;;  %3284 = vst [vmem:[#allocation3 + $0x728] sm:$0xf] %v3224_v39  ;;  %3575 = vrot.lane.b32.xlu1 %v10610_v51, %s8703_s0  ;;  %3573 = vrot.lane.b32.xlu0 %v10774_v36, %s8703_s0  ;;  %v3732_v39 = vcombine.low %v3700_v26, %v3700_v26 }
 0x47f   : > { %v3187_v13 = vpop.permute.xlu1 %3186  ;;  %v3185_v58 = vpop.permute.xlu0 %3184 }
 0x480   : > { %v3225_v52 = vsel %vm3204_vm13, %v3183_v28, %v3185_v58  ;;  %v3226_v35 = vsel %vm3204_vm13, %v3185_v58, %v3187_v13 }
 0x481   : > { %3285 = vst [vmem:[#allocation3 + $0x730] sm:$0xf] %v3225_v52  ;;  %3286 = vst [vmem:[#allocation3 + $0x738] sm:$0xf] %v3226_v35  ;;  %3579 = vrot.lane.b32.xlu1 %v10622_v49, %s8703_s0  ;;  %3577 = vrot.lane.b32.xlu0 %v10784_v59, %s8703_s0 }
 0x483   : > { %v3191_v44 = vpop.permute.xlu1 %3190  ;;  %v3189_v56 = vpop.permute.xlu0 %3188 }
 0x484   : > { %v3227_v51 = vsel %vm3204_vm13, %v3187_v13, %v3189_v56  ;;  %v3228_v36 = vsel %vm3204_vm13, %v3189_v56, %v3191_v44  ;;  %v3701_v13 = vld [vmem:[#allocation2 + $0x30] sm:$0xff] }
 0x485   : > { %3287 = vst [vmem:[#allocation3 + $0x740] sm:$0xf] %v3227_v51  ;;  %3288 = vst [vmem:[#allocation3 + $0x748] sm:$0xf] %v3228_v36  ;;  %3583 = vrot.lane.b32.xlu1 %v10634_v8, %s8703_s0  ;;  %3581 = vrot.lane.b32.xlu0 %v10794_v12, %s8703_s0  ;;  %v3733_v56 = vcombine.low %v3701_v13, %v3701_v13  ;;  %v3702_v51 = vld [vmem:[#allocation2 + $0x38] sm:$0xff] }
 0x487   : > { %v3195_v42 = vpop.permute.xlu1 %3194  ;;  %v3193_v22 = vpop.permute.xlu0 %3192 }
 0x488   : > { %v3229_v49 = vsel %vm3204_vm13, %v3191_v44, %v3193_v22  ;;  %v3230_v59 = vsel %vm3204_vm13, %v3193_v22, %v3195_v42 }
 0x489   : > { %3289 = vst [vmem:[#allocation3 + $0x750] sm:$0xf] %v3229_v49  ;;  %3290 = vst [vmem:[#allocation3 + $0x758] sm:$0xf] %v3230_v59  ;;  %3587 = vrot.lane.b32.xlu1 %v10646_v34, %s8703_s0  ;;  %3585 = vrot.lane.b32.xlu0 %v10804_v16, %s8703_s0  ;;  %v3734_v59 = vcombine.low %v3702_v51, %v3702_v51 }
 0x48b   : > { %v3199_v11 = vpop.permute.xlu1 %3198  ;;  %v3197_v30 = vpop.permute.xlu0 %3196 }
 0x48c   : > { %v3231_v8 = vsel %vm3204_vm13, %v3195_v42, %v3197_v30  ;;  %v3232_v12 = vsel %vm3204_vm13, %v3197_v30, %v3199_v11 }
 0x48d   : > { %3291 = vst [vmem:[#allocation3 + $0x760] sm:$0xf] %v3231_v8  ;;  %3292 = vst [vmem:[#allocation3 + $0x768] sm:$0xf] %v3232_v12  ;;  %3591 = vrot.lane.b32.xlu1 %v10658_v17, %s8703_s0  ;;  %3589 = vrot.lane.b32.xlu0 %v10814_v55, %s8703_s0  ;;  %v3511_v55 = vld [vmem:[#allocation2 + $0x80] sm:$0xf] }
 0x48f   : > { %v3203_v14 = vpop.permute.xlu1 %3202  ;;  %v3201_v2 = vpop.permute.xlu0 %3200 }
 0x490   : > { %v3233_v34 = vsel %vm3204_vm13, %v3199_v11, %v3201_v2  ;;  %v3234_v16 = vsel %vm3204_vm13, %v3201_v2, %v3203_v14  ;;  %v3703_v11 = vld [vmem:[#allocation2 + $0x40] sm:$0xff] }
 0x491   : > { %3293 = vst [vmem:[#allocation3 + $0x770] sm:$0xf] %v3233_v34  ;;  %3294 = vst [vmem:[#allocation3 + $0x778] sm:$0xf] %v3234_v16  ;;  %3595 = vrot.lane.b32.xlu1 %v10670_v37, %s8703_s0  ;;  %3593 = vrot.lane.b32.xlu0 %v10824_v20, %s8703_s0  ;;  %v3735_v2 = vcombine.low %v3703_v11, %v3703_v11  ;;  %v3704_v34 = vld [vmem:[#allocation2 + $0x48] sm:$0xff] }
 0x493   : > { %v3346_v15 = vpop.permute.xlu1 %3345  ;;  %v3344_v17 = vpop.permute.xlu0 %3343 }
 0x494   : > { %v3406_v60 = vsel %vm3405_vm14, %v3344_v17, %v3346_v15 }
 0x495   : > { %3466 = vst [vmem:[#allocation3 + $0x690] sm:$0xf0] %v3406_v60  ;;  %3599 = vrot.lane.b32.xlu1 %v10682_v62, %s8703_s0  ;;  %3597 = vrot.lane.b32.xlu0 %v10834_v18, %s8703_s0 }
 0x497   : > { %v3350_v50 = vpop.permute.xlu1 %3349  ;;  %v3348_v38 = vpop.permute.xlu0 %3347 }
 0x498   : > { %v3407_v37 = vsel %vm3405_vm14, %v3346_v15, %v3348_v38  ;;  %v3408_v20 = vsel %vm3405_vm14, %v3348_v38, %v3350_v50 }
 0x499   : > { %3467 = vst [vmem:[#allocation3 + $0x698] sm:$0xf0] %v3407_v37  ;;  %3468 = vst [vmem:[#allocation3 + $0x6a0] sm:$0xf0] %v3408_v20  ;;  %3603 = vrot.lane.b32.xlu1 %v3511_v55, %s8703_s0  ;;  %3601 = vrot.lane.b32.xlu0 %v10843_v24, %s8703_s0  ;;  %v3736_v55 = vcombine.low %v3704_v34, %v3704_v34 }
 0x49b   : > { %v3354_v62 = vpop.permute.xlu1 %3353  ;;  %v3352_v40 = vpop.permute.xlu0 %3351 }
 0x49c   : > { %v3409_v18 = vsel %vm3405_vm14, %v3350_v50, %v3352_v40  ;;  %v3410_v47 = vsel %vm3405_vm14, %v3352_v40, %v3354_v62  ;;  %v5942_v31 = vld [vmem:[#allocation3 + $0x690] sm:$0xff] }
 0x49d   : > { %3469 = vst [vmem:[#allocation3 + $0x6a8] sm:$0xf0] %v3409_v18  ;;  %3470 = vst [vmem:[#allocation3 + $0x6b0] sm:$0xf0] %v3410_v47  ;;  %3746 = vrot.lane.b32.xlu1 %v3696_v5, %s8704_s21  ;;  %3744 = vrot.lane.b32.xlu0 %v3728_v4, %s8704_s21  ;;  %v7755_v29 = vpack.c.bf16 %v5942_v31, %v5912_v43  ;;  %v3705_v5 = vld [vmem:[#allocation2 + $0x50] sm:$0xff] }
 0x49e   : > { %v3737_v4 = vcombine.low %v3705_v5, %v3705_v5 }
 0x49f   : > { %v3358_v1 = vpop.permute.xlu1 %3357  ;;  %v3356_v25 = vpop.permute.xlu0 %3355 }
 0x4a0   : > { %v3411_v24 = vsel %vm3405_vm14, %v3354_v62, %v3356_v25  ;;  %v3412_v7 = vsel %vm3405_vm14, %v3356_v25, %v3358_v1  ;;  %v5943_v6 = vld [vmem:[#allocation3 + $0x698] sm:$0xff]  ;;  %v5944_v33 = vld [vmem:[#allocation3 + $0x6a0] sm:$0xff]  ;;  %v3706_v62 = vld [vmem:[#allocation2 + $0x58] sm:$0xff] }
 0x4a1   : > { %3471 = vst [vmem:[#allocation3 + $0x6b8] sm:$0xf0] %v3411_v24  ;;  %3472 = vst [vmem:[#allocation3 + $0x6c0] sm:$0xf0] %v3412_v7  ;;  %3750 = vrot.lane.b32.xlu1 %v10708_v32, %s8704_s21  ;;  %3748 = vrot.lane.b32.xlu0 %v10862_v61, %s8704_s21  ;;  %v7753_v3 = vpack.c.bf16 %v5943_v6, %v5913_v10  ;;  %v5914_v61 = vld [vmem:[#allocation3 + $0x5b0] sm:$0xff] }
 0x4a2   : > { %v7783_v23 = vpack.c.bf16 %v5944_v33, %v5914_v61  ;;  %v3707_v25 = vld [vmem:[#allocation2 + $0x60] sm:$0xff] }
 0x4a3   : > { %v3362_v27 = vpop.permute.xlu1 %3361  ;;  %v3360_v0 = vpop.permute.xlu0 %3359  ;;  %7754 = vmatprep.subr.bf16.mxu0 %v7753_v3  ;;  %v3739_v6 = vcombine.low %v3707_v25, %v3707_v25  ;;  %v3708_v3 = vld [vmem:[#allocation2 + $0x68] sm:$0xff] }
 0x4a4   : > { %v3413_v21 = vsel %vm3405_vm14, %v3358_v1, %v3360_v0  ;;  %v3414_v48 = vsel %vm3405_vm14, %v3360_v0, %v3362_v27  ;;  %7756 = vmatpush1.bf16.msra.mxu0 %v7755_v29  ;;  %v5945_v53 = vld [vmem:[#allocation3 + $0x6a8] sm:$0xff]  ;;  %v3738_v1 = vcombine.low %v3706_v62, %v3706_v62  ;;  %v3709_v0 = vld [vmem:[#allocation2 + $0x70] sm:$0xff] }
 0x4a5   : > { %3473 = vst [vmem:[#allocation3 + $0x6c8] sm:$0xf0] %v3413_v21  ;;  %3474 = vst [vmem:[#allocation3 + $0x6d0] sm:$0xf0] %v3414_v48  ;;  %3754 = vrot.lane.b32.xlu1 %v3698_v45, %s8704_s21  ;;  %3752 = vrot.lane.b32.xlu0 %v3730_v19, %s8704_s21  ;;  %v7781_v32 = vpack.c.bf16 %v5945_v53, %v5915_v54  ;;  %v3741_v53 = vcombine.low %v3709_v0, %v3709_v0 }
 0x4a7   : > { %v3366_v57 = vpop.permute.xlu1 %3365  ;;  %7782 = vmatprep.subr.bf16.mxu1 %v7781_v32  ;;  %v3364_v28 = vpop.permute.xlu0 %3363  ;;  %v3710_v32 = vld [vmem:[#allocation2 + $0x78] sm:$0xff] }
 0x4a8   : > { %v3415_v46 = vsel %vm3405_vm14, %v3362_v27, %v3364_v28  ;;  %v3416_v9 = vsel %vm3405_vm14, %v3364_v28, %v3366_v57  ;;  %7784 = vmatpush1.bf16.msra.mxu1 %v7783_v23  ;;  %v3740_v27 = vcombine.low %v3708_v3, %v3708_v3 }
 0x4a9   : > { %3475 = vst [vmem:[#allocation3 + $0x6d8] sm:$0xf0] %v3415_v46  ;;  %3476 = vst [vmem:[#allocation3 + $0x6e0] sm:$0xf0] %v3416_v9  ;;  %3758 = vrot.lane.b32.xlu1 %v3699_v63, %s8704_s21  ;;  %3756 = vrot.lane.b32.xlu0 %v3731_v41, %s8704_s21 }
 0x4ab   : > { %v3370_v58 = vpop.permute.xlu1 %3369  ;;  %v3368_v52 = vpop.permute.xlu0 %3367 }
 0x4ac   : > { %v3417_v35 = vsel %vm3405_vm14, %v3366_v57, %v3368_v52  ;;  %v3418_v44 = vsel %vm3405_vm14, %v3368_v52, %v3370_v58 }
 0x4ad   : > { %3477 = vst [vmem:[#allocation3 + $0x6e8] sm:$0xf0] %v3417_v35  ;;  %3478 = vst [vmem:[#allocation3 + $0x6f0] sm:$0xf0] %v3418_v44  ;;  %3762 = vrot.lane.b32.xlu1 %v3700_v26, %s8704_s21  ;;  %3760 = vrot.lane.b32.xlu0 %v3732_v39, %s8704_s21  ;;  %v3742_v26 = vcombine.low %v3710_v32, %v3710_v32  ;;  %v8417_v39 = vld [vmem:[#allocation2 + $0x80] ss:$0 sps:$4 sm:$0xff]  }
 0x4af   : > { %v3374_v36 = vpop.permute.xlu1 %3373  ;;  %v3372_v42 = vpop.permute.xlu0 %3371 }
 0x4b0   : > { %v3419_v22 = vsel %vm3405_vm14, %v3370_v58, %v3372_v42  ;;  %v3420_v49 = vsel %vm3405_vm14, %v3372_v42, %v3374_v36 }
 0x4b1   : > { %3479 = vst [vmem:[#allocation3 + $0x6f8] sm:$0xf0] %v3419_v22  ;;  %3480 = vst [vmem:[#allocation3 + $0x700] sm:$0xf0] %v3420_v49  ;;  %3766 = vrot.lane.b32.xlu1 %v3701_v13, %s8704_s21  ;;  %3764 = vrot.lane.b32.xlu0 %v3733_v56, %s8704_s21  ;;  %v11101_v13 = vld [vmem:[#allocation2 + $0x14] sm:$0xff] }
 0x4b2   : > { %v11107_v56 = vcombine.high %v11101_v13, %v11101_v13 }
 0x4b3   : > { %v3378_v30 = vpop.permute.xlu1 %3377  ;;  %v3376_v8 = vpop.permute.xlu0 %3375 }
 0x4b4   : > { %v3421_v12 = vsel %vm3405_vm14, %v3374_v36, %v3376_v8  ;;  %v3422_v14 = vsel %vm3405_vm14, %v3376_v8, %v3378_v30 }
 0x4b5   : > { %3481 = vst [vmem:[#allocation3 + $0x708] sm:$0xf0] %v3421_v12  ;;  %3482 = vst [vmem:[#allocation3 + $0x710] sm:$0xf0] %v3422_v14  ;;  %3770 = vrot.lane.b32.xlu1 %v3702_v51, %s8704_s21  ;;  %3768 = vrot.lane.b32.xlu0 %v3734_v59, %s8704_s21  ;;  %v11112_v51 = vld [vmem:[#allocation2 + $0x1c] sm:$0xff]  ;;  %v11130_v14 = vcombine.low %v11101_v13, %v11101_v13 }
 0x4b6   : > { %v11122_v59 = vcombine.low %v11112_v51, %v11112_v51 }
 0x4b7   : > { %v3382_v16 = vpop.permute.xlu1 %3381  ;;  %v3380_v15 = vpop.permute.xlu0 %3379 }
 0x4b8   : > { %v3423_v17 = vsel %vm3405_vm14, %v3378_v30, %v3380_v15  ;;  %v3424_v60 = vsel %vm3405_vm14, %v3380_v15, %v3382_v16 }
 0x4b9   : > { %3483 = vst [vmem:[#allocation3 + $0x718] sm:$0xf0] %v3423_v17  ;;  %3484 = vst [vmem:[#allocation3 + $0x720] sm:$0xf0] %v3424_v60  ;;  %3774 = vrot.lane.b32.xlu1 %v3703_v11, %s8704_s21  ;;  %3772 = vrot.lane.b32.xlu0 %v3735_v2, %s8704_s21 }
 0x4bb   : > { %v3386_v50 = vpop.permute.xlu1 %3385  ;;  %v3384_v38 = vpop.permute.xlu0 %3383 }
 0x4bc   : > { %v3425_v37 = vsel %vm3405_vm14, %v3382_v16, %v3384_v38  ;;  %v3426_v20 = vsel %vm3405_vm14, %v3384_v38, %v3386_v50 }
 0x4bd   : > { %3485 = vst [vmem:[#allocation3 + $0x728] sm:$0xf0] %v3425_v37  ;;  %3486 = vst [vmem:[#allocation3 + $0x730] sm:$0xf0] %v3426_v20  ;;  %3778 = vrot.lane.b32.xlu1 %v3704_v34, %s8704_s21  ;;  %3776 = vrot.lane.b32.xlu0 %v3736_v55, %s8704_s21 }
 0x4bf   : > { %v3390_v40 = vpop.permute.xlu1 %3389  ;;  %v3388_v18 = vpop.permute.xlu0 %3387 }
 0x4c0   : > { %v3427_v47 = vsel %vm3405_vm14, %v3386_v50, %v3388_v18  ;;  %v3428_v45 = vsel %vm3405_vm14, %v3388_v18, %v3390_v40 }
 0x4c1   : > { %3487 = vst [vmem:[#allocation3 + $0x738] sm:$0xf0] %v3427_v47  ;;  %3488 = vst [vmem:[#allocation3 + $0x740] sm:$0xf0] %v3428_v45  ;;  %3782 = vrot.lane.b32.xlu1 %v3705_v5, %s8704_s21  ;;  %3780 = vrot.lane.b32.xlu0 %v3737_v4, %s8704_s21 }
 0x4c3   : > { %v3394_v31 = vpop.permute.xlu1 %3393  ;;  %v3392_v24 = vpop.permute.xlu0 %3391 }
 0x4c4   : > { %v3429_v7 = vsel %vm3405_vm14, %v3390_v40, %v3392_v24  ;;  %v3430_v10 = vsel %vm3405_vm14, %v3392_v24, %v3394_v31 }
 0x4c5   : > { %3489 = vst [vmem:[#allocation3 + $0x748] sm:$0xf0] %v3429_v7  ;;  %3490 = vst [vmem:[#allocation3 + $0x750] sm:$0xf0] %v3430_v10  ;;  %3786 = vrot.lane.b32.xlu1 %v3706_v62, %s8704_s21  ;;  %3784 = vrot.lane.b32.xlu0 %v3738_v1, %s8704_s21 }
 0x4c7   : > { %v3398_v43 = vpop.permute.xlu1 %3397  ;;  %v3396_v19 = vpop.permute.xlu0 %3395 }
 0x4c8   : > { %v3431_v29 = vsel %vm3405_vm14, %v3394_v31, %v3396_v19  ;;  %v3432_v63 = vsel %vm3405_vm14, %v3396_v19, %v3398_v43 }
 0x4c9   : > { %3491 = vst [vmem:[#allocation3 + $0x758] sm:$0xf0] %v3431_v29  ;;  %3492 = vst [vmem:[#allocation3 + $0x760] sm:$0xf0] %v3432_v63  ;;  %3790 = vrot.lane.b32.xlu1 %v3707_v25, %s8704_s21  ;;  %3788 = vrot.lane.b32.xlu0 %v3739_v6, %s8704_s21  ;;  %v8712_v29 = vmov 0.0  }
 0x4ca   : > { %5702 = vst [vmem:[#allocation3 + $0xc38] sm:$0xf0] %v8712_v29  ;;  %5701 = vst [vmem:[#allocation3 + $0xc30] sm:$0xf0] %v8712_v29  ;;  %6220 = vmatprep.mubr.f32.mxu0 %v8712_v29  ;;  %6291 = vmatprep.mubr.f32.mxu1 %v8712_v29 }
 0x4cb   : > { %v3402_v33 = vpop.permute.xlu1 %3401  ;;  %v3400_v21 = vpop.permute.xlu0 %3399  ;;  %5703 = vst [vmem:[#allocation3 + $0xc40] sm:$0xf0] %v8712_v29  ;;  %5704 = vst [vmem:[#allocation3 + $0xc48] sm:$0xf0] %v8712_v29 }
 0x4cc   : > { %v3433_v48 = vsel %vm3405_vm14, %v3398_v43, %v3400_v21  ;;  %v3434_v54 = vsel %vm3405_vm14, %v3400_v21, %v3402_v33  ;;  %5705 = vst [vmem:[#allocation3 + $0xc50] sm:$0xf0] %v8712_v29  ;;  %5706 = vst [vmem:[#allocation3 + $0xc58] sm:$0xf0] %v8712_v29 }
 0x4cd   : > { %3493 = vst [vmem:[#allocation3 + $0x768] sm:$0xf0] %v3433_v48  ;;  %3494 = vst [vmem:[#allocation3 + $0x770] sm:$0xf0] %v3434_v54  ;;  %3794 = vrot.lane.b32.xlu1 %v3708_v3, %s8704_s21  ;;  %3792 = vrot.lane.b32.xlu0 %v3740_v27, %s8704_s21 }
 0x4ce   : > { %5707 = vst [vmem:[#allocation3 + $0xc60] sm:$0xf0] %v8712_v29  ;;  %5708 = vst [vmem:[#allocation3 + $0xc68] sm:$0xf0] %v8712_v29 }
 0x4cf   : > { %v3544_v61 = vpop.permute.xlu1 %3543  ;;  %v3404_v41 = vpop.permute.xlu0 %3403  ;;  %5709 = vst [vmem:[#allocation3 + $0xc70] sm:$0xf0] %v8712_v29  ;;  %5710 = vst [vmem:[#allocation3 + $0xc78] sm:$0xf0] %v8712_v29 }
 0x4d0   : > { %v3435_v23 = vsel %vm3405_vm14, %v3402_v33, %v3404_v41  ;;  %5711 = vst [vmem:[#allocation3 + $0xc80] sm:$0xf0] %v8712_v29  ;;  %5712 = vst [vmem:[#allocation3 + $0xc88] sm:$0xf0] %v8712_v29 }
 0x4d1   : > { %3495 = vst [vmem:[#allocation3 + $0x778] sm:$0xf0] %v3435_v23  ;;  %3798 = vrot.lane.b32.xlu1 %v3709_v0, %s8704_s21  ;;  %3796 = vrot.lane.b32.xlu0 %v3741_v53, %s8704_s21  ;;  %5713 = vst [vmem:[#allocation3 + $0xc90] sm:$0xf0] %v8712_v29 }
 0x4d2   : > { %5714 = vst [vmem:[#allocation3 + $0xc98] sm:$0xf0] %v8712_v29  ;;  %5715 = vst [vmem:[#allocation3 + $0xca0] sm:$0xf0] %v8712_v29 }
 0x4d3   : > { %v3548_v57 = vpop.permute.xlu1 %3547  ;;  %v3546_v28 = vpop.permute.xlu0 %3545  ;;  %5716 = vst [vmem:[#allocation3 + $0xca8] sm:$0xf0] %v8712_v29  ;;  %5717 = vst [vmem:[#allocation3 + $0xcb0] sm:$0xf0] %v8712_v29 }
 0x4d4   : > { %v3606_v46 = vsel %vm3605_vm15, %v3544_v61, %v3546_v28  ;;  %v3607_v9 = vsel %vm3605_vm15, %v3546_v28, %v3548_v57  ;;  %5718 = vst [vmem:[#allocation3 + $0xcb8] sm:$0xf0] %v8712_v29  ;;  %5719 = vst [vmem:[#allocation3 + $0xcc0] sm:$0xf0] %v8712_v29 }
 0x4d5   : > { %3666 = vst [vmem:[#allocation3 + $0x780] sm:$0xf] %v3606_v46  ;;  %3667 = vst [vmem:[#allocation3 + $0x788] sm:$0xf] %v3607_v9  ;;  %3802 = vrot.lane.b32.xlu1 %v3710_v32, %s8704_s21  ;;  %3800 = vrot.lane.b32.xlu0 %v3742_v26, %s8704_s21  ;;  %v11230_v9 = vcombine.high %v11112_v51, %v11112_v51 }
 0x4d6   : > { %5720 = vst [vmem:[#allocation3 + $0xcc8] sm:$0xf0] %v8712_v29  ;;  %5721 = vst [vmem:[#allocation3 + $0xcd0] sm:$0xf0] %v8712_v29 }
 0x4d7   : > { %v3552_v58 = vpop.permute.xlu1 %3551  ;;  %v3550_v52 = vpop.permute.xlu0 %3549  ;;  %5722 = vst [vmem:[#allocation3 + $0xcd8] sm:$0xf0] %v8712_v29  ;;  %5723 = vst [vmem:[#allocation3 + $0xce0] sm:$0xf0] %v8712_v29 }
 0x4d8   : > { %v3608_v35 = vsel %vm3605_vm15, %v3548_v57, %v3550_v52  ;;  %v3609_v44 = vsel %vm3605_vm15, %v3550_v52, %v3552_v58  ;;  %5724 = vst [vmem:[#allocation3 + $0xce8] sm:$0xf0] %v8712_v29  ;;  %5725 = vst [vmem:[#allocation3 + $0xcf0] sm:$0xf0] %v8712_v29 }
 0x4d9   : > { %3668 = vst [vmem:[#allocation3 + $0x790] sm:$0xf] %v3608_v35  ;;  %3669 = vst [vmem:[#allocation3 + $0x798] sm:$0xf] %v3609_v44  ;;  %3944 = vrot.lane.b32.xlu1 %v11101_v13, %s8705_s14  ;;  %3804 = vrot.lane.b32.xlu0 %v8417_v39, %s8704_s21  ;;  %v11236_v39 = vld [vmem:[#allocation2 + $0x24] sm:$0xff]  ;;  %s8715_s21 = smov [#allocation12]  }
 0x4da   : > { %5726 = vst [vmem:[#allocation3 + $0xcf8] sm:$0xf0] %v8712_v29  ;;  %5727 = vst [vmem:[#allocation3 + $0xd00] sm:$0xf0] %v8712_v29 }
 0x4db   : > { %v3556_v36 = vpop.permute.xlu1 %3555  ;;  %v3554_v42 = vpop.permute.xlu0 %3553  ;;  %5728 = vst [vmem:[#allocation3 + $0xd08] sm:$0xf0] %v8712_v29  ;;  %5729 = vst [vmem:[#allocation3 + $0xd10] sm:$0xf0] %v8712_v29 }
 0x4dc   : > { %v3610_v22 = vsel %vm3605_vm15, %v3552_v58, %v3554_v42  ;;  %v3611_v49 = vsel %vm3605_vm15, %v3554_v42, %v3556_v36  ;;  %5730 = vst [vmem:[#allocation3 + $0xd18] sm:$0xf0] %v8712_v29 }
 0x4dd   : > { %3670 = vst [vmem:[#allocation3 + $0x7a0] sm:$0xf] %v3610_v22  ;;  %3671 = vst [vmem:[#allocation3 + $0x7a8] sm:$0xf] %v3611_v49  ;;  %3948 = vrot.lane.b32.xlu1 %v11112_v51, %s8705_s14  ;;  %3946 = vrot.lane.b32.xlu0 %v11107_v56, %s8705_s14  ;;  %v11251_v22 = vcombine.high %v11236_v39, %v11236_v39  ;;  %v11257_v49 = vld [vmem:[#allocation2 + $0x2c] sm:$0xff] }
 0x4df   : > { %v3560_v11 = vpop.permute.xlu1 %3559  ;;  %v3558_v30 = vpop.permute.xlu0 %3557 }
 0x4e0   : > { %v3612_v8 = vsel %vm3605_vm15, %v3556_v36, %v3558_v30  ;;  %v3613_v12 = vsel %vm3605_vm15, %v3558_v30, %v3560_v11 }
 0x4e1   : > { %3672 = vst [vmem:[#allocation3 + $0x7b0] sm:$0xf] %v3612_v8  ;;  %3673 = vst [vmem:[#allocation3 + $0x7b8] sm:$0xf] %v3613_v12  ;;  %4149 = vrot.lane.b32.xlu1 %v11122_v59, %s8706_s7  ;;  %4147 = vrot.lane.b32.xlu0 %v11101_v13, %s8706_s7  ;;  %v11267_v12 = vcombine.low %v11257_v49, %v11257_v49 }
 0x4e3   : > { %v3564_v2 = vpop.permute.xlu1 %3563  ;;  %v3562_v34 = vpop.permute.xlu0 %3561 }
 0x4e4   : > { %v3614_v16 = vsel %vm3605_vm15, %v3560_v11, %v3562_v34  ;;  %v3615_v15 = vsel %vm3605_vm15, %v3562_v34, %v3564_v2 }
 0x4e5   : > { %3674 = vst [vmem:[#allocation3 + $0x7c0] sm:$0xf] %v3614_v16  ;;  %3675 = vst [vmem:[#allocation3 + $0x7c8] sm:$0xf] %v3615_v15  ;;  %4347 = vrot.lane.b32.xlu1 %v11107_v56, %s8707_s11  ;;  %4145 = vrot.lane.b32.xlu0 %v11130_v14, %s8706_s7 }
 0x4e7   : > { %v3568_v17 = vpop.permute.xlu1 %3567  ;;  %v3566_v60 = vpop.permute.xlu0 %3565 }
 0x4e8   : > { %v3616_v55 = vsel %vm3605_vm15, %v3564_v2, %v3566_v60  ;;  %v3617_v5 = vsel %vm3605_vm15, %v3566_v60, %v3568_v17 }
 0x4e9   : > { %3676 = vst [vmem:[#allocation3 + $0x7d0] sm:$0xf] %v3616_v55  ;;  %3677 = vst [vmem:[#allocation3 + $0x7d8] sm:$0xf] %v3617_v5  ;;  %4548 = vrot.lane.b32.xlu1 %v11101_v13, %s8708_s8  ;;  %4349 = vrot.lane.b32.xlu0 %v11112_v51, %s8707_s11 }
 0x4eb   : > { %v3572_v50 = vpop.permute.xlu1 %3571  ;;  %v3570_v38 = vpop.permute.xlu0 %3569 }
 0x4ec   : > { %v3618_v37 = vsel %vm3605_vm15, %v3568_v17, %v3570_v38  ;;  %v3619_v20 = vsel %vm3605_vm15, %v3570_v38, %v3572_v50 }
 0x4ed   : > { %3678 = vst [vmem:[#allocation3 + $0x7e0] sm:$0xf] %v3618_v37  ;;  %3679 = vst [vmem:[#allocation3 + $0x7e8] sm:$0xf] %v3619_v20  ;;  %4748 = vrot.lane.b32.xlu1 %v11107_v56, %s8709_s28  ;;  %4550 = vrot.lane.b32.xlu0 %v11122_v59, %s8708_s8 }
 0x4ef   : > { %v3576_v4 = vpop.permute.xlu1 %3575  ;;  %v3574_v62 = vpop.permute.xlu0 %3573 }
 0x4f0   : > { %v3620_v40 = vsel %vm3605_vm15, %v3572_v50, %v3574_v62  ;;  %v3621_v18 = vsel %vm3605_vm15, %v3574_v62, %v3576_v4 }
 0x4f1   : > { %3680 = vst [vmem:[#allocation3 + $0x7f0] sm:$0xf] %v3620_v40  ;;  %3681 = vst [vmem:[#allocation3 + $0x7f8] sm:$0xf] %v3621_v18  ;;  %4949 = vrot.lane.b32.xlu1 %v11101_v13, %s8710_s16  ;;  %4750 = vrot.lane.b32.xlu0 %v11112_v51, %s8709_s28 }
 0x4f3   : > { %v3580_v47 = vpop.permute.xlu1 %3579  ;;  %v3578_v45 = vpop.permute.xlu0 %3577 }
 0x4f4   : > { %v3622_v1 = vsel %vm3605_vm15, %v3576_v4, %v3578_v45  ;;  %v3623_v25 = vsel %vm3605_vm15, %v3578_v45, %v3580_v47 }
 0x4f5   : > { %3682 = vst [vmem:[#allocation3 + $0x800] sm:$0xf] %v3622_v1  ;;  %3683 = vst [vmem:[#allocation3 + $0x808] sm:$0xf] %v3623_v25  ;;  %4345 = vrot.lane.b32.xlu1 %v11101_v13, %s8707_s11  ;;  %4951 = vrot.lane.b32.xlu0 %v11122_v59, %s8710_s16 }
 0x4f7   : > { %v3584_v31 = vpop.permute.xlu1 %3583  ;;  %v3582_v24 = vpop.permute.xlu0 %3581 }
 0x4f8   : > { %v3624_v7 = vsel %vm3605_vm15, %v3580_v47, %v3582_v24  ;;  %v3625_v10 = vsel %vm3605_vm15, %v3582_v24, %v3584_v31 }
 0x4f9   : > { %3684 = vst [vmem:[#allocation3 + $0x810] sm:$0xf] %v3624_v7  ;;  %3685 = vst [vmem:[#allocation3 + $0x818] sm:$0xf] %v3625_v10  ;;  %4746 = vrot.lane.b32.xlu1 %v11101_v13, %s8709_s28  ;;  %4546 = vrot.lane.b32.xlu0 %v11130_v14, %s8708_s8 }
 0x4fb   : > { %v3588_v6 = vpop.permute.xlu1 %3587  ;;  %v3586_v3 = vpop.permute.xlu0 %3585 }
 0x4fc   : > { %v3626_v43 = vsel %vm3605_vm15, %v3584_v31, %v3586_v3  ;;  %v3627_v19 = vsel %vm3605_vm15, %v3586_v3, %v3588_v6 }
 0x4fd   : > { %3686 = vst [vmem:[#allocation3 + $0x820] sm:$0xf] %v3626_v43  ;;  %3687 = vst [vmem:[#allocation3 + $0x828] sm:$0xf] %v3627_v19  ;;  %5149 = vrot.lane.b32.xlu1 %v11107_v56, %s8711_s10  ;;  %4947 = vrot.lane.b32.xlu0 %v11130_v14, %s8710_s16 }
 0x4ff   : > { %v3592_v63 = vpop.permute.xlu1 %3591  ;;  %v3590_v27 = vpop.permute.xlu0 %3589 }
 0x500   : > { %v3628_v0 = vsel %vm3605_vm15, %v3588_v6, %v3590_v27  ;;  %v3629_v33 = vsel %vm3605_vm15, %v3590_v27, %v3592_v63 }
 0x501   : > { %3688 = vst [vmem:[#allocation3 + $0x830] sm:$0xf] %v3628_v0  ;;  %3689 = vst [vmem:[#allocation3 + $0x838] sm:$0xf] %v3629_v33  ;;  %5350 = vrot.lane.b32.xlu1 %v11101_v13, %s8713_s26  ;;  %5151 = vrot.lane.b32.xlu0 %v11112_v51, %s8711_s10 }
 0x503   : > { %v3596_v21 = vpop.permute.xlu1 %3595  ;;  %v3594_v48 = vpop.permute.xlu0 %3593 }
 0x504   : > { %v3630_v54 = vsel %vm3605_vm15, %v3592_v63, %v3594_v48  ;;  %v3631_v53 = vsel %vm3605_vm15, %v3594_v48, %v3596_v21 }
 0x505   : > { %3690 = vst [vmem:[#allocation3 + $0x840] sm:$0xf] %v3630_v54  ;;  %3691 = vst [vmem:[#allocation3 + $0x848] sm:$0xf] %v3631_v53  ;;  %5550 = vrot.lane.b32.xlu1 %v11107_v56, %s8714_s9  ;;  %5352 = vrot.lane.b32.xlu0 %v11122_v59, %s8713_s26 }
 0x507   : > { %v3600_v32 = vpop.permute.xlu1 %3599  ;;  %v3598_v61 = vpop.permute.xlu0 %3597 }
 0x508   : > { %v3632_v41 = vsel %vm3605_vm15, %v3596_v21, %v3598_v61  ;;  %v3633_v23 = vsel %vm3605_vm15, %v3598_v61, %v3600_v32 }
 0x509   : > { %3692 = vst [vmem:[#allocation3 + $0x850] sm:$0xf] %v3632_v41  ;;  %3693 = vst [vmem:[#allocation3 + $0x858] sm:$0xf] %v3633_v23  ;;  %5147 = vrot.lane.b32.xlu1 %v11101_v13, %s8711_s10  ;;  %5552 = vrot.lane.b32.xlu0 %v11112_v51, %s8714_s9 }
 0x50b   : > { %v3604_v26 = vpop.permute.xlu1 %3603  ;;  %v3602_v57 = vpop.permute.xlu0 %3601 }
 0x50c   : > { %v3634_v28 = vsel %vm3605_vm15, %v3600_v32, %v3602_v57  ;;  %v3635_v46 = vsel %vm3605_vm15, %v3602_v57, %v3604_v26 }
 0x50d   : > { %3694 = vst [vmem:[#allocation3 + $0x860] sm:$0xf] %v3634_v28  ;;  %3695 = vst [vmem:[#allocation3 + $0x868] sm:$0xf] %v3635_v46  ;;  %5548 = vrot.lane.b32.xlu1 %v11101_v13, %s8714_s9  ;;  %5348 = vrot.lane.b32.xlu0 %v11130_v14, %s8713_s26  ;;  %v11245_v13 = vcombine.low %v11236_v39, %v11236_v39 }
 0x50f   : > { %v3747_v58 = vpop.permute.xlu1 %3746  ;;  %v3745_v52 = vpop.permute.xlu0 %3744 }
 0x510   : > { %v3807_v35 = vsel %vm3806_vm0, %v3745_v52, %v3747_v58 }
 0x511   : > { %3867 = vst [vmem:[#allocation3 + $0x780] sm:$0xf0] %v3807_v35  ;;  %3952 = vrot.lane.b32.xlu1 %v11236_v39, %s8705_s14  ;;  %3950 = vrot.lane.b32.xlu0 %v11230_v9, %s8705_s14 }
 0x513   : > { %v3751_v44 = vpop.permute.xlu1 %3750  ;;  %v3749_v56 = vpop.permute.xlu0 %3748 }
 0x514   : > { %v3808_v36 = vsel %vm3806_vm0, %v3747_v58, %v3749_v56  ;;  %v3809_v42 = vsel %vm3806_vm0, %v3749_v56, %v3751_v44 }
 0x515   : > { %3868 = vst [vmem:[#allocation3 + $0x788] sm:$0xf0] %v3808_v36  ;;  %3869 = vst [vmem:[#allocation3 + $0x790] sm:$0xf0] %v3809_v42  ;;  %4153 = vrot.lane.b32.xlu1 %v11245_v13, %s8706_s7  ;;  %4151 = vrot.lane.b32.xlu0 %v11112_v51, %s8706_s7 }
 0x517   : > { %v3755_v59 = vpop.permute.xlu1 %3754  ;;  %v3753_v11 = vpop.permute.xlu0 %3752 }
 0x518   : > { %v3810_v30 = vsel %vm3806_vm0, %v3751_v44, %v3753_v11  ;;  %v3811_v8 = vsel %vm3806_vm0, %v3753_v11, %v3755_v59 }
 0x519   : > { %3870 = vst [vmem:[#allocation3 + $0x798] sm:$0xf0] %v3810_v30  ;;  %3871 = vst [vmem:[#allocation3 + $0x7a0] sm:$0xf0] %v3811_v8  ;;  %3956 = vrot.lane.b32.xlu1 %v11257_v49, %s8705_s14  ;;  %3954 = vrot.lane.b32.xlu0 %v11251_v22, %s8705_s14  ;;  %v11361_v8 = vcombine.high %v11257_v49, %v11257_v49 }
 0x51b   : > { %v3759_v14 = vpop.permute.xlu1 %3758  ;;  %v3757_v2 = vpop.permute.xlu0 %3756 }
 0x51c   : > { %v3812_v34 = vsel %vm3806_vm0, %v3755_v59, %v3757_v2  ;;  %v3813_v16 = vsel %vm3806_vm0, %v3757_v2, %v3759_v14 }
 0x51d   : > { %3872 = vst [vmem:[#allocation3 + $0x7a8] sm:$0xf0] %v3812_v34  ;;  %3873 = vst [vmem:[#allocation3 + $0x7b0] sm:$0xf0] %v3813_v16  ;;  %4157 = vrot.lane.b32.xlu1 %v11267_v12, %s8706_s7  ;;  %4155 = vrot.lane.b32.xlu0 %v11236_v39, %s8706_s7 }
 0x51f   : > { %v3763_v15 = vpop.permute.xlu1 %3762  ;;  %v3761_v17 = vpop.permute.xlu0 %3760 }
 0x520   : > { %v3814_v60 = vsel %vm3806_vm0, %v3759_v14, %v3761_v17  ;;  %v3815_v55 = vsel %vm3806_vm0, %v3761_v17, %v3763_v15  ;;  %v5973_v17 = vld [vmem:[#allocation3 + $0x788] sm:$0xff] }
 0x521   : > { %3874 = vst [vmem:[#allocation3 + $0x7b8] sm:$0xf0] %v3814_v60  ;;  %3875 = vst [vmem:[#allocation3 + $0x7c0] sm:$0xf0] %v3815_v55  ;;  %4353 = vrot.lane.b32.xlu1 %v11236_v39, %s8707_s11  ;;  %4351 = vrot.lane.b32.xlu0 %v11230_v9, %s8707_s11 }
 0x523   : > { %v3767_v5 = vpop.permute.xlu1 %3766  ;;  %v3765_v50 = vpop.permute.xlu0 %3764 }
 0x524   : > { %v3816_v38 = vsel %vm3806_vm0, %v3763_v15, %v3765_v50  ;;  %v3817_v37 = vsel %vm3806_vm0, %v3765_v50, %v3767_v5  ;;  %v11390_v50 = vld [vmem:[#allocation2 + $0x3c] sm:$0xff] }
 0x525   : > { %3876 = vst [vmem:[#allocation3 + $0x7c8] sm:$0xf0] %v3816_v38  ;;  %3877 = vst [vmem:[#allocation3 + $0x7d0] sm:$0xf0] %v3817_v37  ;;  %4554 = vrot.lane.b32.xlu1 %v11245_v13, %s8708_s8  ;;  %4552 = vrot.lane.b32.xlu0 %v11112_v51, %s8708_s8 }
 0x527   : > { %v3771_v20 = vpop.permute.xlu1 %3770  ;;  %v3769_v4 = vpop.permute.xlu0 %3768 }
 0x528   : > { %v3818_v62 = vsel %vm3806_vm0, %v3767_v5, %v3769_v4  ;;  %v3819_v40 = vsel %vm3806_vm0, %v3769_v4, %v3771_v20  ;;  %v5972_v4 = vld [vmem:[#allocation3 + $0x780] sm:$0xff] }
 0x529   : > { %3878 = vst [vmem:[#allocation3 + $0x7d8] sm:$0xf0] %v3818_v62  ;;  %3879 = vst [vmem:[#allocation3 + $0x7e0] sm:$0xf0] %v3819_v40  ;;  %4754 = vrot.lane.b32.xlu1 %v11236_v39, %s8709_s28  ;;  %4752 = vrot.lane.b32.xlu0 %v11230_v9, %s8709_s28 }
 0x52b   : > { %v3775_v18 = vpop.permute.xlu1 %3774  ;;  %v3773_v47 = vpop.permute.xlu0 %3772 }
 0x52c   : > { %v3820_v45 = vsel %vm3806_vm0, %v3771_v20, %v3773_v47  ;;  %v3821_v1 = vsel %vm3806_vm0, %v3773_v47, %v3775_v18 }
 0x52d   : > { %3880 = vst [vmem:[#allocation3 + $0x7e8] sm:$0xf0] %v3820_v45  ;;  %3881 = vst [vmem:[#allocation3 + $0x7f0] sm:$0xf0] %v3821_v1  ;;  %4955 = vrot.lane.b32.xlu1 %v11245_v13, %s8710_s16  ;;  %4953 = vrot.lane.b32.xlu0 %v11112_v51, %s8710_s16 }
 0x52f   : > { %v3779_v25 = vpop.permute.xlu1 %3778  ;;  %v3777_v31 = vpop.permute.xlu0 %3776 }
 0x530   : > { %v3822_v24 = vsel %vm3806_vm0, %v3775_v18, %v3777_v31  ;;  %v3823_v7 = vsel %vm3806_vm0, %v3777_v31, %v3779_v25  ;;  %v11402_v18 = vcombine.low %v11390_v50, %v11390_v50 }
 0x531   : > { %3882 = vst [vmem:[#allocation3 + $0x7f8] sm:$0xf0] %v3822_v24  ;;  %3883 = vst [vmem:[#allocation3 + $0x800] sm:$0xf0] %v3823_v7  ;;  %4357 = vrot.lane.b32.xlu1 %v11257_v49, %s8707_s11  ;;  %4355 = vrot.lane.b32.xlu0 %v11251_v22, %s8707_s11 }
 0x533   : > { %v3783_v10 = vpop.permute.xlu1 %3782  ;;  %v3781_v6 = vpop.permute.xlu0 %3780 }
 0x534   : > { %v3824_v3 = vsel %vm3806_vm0, %v3779_v25, %v3781_v6  ;;  %v3825_v43 = vsel %vm3806_vm0, %v3781_v6, %v3783_v10 }
 0x535   : > { %3884 = vst [vmem:[#allocation3 + $0x808] sm:$0xf0] %v3824_v3  ;;  %3885 = vst [vmem:[#allocation3 + $0x810] sm:$0xf0] %v3825_v43  ;;  %4558 = vrot.lane.b32.xlu1 %v11267_v12, %s8708_s8  ;;  %4556 = vrot.lane.b32.xlu0 %v11236_v39, %s8708_s8 }
 0x537   : > { %v3787_v19 = vpop.permute.xlu1 %3786  ;;  %v3785_v63 = vpop.permute.xlu0 %3784 }
 0x538   : > { %v3826_v27 = vsel %vm3806_vm0, %v3783_v10, %v3785_v63  ;;  %v3827_v0 = vsel %vm3806_vm0, %v3785_v63, %v3787_v19 }
 0x539   : > { %3886 = vst [vmem:[#allocation3 + $0x818] sm:$0xf0] %v3826_v27  ;;  %3887 = vst [vmem:[#allocation3 + $0x820] sm:$0xf0] %v3827_v0  ;;  %4758 = vrot.lane.b32.xlu1 %v11257_v49, %s8709_s28  ;;  %4756 = vrot.lane.b32.xlu0 %v11251_v22, %s8709_s28 }
 0x53b   : > { %v3791_v33 = vpop.permute.xlu1 %3790  ;;  %v3789_v21 = vpop.permute.xlu0 %3788 }
 0x53c   : > { %v3828_v48 = vsel %vm3806_vm0, %v3787_v19, %v3789_v21  ;;  %v3829_v54 = vsel %vm3806_vm0, %v3789_v21, %v3791_v33 }
 0x53d   : > { %3888 = vst [vmem:[#allocation3 + $0x828] sm:$0xf0] %v3828_v48  ;;  %3889 = vst [vmem:[#allocation3 + $0x830] sm:$0xf0] %v3829_v54  ;;  %4959 = vrot.lane.b32.xlu1 %v11267_v12, %s8710_s16  ;;  %4957 = vrot.lane.b32.xlu0 %v11236_v39, %s8710_s16 }
 0x53f   : > { %v3795_v53 = vpop.permute.xlu1 %3794  ;;  %v3793_v32 = vpop.permute.xlu0 %3792 }
 0x540   : > { %v3830_v61 = vsel %vm3806_vm0, %v3791_v33, %v3793_v32  ;;  %v3831_v41 = vsel %vm3806_vm0, %v3793_v32, %v3795_v53 }
 0x541   : > { %3890 = vst [vmem:[#allocation3 + $0x838] sm:$0xf0] %v3830_v61  ;;  %3891 = vst [vmem:[#allocation3 + $0x840] sm:$0xf0] %v3831_v41  ;;  %5155 = vrot.lane.b32.xlu1 %v11236_v39, %s8711_s10  ;;  %5153 = vrot.lane.b32.xlu0 %v11230_v9, %s8711_s10 }
 0x543   : > { %v3799_v23 = vpop.permute.xlu1 %3798  ;;  %v3797_v26 = vpop.permute.xlu0 %3796 }
 0x544   : > { %v3832_v57 = vsel %vm3806_vm0, %v3795_v53, %v3797_v26  ;;  %v3833_v28 = vsel %vm3806_vm0, %v3797_v26, %v3799_v23 }
 0x545   : > { %3892 = vst [vmem:[#allocation3 + $0x848] sm:$0xf0] %v3832_v57  ;;  %3893 = vst [vmem:[#allocation3 + $0x850] sm:$0xf0] %v3833_v28  ;;  %5356 = vrot.lane.b32.xlu1 %v11245_v13, %s8713_s26  ;;  %5354 = vrot.lane.b32.xlu0 %v11112_v51, %s8713_s26 }
 0x547   : > { %v3803_v46 = vpop.permute.xlu1 %3802  ;;  %v3801_v58 = vpop.permute.xlu0 %3800 }
 0x548   : > { %v3834_v52 = vsel %vm3806_vm0, %v3799_v23, %v3801_v58  ;;  %v3835_v35 = vsel %vm3806_vm0, %v3801_v58, %v3803_v46 }
 0x549   : > { %3894 = vst [vmem:[#allocation3 + $0x858] sm:$0xf0] %v3834_v52  ;;  %3895 = vst [vmem:[#allocation3 + $0x860] sm:$0xf0] %v3835_v35  ;;  %5556 = vrot.lane.b32.xlu1 %v11236_v39, %s8714_s9  ;;  %5554 = vrot.lane.b32.xlu0 %v11230_v9, %s8714_s9 }
 0x54b   : > { %v3945_v44 = vpop.permute.xlu1 %3944  ;;  %v3805_v56 = vpop.permute.xlu0 %3804 }
 0x54c   : > { %v3836_v13 = vsel %vm3806_vm0, %v3803_v46, %v3805_v56 }
 0x54d   : > { %3896 = vst [vmem:[#allocation3 + $0x868] sm:$0xf0] %v3836_v13  ;;  %5159 = vrot.lane.b32.xlu1 %v11257_v49, %s8711_s10  ;;  %5157 = vrot.lane.b32.xlu0 %v11251_v22, %s8711_s10 }
 0x54f   : > { %v11346_v51 = vpop.permute.xlu1 %3948  ;;  %v3947_v36 = vpop.permute.xlu0 %3946 }
 0x550   : > { %v4007_v42 = vsel %vm4006_vm1, %v3945_v44, %v3947_v36  ;;  %v4008_v9 = vsel %vm4006_vm1, %v3947_v36, %v11346_v51 }
 0x551   : > { %4067 = vst [vmem:[#allocation3 + $0x870] sm:$0xf] %v4007_v42  ;;  %4068 = vst [vmem:[#allocation3 + $0x878] sm:$0xf] %v4008_v9  ;;  %5360 = vrot.lane.b32.xlu1 %v11267_v12, %s8713_s26  ;;  %5358 = vrot.lane.b32.xlu0 %v11236_v39, %s8713_s26  ;;  %v11367_v12 = vld [vmem:[#allocation2 + $0x34] sm:$0xff] }
 0x552   : > { %v11376_v34 = vcombine.low %v11367_v12, %v11367_v12  ;;  %v11384_v55 = vcombine.high %v11367_v12, %v11367_v12 }
 0x553   : > { %v11355_v59 = vpop.permute.xlu1 %4149  ;;  %v4148_v11 = vpop.permute.xlu0 %4147 }
 0x554   : > { %v4209_v30 = vsel %vm4207_vm2, %v4148_v11, %v11355_v59 }
 0x555   : > { %4269 = vst [vmem:[#allocation3 + $0x878] sm:$0xf0] %v4209_v30  ;;  %5560 = vrot.lane.b32.xlu1 %v11257_v49, %s8714_s9  ;;  %5558 = vrot.lane.b32.xlu0 %v11251_v22, %s8714_s9 }
 0x557   : > { %v4348_v39 = vpop.permute.xlu1 %4347  ;;  %v4146_v14 = vpop.permute.xlu0 %4145 }
 0x558   : > { %v4208_v2 = vsel %vm4207_vm2, %v4146_v14, %v4148_v11 }
 0x559   : > { %4268 = vst [vmem:[#allocation3 + $0x870] sm:$0xf0] %v4208_v2  ;;  %3960 = vrot.lane.b32.xlu1 %v11367_v12, %s8705_s14  ;;  %3958 = vrot.lane.b32.xlu0 %v11361_v8, %s8705_s14 }
 0x55b   : > { %v4549_v16 = vpop.permute.xlu1 %4548  ;;  %v11378_v22 = vpop.permute.xlu0 %4349 }
 0x55c   : > { %v4409_v15 = vsel %vm4407_vm3, %v4348_v39, %v11378_v22  ;;  %v6003_v60 = vld [vmem:[#allocation3 + $0x878] sm:$0xff] }
 0x55d   : > { %4469 = vst [vmem:[#allocation3 + $0x968] sm:$0xf] %v4409_v15  ;;  %4161 = vrot.lane.b32.xlu1 %v11376_v34, %s8706_s7  ;;  %4159 = vrot.lane.b32.xlu0 %v11257_v49, %s8706_s7  ;;  %v7757_v5 = vpack.c.bf16 %v6003_v60, %v5973_v17  ;;  %v5767_v15 = vld [vmem:[#allocation3 + $0x118] sm:$0xff] }
 0x55f   : > { %v4749_v38 = vpop.permute.xlu1 %4748  ;;  %v11392_v37 = vpop.permute.xlu0 %4550  ;;  %7758 = vmatprep.subr.bf16.mxu0 %v7757_v5 }
 0x560   : > { %v4610_v20 = vsel %vm4608_vm4, %v4549_v16, %v11392_v37  ;;  %v6002_v62 = vld [vmem:[#allocation3 + $0x870] sm:$0xff] }
 0x561   : > { %4670 = vst [vmem:[#allocation3 + $0x968] sm:$0xf0] %v4610_v20  ;;  %3964 = vrot.lane.b32.xlu1 %v11390_v50, %s8705_s14  ;;  %3962 = vrot.lane.b32.xlu0 %v11384_v55, %s8705_s14  ;;  %v7759_v40 = vpack.c.bf16 %v6002_v62, %v5972_v4  ;;  %v5737_v20 = vld [vmem:[#allocation3 + $0x28] sm:$0xff]  ;;  %v5766_v62 = vld [vmem:[#allocation3 + $0x110] sm:$0xff] }
 0x562   : > { %v7797_v4 = vpack.c.bf16 %v5767_v15, %v5737_v20  ;;  %v5976_v20 = vld [vmem:[#allocation3 + $0x7a0] sm:$0xff] }
 0x563   : > { %v4950_v47 = vpop.permute.xlu1 %4949  ;;  %v11404_v45 = vpop.permute.xlu0 %4750  ;;  %7760 = vmatpush1.bf16.msra.mxu0 %v7759_v40 }
 0x564   : > { %v4810_v1 = vsel %vm4808_vm5, %v4749_v38, %v11404_v45 }
 0x565   : > { %4870 = vst [vmem:[#allocation3 + $0xa58] sm:$0xf] %v4810_v1  ;;  %4165 = vrot.lane.b32.xlu1 %v11402_v18, %s8706_s7  ;;  %4163 = vrot.lane.b32.xlu0 %v11367_v12, %s8706_s7  ;;  %v5827_v1 = vld [vmem:[#allocation3 + $0x2f8] sm:$0xff] }
 0x567   : > { %v4346_v25 = vpop.permute.xlu1 %4345  ;;  %v11412_v31 = vpop.permute.xlu0 %4951 }
 0x568   : > { %v4408_v24 = vsel %vm4407_vm3, %v4346_v25, %v4348_v39  ;;  %v5011_v7 = vsel %vm5009_vm6, %v4950_v47, %v11412_v31  ;;  %v6033_v0 = vld [vmem:[#allocation3 + $0x968] sm:$0xff] }
 0x569   : > { %4468 = vst [vmem:[#allocation3 + $0x960] sm:$0xf] %v4408_v24  ;;  %5071 = vst [vmem:[#allocation3 + $0xa58] sm:$0xf0] %v5011_v7  ;;  %4361 = vrot.lane.b32.xlu1 %v11367_v12, %s8707_s11  ;;  %4359 = vrot.lane.b32.xlu0 %v11361_v8, %s8707_s11  ;;  %v5736_v7 = vld [vmem:[#allocation3 + $0x20] sm:$0xff] }
 0x56b   : > { %v4747_v10 = vpop.permute.xlu1 %4746  ;;  %v4547_v6 = vpop.permute.xlu0 %4546 }
 0x56c   : > { %v4809_v3 = vsel %vm4808_vm5, %v4747_v10, %v4749_v38  ;;  %v4609_v43 = vsel %vm4608_vm4, %v4547_v6, %v4549_v16  ;;  %v7799_v10 = vpack.c.bf16 %v5766_v62, %v5736_v7  ;;  %v5797_v6 = vld [vmem:[#allocation3 + $0x208] sm:$0xff] }
 0x56d   : > { %4869 = vst [vmem:[#allocation3 + $0xa50] sm:$0xf] %v4809_v3  ;;  %4669 = vst [vmem:[#allocation3 + $0x960] sm:$0xf0] %v4609_v43  ;;  %4562 = vrot.lane.b32.xlu1 %v11376_v34, %s8708_s8  ;;  %4560 = vrot.lane.b32.xlu0 %v11257_v49, %s8708_s8  ;;  %v7801_v3 = vpack.c.bf16 %v5827_v1, %v5797_v6  ;;  %v5826_v43 = vld [vmem:[#allocation3 + $0x2f0] sm:$0xff]  ;;  %v11551_v6 = vld [vmem:[#allocation2 + $0x4c] sm:$0xff] }
 0x56f   : > { %v5150_v19 = vpop.permute.xlu1 %5149  ;;  %v4948_v63 = vpop.permute.xlu0 %4947 }
 0x570   : > { %v5010_v27 = vsel %vm5009_vm6, %v4948_v63, %v4950_v47  ;;  %v6063_v33 = vld [vmem:[#allocation3 + $0xa58] sm:$0xff] }
 0x571   : > { %5070 = vst [vmem:[#allocation3 + $0xa50] sm:$0xf0] %v5010_v27  ;;  %4762 = vrot.lane.b32.xlu1 %v11367_v12, %s8709_s28  ;;  %4760 = vrot.lane.b32.xlu0 %v11361_v8, %s8709_s28  ;;  %v7761_v21 = vpack.c.bf16 %v6063_v33, %v6033_v0  ;;  %v5796_v27 = vld [vmem:[#allocation3 + $0x200] sm:$0xff]  ;;  %v5974_v0 = vld [vmem:[#allocation3 + $0x790] sm:$0xff]  ;;  %v5887_v33 = vld [vmem:[#allocation3 + $0x4d8] sm:$0xff] }
 0x573   : > { %v5351_v48 = vpop.permute.xlu1 %5350  ;;  %v11432_v54 = vpop.permute.xlu0 %5151  ;;  %7762 = vmatprep.subr.bf16.mxu0 %v7761_v21  ;;  %v5975_v21 = vld [vmem:[#allocation3 + $0x798] sm:$0xff] }
 0x574   : > { %v5211_v53 = vsel %vm5209_vm7, %v5150_v19, %v11432_v54  ;;  %v6032_v23 = vld [vmem:[#allocation3 + $0x960] sm:$0xff] }
 0x575   : > { %5271 = vst [vmem:[#allocation3 + $0xb48] sm:$0xf] %v5211_v53  ;;  %4963 = vrot.lane.b32.xlu1 %v11376_v34, %s8710_s16  ;;  %4961 = vrot.lane.b32.xlu0 %v11257_v49, %s8710_s16 }
 0x577   : > { %v5551_v32 = vpop.permute.xlu1 %5550  ;;  %v11440_v61 = vpop.permute.xlu0 %5352 }
 0x578   : > { %v5412_v41 = vsel %vm5410_vm8, %v5351_v48, %v11440_v61  ;;  %v6062_v26 = vld [vmem:[#allocation3 + $0xa50] sm:$0xff] }
 0x579   : > { %5472 = vst [vmem:[#allocation3 + $0xb48] sm:$0xf0] %v5412_v41  ;;  %4365 = vrot.lane.b32.xlu1 %v11390_v50, %s8707_s11  ;;  %4363 = vrot.lane.b32.xlu0 %v11384_v55, %s8707_s11  ;;  %v7763_v57 = vpack.c.bf16 %v6062_v26, %v6032_v23  ;;  %v7803_v41 = vpack.c.bf16 %v5826_v43, %v5796_v27  ;;  %v5857_v26 = vld [vmem:[#allocation3 + $0x3e8] sm:$0xff] }
 0x57b   : > { %v5148_v28 = vpop.permute.xlu1 %5147  ;;  %v11448_v46 = vpop.permute.xlu0 %5552  ;;  %7764 = vmatpush1.bf16.msra.mxu0 %v7763_v57  ;;  %v7805_v57 = vpack.c.bf16 %v5887_v33, %v5857_v26 }
 0x57c   : > { %v5210_v58 = vsel %vm5209_vm7, %v5148_v28, %v5150_v19  ;;  %v5612_v52 = vsel %vm5610_vm9, %v5551_v32, %v11448_v46  ;;  %v5886_v28 = vld [vmem:[#allocation3 + $0x4d0] sm:$0xff] }
 0x57d   : > { %5270 = vst [vmem:[#allocation3 + $0xb40] sm:$0xf] %v5210_v58  ;;  %5672 = vst [vmem:[#allocation3 + $0xc38] sm:$0xf] %v5612_v52  ;;  %4566 = vrot.lane.b32.xlu1 %v11402_v18, %s8708_s8  ;;  %4564 = vrot.lane.b32.xlu0 %v11367_v12, %s8708_s8 }
 0x57f   : > { %v5549_v35 = vpop.permute.xlu1 %5548  ;;  %v5349_v44 = vpop.permute.xlu0 %5348 }
 0x580   : > { %v5611_v56 = vsel %vm5610_vm9, %v5549_v35, %v5551_v32  ;;  %v5411_v13 = vsel %vm5410_vm8, %v5349_v44, %v5351_v48  ;;  %v6093_v30 = vld [vmem:[#allocation3 + $0xb48] sm:$0xff]  ;;  %v5947_v35 = vld [vmem:[#allocation3 + $0x6b8] sm:$0xff] }
 0x581   : > { %5671 = vst [vmem:[#allocation3 + $0xc30] sm:$0xf] %v5611_v56  ;;  %5471 = vst [vmem:[#allocation3 + $0xb40] sm:$0xf0] %v5411_v13  ;;  %4766 = vrot.lane.b32.xlu1 %v11390_v50, %s8709_s28  ;;  %4764 = vrot.lane.b32.xlu0 %v11384_v55, %s8709_s28  ;;  %v5856_v13 = vld [vmem:[#allocation3 + $0x3e0] sm:$0xff] }
 0x583   : > { %v3953_v36 = vpop.permute.xlu1 %3952  ;;  %v3951_v42 = vpop.permute.xlu0 %3950 }
 0x584   : > { %v4009_v9 = vsel %vm4006_vm1, %v11346_v51, %v3951_v42  ;;  %v4010_v11 = vsel %vm4006_vm1, %v3951_v42, %v3953_v36  ;;  %v6123_v39 = vld [vmem:[#allocation3 + $0xc38] sm:$0xff] }
 0x585   : > { %4069 = vst [vmem:[#allocation3 + $0x880] sm:$0xf] %v4009_v9  ;;  %4070 = vst [vmem:[#allocation3 + $0x888] sm:$0xf] %v4010_v11  ;;  %4967 = vrot.lane.b32.xlu1 %v11402_v18, %s8710_s16  ;;  %4965 = vrot.lane.b32.xlu0 %v11367_v12, %s8710_s16  ;;  %v7765_v14 = vpack.c.bf16 %v6123_v39, %v6093_v30  ;;  %v5946_v9 = vld [vmem:[#allocation3 + $0x6b0] sm:$0xff] }
 0x587   : > { %v4154_v2 = vpop.permute.xlu1 %4153  ;;  %v4152_v16 = vpop.permute.xlu0 %4151  ;;  %7766 = vmatprep.subr.bf16.mxu0 %v7765_v14  ;;  %v5916_v14 = vld [vmem:[#allocation3 + $0x5c0] sm:$0xff] }
 0x588   : > { %v4210_v51 = vsel %vm4207_vm2, %v11355_v59, %v4152_v16  ;;  %v4211_v17 = vsel %vm4207_vm2, %v4152_v16, %v4154_v2  ;;  %v6092_v60 = vld [vmem:[#allocation3 + $0xb40] sm:$0xff]  ;;  %v6122_v5 = vld [vmem:[#allocation3 + $0xc30] sm:$0xff]  ;;  %v7811_v15 = vpack.c.bf16 %v5946_v9, %v5916_v14 }
 0x589   : > { %4270 = vst [vmem:[#allocation3 + $0x880] sm:$0xf0] %v4210_v51  ;;  %4271 = vst [vmem:[#allocation3 + $0x888] sm:$0xf0] %v4211_v17  ;;  %5163 = vrot.lane.b32.xlu1 %v11367_v12, %s8711_s10  ;;  %5161 = vrot.lane.b32.xlu0 %v11361_v8, %s8711_s10  ;;  %v7767_v38 = vpack.c.bf16 %v6122_v5, %v6092_v60  ;;  %v11479_v59 = vld [vmem:[#allocation9] sm:$0xff] }
 0x58b   : > { %v11477_v40 = vpop.permute.xlu1 %3956  ;;  %v3955_v47 = vpop.permute.xlu0 %3954  ;;  %7768 = vmatpush1.bf16.msra.mxu0 %v7767_v38 }
 0x58c   : > { %v4011_v25 = vsel %vm4006_vm1, %v3953_v36, %v3955_v47  ;;  %v4012_v24 = vsel %vm4006_vm1, %v3955_v47, %v11477_v40  ;;  %7798 = vmatprep.subr.bf16.mxu0 %v7797_v4  ;;  %v5917_v36 = vld [vmem:[#allocation3 + $0x5c8] sm:$0xff]  ;;  %v11519_v4 = vcombine.high %v11390_v50, %v11390_v50 }
 0x58d   : > { %4071 = vst [vmem:[#allocation3 + $0x890] sm:$0xf] %v4011_v25  ;;  %4072 = vst [vmem:[#allocation3 + $0x898] sm:$0xf] %v4012_v24  ;;  %5364 = vrot.lane.b32.xlu1 %v11376_v34, %s8713_s26  ;;  %5362 = vrot.lane.b32.xlu0 %v11257_v49, %s8713_s26  ;;  %v7809_v42 = vpack.c.bf16 %v5947_v35, %v5917_v36 }
 0x58e   : > { %7720 = vmatmul.mubr.msk.f32.vlgmr.msra.gmra.mrb[0].mxu0 %vm6152_vm10, %v11479_v59 }
 0x58f   : > { %v11490_v19 = vpop.permute.xlu1 %4157  ;;  %v4156_v63 = vpop.permute.xlu0 %4155  ;;  %7800 = vmatpush1.bf16.msra.mxu0 %v7799_v10  ;;  %6362 = vmatprep.mubr.f32.mxu0 %v8712_v29 }
 0x590   : > { %v4212_v34 = vsel %vm4207_vm2, %v4154_v2, %v4156_v63  ;;  %v4213_v49 = vsel %vm4207_vm2, %v4156_v63, %v11490_v19  ;;  %7802 = vmatprep.subr.bf16.mxu0 %v7801_v3  ;;  %v6005_v48 = vld [vmem:[#allocation3 + $0x888] sm:$0xff]  ;;  %v6004_v53 = vld [vmem:[#allocation3 + $0x880] sm:$0xff] }
 0x591   : > { %4272 = vst [vmem:[#allocation3 + $0x890] sm:$0xf0] %v4212_v34  ;;  %4273 = vst [vmem:[#allocation3 + $0x898] sm:$0xf0] %v4213_v49  ;;  %5564 = vrot.lane.b32.xlu1 %v11367_v12, %s8714_s9  ;;  %5562 = vrot.lane.b32.xlu0 %v11361_v8, %s8714_s9  ;;  %v7785_v32 = vpack.c.bf16 %v6005_v48, %v5975_v21  ;;  %v7787_v23 = vpack.c.bf16 %v6004_v53, %v5974_v0  ;;  %v5977_v2 = vld [vmem:[#allocation3 + $0x7a8] sm:$0xff] }
 0x592   : > { %v7807_v8 = vpack.c.bf16 %v5886_v28, %v5856_v13  ;;  %v11564_v53 = vcombine.low %v11551_v6, %v11551_v6 }
 0x593   : > { %v4354_v58 = vpop.permute.xlu1 %4353  ;;  %7786 = vmatprep.subr.bf16.mxu1 %v7785_v32  ;;  %v4352_v52 = vpop.permute.xlu0 %4351  ;;  %7804 = vmatpush1.bf16.msra.mxu0 %v7803_v41 }
 0x594   : > { %v4410_v44 = vsel %vm4407_vm3, %v11378_v22, %v4352_v52  ;;  %v4411_v56 = vsel %vm4407_vm3, %v4352_v52, %v4354_v58  ;;  %7788 = vmatpush1.bf16.msra.mxu1 %v7787_v23  ;;  %7806 = vmatprep.subr.bf16.mxu0 %v7805_v57 }
 0x595   : > { %4470 = vst [vmem:[#allocation3 + $0x970] sm:$0xf] %v4410_v44  ;;  %4471 = vst [vmem:[#allocation3 + $0x978] sm:$0xf] %v4411_v56  ;;  %5167 = vrot.lane.b32.xlu1 %v11390_v50, %s8711_s10  ;;  %5165 = vrot.lane.b32.xlu0 %v11384_v55, %s8711_s10 }
 0x597   : > { %v4555_v11 = vpop.permute.xlu1 %4554  ;;  %v4553_v30 = vpop.permute.xlu0 %4552  ;;  %7808 = vmatpush1.bf16.msra.mxu0 %v7807_v8 }
 0x598   : > { %v4611_v22 = vsel %vm4608_vm4, %v11392_v37, %v4553_v30  ;;  %v4612_v39 = vsel %vm4608_vm4, %v4553_v30, %v4555_v11  ;;  %7810 = vmatprep.subr.bf16.mxu0 %v7809_v42  ;;  %v6007_v16 = vld [vmem:[#allocation3 + $0x898] sm:$0xff]  ;;  %v6006_v17 = vld [vmem:[#allocation3 + $0x890] sm:$0xff] }
 0x599   : > { %4671 = vst [vmem:[#allocation3 + $0x970] sm:$0xf0] %v4611_v22  ;;  %4672 = vst [vmem:[#allocation3 + $0x978] sm:$0xf0] %v4612_v39  ;;  %5368 = vrot.lane.b32.xlu1 %v11402_v18, %s8713_s26  ;;  %5366 = vrot.lane.b32.xlu0 %v11367_v12, %s8713_s26  ;;  %v7813_v51 = vpack.c.bf16 %v6007_v16, %v5977_v2  ;;  %v7815_v12 = vpack.c.bf16 %v6006_v17, %v5976_v20  ;;  %v11525_v18 = vld [vmem:[#allocation2 + $0x44] sm:$0xff] }
 0x59a   : > { %v11545_v10 = vcombine.high %v11525_v18, %v11525_v18 }
 0x59b   : > { %v4755_v60 = vpop.permute.xlu1 %4754  ;;  %v4753_v5 = vpop.permute.xlu0 %4752  ;;  %7812 = vmatpush1.bf16.msra.mxu0 %v7811_v15 }
 0x59c   : > { %v4811_v37 = vsel %vm4808_vm5, %v11404_v45, %v4753_v5  ;;  %v4812_v38 = vsel %vm4808_vm5, %v4753_v5, %v4755_v60  ;;  %7814 = vmatprep.subr.bf16.mxu0 %v7813_v51 }
 0x59d   : > { %4871 = vst [vmem:[#allocation3 + $0xa60] sm:$0xf] %v4811_v37  ;;  %4872 = vst [vmem:[#allocation3 + $0xa68] sm:$0xf] %v4812_v38  ;;  %5568 = vrot.lane.b32.xlu1 %v11390_v50, %s8714_s9  ;;  %5566 = vrot.lane.b32.xlu0 %v11384_v55, %s8714_s9  ;;  %v11536_v55 = vcombine.low %v11525_v18, %v11525_v18 }
 0x59f   : > { %v4956_v45 = vpop.permute.xlu1 %4955  ;;  %v4954_v62 = vpop.permute.xlu0 %4953  ;;  %7816 = vmatpush1.bf16.msra.mxu0 %v7815_v12 }
 0x5a0   : > { %v5012_v47 = vsel %vm5009_vm6, %v11412_v31, %v4954_v62  ;;  %v5013_v1 = vsel %vm5009_vm6, %v4954_v62, %v4956_v45  ;;  %v6035_v63 = vld [vmem:[#allocation3 + $0x978] sm:$0xff]  ;;  %v6034_v34 = vld [vmem:[#allocation3 + $0x970] sm:$0xff] }
 0x5a1   : > { %5072 = vst [vmem:[#allocation3 + $0xa60] sm:$0xf0] %v5012_v47  ;;  %5073 = vst [vmem:[#allocation3 + $0xa68] sm:$0xf0] %v5013_v1  ;;  %3968 = vrot.lane.b32.xlu1 %v11525_v18, %s8705_s14  ;;  %3966 = vrot.lane.b32.xlu0 %v11519_v4, %s8705_s14 }
 0x5a3   : > { %v11538_v25 = vpop.permute.xlu1 %4357  ;;  %v4356_v24 = vpop.permute.xlu0 %4355 }
 0x5a4   : > { %v4412_v7 = vsel %vm4407_vm3, %v4354_v58, %v4356_v24  ;;  %v4413_v31 = vsel %vm4407_vm3, %v4356_v24, %v11538_v25 }
 0x5a5   : > { %4472 = vst [vmem:[#allocation3 + $0x980] sm:$0xf] %v4412_v7  ;;  %4473 = vst [vmem:[#allocation3 + $0x988] sm:$0xf] %v4413_v31  ;;  %4169 = vrot.lane.b32.xlu1 %v11536_v55, %s8706_s7  ;;  %4167 = vrot.lane.b32.xlu0 %v11390_v50, %s8706_s7  ;;  %v5769_v7 = vld [vmem:[#allocation3 + $0x128] sm:$0xff] }
 0x5a7   : > { %v11553_v3 = vpop.permute.xlu1 %4558  ;;  %v4557_v43 = vpop.permute.xlu0 %4556 }
 0x5a8   : > { %v4613_v27 = vsel %vm4608_vm4, %v4555_v11, %v4557_v43  ;;  %v4614_v0 = vsel %vm4608_vm4, %v4557_v43, %v11553_v3  ;;  %v6065_v33 = vld [vmem:[#allocation3 + $0xa68] sm:$0xff]  ;;  %v6064_v49 = vld [vmem:[#allocation3 + $0xa60] sm:$0xff] }
 0x5a9   : > { %4673 = vst [vmem:[#allocation3 + $0x980] sm:$0xf0] %v4613_v27  ;;  %4674 = vst [vmem:[#allocation3 + $0x988] sm:$0xf0] %v4614_v0  ;;  %3972 = vrot.lane.b32.xlu1 %v11551_v6, %s8705_s14  ;;  %3970 = vrot.lane.b32.xlu0 %v11545_v10, %s8705_s14  ;;  %v7789_v21 = vpack.c.bf16 %v6065_v33, %v6035_v63  ;;  %v7791_v48 = vpack.c.bf16 %v6064_v49, %v6034_v34  ;;  %v5739_v63 = vld [vmem:[#allocation3 + $0x38] sm:$0xff]  ;;  %v5768_v27 = vld [vmem:[#allocation3 + $0x120] sm:$0xff] }
 0x5aa   : > { %v7825_v34 = vpack.c.bf16 %v5769_v7, %v5739_v63  ;;  %v5738_v49 = vld [vmem:[#allocation3 + $0x30] sm:$0xff]  ;;  %v5740_v7 = vld [vmem:[#allocation3 + $0x40] sm:$0xff] }
 0x5ab   : > { %v11566_v32 = vpop.permute.xlu1 %4758  ;;  %7790 = vmatprep.subr.bf16.mxu1 %v7789_v21  ;;  %v4757_v41 = vpop.permute.xlu0 %4756  ;;  %v5829_v21 = vld [vmem:[#allocation3 + $0x308] sm:$0xff] }
 0x5ac   : > { %v4813_v23 = vsel %vm4808_vm5, %v4755_v60, %v4757_v41  ;;  %v4814_v26 = vsel %vm4808_vm5, %v4757_v41, %v11566_v32  ;;  %7792 = vmatpush1.bf16.msra.mxu1 %v7791_v48  ;;  %v7827_v48 = vpack.c.bf16 %v5768_v27, %v5738_v49  ;;  %v5978_v49 = vld [vmem:[#allocation3 + $0x7b0] sm:$0xff] }
 0x5ad   : > { %4873 = vst [vmem:[#allocation3 + $0xa70] sm:$0xf] %v4813_v23  ;;  %4874 = vst [vmem:[#allocation3 + $0xa78] sm:$0xf] %v4814_v26  ;;  %4173 = vrot.lane.b32.xlu1 %v11564_v53, %s8706_s7  ;;  %4171 = vrot.lane.b32.xlu0 %v11525_v18, %s8706_s7  ;;  %v5799_v26 = vld [vmem:[#allocation3 + $0x218] sm:$0xff] }
 0x5af   : > { %v11575_v57 = vpop.permute.xlu1 %4959  ;;  %v4958_v28 = vpop.permute.xlu0 %4957 }
 0x5b0   : > { %v5014_v58 = vsel %vm5009_vm6, %v4956_v45, %v4958_v28  ;;  %v5015_v52 = vsel %vm5009_vm6, %v4958_v28, %v11575_v57  ;;  %v6037_v42 = vld [vmem:[#allocation3 + $0x988] sm:$0xff]  ;;  %v5828_v28 = vld [vmem:[#allocation3 + $0x300] sm:$0xff] }
 0x5b1   : > { %5074 = vst [vmem:[#allocation3 + $0xa70] sm:$0xf0] %v5014_v58  ;;  %5075 = vst [vmem:[#allocation3 + $0xa78] sm:$0xf0] %v5015_v52  ;;  %4369 = vrot.lane.b32.xlu1 %v11525_v18, %s8707_s11  ;;  %4367 = vrot.lane.b32.xlu0 %v11519_v4, %s8707_s11 }
 0x5b3   : > { %v5156_v35 = vpop.permute.xlu1 %5155  ;;  %v5154_v44 = vpop.permute.xlu0 %5153 }
 0x5b4   : > { %v5212_v56 = vsel %vm5209_vm7, %v11432_v54, %v5154_v44  ;;  %v5213_v13 = vsel %vm5209_vm7, %v5154_v44, %v5156_v35  ;;  %v6036_v54 = vld [vmem:[#allocation3 + $0x980] sm:$0xff]  ;;  %v5798_v44 = vld [vmem:[#allocation3 + $0x210] sm:$0xff] }
 0x5b5   : > { %5272 = vst [vmem:[#allocation3 + $0xb50] sm:$0xf] %v5212_v56  ;;  %5273 = vst [vmem:[#allocation3 + $0xb58] sm:$0xf] %v5213_v13  ;;  %4570 = vrot.lane.b32.xlu1 %v11536_v55, %s8708_s8  ;;  %4568 = vrot.lane.b32.xlu0 %v11390_v50, %s8708_s8  ;;  %v5889_v56 = vld [vmem:[#allocation3 + $0x4e8] sm:$0xff]  ;;  %v7831_v13 = vpack.c.bf16 %v5828_v28, %v5798_v44 }
 0x5b7   : > { %v5357_v8 = vpop.permute.xlu1 %5356  ;;  %v5355_v36 = vpop.permute.xlu0 %5354 }
 0x5b8   : > { %v5413_v9 = vsel %vm5410_vm8, %v11440_v61, %v5355_v36  ;;  %v5414_v11 = vsel %vm5410_vm8, %v5355_v36, %v5357_v8  ;;  %v6067_v30 = vld [vmem:[#allocation3 + $0xa78] sm:$0xff]  ;;  %v6066_v22 = vld [vmem:[#allocation3 + $0xa70] sm:$0xff] }
 0x5b9   : > { %5473 = vst [vmem:[#allocation3 + $0xb50] sm:$0xf0] %v5413_v9  ;;  %5474 = vst [vmem:[#allocation3 + $0xb58] sm:$0xf0] %v5414_v11  ;;  %4770 = vrot.lane.b32.xlu1 %v11525_v18, %s8709_s28  ;;  %4768 = vrot.lane.b32.xlu0 %v11519_v4, %s8709_s28  ;;  %v7817_v39 = vpack.c.bf16 %v6067_v30, %v6037_v42  ;;  %v7819_v14 = vpack.c.bf16 %v6066_v22, %v6036_v54  ;;  %v5859_v42 = vld [vmem:[#allocation3 + $0x3f8] sm:$0xff]  ;;  %v5888_v11 = vld [vmem:[#allocation3 + $0x4e0] sm:$0xff] }
 0x5ba   : > { %v7833_v22 = vpack.c.bf16 %v5889_v56, %v5859_v42 }
 0x5bb   : > { %v5557_v2 = vpop.permute.xlu1 %5556  ;;  %v5555_v16 = vpop.permute.xlu0 %5554  ;;  %7818 = vmatprep.subr.bf16.mxu0 %v7817_v39 }
 0x5bc   : > { %v5613_v61 = vsel %vm5610_vm9, %v11448_v46, %v5555_v16  ;;  %v5614_v15 = vsel %vm5610_vm9, %v5555_v16, %v5557_v2  ;;  %7820 = vmatpush1.bf16.msra.mxu0 %v7819_v14 }
 0x5bd   : > { %5673 = vst [vmem:[#allocation3 + $0xc40] sm:$0xf] %v5613_v61  ;;  %5674 = vst [vmem:[#allocation3 + $0xc48] sm:$0xf] %v5614_v15  ;;  %4971 = vrot.lane.b32.xlu1 %v11536_v55, %s8710_s16  ;;  %4969 = vrot.lane.b32.xlu0 %v11390_v50, %s8710_s16  ;;  %v5858_v15 = vld [vmem:[#allocation3 + $0x3f0] sm:$0xff] }
 0x5bf   : > { %v11605_v51 = vpop.permute.xlu1 %5159  ;;  %v5158_v17 = vpop.permute.xlu0 %5157 }
 0x5c0   : > { %v5214_v60 = vsel %vm5209_vm7, %v5156_v35, %v5158_v17  ;;  %v5215_v5 = vsel %vm5209_vm7, %v5158_v17, %v11605_v51  ;;  %v6095_v38 = vld [vmem:[#allocation3 + $0xb58] sm:$0xff]  ;;  %v6094_v62 = vld [vmem:[#allocation3 + $0xb50] sm:$0xff]  ;;  %v7829_v35 = vpack.c.bf16 %v5829_v21, %v5799_v26  ;;  %v5949_v17 = vld [vmem:[#allocation3 + $0x6c8] sm:$0xff] }
 0x5c1   : > { %5274 = vst [vmem:[#allocation3 + $0xb60] sm:$0xf] %v5214_v60  ;;  %5275 = vst [vmem:[#allocation3 + $0xb68] sm:$0xf] %v5215_v5  ;;  %4373 = vrot.lane.b32.xlu1 %v11551_v6, %s8707_s11  ;;  %4371 = vrot.lane.b32.xlu0 %v11545_v10, %s8707_s11  ;;  %v5741_v60 = vld [vmem:[#allocation3 + $0x48] sm:$0xff]  ;;  %v5830_v21 = vld [vmem:[#allocation3 + $0x310] sm:$0xff] }
 0x5c3   : > { %v11614_v46 = vpop.permute.xlu1 %5360  ;;  %v5359_v37 = vpop.permute.xlu0 %5358 }
 0x5c4   : > { %v5415_v20 = vsel %vm5410_vm8, %v5357_v8, %v5359_v37  ;;  %v5416_v12 = vsel %vm5410_vm8, %v5359_v37, %v11614_v46  ;;  %v6125_v45 = vld [vmem:[#allocation3 + $0xc48] sm:$0xff]  ;;  %v6124_v47 = vld [vmem:[#allocation3 + $0xc40] sm:$0xff]  ;;  %v5771_v8 = vld [vmem:[#allocation3 + $0x138] sm:$0xff] }
 0x5c5   : > { %5475 = vst [vmem:[#allocation3 + $0xb60] sm:$0xf0] %v5415_v20  ;;  %5476 = vst [vmem:[#allocation3 + $0xb68] sm:$0xf0] %v5416_v12  ;;  %4574 = vrot.lane.b32.xlu1 %v11564_v53, %s8708_s8  ;;  %4572 = vrot.lane.b32.xlu0 %v11525_v18, %s8708_s8  ;;  %v7793_v1 = vpack.c.bf16 %v6125_v45, %v6095_v38  ;;  %v7795_v24 = vpack.c.bf16 %v6124_v47, %v6094_v62  ;;  %v5919_v38 = vld [vmem:[#allocation3 + $0x5d8] sm:$0xff]  ;;  %v5948_v12 = vld [vmem:[#allocation3 + $0x6c0] sm:$0xff] }
 0x5c6   : > { %v7853_v20 = vpack.c.bf16 %v5771_v8, %v5741_v60  ;;  %v5770_v45 = vld [vmem:[#allocation3 + $0x130] sm:$0xff]  ;;  %v5861_v8 = vld [vmem:[#allocation3 + $0x408] sm:$0xff] }
 0x5c7   : > { %v11623_v31 = vpop.permute.xlu1 %5560  ;;  %7794 = vmatprep.subr.bf16.mxu1 %v7793_v1  ;;  %v5559_v43 = vpop.permute.xlu0 %5558  ;;  %v7837_v1 = vpack.c.bf16 %v5949_v17, %v5919_v38  ;;  %v7855_v27 = vpack.c.bf16 %v5770_v45, %v5740_v7 }
 0x5c8   : > { %v5615_v0 = vsel %vm5610_vm9, %v5557_v2, %v5559_v43  ;;  %v5616_v33 = vsel %vm5610_vm9, %v5559_v43, %v11623_v31  ;;  %7796 = vmatpush1.bf16.msra.mxu1 %v7795_v24  ;;  %v5918_v24 = vld [vmem:[#allocation3 + $0x5d0] sm:$0xff]  ;;  %v5831_v43 = vld [vmem:[#allocation3 + $0x318] sm:$0xff] }
 0x5c9   : > { %5675 = vst [vmem:[#allocation3 + $0xc50] sm:$0xf] %v5615_v0  ;;  %5676 = vst [vmem:[#allocation3 + $0xc58] sm:$0xf] %v5616_v33  ;;  %4774 = vrot.lane.b32.xlu1 %v11551_v6, %s8709_s28  ;;  %4772 = vrot.lane.b32.xlu0 %v11545_v10, %s8709_s28  ;;  %v7839_v63 = vpack.c.bf16 %v5948_v12, %v5918_v24 }
 0x5ca   : > { %7826 = vmatprep.subr.bf16.mxu1 %v7825_v34  ;;  %v5801_v34 = vld [vmem:[#allocation3 + $0x228] sm:$0xff] }
 0x5cb   : > { %v3961_v41 = vpop.permute.xlu1 %3960  ;;  %v3959_v23 = vpop.permute.xlu0 %3958  ;;  %7721 = vmatmul.mubr.msk.f32.vlgmr.msra.gmra.mrb[0].mxu1 %vm6152_vm10, %v11479_v59 }
 0x5cc   : > { %v4013_v58 = vsel %vm4006_vm1, %v11477_v40, %v3959_v23  ;;  %v4014_v52 = vsel %vm4006_vm1, %v3959_v23, %v3961_v41  ;;  %7828 = vmatpush1.bf16.msra.mxu1 %v7827_v48  ;;  %6433 = vmatprep.mubr.f32.mxu1 %v8712_v29  ;;  %v6097_v9 = vld [vmem:[#allocation3 + $0xb68] sm:$0xff]  ;;  %v6096_v14 = vld [vmem:[#allocation3 + $0xb60] sm:$0xff]  ;;  %v7857_v48 = vpack.c.bf16 %v5831_v43, %v5801_v34 }
 0x5cd   : > { %4073 = vst [vmem:[#allocation3 + $0x8a0] sm:$0xf] %v4013_v58  ;;  %4074 = vst [vmem:[#allocation3 + $0x8a8] sm:$0xf] %v4014_v52  ;;  %4975 = vrot.lane.b32.xlu1 %v11564_v53, %s8710_s16  ;;  %4973 = vrot.lane.b32.xlu0 %v11525_v18, %s8710_s16  ;;  %v5800_v52 = vld [vmem:[#allocation3 + $0x220] sm:$0xff] }
 0x5ce   : > { %7830 = vmatprep.subr.bf16.mxu1 %v7829_v35  ;;  %v5891_v35 = vld [vmem:[#allocation3 + $0x4f8] sm:$0xff]  ;;  %v7859_v44 = vpack.c.bf16 %v5830_v21, %v5800_v52 }
 0x5cf   : > { %v4162_v40 = vpop.permute.xlu1 %4161  ;;  %v4160_v36 = vpop.permute.xlu0 %4159  ;;  %v7861_v42 = vpack.c.bf16 %v5891_v35, %v5861_v8 }
 0x5d0   : > { %v4214_v30 = vsel %vm4207_vm2, %v11490_v19, %v4160_v36  ;;  %v4215_v54 = vsel %vm4207_vm2, %v4160_v36, %v4162_v40  ;;  %7832 = vmatpush1.bf16.msra.mxu1 %v7831_v13  ;;  %v6127_v39 = vld [vmem:[#allocation3 + $0xc58] sm:$0xff]  ;;  %v6126_v2 = vld [vmem:[#allocation3 + $0xc50] sm:$0xff]  ;;  %v7835_v19 = vpack.c.bf16 %v5888_v11, %v5858_v15 }
 0x5d1   : > { %4274 = vst [vmem:[#allocation3 + $0x8a0] sm:$0xf0] %v4214_v30  ;;  %4275 = vst [vmem:[#allocation3 + $0x8a8] sm:$0xf0] %v4215_v54  ;;  %5171 = vrot.lane.b32.xlu1 %v11525_v18, %s8711_s10  ;;  %5169 = vrot.lane.b32.xlu0 %v11519_v4, %s8711_s10  ;;  %v7821_v16 = vpack.c.bf16 %v6127_v39, %v6097_v9  ;;  %v7823_v61 = vpack.c.bf16 %v6126_v2, %v6096_v14  ;;  %v5860_v9 = vld [vmem:[#allocation3 + $0x400] sm:$0xff]  ;;  %v5951_v11 = vld [vmem:[#allocation3 + $0x6d8] sm:$0xff] }
 0x5d2   : > { %7834 = vmatprep.subr.bf16.mxu1 %v7833_v22  ;;  %v5921_v22 = vld [vmem:[#allocation3 + $0x5e8] sm:$0xff]  ;;  %v5950_v39 = vld [vmem:[#allocation3 + $0x6d0] sm:$0xff] }
 0x5d3   : > { %v11649_v5 = vpop.permute.xlu1 %3964  ;;  %v3963_v37 = vpop.permute.xlu0 %3962  ;;  %7822 = vmatprep.subr.bf16.mxu0 %v7821_v16  ;;  %v7865_v16 = vpack.c.bf16 %v5951_v11, %v5921_v22 }
 0x5d4   : > { %v4015_v62 = vsel %vm4006_vm1, %v3961_v41, %v3963_v37  ;;  %v4016_v47 = vsel %vm4006_vm1, %v3963_v37, %v11649_v5  ;;  %7824 = vmatpush1.bf16.msra.mxu0 %v7823_v61  ;;  %7836 = vmatpush1.bf16.msra.mxu1 %v7835_v19  ;;  %v5979_v41 = vld [vmem:[#allocation3 + $0x7b8] sm:$0xff]  ;;  %v5920_v61 = vld [vmem:[#allocation3 + $0x5e0] sm:$0xff]  ;;  %v5981_v37 = vld [vmem:[#allocation3 + $0x7c8] sm:$0xff] }
 0x5d5   : > { %4075 = vst [vmem:[#allocation3 + $0x8b0] sm:$0xf] %v4015_v62  ;;  %4076 = vst [vmem:[#allocation3 + $0x8b8] sm:$0xf] %v4016_v47  ;;  %5372 = vrot.lane.b32.xlu1 %v11536_v55, %s8713_s26  ;;  %5370 = vrot.lane.b32.xlu0 %v11390_v50, %s8713_s26  ;;  %v7867_v17 = vpack.c.bf16 %v5950_v39, %v5920_v61 }
 0x5d6   : > { %7838 = vmatprep.subr.bf16.mxu1 %v7837_v1  ;;  %7854 = vmatprep.subr.bf16.mxu0 %v7853_v20 }
 0x5d7   : > { %v11658_v0 = vpop.permute.xlu1 %4165  ;;  %v4164_v33 = vpop.permute.xlu0 %4163  ;;  %7722 = vmatmul.mubr.msk.f32.vlgmr.msra.gmra.mrb[2].mxu0 %vm6152_vm10, %v11479_v59 }
 0x5d8   : > { %v4216_v55 = vsel %vm4207_vm2, %v4162_v40, %v4164_v33  ;;  %v4217_v50 = vsel %vm4207_vm2, %v4164_v33, %v11658_v0  ;;  %7840 = vmatpush1.bf16.msra.mxu1 %v7839_v63  ;;  %7856 = vmatpush1.bf16.msra.mxu0 %v7855_v27  ;;  %v6009_v23 = vld [vmem:[#allocation3 + $0x8a8] sm:$0xff]  ;;  %v6008_v26 = vld [vmem:[#allocation3 + $0x8a0] sm:$0xff]  ;;  %v5890_v40 = vld [vmem:[#allocation3 + $0x4f0] sm:$0xff] }
 0x5d9   : > { %4276 = vst [vmem:[#allocation3 + $0x8b0] sm:$0xf0] %v4216_v55  ;;  %4277 = vst [vmem:[#allocation3 + $0x8b8] sm:$0xf0] %v4217_v50  ;;  %5572 = vrot.lane.b32.xlu1 %v11525_v18, %s8714_s9  ;;  %5570 = vrot.lane.b32.xlu0 %v11519_v4, %s8714_s9  ;;  %v7841_v28 = vpack.c.bf16 %v6009_v23, %v5979_v41  ;;  %v7843_v58 = vpack.c.bf16 %v6008_v26, %v5978_v49  ;;  %v11725_v33 = vld [vmem:[#allocation2 + $0x5c] sm:$0xff] }
 0x5da   : > { %7858 = vmatprep.subr.bf16.mxu0 %v7857_v48  ;;  %6504 = vmatprep.mubr.f32.mxu0 %v8712_v29  ;;  %v7863_v30 = vpack.c.bf16 %v5890_v40, %v5860_v9 }
 0x5db   : > { %v11670_v56 = vpop.permute.xlu1 %4361  ;;  %7842 = vmatprep.subr.bf16.mxu1 %v7841_v28  ;;  %v4360_v13 = vpop.permute.xlu0 %4359 }
 0x5dc   : > { %v4414_v36 = vsel %vm4407_vm3, %v11538_v25, %v4360_v13  ;;  %v4415_v4 = vsel %vm4407_vm3, %v4360_v13, %v11670_v56  ;;  %7844 = vmatpush1.bf16.msra.mxu1 %v7843_v58  ;;  %7860 = vmatpush1.bf16.msra.mxu0 %v7859_v44  ;;  %v11738_v58 = vcombine.low %v11725_v33, %v11725_v33 }
 0x5dd   : > { %4474 = vst [vmem:[#allocation3 + $0x990] sm:$0xf] %v4414_v36  ;;  %4475 = vst [vmem:[#allocation3 + $0x998] sm:$0xf] %v4415_v4  ;;  %5175 = vrot.lane.b32.xlu1 %v11551_v6, %s8711_s10  ;;  %5173 = vrot.lane.b32.xlu0 %v11545_v10, %s8711_s10 }
 0x5de   : > { %7862 = vmatprep.subr.bf16.mxu0 %v7861_v42 }
 0x5df   : > { %v4563_v54 = vpop.permute.xlu1 %4562  ;;  %v4561_v25 = vpop.permute.xlu0 %4560 }
 0x5e0   : > { %v4615_v14 = vsel %vm4608_vm4, %v11553_v3, %v4561_v25  ;;  %v4616_v2 = vsel %vm4608_vm4, %v4561_v25, %v4563_v54  ;;  %7864 = vmatpush1.bf16.msra.mxu0 %v7863_v30  ;;  %v6011_v15 = vld [vmem:[#allocation3 + $0x8b8] sm:$0xff]  ;;  %v6010_v3 = vld [vmem:[#allocation3 + $0x8b0] sm:$0xff] }
 0x5e1   : > { %4675 = vst [vmem:[#allocation3 + $0x990] sm:$0xf0] %v4615_v14  ;;  %4676 = vst [vmem:[#allocation3 + $0x998] sm:$0xf0] %v4616_v2  ;;  %5376 = vrot.lane.b32.xlu1 %v11564_v53, %s8713_s26  ;;  %5374 = vrot.lane.b32.xlu0 %v11525_v18, %s8713_s26  ;;  %v7869_v12 = vpack.c.bf16 %v6011_v15, %v5981_v37  ;;  %v11692_v53 = vcombine.high %v11551_v6, %v11551_v6  ;;  %v5980_v18 = vld [vmem:[#allocation3 + $0x7c0] sm:$0xff] }
 0x5e2   : > { %7866 = vmatprep.subr.bf16.mxu0 %v7865_v16  ;;  %v7871_v45 = vpack.c.bf16 %v6010_v3, %v5980_v18 }
 0x5e3   : > { %v4763_v19 = vpop.permute.xlu1 %4762  ;;  %v4761_v60 = vpop.permute.xlu0 %4760 }
 0x5e4   : > { %v4815_v38 = vsel %vm4808_vm5, %v11566_v32, %v4761_v60  ;;  %v4816_v20 = vsel %vm4808_vm5, %v4761_v60, %v4763_v19  ;;  %7868 = vmatpush1.bf16.msra.mxu0 %v7867_v17  ;;  %v11698_v32 = vld [vmem:[#allocation2 + $0x54] sm:$0xff] }
 0x5e5   : > { %4875 = vst [vmem:[#allocation3 + $0xa80] sm:$0xf] %v4815_v38  ;;  %4876 = vst [vmem:[#allocation3 + $0xa88] sm:$0xf] %v4816_v20  ;;  %5576 = vrot.lane.b32.xlu1 %v11551_v6, %s8714_s9  ;;  %5574 = vrot.lane.b32.xlu0 %v11545_v10, %s8714_s9  ;;  %v11709_v10 = vcombine.low %v11698_v32, %v11698_v32  ;;  %v11719_v27 = vcombine.high %v11698_v32, %v11698_v32 }
 0x5e6   : > { %7870 = vmatprep.subr.bf16.mxu0 %v7869_v12 }
 0x5e7   : > { %v4964_v62 = vpop.permute.xlu1 %4963  ;;  %v4962_v47 = vpop.permute.xlu0 %4961 }
 0x5e8   : > { %v5016_v1 = vsel %vm5009_vm6, %v11575_v57, %v4962_v47  ;;  %v5017_v24 = vsel %vm5009_vm6, %v4962_v47, %v4964_v62  ;;  %7872 = vmatpush1.bf16.msra.mxu0 %v7871_v45  ;;  %v6039_v21 = vld [vmem:[#allocation3 + $0x998] sm:$0xff]  ;;  %v6038_v41 = vld [vmem:[#allocation3 + $0x990] sm:$0xff] }
 0x5e9   : > { %5076 = vst [vmem:[#allocation3 + $0xa80] sm:$0xf0] %v5016_v1  ;;  %5077 = vst [vmem:[#allocation3 + $0xa88] sm:$0xf0] %v5017_v24  ;;  %3976 = vrot.lane.b32.xlu1 %v11698_v32, %s8705_s14  ;;  %3974 = vrot.lane.b32.xlu0 %v11692_v53, %s8705_s14 }
 0x5eb   : > { %v11711_v7 = vpop.permute.xlu1 %4365  ;;  %v4364_v43 = vpop.permute.xlu0 %4363 }
 0x5ec   : > { %v4416_v57 = vsel %vm4407_vm3, %v11670_v56, %v4364_v43  ;;  %v4417_v63 = vsel %vm4407_vm3, %v4364_v43, %v11711_v7 }
 0x5ed   : > { %4476 = vst [vmem:[#allocation3 + $0x9a0] sm:$0xf] %v4416_v57  ;;  %4477 = vst [vmem:[#allocation3 + $0x9a8] sm:$0xf] %v4417_v63  ;;  %4177 = vrot.lane.b32.xlu1 %v11709_v10, %s8706_s7  ;;  %4175 = vrot.lane.b32.xlu0 %v11551_v6, %s8706_s7  ;;  %v5773_v57 = vld [vmem:[#allocation3 + $0x148] sm:$0xff] }
 0x5ef   : > { %v11727_v34 = vpop.permute.xlu1 %4566  ;;  %v4565_v49 = vpop.permute.xlu0 %4564 }
 0x5f0   : > { %v4617_v55 = vsel %vm4608_vm4, %v4563_v54, %v4565_v49  ;;  %v4618_v50 = vsel %vm4608_vm4, %v4565_v49, %v11727_v34  ;;  %v6069_v48 = vld [vmem:[#allocation3 + $0xa88] sm:$0xff]  ;;  %v6068_v23 = vld [vmem:[#allocation3 + $0xa80] sm:$0xff] }
 0x5f1   : > { %4677 = vst [vmem:[#allocation3 + $0x9a0] sm:$0xf0] %v4617_v55  ;;  %4678 = vst [vmem:[#allocation3 + $0x9a8] sm:$0xf0] %v4618_v50  ;;  %3980 = vrot.lane.b32.xlu1 %v11725_v33, %s8705_s14  ;;  %3978 = vrot.lane.b32.xlu0 %v11719_v27, %s8705_s14  ;;  %v7845_v26 = vpack.c.bf16 %v6069_v48, %v6039_v21  ;;  %v7847_v28 = vpack.c.bf16 %v6068_v23, %v6038_v41  ;;  %v5743_v21 = vld [vmem:[#allocation3 + $0x58] sm:$0xff]  ;;  %v5772_v55 = vld [vmem:[#allocation3 + $0x140] sm:$0xff] }
 0x5f2   : > { %v7881_v41 = vpack.c.bf16 %v5773_v57, %v5743_v21  ;;  %v5742_v23 = vld [vmem:[#allocation3 + $0x50] sm:$0xff]  ;;  %v5835_v57 = vld [vmem:[#allocation3 + $0x338] sm:$0xff] }
 0x5f3   : > { %v11740_v52 = vpop.permute.xlu1 %4766  ;;  %7846 = vmatprep.subr.bf16.mxu1 %v7845_v26  ;;  %v4765_v35 = vpop.permute.xlu0 %4764  ;;  %v5833_v26 = vld [vmem:[#allocation3 + $0x328] sm:$0xff] }
 0x5f4   : > { %v4817_v44 = vsel %vm4808_vm5, %v4763_v19, %v4765_v35  ;;  %v4818_v56 = vsel %vm4808_vm5, %v4765_v35, %v11740_v52  ;;  %7848 = vmatpush1.bf16.msra.mxu1 %v7847_v28  ;;  %v7883_v28 = vpack.c.bf16 %v5772_v55, %v5742_v23  ;;  %v5834_v23 = vld [vmem:[#allocation3 + $0x330] sm:$0xff] }
 0x5f5   : > { %4877 = vst [vmem:[#allocation3 + $0xa90] sm:$0xf] %v4817_v44  ;;  %4878 = vst [vmem:[#allocation3 + $0xa98] sm:$0xf] %v4818_v56  ;;  %4181 = vrot.lane.b32.xlu1 %v11738_v58, %s8706_s7  ;;  %4179 = vrot.lane.b32.xlu0 %v11698_v32, %s8706_s7  ;;  %v5803_v56 = vld [vmem:[#allocation3 + $0x238] sm:$0xff] }
 0x5f7   : > { %v11749_v13 = vpop.permute.xlu1 %4967  ;;  %v4966_v8 = vpop.permute.xlu0 %4965 }
 0x5f8   : > { %v5018_v40 = vsel %vm5009_vm6, %v4964_v62, %v4966_v8  ;;  %v5019_v36 = vsel %vm5009_vm6, %v4966_v8, %v11749_v13  ;;  %v6041_v25 = vld [vmem:[#allocation3 + $0x9a8] sm:$0xff]  ;;  %v5832_v8 = vld [vmem:[#allocation3 + $0x320] sm:$0xff] }
 0x5f9   : > { %5078 = vst [vmem:[#allocation3 + $0xa90] sm:$0xf0] %v5018_v40  ;;  %5079 = vst [vmem:[#allocation3 + $0xa98] sm:$0xf0] %v5019_v36  ;;  %4377 = vrot.lane.b32.xlu1 %v11698_v32, %s8707_s11  ;;  %4375 = vrot.lane.b32.xlu0 %v11692_v53, %s8707_s11 }
 0x5fb   : > { %v5164_v4 = vpop.permute.xlu1 %5163  ;;  %v5162_v42 = vpop.permute.xlu0 %5161 }
 0x5fc   : > { %v5216_v9 = vsel %vm5209_vm7, %v11605_v51, %v5162_v42  ;;  %v5217_v11 = vsel %vm5209_vm7, %v5162_v42, %v5164_v4  ;;  %v6040_v51 = vld [vmem:[#allocation3 + $0x9a0] sm:$0xff]  ;;  %v5893_v42 = vld [vmem:[#allocation3 + $0x508] sm:$0xff] }
 0x5fd   : > { %5276 = vst [vmem:[#allocation3 + $0xb70] sm:$0xf] %v5216_v9  ;;  %5277 = vst [vmem:[#allocation3 + $0xb78] sm:$0xf] %v5217_v11  ;;  %4578 = vrot.lane.b32.xlu1 %v11709_v10, %s8708_s8  ;;  %4576 = vrot.lane.b32.xlu0 %v11551_v6, %s8708_s8  ;;  %v5775_v11 = vld [vmem:[#allocation3 + $0x158] sm:$0xff] }
 0x5ff   : > { %v5365_v30 = vpop.permute.xlu1 %5364  ;;  %v5363_v54 = vpop.permute.xlu0 %5362 }
 0x600   : > { %v5417_v22 = vsel %vm5410_vm8, %v11614_v46, %v5363_v54  ;;  %v5418_v39 = vsel %vm5410_vm8, %v5363_v54, %v5365_v30  ;;  %v6071_v14 = vld [vmem:[#allocation3 + $0xa98] sm:$0xff]  ;;  %v6070_v2 = vld [vmem:[#allocation3 + $0xa90] sm:$0xff] }
 0x601   : > { %5477 = vst [vmem:[#allocation3 + $0xb70] sm:$0xf0] %v5417_v22  ;;  %5478 = vst [vmem:[#allocation3 + $0xb78] sm:$0xf0] %v5418_v39  ;;  %4778 = vrot.lane.b32.xlu1 %v11698_v32, %s8709_s28  ;;  %4776 = vrot.lane.b32.xlu0 %v11692_v53, %s8709_s28  ;;  %v7873_v16 = vpack.c.bf16 %v6071_v14, %v6041_v25  ;;  %v7875_v61 = vpack.c.bf16 %v6070_v2, %v6040_v51  ;;  %v5863_v54 = vld [vmem:[#allocation3 + $0x418] sm:$0xff]  ;;  %v5892_v22 = vld [vmem:[#allocation3 + $0x500] sm:$0xff] }
 0x602   : > { %v7889_v51 = vpack.c.bf16 %v5893_v42, %v5863_v54 }
 0x603   : > { %v5565_v15 = vpop.permute.xlu1 %5564  ;;  %v5563_v17 = vpop.permute.xlu0 %5562  ;;  %7874 = vmatprep.subr.bf16.mxu0 %v7873_v16 }
 0x604   : > { %v5617_v46 = vsel %vm5610_vm9, %v11623_v31, %v5563_v17  ;;  %v5618_v19 = vsel %vm5610_vm9, %v5563_v17, %v5565_v15  ;;  %7876 = vmatpush1.bf16.msra.mxu0 %v7875_v61 }
 0x605   : > { %5677 = vst [vmem:[#allocation3 + $0xc60] sm:$0xf] %v5617_v46  ;;  %5678 = vst [vmem:[#allocation3 + $0xc68] sm:$0xf] %v5618_v19  ;;  %4979 = vrot.lane.b32.xlu1 %v11709_v10, %s8710_s16  ;;  %4977 = vrot.lane.b32.xlu0 %v11551_v6, %s8710_s16  ;;  %v5862_v46 = vld [vmem:[#allocation3 + $0x410] sm:$0xff]  ;;  %v5953_v19 = vld [vmem:[#allocation3 + $0x6e8] sm:$0xff] }
 0x607   : > { %v11779_v60 = vpop.permute.xlu1 %5167  ;;  %v5166_v37 = vpop.permute.xlu0 %5165 }
 0x608   : > { %v5218_v3 = vsel %vm5209_vm7, %v5164_v4, %v5166_v37  ;;  %v5219_v38 = vsel %vm5209_vm7, %v5166_v37, %v11779_v60  ;;  %v6099_v12 = vld [vmem:[#allocation3 + $0xb78] sm:$0xff]  ;;  %v6098_v47 = vld [vmem:[#allocation3 + $0xb70] sm:$0xff]  ;;  %v7885_v4 = vpack.c.bf16 %v5833_v26, %v5803_v56  ;;  %v5745_v37 = vld [vmem:[#allocation3 + $0x68] sm:$0xff] }
 0x609   : > { %5278 = vst [vmem:[#allocation3 + $0xb80] sm:$0xf] %v5218_v3  ;;  %5279 = vst [vmem:[#allocation3 + $0xb88] sm:$0xf] %v5219_v38  ;;  %4381 = vrot.lane.b32.xlu1 %v11725_v33, %s8707_s11  ;;  %4379 = vrot.lane.b32.xlu0 %v11719_v27, %s8707_s11 }
 0x60b   : > { %v11788_v31 = vpop.permute.xlu1 %5368  ;;  %v5367_v20 = vpop.permute.xlu0 %5366 }
 0x60c   : > { %v5419_v18 = vsel %vm5410_vm8, %v5365_v30, %v5367_v20  ;;  %v5420_v45 = vsel %vm5410_vm8, %v5367_v20, %v11788_v31  ;;  %v6129_v62 = vld [vmem:[#allocation3 + $0xc68] sm:$0xff]  ;;  %v6128_v1 = vld [vmem:[#allocation3 + $0xc60] sm:$0xff]  ;;  %v5923_v20 = vld [vmem:[#allocation3 + $0x5f8] sm:$0xff] }
 0x60d   : > { %5479 = vst [vmem:[#allocation3 + $0xb80] sm:$0xf0] %v5419_v18  ;;  %5480 = vst [vmem:[#allocation3 + $0xb88] sm:$0xf0] %v5420_v45  ;;  %4582 = vrot.lane.b32.xlu1 %v11738_v58, %s8708_s8  ;;  %4580 = vrot.lane.b32.xlu0 %v11698_v32, %s8708_s8  ;;  %v7849_v24 = vpack.c.bf16 %v6129_v62, %v6099_v12  ;;  %v7851_v43 = vpack.c.bf16 %v6128_v1, %v6098_v47  ;;  %v5952_v18 = vld [vmem:[#allocation3 + $0x6e0] sm:$0xff]  ;;  %v5774_v45 = vld [vmem:[#allocation3 + $0x150] sm:$0xff] }
 0x60e   : > { %v7909_v12 = vpack.c.bf16 %v5775_v11, %v5745_v37  ;;  %v7893_v1 = vpack.c.bf16 %v5953_v19, %v5923_v20  ;;  %v5865_v11 = vld [vmem:[#allocation3 + $0x428] sm:$0xff] }
 0x60f   : > { %v11797_v63 = vpop.permute.xlu1 %5568  ;;  %7850 = vmatprep.subr.bf16.mxu1 %v7849_v24  ;;  %v5567_v49 = vpop.permute.xlu0 %5566  ;;  %v5922_v24 = vld [vmem:[#allocation3 + $0x5f0] sm:$0xff] }
 0x610   : > { %v5619_v50 = vsel %vm5610_vm9, %v5565_v15, %v5567_v49  ;;  %v5620_v48 = vsel %vm5610_vm9, %v5567_v49, %v11797_v63  ;;  %7852 = vmatpush1.bf16.msra.mxu1 %v7851_v43  ;;  %v5744_v43 = vld [vmem:[#allocation3 + $0x60] sm:$0xff]  ;;  %v7895_v49 = vpack.c.bf16 %v5952_v18, %v5922_v24 }
 0x611   : > { %5679 = vst [vmem:[#allocation3 + $0xc70] sm:$0xf] %v5619_v50  ;;  %5680 = vst [vmem:[#allocation3 + $0xc78] sm:$0xf] %v5620_v48  ;;  %4782 = vrot.lane.b32.xlu1 %v11725_v33, %s8709_s28  ;;  %4780 = vrot.lane.b32.xlu0 %v11719_v27, %s8709_s28  ;;  %v7911_v21 = vpack.c.bf16 %v5774_v45, %v5744_v43  ;;  %v11834_v48 = vld [vmem:[#allocation9] sm:$0xff] }
 0x612   : > { %7882 = vmatprep.subr.bf16.mxu1 %v7881_v41  ;;  %v5805_v41 = vld [vmem:[#allocation3 + $0x248] sm:$0xff] }
 0x613   : > { %v3969_v35 = vpop.permute.xlu1 %3968  ;;  %v3967_v44 = vpop.permute.xlu0 %3966  ;;  %7723 = vmatmul.mubr.msk.f32.vlgmr.msra.gmra.mrb[2].mxu1 %vm6152_vm10, %v11479_v59  ;;  %v5802_v59 = vld [vmem:[#allocation3 + $0x230] sm:$0xff] }
 0x614   : > { %v4017_v40 = vsel %vm4006_vm1, %v11649_v5, %v3967_v44  ;;  %v4018_v36 = vsel %vm4006_vm1, %v3967_v44, %v3969_v35  ;;  %7884 = vmatpush1.bf16.msra.mxu1 %v7883_v28  ;;  %6575 = vmatprep.mubr.f32.mxu1 %v8712_v29  ;;  %v7887_v9 = vpack.c.bf16 %v5832_v8, %v5802_v59  ;;  %v6101_v25 = vld [vmem:[#allocation3 + $0xb88] sm:$0xff]  ;;  %v6100_v16 = vld [vmem:[#allocation3 + $0xb80] sm:$0xff] }
 0x615   : > { %4077 = vst [vmem:[#allocation3 + $0x8c0] sm:$0xf] %v4017_v40  ;;  %4078 = vst [vmem:[#allocation3 + $0x8c8] sm:$0xf] %v4018_v36  ;;  %4983 = vrot.lane.b32.xlu1 %v11738_v58, %s8710_s16  ;;  %4981 = vrot.lane.b32.xlu0 %v11698_v32, %s8710_s16  ;;  %v7913_v28 = vpack.c.bf16 %v5835_v57, %v5805_v41  ;;  %v5804_v36 = vld [vmem:[#allocation3 + $0x240] sm:$0xff] }
 0x616   : > { %7886 = vmatprep.subr.bf16.mxu1 %v7885_v4  ;;  %v5895_v4 = vld [vmem:[#allocation3 + $0x518] sm:$0xff]  ;;  %v7915_v59 = vpack.c.bf16 %v5834_v23, %v5804_v36 }
 0x617   : > { %v4170_v5 = vpop.permute.xlu1 %4169  ;;  %v4168_v30 = vpop.permute.xlu0 %4167  ;;  %v7917_v54 = vpack.c.bf16 %v5895_v4, %v5865_v11  ;;  %v394_v36 = vld [vmem:[%s8993_s29 + $0x10] sm:$0xff]  ;;  %s8167_s29 = smul.u32 240, %s8981_s12 }
 0x618   : > { %v4218_v39 = vsel %vm4207_vm2, %v11658_v0, %v4168_v30  ;;  %v4219_v14 = vsel %vm4207_vm2, %v4168_v30, %v4170_v5  ;;  %7888 = vmatpush1.bf16.msra.mxu1 %v7887_v9  ;;  %v6131_v2 = vld [vmem:[#allocation3 + $0xc78] sm:$0xff]  ;;  %v6130_v61 = vld [vmem:[#allocation3 + $0xc70] sm:$0xff]  ;;  %v7891_v0 = vpack.c.bf16 %v5892_v22, %v5862_v46  ;;  %397 = vst [vmem:[#allocation2 + $0x88] sm:$0xff] %v394_v36 }
 0x619   : > { %4278 = vst [vmem:[#allocation3 + $0x8c0] sm:$0xf0] %v4218_v39  ;;  %4279 = vst [vmem:[#allocation3 + $0x8c8] sm:$0xf0] %v4219_v14  ;;  %5179 = vrot.lane.b32.xlu1 %v11698_v32, %s8711_s10  ;;  %5177 = vrot.lane.b32.xlu0 %v11692_v53, %s8711_s10  ;;  %v7877_v15 = vpack.c.bf16 %v6131_v2, %v6101_v25  ;;  %v7879_v17 = vpack.c.bf16 %v6130_v61, %v6100_v16  ;;  %v5864_v25 = vld [vmem:[#allocation3 + $0x420] sm:$0xff]  ;;  %v5955_v22 = vld [vmem:[#allocation3 + $0x6f8] sm:$0xff] }
 0x61a   : > { %7890 = vmatprep.subr.bf16.mxu1 %v7889_v51  ;;  %v5925_v51 = vld [vmem:[#allocation3 + $0x608] sm:$0xff]  ;;  %v5954_v2 = vld [vmem:[#allocation3 + $0x6f0] sm:$0xff]  ;;  %s12397_s2 = scalar_lea.vmem [#allocation12], %s8167_s29 }
 0x61b   : > { %v11823_v3 = vpop.permute.xlu1 %3972  ;;  %v3971_v38 = vpop.permute.xlu0 %3970  ;;  %7878 = vmatprep.subr.bf16.mxu0 %v7877_v15  ;;  %v7921_v15 = vpack.c.bf16 %v5955_v22, %v5925_v51  ;;  %s7554_s17 = sshll.u32 %s12397_s2, 4  ;;  %s7555_s17 = int_to_ptr.vmem [resolvable:$true] %s7554_s17 }
 0x61c   : > { %v4019_v62 = vsel %vm4006_vm1, %v3969_v35, %v3971_v38  ;;  %v4020_v47 = vsel %vm4006_vm1, %v3971_v38, %v11823_v3  ;;  %7880 = vmatpush1.bf16.msra.mxu0 %v7879_v17  ;;  %7892 = vmatpush1.bf16.msra.mxu1 %v7891_v0  ;;  %v5983_v35 = vld [vmem:[#allocation3 + $0x7d8] sm:$0xff]  ;;  %v5924_v17 = vld [vmem:[#allocation3 + $0x600] sm:$0xff]  ;;  %v5985_v38 = vld [vmem:[#allocation3 + $0x7e8] sm:$0xff]  ;;  %s8580_s0 = scalar_lea.vmem %s7555_s17, 3840 }
 0x61d   : > { %4079 = vst [vmem:[#allocation3 + $0x8d0] sm:$0xf] %v4019_v62  ;;  %4080 = vst [vmem:[#allocation3 + $0x8d8] sm:$0xf] %v4020_v47  ;;  %5380 = vrot.lane.b32.xlu1 %v11709_v10, %s8713_s26  ;;  %5378 = vrot.lane.b32.xlu0 %v11551_v6, %s8713_s26  ;;  %v5982_v10 = vld [vmem:[#allocation3 + $0x7d0] sm:$0xff]  ;;  %v7923_v19 = vpack.c.bf16 %v5954_v2, %v5924_v17  ;;  %p8581_p12 = scmp.ne.s32.totalorder %s7555_s17, %s8580_s0 }
 0x61e   : > { %7894 = vmatprep.subr.bf16.mxu1 %v7893_v1  ;;  %7910 = vmatprep.subr.bf16.mxu0 %v7909_v12 }
 0x61f   : > { %v11832_v55 = vpop.permute.xlu1 %4173  ;;  %v4172_v50 = vpop.permute.xlu0 %4171  ;;  %7724 = vmatmul.mubr.msk.f32.vlgmr.msra.gmra.mrb[4].mxu0 %vm6152_vm10, %v11834_v48  ;;  %p8582_p7 = pnand %p8581_p12, %p12755_p13 }
 0x620   : > { %v4220_v6 = vsel %vm4207_vm2, %v4170_v5, %v4172_v50  ;;  %v4221_v26 = vsel %vm4207_vm2, %v4172_v50, %v11832_v55  ;;  %7896 = vmatpush1.bf16.msra.mxu1 %v7895_v49  ;;  %7912 = vmatpush1.bf16.msra.mxu0 %v7911_v21  ;;  %v6013_v44 = vld [vmem:[#allocation3 + $0x8c8] sm:$0xff]  ;;  %v6012_v56 = vld [vmem:[#allocation3 + $0x8c0] sm:$0xff]  ;;  %v5894_v5 = vld [vmem:[#allocation3 + $0x510] sm:$0xff] }
 0x621   : > { %4280 = vst [vmem:[#allocation3 + $0x8d0] sm:$0xf0] %v4220_v6  ;;  %4281 = vst [vmem:[#allocation3 + $0x8d8] sm:$0xf0] %v4221_v26  ;;  %5580 = vrot.lane.b32.xlu1 %v11698_v32, %s8714_s9  ;;  %5578 = vrot.lane.b32.xlu0 %v11692_v53, %s8714_s9  ;;  %v7897_v8 = vpack.c.bf16 %v6013_v44, %v5983_v35  ;;  %v7899_v40 = vpack.c.bf16 %v6012_v56, %v5982_v10  ;;  %v11901_v50 = vld [vmem:[#allocation2 + $0x6c] sm:$0xff]  ;;  %p8583_p3 = pneg %p8582_p7 }
 0x622   : > { %7914 = vmatprep.subr.bf16.mxu0 %v7913_v28  ;;  %6646 = vmatprep.mubr.f32.mxu0 %v8712_v29  ;;  %v7919_v39 = vpack.c.bf16 %v5894_v5, %v5864_v25 }
 0x623   : > { %v11846_v42 = vpop.permute.xlu1 %4369  ;;  %7898 = vmatprep.subr.bf16.mxu1 %v7897_v8  ;;  %v4368_v9 = vpop.permute.xlu0 %4367 }
 0x624   : > { %v4418_v30 = vsel %vm4407_vm3, %v11711_v7, %v4368_v9  ;;  %v4419_v53 = vsel %vm4407_vm3, %v4368_v9, %v11846_v42  ;;  %7900 = vmatpush1.bf16.msra.mxu1 %v7899_v40  ;;  %7916 = vmatpush1.bf16.msra.mxu0 %v7915_v59  ;;  %v11914_v40 = vcombine.low %v11901_v50, %v11901_v50 }
 0x625   : > { %4478 = vst [vmem:[#allocation3 + $0x9b0] sm:$0xf] %v4418_v30  ;;  %4479 = vst [vmem:[#allocation3 + $0x9b8] sm:$0xf] %v4419_v53  ;;  %5183 = vrot.lane.b32.xlu1 %v11725_v33, %s8711_s10  ;;  %5181 = vrot.lane.b32.xlu0 %v11719_v27, %s8711_s10 }
 0x626   : > { %7918 = vmatprep.subr.bf16.mxu0 %v7917_v54 }
 0x627   : > { %v4571_v14 = vpop.permute.xlu1 %4570  ;;  %v4569_v7 = vpop.permute.xlu0 %4568 }
 0x628   : > { %v4619_v16 = vsel %vm4608_vm4, %v11727_v34, %v4569_v7  ;;  %v4620_v61 = vsel %vm4608_vm4, %v4569_v7, %v4571_v14  ;;  %7920 = vmatpush1.bf16.msra.mxu0 %v7919_v39  ;;  %v6015_v46 = vld [vmem:[#allocation3 + $0x8d8] sm:$0xff]  ;;  %v6014_v34 = vld [vmem:[#allocation3 + $0x8d0] sm:$0xff] }
 0x629   : > { %4679 = vst [vmem:[#allocation3 + $0x9b0] sm:$0xf0] %v4619_v16  ;;  %4680 = vst [vmem:[#allocation3 + $0x9b8] sm:$0xf0] %v4620_v61  ;;  %5384 = vrot.lane.b32.xlu1 %v11738_v58, %s8713_s26  ;;  %5382 = vrot.lane.b32.xlu0 %v11698_v32, %s8713_s26  ;;  %v7925_v18 = vpack.c.bf16 %v6015_v46, %v5985_v38  ;;  %v11868_v58 = vcombine.high %v11725_v33, %v11725_v33  ;;  %v5984_v32 = vld [vmem:[#allocation3 + $0x7e0] sm:$0xff] }
 0x62a   : > { %7922 = vmatprep.subr.bf16.mxu0 %v7921_v15  ;;  %v7927_v45 = vpack.c.bf16 %v6014_v34, %v5984_v32 }
 0x62b   : > { %v4771_v0 = vpop.permute.xlu1 %4770  ;;  %v4769_v37 = vpop.permute.xlu0 %4768 }
 0x62c   : > { %v4819_v20 = vsel %vm4808_vm5, %v11740_v52, %v4769_v37  ;;  %v4820_v12 = vsel %vm4808_vm5, %v4769_v37, %v4771_v0  ;;  %7924 = vmatpush1.bf16.msra.mxu0 %v7923_v19  ;;  %v11874_v52 = vld [vmem:[#allocation2 + $0x64] sm:$0xff] }
 0x62d   : > { %4879 = vst [vmem:[#allocation3 + $0xaa0] sm:$0xf] %v4819_v20  ;;  %4880 = vst [vmem:[#allocation3 + $0xaa8] sm:$0xf] %v4820_v12  ;;  %5584 = vrot.lane.b32.xlu1 %v11725_v33, %s8714_s9  ;;  %5582 = vrot.lane.b32.xlu0 %v11719_v27, %s8714_s9  ;;  %v11885_v27 = vcombine.low %v11874_v52, %v11874_v52  ;;  %v11895_v21 = vcombine.high %v11874_v52, %v11874_v52 }
 0x62e   : > { %7926 = vmatprep.subr.bf16.mxu0 %v7925_v18 }
 0x62f   : > { %v4972_v62 = vpop.permute.xlu1 %4971  ;;  %v4970_v47 = vpop.permute.xlu0 %4969 }
 0x630   : > { %v5020_v1 = vsel %vm5009_vm6, %v11749_v13, %v4970_v47  ;;  %v5021_v24 = vsel %vm5009_vm6, %v4970_v47, %v4972_v62  ;;  %7928 = vmatpush1.bf16.msra.mxu0 %v7927_v45  ;;  %v6043_v23 = vld [vmem:[#allocation3 + $0x9b8] sm:$0xff]  ;;  %v6042_v35 = vld [vmem:[#allocation3 + $0x9b0] sm:$0xff] }
 0x631   : > { %5080 = vst [vmem:[#allocation3 + $0xaa0] sm:$0xf0] %v5020_v1  ;;  %5081 = vst [vmem:[#allocation3 + $0xaa8] sm:$0xf0] %v5021_v24  ;;  %3984 = vrot.lane.b32.xlu1 %v11874_v52, %s8705_s14  ;;  %3982 = vrot.lane.b32.xlu0 %v11868_v58, %s8705_s14 }
 0x633   : > { %v11887_v43 = vpop.permute.xlu1 %4373  ;;  %v4372_v57 = vpop.permute.xlu0 %4371 }
 0x634   : > { %v4420_v13 = vsel %vm4407_vm3, %v11846_v42, %v4372_v57  ;;  %v4421_v49 = vsel %vm4407_vm3, %v4372_v57, %v11887_v43 }
 0x635   : > { %4480 = vst [vmem:[#allocation3 + $0x9c0] sm:$0xf] %v4420_v13  ;;  %4481 = vst [vmem:[#allocation3 + $0x9c8] sm:$0xf] %v4421_v49  ;;  %4185 = vrot.lane.b32.xlu1 %v11885_v27, %s8706_s7  ;;  %4183 = vrot.lane.b32.xlu0 %v11725_v33, %s8706_s7  ;;  %v5777_v49 = vld [vmem:[#allocation3 + $0x168] sm:$0xff] }
 0x637   : > { %v11903_v41 = vpop.permute.xlu1 %4574  ;;  %v4573_v10 = vpop.permute.xlu0 %4572 }
 0x638   : > { %v4621_v6 = vsel %vm4608_vm4, %v4571_v14, %v4573_v10  ;;  %v4622_v26 = vsel %vm4608_vm4, %v4573_v10, %v11903_v41  ;;  %v6073_v28 = vld [vmem:[#allocation3 + $0xaa8] sm:$0xff]  ;;  %v6072_v44 = vld [vmem:[#allocation3 + $0xaa0] sm:$0xff] }
 0x639   : > { %4681 = vst [vmem:[#allocation3 + $0x9c0] sm:$0xf0] %v4621_v6  ;;  %4682 = vst [vmem:[#allocation3 + $0x9c8] sm:$0xf0] %v4622_v26  ;;  %3988 = vrot.lane.b32.xlu1 %v11901_v50, %s8705_s14  ;;  %3986 = vrot.lane.b32.xlu0 %v11895_v21, %s8705_s14  ;;  %v7901_v56 = vpack.c.bf16 %v6073_v28, %v6043_v23  ;;  %v7903_v8 = vpack.c.bf16 %v6072_v44, %v6042_v35  ;;  %v5747_v6 = vld [vmem:[#allocation3 + $0x78] sm:$0xff]  ;;  %v5776_v26 = vld [vmem:[#allocation3 + $0x160] sm:$0xff] }
 0x63a   : > { %v7937_v44 = vpack.c.bf16 %v5777_v49, %v5747_v6  ;;  %v5748_v49 = vld [vmem:[#allocation3 + $0x80] sm:$0xff] }
 0x63b   : > { %v11917_v4 = vpop.permute.xlu1 %4774  ;;  %7902 = vmatprep.subr.bf16.mxu1 %v7901_v56  ;;  %v4773_v59 = vpop.permute.xlu0 %4772  ;;  %v5746_v56 = vld [vmem:[#allocation3 + $0x70] sm:$0xff] }
 0x63c   : > { %v4821_v42 = vsel %vm4808_vm5, %v4771_v0, %v4773_v59  ;;  %v4822_v9 = vsel %vm4808_vm5, %v4773_v59, %v11917_v4  ;;  %7904 = vmatpush1.bf16.msra.mxu1 %v7903_v8  ;;  %v5837_v8 = vld [vmem:[#allocation3 + $0x348] sm:$0xff]  ;;  %v7939_v36 = vpack.c.bf16 %v5776_v26, %v5746_v56  ;;  %v5986_v56 = vld [vmem:[#allocation3 + $0x7f0] sm:$0xff] }
 0x63d   : > { %4881 = vst [vmem:[#allocation3 + $0xab0] sm:$0xf] %v4821_v42  ;;  %4882 = vst [vmem:[#allocation3 + $0xab8] sm:$0xf] %v4822_v9  ;;  %4189 = vrot.lane.b32.xlu1 %v11914_v40, %s8706_s7  ;;  %4187 = vrot.lane.b32.xlu0 %v11874_v52, %s8706_s7  ;;  %v5807_v9 = vld [vmem:[#allocation3 + $0x258] sm:$0xff] }
 0x63f   : > { %v11926_v11 = vpop.permute.xlu1 %4975  ;;  %v4974_v5 = vpop.permute.xlu0 %4973 }
 0x640   : > { %v5022_v30 = vsel %vm5009_vm6, %v4972_v62, %v4974_v5  ;;  %v5023_v53 = vsel %vm5009_vm6, %v4974_v5, %v11926_v11  ;;  %v6045_v51 = vld [vmem:[#allocation3 + $0x9c8] sm:$0xff]  ;;  %v5836_v5 = vld [vmem:[#allocation3 + $0x340] sm:$0xff] }
 0x641   : > { %5082 = vst [vmem:[#allocation3 + $0xab0] sm:$0xf0] %v5022_v30  ;;  %5083 = vst [vmem:[#allocation3 + $0xab8] sm:$0xf0] %v5023_v53  ;;  %4385 = vrot.lane.b32.xlu1 %v11874_v52, %s8707_s11  ;;  %4383 = vrot.lane.b32.xlu0 %v11868_v58, %s8707_s11 }
 0x643   : > { %v5172_v54 = vpop.permute.xlu1 %5171  ;;  %v5170_v25 = vpop.permute.xlu0 %5169 }
 0x644   : > { %v5220_v22 = vsel %vm5209_vm7, %v11779_v60, %v5170_v25  ;;  %v5221_v39 = vsel %vm5209_vm7, %v5170_v25, %v5172_v54  ;;  %v6044_v60 = vld [vmem:[#allocation3 + $0x9c0] sm:$0xff]  ;;  %v5806_v25 = vld [vmem:[#allocation3 + $0x250] sm:$0xff] }
 0x645   : > { %5280 = vst [vmem:[#allocation3 + $0xb90] sm:$0xf] %v5220_v22  ;;  %5281 = vst [vmem:[#allocation3 + $0xb98] sm:$0xf] %v5221_v39  ;;  %4586 = vrot.lane.b32.xlu1 %v11885_v27, %s8708_s8  ;;  %4584 = vrot.lane.b32.xlu0 %v11725_v33, %s8708_s8  ;;  %v5897_v22 = vld [vmem:[#allocation3 + $0x528] sm:$0xff]  ;;  %v7943_v39 = vpack.c.bf16 %v5836_v5, %v5806_v25 }
 0x647   : > { %v5373_v14 = vpop.permute.xlu1 %5372  ;;  %v5371_v7 = vpop.permute.xlu0 %5370 }
 0x648   : > { %v5421_v2 = vsel %vm5410_vm8, %v11788_v31, %v5371_v7  ;;  %v5422_v16 = vsel %vm5410_vm8, %v5371_v7, %v5373_v14  ;;  %v6075_v61 = vld [vmem:[#allocation3 + $0xab8] sm:$0xff]  ;;  %v6074_v15 = vld [vmem:[#allocation3 + $0xab0] sm:$0xff] }
 0x649   : > { %5481 = vst [vmem:[#allocation3 + $0xb90] sm:$0xf0] %v5421_v2  ;;  %5482 = vst [vmem:[#allocation3 + $0xb98] sm:$0xf0] %v5422_v16  ;;  %4786 = vrot.lane.b32.xlu1 %v11874_v52, %s8709_s28  ;;  %4784 = vrot.lane.b32.xlu0 %v11868_v58, %s8709_s28  ;;  %v7929_v17 = vpack.c.bf16 %v6075_v61, %v6045_v51  ;;  %v7931_v46 = vpack.c.bf16 %v6074_v15, %v6044_v60  ;;  %v5867_v51 = vld [vmem:[#allocation3 + $0x438] sm:$0xff]  ;;  %v5896_v16 = vld [vmem:[#allocation3 + $0x520] sm:$0xff] }
 0x64a   : > { %v7945_v15 = vpack.c.bf16 %v5897_v22, %v5867_v51 }
 0x64b   : > { %v5573_v19 = vpop.permute.xlu1 %5572  ;;  %v5571_v0 = vpop.permute.xlu0 %5570  ;;  %7930 = vmatprep.subr.bf16.mxu0 %v7929_v17 }
 0x64c   : > { %v5621_v31 = vsel %vm5610_vm9, %v11797_v63, %v5571_v0  ;;  %v5622_v37 = vsel %vm5610_vm9, %v5571_v0, %v5573_v19  ;;  %7932 = vmatpush1.bf16.msra.mxu0 %v7931_v46 }
 0x64d   : > { %5681 = vst [vmem:[#allocation3 + $0xc80] sm:$0xf] %v5621_v31  ;;  %5682 = vst [vmem:[#allocation3 + $0xc88] sm:$0xf] %v5622_v37  ;;  %4987 = vrot.lane.b32.xlu1 %v11885_v27, %s8710_s16  ;;  %4985 = vrot.lane.b32.xlu0 %v11725_v33, %s8710_s16  ;;  %v5866_v37 = vld [vmem:[#allocation3 + $0x430] sm:$0xff] }
 0x64f   : > { %v11956_v38 = vpop.permute.xlu1 %5175  ;;  %v5174_v34 = vpop.permute.xlu0 %5173 }
 0x650   : > { %v5222_v20 = vsel %vm5209_vm7, %v5172_v54, %v5174_v34  ;;  %v5223_v12 = vsel %vm5209_vm7, %v5174_v34, %v11956_v38  ;;  %v6103_v32 = vld [vmem:[#allocation3 + $0xb98] sm:$0xff]  ;;  %v6102_v1 = vld [vmem:[#allocation3 + $0xb90] sm:$0xff]  ;;  %v7941_v54 = vpack.c.bf16 %v5837_v8, %v5807_v9  ;;  %v5957_v34 = vld [vmem:[#allocation3 + $0x708] sm:$0xff] }
 0x651   : > { %5282 = vst [vmem:[#allocation3 + $0xba0] sm:$0xf] %v5222_v20  ;;  %5283 = vst [vmem:[#allocation3 + $0xba8] sm:$0xf] %v5223_v12  ;;  %4389 = vrot.lane.b32.xlu1 %v11901_v50, %s8707_s11  ;;  %4387 = vrot.lane.b32.xlu0 %v11895_v21, %s8707_s11  ;;  %v5749_v20 = vld [vmem:[#allocation3 + $0x88] sm:$0xff]  ;;  %v5838_v8 = vld [vmem:[#allocation3 + $0x350] sm:$0xff] }
 0x653   : > { %v11965_v63 = vpop.permute.xlu1 %5376  ;;  %v5375_v18 = vpop.permute.xlu0 %5374 }
 0x654   : > { %v5423_v45 = vsel %vm5410_vm8, %v5373_v14, %v5375_v18  ;;  %v5424_v62 = vsel %vm5410_vm8, %v5375_v18, %v11965_v63  ;;  %v6133_v47 = vld [vmem:[#allocation3 + $0xc88] sm:$0xff]  ;;  %v6132_v24 = vld [vmem:[#allocation3 + $0xc80] sm:$0xff]  ;;  %v5779_v14 = vld [vmem:[#allocation3 + $0x178] sm:$0xff] }
 0x655   : > { %5483 = vst [vmem:[#allocation3 + $0xba0] sm:$0xf0] %v5423_v45  ;;  %5484 = vst [vmem:[#allocation3 + $0xba8] sm:$0xf0] %v5424_v62  ;;  %4590 = vrot.lane.b32.xlu1 %v11914_v40, %s8708_s8  ;;  %4588 = vrot.lane.b32.xlu0 %v11874_v52, %s8708_s8  ;;  %v7905_v57 = vpack.c.bf16 %v6133_v47, %v6103_v32  ;;  %v7907_v13 = vpack.c.bf16 %v6132_v24, %v6102_v1  ;;  %v5927_v32 = vld [vmem:[#allocation3 + $0x618] sm:$0xff]  ;;  %v5956_v62 = vld [vmem:[#allocation3 + $0x700] sm:$0xff] }
 0x656   : > { %v7965_v45 = vpack.c.bf16 %v5779_v14, %v5749_v20  ;;  %v5778_v47 = vld [vmem:[#allocation3 + $0x170] sm:$0xff]  ;;  %v5869_v14 = vld [vmem:[#allocation3 + $0x448] sm:$0xff] }
 0x657   : > { %v11974_v10 = vpop.permute.xlu1 %5576  ;;  %7906 = vmatprep.subr.bf16.mxu1 %v7905_v57  ;;  %v5575_v23 = vpop.permute.xlu0 %5574  ;;  %v7949_v57 = vpack.c.bf16 %v5957_v34, %v5927_v32  ;;  %v7967_v26 = vpack.c.bf16 %v5778_v47, %v5748_v49 }
 0x658   : > { %v5623_v28 = vsel %vm5610_vm9, %v5573_v19, %v5575_v23  ;;  %v5624_v35 = vsel %vm5610_vm9, %v5575_v23, %v11974_v10  ;;  %7908 = vmatpush1.bf16.msra.mxu1 %v7907_v13  ;;  %v5926_v13 = vld [vmem:[#allocation3 + $0x610] sm:$0xff]  ;;  %v5839_v23 = vld [vmem:[#allocation3 + $0x358] sm:$0xff] }
 0x659   : > { %5683 = vst [vmem:[#allocation3 + $0xc90] sm:$0xf] %v5623_v28  ;;  %5684 = vst [vmem:[#allocation3 + $0xc98] sm:$0xf] %v5624_v35  ;;  %4790 = vrot.lane.b32.xlu1 %v11901_v50, %s8709_s28  ;;  %4788 = vrot.lane.b32.xlu0 %v11895_v21, %s8709_s28  ;;  %v7951_v6 = vpack.c.bf16 %v5956_v62, %v5926_v13 }
 0x65a   : > { %7938 = vmatprep.subr.bf16.mxu1 %v7937_v44  ;;  %v5809_v44 = vld [vmem:[#allocation3 + $0x268] sm:$0xff] }
 0x65b   : > { %v3977_v59 = vpop.permute.xlu1 %3976  ;;  %v3975_v42 = vpop.permute.xlu0 %3974  ;;  %7725 = vmatmul.mubr.msk.f32.vlgmr.msra.gmra.mrb[4].mxu1 %vm6152_vm10, %v11834_v48 }
 0x65c   : > { %v4021_v30 = vsel %vm4006_vm1, %v11823_v3, %v3975_v42  ;;  %v4022_v53 = vsel %vm4006_vm1, %v3975_v42, %v3977_v59  ;;  %7940 = vmatpush1.bf16.msra.mxu1 %v7939_v36  ;;  %6717 = vmatprep.mubr.f32.mxu1 %v8712_v29  ;;  %v6105_v2 = vld [vmem:[#allocation3 + $0xba8] sm:$0xff]  ;;  %v6104_v46 = vld [vmem:[#allocation3 + $0xba0] sm:$0xff]  ;;  %v7969_v36 = vpack.c.bf16 %v5839_v23, %v5809_v44 }
 0x65d   : > { %4081 = vst [vmem:[#allocation3 + $0x8e0] sm:$0xf] %v4021_v30  ;;  %4082 = vst [vmem:[#allocation3 + $0x8e8] sm:$0xf] %v4022_v53  ;;  %4991 = vrot.lane.b32.xlu1 %v11914_v40, %s8710_s16  ;;  %4989 = vrot.lane.b32.xlu0 %v11874_v52, %s8710_s16  ;;  %v5808_v53 = vld [vmem:[#allocation3 + $0x260] sm:$0xff] }
 0x65e   : > { %7942 = vmatprep.subr.bf16.mxu1 %v7941_v54  ;;  %v5899_v54 = vld [vmem:[#allocation3 + $0x538] sm:$0xff]  ;;  %v7971_v25 = vpack.c.bf16 %v5838_v8, %v5808_v53 }
 0x65f   : > { %v4178_v3 = vpop.permute.xlu1 %4177  ;;  %v4176_v7 = vpop.permute.xlu0 %4175  ;;  %v7973_v51 = vpack.c.bf16 %v5899_v54, %v5869_v14 }
 0x660   : > { %v4222_v61 = vsel %vm4207_vm2, %v11832_v55, %v4176_v7  ;;  %v4223_v60 = vsel %vm4207_vm2, %v4176_v7, %v4178_v3  ;;  %7944 = vmatpush1.bf16.msra.mxu1 %v7943_v39  ;;  %v6135_v17 = vld [vmem:[#allocation3 + $0xc98] sm:$0xff]  ;;  %v6134_v19 = vld [vmem:[#allocation3 + $0xc90] sm:$0xff]  ;;  %v7947_v55 = vpack.c.bf16 %v5896_v16, %v5866_v37 }
 0x661   : > { %4282 = vst [vmem:[#allocation3 + $0x8e0] sm:$0xf0] %v4222_v61  ;;  %4283 = vst [vmem:[#allocation3 + $0x8e8] sm:$0xf0] %v4223_v60  ;;  %5187 = vrot.lane.b32.xlu1 %v11874_v52, %s8711_s10  ;;  %5185 = vrot.lane.b32.xlu0 %v11868_v58, %s8711_s10  ;;  %v7933_v0 = vpack.c.bf16 %v6135_v17, %v6105_v2  ;;  %v7935_v31 = vpack.c.bf16 %v6134_v19, %v6104_v46  ;;  %v5868_v2 = vld [vmem:[#allocation3 + $0x440] sm:$0xff]  ;;  %v5959_v16 = vld [vmem:[#allocation3 + $0x718] sm:$0xff] }
 0x662   : > { %7946 = vmatprep.subr.bf16.mxu1 %v7945_v15  ;;  %v5929_v15 = vld [vmem:[#allocation3 + $0x628] sm:$0xff]  ;;  %v5958_v17 = vld [vmem:[#allocation3 + $0x710] sm:$0xff] }
 0x663   : > { %v12000_v12 = vpop.permute.xlu1 %3980  ;;  %v3979_v18 = vpop.permute.xlu0 %3978  ;;  %7934 = vmatprep.subr.bf16.mxu0 %v7933_v0  ;;  %v7977_v0 = vpack.c.bf16 %v5959_v16, %v5929_v15 }
 0x664   : > { %v4023_v1 = vsel %vm4006_vm1, %v3977_v59, %v3979_v18  ;;  %v4024_v24 = vsel %vm4006_vm1, %v3979_v18, %v12000_v12  ;;  %7936 = vmatpush1.bf16.msra.mxu0 %v7935_v31  ;;  %7948 = vmatpush1.bf16.msra.mxu1 %v7947_v55  ;;  %v5987_v59 = vld [vmem:[#allocation3 + $0x7f8] sm:$0xff]  ;;  %v5928_v31 = vld [vmem:[#allocation3 + $0x620] sm:$0xff]  ;;  %v5989_v18 = vld [vmem:[#allocation3 + $0x808] sm:$0xff] }
 0x665   : > { %4083 = vst [vmem:[#allocation3 + $0x8f0] sm:$0xf] %v4023_v1  ;;  %4084 = vst [vmem:[#allocation3 + $0x8f8] sm:$0xf] %v4024_v24  ;;  %5388 = vrot.lane.b32.xlu1 %v11885_v27, %s8713_s26  ;;  %5386 = vrot.lane.b32.xlu0 %v11725_v33, %s8713_s26  ;;  %v7979_v34 = vpack.c.bf16 %v5958_v17, %v5928_v31 }
 0x666   : > { %7950 = vmatprep.subr.bf16.mxu1 %v7949_v57  ;;  %7966 = vmatprep.subr.bf16.mxu0 %v7965_v45 }
 0x667   : > { %v12009_v28 = vpop.permute.xlu1 %4181  ;;  %v4180_v35 = vpop.permute.xlu0 %4179  ;;  %7726 = vmatmul.mubr.msk.f32.vlgmr.msra.gmra.mrb[6].mxu0 %vm6152_vm10, %v11834_v48 }
 0x668   : > { %v4224_v27 = vsel %vm4207_vm2, %v4178_v3, %v4180_v35  ;;  %v4225_v33 = vsel %vm4207_vm2, %v4180_v35, %v12009_v28  ;;  %7952 = vmatpush1.bf16.msra.mxu1 %v7951_v6  ;;  %7968 = vmatpush1.bf16.msra.mxu0 %v7967_v26  ;;  %v6017_v42 = vld [vmem:[#allocation3 + $0x8e8] sm:$0xff]  ;;  %v6016_v9 = vld [vmem:[#allocation3 + $0x8e0] sm:$0xff]  ;;  %v5898_v3 = vld [vmem:[#allocation3 + $0x530] sm:$0xff] }
 0x669   : > { %4284 = vst [vmem:[#allocation3 + $0x8f0] sm:$0xf0] %v4224_v27  ;;  %4285 = vst [vmem:[#allocation3 + $0x8f8] sm:$0xf0] %v4225_v33  ;;  %5588 = vrot.lane.b32.xlu1 %v11874_v52, %s8714_s9  ;;  %5586 = vrot.lane.b32.xlu0 %v11868_v58, %s8714_s9  ;;  %v7953_v5 = vpack.c.bf16 %v6017_v42, %v5987_v59  ;;  %v7955_v30 = vpack.c.bf16 %v6016_v9, %v5986_v56  ;;  %v12076_v35 = vld [vmem:[#allocation2 + $0x7c] sm:$0xff] }
 0x66a   : > { %7970 = vmatprep.subr.bf16.mxu0 %v7969_v36  ;;  %6788 = vmatprep.mubr.f32.mxu0 %v8712_v29  ;;  %v7975_v61 = vpack.c.bf16 %v5898_v3, %v5868_v2 }
 0x66b   : > { %v12021_v22 = vpop.permute.xlu1 %4377  ;;  %7954 = vmatprep.subr.bf16.mxu1 %v7953_v5  ;;  %v4376_v39 = vpop.permute.xlu0 %4375 }
 0x66c   : > { %v4422_v7 = vsel %vm4407_vm3, %v11887_v43, %v4376_v39  ;;  %v4423_v58 = vsel %vm4407_vm3, %v4376_v39, %v12021_v22  ;;  %7956 = vmatpush1.bf16.msra.mxu1 %v7955_v30  ;;  %7972 = vmatpush1.bf16.msra.mxu0 %v7971_v25  ;;  %v12089_v30 = vcombine.low %v12076_v35, %v12076_v35 }
 0x66d   : > { %4482 = vst [vmem:[#allocation3 + $0x9d0] sm:$0xf] %v4422_v7  ;;  %4483 = vst [vmem:[#allocation3 + $0x9d8] sm:$0xf] %v4423_v58  ;;  %5191 = vrot.lane.b32.xlu1 %v11901_v50, %s8711_s10  ;;  %5189 = vrot.lane.b32.xlu0 %v11895_v21, %s8711_s10 }
 0x66e   : > { %7974 = vmatprep.subr.bf16.mxu0 %v7973_v51 }
 0x66f   : > { %v4579_v60 = vpop.permute.xlu1 %4578  ;;  %v4577_v43 = vpop.permute.xlu0 %4576 }
 0x670   : > { %v4623_v46 = vsel %vm4608_vm4, %v11903_v41, %v4577_v43  ;;  %v4624_v19 = vsel %vm4608_vm4, %v4577_v43, %v4579_v60  ;;  %7976 = vmatpush1.bf16.msra.mxu0 %v7975_v61  ;;  %v6019_v37 = vld [vmem:[#allocation3 + $0x8f8] sm:$0xff]  ;;  %v6018_v41 = vld [vmem:[#allocation3 + $0x8f0] sm:$0xff] }
 0x671   : > { %4683 = vst [vmem:[#allocation3 + $0x9d0] sm:$0xf0] %v4623_v46  ;;  %4684 = vst [vmem:[#allocation3 + $0x9d8] sm:$0xf0] %v4624_v19  ;;  %5392 = vrot.lane.b32.xlu1 %v11914_v40, %s8713_s26  ;;  %5390 = vrot.lane.b32.xlu0 %v11874_v52, %s8713_s26  ;;  %v7981_v62 = vpack.c.bf16 %v6019_v37, %v5989_v18  ;;  %v12043_v40 = vcombine.high %v11901_v50, %v11901_v50  ;;  %v5988_v52 = vld [vmem:[#allocation3 + $0x800] sm:$0xff] }
 0x672   : > { %7978 = vmatprep.subr.bf16.mxu0 %v7977_v0  ;;  %v7983_v47 = vpack.c.bf16 %v6018_v41, %v5988_v52 }
 0x673   : > { %v4779_v55 = vpop.permute.xlu1 %4778  ;;  %v4777_v20 = vpop.permute.xlu0 %4776 }
 0x674   : > { %v4823_v32 = vsel %vm4808_vm5, %v11917_v4, %v4777_v20  ;;  %v4824_v45 = vsel %vm4808_vm5, %v4777_v20, %v4779_v55  ;;  %7980 = vmatpush1.bf16.msra.mxu0 %v7979_v34  ;;  %v12049_v4 = vld [vmem:[#allocation2 + $0x74] sm:$0xff] }
 0x675   : > { %4883 = vst [vmem:[#allocation3 + $0xac0] sm:$0xf] %v4823_v32  ;;  %4884 = vst [vmem:[#allocation3 + $0xac8] sm:$0xf] %v4824_v45  ;;  %5592 = vrot.lane.b32.xlu1 %v11901_v50, %s8714_s9  ;;  %5590 = vrot.lane.b32.xlu0 %v11895_v21, %s8714_s9  ;;  %v12060_v21 = vcombine.low %v12049_v4, %v12049_v4  ;;  %v12070_v26 = vcombine.high %v12049_v4, %v12049_v4 }
 0x676   : > { %7982 = vmatprep.subr.bf16.mxu0 %v7981_v62 }
 0x677   : > { %v4980_v1 = vpop.permute.xlu1 %4979  ;;  %v4978_v24 = vpop.permute.xlu0 %4977 }
 0x678   : > { %v5024_v57 = vsel %vm5009_vm6, %v11926_v11, %v4978_v24  ;;  %v5025_v13 = vsel %vm5009_vm6, %v4978_v24, %v4980_v1  ;;  %7984 = vmatpush1.bf16.msra.mxu0 %v7983_v47  ;;  %v6047_v8 = vld [vmem:[#allocation3 + $0x9d8] sm:$0xff]  ;;  %v6046_v59 = vld [vmem:[#allocation3 + $0x9d0] sm:$0xff] }
 0x679   : > { %5084 = vst [vmem:[#allocation3 + $0xac0] sm:$0xf0] %v5024_v57  ;;  %5085 = vst [vmem:[#allocation3 + $0xac8] sm:$0xf0] %v5025_v13  ;;  %3992 = vrot.lane.b32.xlu1 %v12049_v4, %s8705_s14  ;;  %3990 = vrot.lane.b32.xlu0 %v12043_v40, %s8705_s14 }
 0x67b   : > { %v12062_v49 = vpop.permute.xlu1 %4381  ;;  %v4380_v23 = vpop.permute.xlu0 %4379 }
 0x67c   : > { %v4424_v11 = vsel %vm4407_vm3, %v12021_v22, %v4380_v23  ;;  %v4425_v6 = vsel %vm4407_vm3, %v4380_v23, %v12062_v49 }
 0x67d   : > { %4484 = vst [vmem:[#allocation3 + $0x9e0] sm:$0xf] %v4424_v11  ;;  %4485 = vst [vmem:[#allocation3 + $0x9e8] sm:$0xf] %v4425_v6  ;;  %4193 = vrot.lane.b32.xlu1 %v12060_v21, %s8706_s7  ;;  %4191 = vrot.lane.b32.xlu0 %v11901_v50, %s8706_s7  ;;  %v5781_v11 = vld [vmem:[#allocation3 + $0x188] sm:$0xff] }
 0x67f   : > { %v12078_v44 = vpop.permute.xlu1 %4582  ;;  %v4581_v56 = vpop.permute.xlu0 %4580 }
 0x680   : > { %v4625_v27 = vsel %vm4608_vm4, %v4579_v60, %v4581_v56  ;;  %v4626_v33 = vsel %vm4608_vm4, %v4581_v56, %v12078_v44  ;;  %v6077_v36 = vld [vmem:[#allocation3 + $0xac8] sm:$0xff]  ;;  %v6076_v42 = vld [vmem:[#allocation3 + $0xac0] sm:$0xff] }
 0x681   : > { %4685 = vst [vmem:[#allocation3 + $0x9e0] sm:$0xf0] %v4625_v27  ;;  %4686 = vst [vmem:[#allocation3 + $0x9e8] sm:$0xf0] %v4626_v33  ;;  %3996 = vrot.lane.b32.xlu1 %v12076_v35, %s8705_s14  ;;  %3994 = vrot.lane.b32.xlu0 %v12070_v26, %s8705_s14  ;;  %v7957_v9 = vpack.c.bf16 %v6077_v36, %v6047_v8  ;;  %v7959_v5 = vpack.c.bf16 %v6076_v42, %v6046_v59  ;;  %v5751_v8 = vld [vmem:[#allocation3 + $0x98] sm:$0xff]  ;;  %v5780_v27 = vld [vmem:[#allocation3 + $0x180] sm:$0xff] }
 0x682   : > { %v7993_v59 = vpack.c.bf16 %v5781_v11, %v5751_v8  ;;  %v5750_v42 = vld [vmem:[#allocation3 + $0x90] sm:$0xff]  ;;  %v5843_v11 = vld [vmem:[#allocation3 + $0x378] sm:$0xff] }
 0x683   : > { %v12091_v53 = vpop.permute.xlu1 %4782  ;;  %7958 = vmatprep.subr.bf16.mxu1 %v7957_v9  ;;  %v4781_v54 = vpop.permute.xlu0 %4780  ;;  %v5841_v9 = vld [vmem:[#allocation3 + $0x368] sm:$0xff] }
 0x684   : > { %v4825_v25 = vsel %vm4808_vm5, %v4779_v55, %v4781_v54  ;;  %v4826_v22 = vsel %vm4808_vm5, %v4781_v54, %v12091_v53  ;;  %7960 = vmatpush1.bf16.msra.mxu1 %v7959_v5  ;;  %v7995_v5 = vpack.c.bf16 %v5780_v27, %v5750_v42  ;;  %v5842_v42 = vld [vmem:[#allocation3 + $0x370] sm:$0xff] }
 0x685   : > { %4885 = vst [vmem:[#allocation3 + $0xad0] sm:$0xf] %v4825_v25  ;;  %4886 = vst [vmem:[#allocation3 + $0xad8] sm:$0xf] %v4826_v22  ;;  %4197 = vrot.lane.b32.xlu1 %v12089_v30, %s8706_s7  ;;  %4195 = vrot.lane.b32.xlu0 %v12049_v4, %s8706_s7  ;;  %v5811_v22 = vld [vmem:[#allocation3 + $0x278] sm:$0xff] }
 0x687   : > { %v12100_v39 = vpop.permute.xlu1 %4983  ;;  %v4982_v14 = vpop.permute.xlu0 %4981 }
 0x688   : > { %v5026_v3 = vsel %vm5009_vm6, %v4980_v1, %v4982_v14  ;;  %v5027_v7 = vsel %vm5009_vm6, %v4982_v14, %v12100_v39  ;;  %v6049_v43 = vld [vmem:[#allocation3 + $0x9e8] sm:$0xff]  ;;  %v5840_v14 = vld [vmem:[#allocation3 + $0x360] sm:$0xff] }
 0x689   : > { %5086 = vst [vmem:[#allocation3 + $0xad0] sm:$0xf0] %v5026_v3  ;;  %5087 = vst [vmem:[#allocation3 + $0xad8] sm:$0xf0] %v5027_v7  ;;  %4393 = vrot.lane.b32.xlu1 %v12049_v4, %s8707_s11  ;;  %4391 = vrot.lane.b32.xlu0 %v12043_v40, %s8707_s11 }
 0x68b   : > { %v5180_v58 = vpop.permute.xlu1 %5179  ;;  %v5178_v51 = vpop.permute.xlu0 %5177 }
 0x68c   : > { %v5224_v2 = vsel %vm5209_vm7, %v11956_v38, %v5178_v51  ;;  %v5225_v16 = vsel %vm5209_vm7, %v5178_v51, %v5180_v58  ;;  %v6048_v38 = vld [vmem:[#allocation3 + $0x9e0] sm:$0xff]  ;;  %v5901_v51 = vld [vmem:[#allocation3 + $0x548] sm:$0xff] }
 0x68d   : > { %5284 = vst [vmem:[#allocation3 + $0xbb0] sm:$0xf] %v5224_v2  ;;  %5285 = vst [vmem:[#allocation3 + $0xbb8] sm:$0xf] %v5225_v16  ;;  %4594 = vrot.lane.b32.xlu1 %v12060_v21, %s8708_s8  ;;  %4592 = vrot.lane.b32.xlu0 %v11901_v50, %s8708_s8  ;;  %v5783_v16 = vld [vmem:[#allocation3 + $0x198] sm:$0xff] }
 0x68f   : > { %v5381_v61 = vpop.permute.xlu1 %5380  ;;  %v5379_v60 = vpop.permute.xlu0 %5378 }
 0x690   : > { %v5425_v15 = vsel %vm5410_vm8, %v11965_v63, %v5379_v60  ;;  %v5426_v17 = vsel %vm5410_vm8, %v5379_v60, %v5381_v61  ;;  %v6079_v46 = vld [vmem:[#allocation3 + $0xad8] sm:$0xff]  ;;  %v6078_v19 = vld [vmem:[#allocation3 + $0xad0] sm:$0xff] }
 0x691   : > { %5485 = vst [vmem:[#allocation3 + $0xbb0] sm:$0xf0] %v5425_v15  ;;  %5486 = vst [vmem:[#allocation3 + $0xbb8] sm:$0xf0] %v5426_v17  ;;  %4794 = vrot.lane.b32.xlu1 %v12049_v4, %s8709_s28  ;;  %4792 = vrot.lane.b32.xlu0 %v12043_v40, %s8709_s28  ;;  %v7985_v0 = vpack.c.bf16 %v6079_v46, %v6049_v43  ;;  %v7987_v31 = vpack.c.bf16 %v6078_v19, %v6048_v38  ;;  %v5871_v60 = vld [vmem:[#allocation3 + $0x458] sm:$0xff]  ;;  %v5900_v15 = vld [vmem:[#allocation3 + $0x540] sm:$0xff] }
 0x692   : > { %v8001_v38 = vpack.c.bf16 %v5901_v51, %v5871_v60 }
 0x693   : > { %v5581_v37 = vpop.permute.xlu1 %5580  ;;  %v5579_v34 = vpop.permute.xlu0 %5578  ;;  %7986 = vmatprep.subr.bf16.mxu0 %v7985_v0 }
 0x694   : > { %v5625_v63 = vsel %vm5610_vm9, %v11974_v10, %v5579_v34  ;;  %v5626_v55 = vsel %vm5610_vm9, %v5579_v34, %v5581_v37  ;;  %7988 = vmatpush1.bf16.msra.mxu0 %v7987_v31 }
 0x695   : > { %5685 = vst [vmem:[#allocation3 + $0xca0] sm:$0xf] %v5625_v63  ;;  %5686 = vst [vmem:[#allocation3 + $0xca8] sm:$0xf] %v5626_v55  ;;  %4995 = vrot.lane.b32.xlu1 %v12060_v21, %s8710_s16  ;;  %4993 = vrot.lane.b32.xlu0 %v11901_v50, %s8710_s16  ;;  %v5870_v63 = vld [vmem:[#allocation3 + $0x450] sm:$0xff]  ;;  %v5961_v55 = vld [vmem:[#allocation3 + $0x728] sm:$0xff] }
 0x697   : > { %v12130_v20 = vpop.permute.xlu1 %5183  ;;  %v5182_v18 = vpop.permute.xlu0 %5181 }
 0x698   : > { %v5226_v41 = vsel %vm5209_vm7, %v5180_v58, %v5182_v18  ;;  %v5227_v32 = vsel %vm5209_vm7, %v5182_v18, %v12130_v20  ;;  %v6107_v62 = vld [vmem:[#allocation3 + $0xbb8] sm:$0xff]  ;;  %v6106_v24 = vld [vmem:[#allocation3 + $0xbb0] sm:$0xff]  ;;  %v7997_v58 = vpack.c.bf16 %v5841_v9, %v5811_v22  ;;  %v5753_v18 = vld [vmem:[#allocation3 + $0xa8] sm:$0xff] }
 0x699   : > { %5286 = vst [vmem:[#allocation3 + $0xbc0] sm:$0xf] %v5226_v41  ;;  %5287 = vst [vmem:[#allocation3 + $0xbc8] sm:$0xf] %v5227_v32  ;;  %4397 = vrot.lane.b32.xlu1 %v12076_v35, %s8707_s11  ;;  %4395 = vrot.lane.b32.xlu0 %v12070_v26, %s8707_s11 }
 0x69b   : > { %v12139_v10 = vpop.permute.xlu1 %5384  ;;  %v5383_v45 = vpop.permute.xlu0 %5382 }
 0x69c   : > { %v5427_v52 = vsel %vm5410_vm8, %v5381_v61, %v5383_v45  ;;  %v5428_v47 = vsel %vm5410_vm8, %v5383_v45, %v12139_v10  ;;  %v6137_v1 = vld [vmem:[#allocation3 + $0xca8] sm:$0xff]  ;;  %v6136_v57 = vld [vmem:[#allocation3 + $0xca0] sm:$0xff]  ;;  %v5931_v45 = vld [vmem:[#allocation3 + $0x638] sm:$0xff] }
 0x69d   : > { %5487 = vst [vmem:[#allocation3 + $0xbc0] sm:$0xf0] %v5427_v52  ;;  %5488 = vst [vmem:[#allocation3 + $0xbc8] sm:$0xf0] %v5428_v47  ;;  %4598 = vrot.lane.b32.xlu1 %v12089_v30, %s8708_s8  ;;  %4596 = vrot.lane.b32.xlu0 %v12049_v4, %s8708_s8  ;;  %v7961_v13 = vpack.c.bf16 %v6137_v1, %v6107_v62  ;;  %v7963_v23 = vpack.c.bf16 %v6136_v57, %v6106_v24  ;;  %v5960_v52 = vld [vmem:[#allocation3 + $0x720] sm:$0xff]  ;;  %v5782_v47 = vld [vmem:[#allocation3 + $0x190] sm:$0xff] }
 0x69e   : > { %v8021_v62 = vpack.c.bf16 %v5783_v16, %v5753_v18  ;;  %v8005_v57 = vpack.c.bf16 %v5961_v55, %v5931_v45  ;;  %v5873_v16 = vld [vmem:[#allocation3 + $0x468] sm:$0xff] }
 0x69f   : > { %v12148_v6 = vpop.permute.xlu1 %5584  ;;  %7962 = vmatprep.subr.bf16.mxu1 %v7961_v13  ;;  %v5583_v56 = vpop.permute.xlu0 %5582  ;;  %v5930_v13 = vld [vmem:[#allocation3 + $0x630] sm:$0xff] }
 0x6a0   : > { %v5627_v33 = vsel %vm5610_vm9, %v5581_v37, %v5583_v56  ;;  %v5628_v36 = vsel %vm5610_vm9, %v5583_v56, %v12148_v6  ;;  %7964 = vmatpush1.bf16.msra.mxu1 %v7963_v23  ;;  %v5752_v23 = vld [vmem:[#allocation3 + $0xa0] sm:$0xff]  ;;  %v8007_v56 = vpack.c.bf16 %v5960_v52, %v5930_v13 }
 0x6a1   : > { %5687 = vst [vmem:[#allocation3 + $0xcb0] sm:$0xf] %v5627_v33  ;;  %5688 = vst [vmem:[#allocation3 + $0xcb8] sm:$0xf] %v5628_v36  ;;  %4798 = vrot.lane.b32.xlu1 %v12076_v35, %s8709_s28  ;;  %4796 = vrot.lane.b32.xlu0 %v12070_v26, %s8709_s28  ;;  %v8023_v8 = vpack.c.bf16 %v5782_v47, %v5752_v23  ;;  %v12185_v36 = vld [vmem:[#allocation9] sm:$0xff] }
 0x6a2   : > { %7994 = vmatprep.subr.bf16.mxu1 %v7993_v59  ;;  %v5813_v59 = vld [vmem:[#allocation3 + $0x288] sm:$0xff] }
 0x6a3   : > { %v3985_v54 = vpop.permute.xlu1 %3984  ;;  %v3983_v25 = vpop.permute.xlu0 %3982  ;;  %7727 = vmatmul.mubr.msk.f32.vlgmr.msra.gmra.mrb[6].mxu1 %vm6152_vm10, %v11834_v48  ;;  %v5810_v48 = vld [vmem:[#allocation3 + $0x270] sm:$0xff] }
 0x6a4   : > { %v4025_v3 = vsel %vm4006_vm1, %v12000_v12, %v3983_v25  ;;  %v4026_v7 = vsel %vm4006_vm1, %v3983_v25, %v3985_v54  ;;  %7996 = vmatpush1.bf16.msra.mxu1 %v7995_v5  ;;  %6859 = vmatprep.mubr.f32.mxu1 %v8712_v29  ;;  %v7999_v2 = vpack.c.bf16 %v5840_v14, %v5810_v48  ;;  %v6109_v43 = vld [vmem:[#allocation3 + $0xbc8] sm:$0xff]  ;;  %v6108_v0 = vld [vmem:[#allocation3 + $0xbc0] sm:$0xff] }
 0x6a5   : > { %4085 = vst [vmem:[#allocation3 + $0x900] sm:$0xf] %v4025_v3  ;;  %4086 = vst [vmem:[#allocation3 + $0x908] sm:$0xf] %v4026_v7  ;;  %4999 = vrot.lane.b32.xlu1 %v12089_v30, %s8710_s16  ;;  %4997 = vrot.lane.b32.xlu0 %v12049_v4, %s8710_s16  ;;  %v8025_v5 = vpack.c.bf16 %v5843_v11, %v5813_v59  ;;  %v5812_v7 = vld [vmem:[#allocation3 + $0x280] sm:$0xff] }
 0x6a6   : > { %7998 = vmatprep.subr.bf16.mxu1 %v7997_v58  ;;  %v5903_v58 = vld [vmem:[#allocation3 + $0x558] sm:$0xff]  ;;  %v8027_v48 = vpack.c.bf16 %v5842_v42, %v5812_v7 }
 0x6a7   : > { %v4186_v12 = vpop.permute.xlu1 %4185  ;;  %v4184_v61 = vpop.permute.xlu0 %4183  ;;  %v8029_v60 = vpack.c.bf16 %v5903_v58, %v5873_v16 }
 0x6a8   : > { %v4226_v17 = vsel %vm4207_vm2, %v12009_v28, %v4184_v61  ;;  %v4227_v46 = vsel %vm4207_vm2, %v4184_v61, %v4186_v12  ;;  %8000 = vmatpush1.bf16.msra.mxu1 %v7999_v2  ;;  %v6139_v19 = vld [vmem:[#allocation3 + $0xcb8] sm:$0xff]  ;;  %v6138_v31 = vld [vmem:[#allocation3 + $0xcb0] sm:$0xff]  ;;  %v8003_v28 = vpack.c.bf16 %v5900_v15, %v5870_v63 }
 0x6a9   : > { %4286 = vst [vmem:[#allocation3 + $0x900] sm:$0xf0] %v4226_v17  ;;  %4287 = vst [vmem:[#allocation3 + $0x908] sm:$0xf0] %v4227_v46  ;;  %5195 = vrot.lane.b32.xlu1 %v12049_v4, %s8711_s10  ;;  %5193 = vrot.lane.b32.xlu0 %v12043_v40, %s8711_s10  ;;  %v7989_v37 = vpack.c.bf16 %v6139_v19, %v6109_v43  ;;  %v7991_v34 = vpack.c.bf16 %v6138_v31, %v6108_v0  ;;  %v5872_v43 = vld [vmem:[#allocation3 + $0x460] sm:$0xff]  ;;  %v5963_v15 = vld [vmem:[#allocation3 + $0x738] sm:$0xff] }
 0x6aa   : > { %8002 = vmatprep.subr.bf16.mxu1 %v8001_v38  ;;  %v5933_v38 = vld [vmem:[#allocation3 + $0x648] sm:$0xff]  ;;  %v5962_v19 = vld [vmem:[#allocation3 + $0x730] sm:$0xff] }
 0x6ab   : > { %v12174_v41 = vpop.permute.xlu1 %3988  ;;  %v3987_v32 = vpop.permute.xlu0 %3986  ;;  %7990 = vmatprep.subr.bf16.mxu0 %v7989_v37  ;;  %v8033_v37 = vpack.c.bf16 %v5963_v15, %v5933_v38 }
 0x6ac   : > { %v4027_v1 = vsel %vm4006_vm1, %v3985_v54, %v3987_v32  ;;  %v4028_v24 = vsel %vm4006_vm1, %v3987_v32, %v12174_v41  ;;  %7992 = vmatpush1.bf16.msra.mxu0 %v7991_v34  ;;  %8004 = vmatpush1.bf16.msra.mxu1 %v8003_v28  ;;  %v5991_v54 = vld [vmem:[#allocation3 + $0x818] sm:$0xff]  ;;  %v5932_v34 = vld [vmem:[#allocation3 + $0x640] sm:$0xff]  ;;  %v5993_v32 = vld [vmem:[#allocation3 + $0x828] sm:$0xff] }
 0x6ad   : > { %4087 = vst [vmem:[#allocation3 + $0x910] sm:$0xf] %v4027_v1  ;;  %4088 = vst [vmem:[#allocation3 + $0x918] sm:$0xf] %v4028_v24  ;;  %5396 = vrot.lane.b32.xlu1 %v12060_v21, %s8713_s26  ;;  %5394 = vrot.lane.b32.xlu0 %v11901_v50, %s8713_s26  ;;  %v5990_v21 = vld [vmem:[#allocation3 + $0x810] sm:$0xff]  ;;  %v8035_v55 = vpack.c.bf16 %v5962_v19, %v5932_v34 }
 0x6ae   : > { %8006 = vmatprep.subr.bf16.mxu1 %v8005_v57  ;;  %8022 = vmatprep.subr.bf16.mxu0 %v8021_v62 }
 0x6af   : > { %v12183_v27 = vpop.permute.xlu1 %4189  ;;  %v4188_v33 = vpop.permute.xlu0 %4187  ;;  %7728 = vmatmul.mubr.msk.f32.vlgmr.msra.gmra.mrb[8].mxu0 %vm6152_vm10, %v12185_v36 }
 0x6b0   : > { %v4228_v50 = vsel %vm4207_vm2, %v4186_v12, %v4188_v33  ;;  %v4229_v9 = vsel %vm4207_vm2, %v4188_v33, %v12183_v27  ;;  %8008 = vmatpush1.bf16.msra.mxu1 %v8007_v56  ;;  %8024 = vmatpush1.bf16.msra.mxu0 %v8023_v8  ;;  %v6021_v25 = vld [vmem:[#allocation3 + $0x908] sm:$0xff]  ;;  %v6020_v22 = vld [vmem:[#allocation3 + $0x900] sm:$0xff]  ;;  %v5902_v12 = vld [vmem:[#allocation3 + $0x550] sm:$0xff] }
 0x6b1   : > { %4288 = vst [vmem:[#allocation3 + $0x910] sm:$0xf0] %v4228_v50  ;;  %4289 = vst [vmem:[#allocation3 + $0x918] sm:$0xf0] %v4229_v9  ;;  %5596 = vrot.lane.b32.xlu1 %v12049_v4, %s8714_s9  ;;  %5594 = vrot.lane.b32.xlu0 %v12043_v40, %s8714_s9  ;;  %v8009_v14 = vpack.c.bf16 %v6021_v25, %v5991_v54  ;;  %v8011_v3 = vpack.c.bf16 %v6020_v22, %v5990_v21  ;;  %v3912_v33 = vld [vmem:[#allocation2 + $0x8c] sm:$0xf] }
 0x6b2   : > { %8026 = vmatprep.subr.bf16.mxu0 %v8025_v5  ;;  %6930 = vmatprep.mubr.f32.mxu0 %v8712_v29  ;;  %v8031_v17 = vpack.c.bf16 %v5902_v12, %v5872_v43 }
 0x6b3   : > { %v12197_v51 = vpop.permute.xlu1 %4385  ;;  %8010 = vmatprep.subr.bf16.mxu1 %v8009_v14  ;;  %v4384_v2 = vpop.permute.xlu0 %4383 }
 0x6b4   : > { %v4426_v61 = vsel %vm4407_vm3, %v12062_v49, %v4384_v2  ;;  %v4427_v40 = vsel %vm4407_vm3, %v4384_v2, %v12197_v51  ;;  %8012 = vmatpush1.bf16.msra.mxu1 %v8011_v3  ;;  %8028 = vmatpush1.bf16.msra.mxu0 %v8027_v48  ;;  %v8456_v3 = vld [vmem:[#allocation2 + $0x8c] ss:$0 sps:$4 sm:$0xff]  }
 0x6b5   : > { %4486 = vst [vmem:[#allocation3 + $0x9f0] sm:$0xf] %v4426_v61  ;;  %4487 = vst [vmem:[#allocation3 + $0x9f8] sm:$0xf] %v4427_v40  ;;  %5199 = vrot.lane.b32.xlu1 %v12076_v35, %s8711_s10  ;;  %5197 = vrot.lane.b32.xlu0 %v12070_v26, %s8711_s10 }
 0x6b6   : > { %8030 = vmatprep.subr.bf16.mxu0 %v8029_v60 }
 0x6b7   : > { %v4587_v46 = vpop.permute.xlu1 %4586  ;;  %v4585_v49 = vpop.permute.xlu0 %4584 }
 0x6b8   : > { %v4627_v0 = vsel %vm4608_vm4, %v12078_v44, %v4585_v49  ;;  %v4628_v31 = vsel %vm4608_vm4, %v4585_v49, %v4587_v46  ;;  %8032 = vmatpush1.bf16.msra.mxu0 %v8031_v17  ;;  %v6023_v63 = vld [vmem:[#allocation3 + $0x918] sm:$0xff]  ;;  %v6022_v44 = vld [vmem:[#allocation3 + $0x910] sm:$0xff] }
 0x6b9   : > { %4687 = vst [vmem:[#allocation3 + $0x9f0] sm:$0xf0] %v4627_v0  ;;  %4688 = vst [vmem:[#allocation3 + $0x9f8] sm:$0xf0] %v4628_v31  ;;  %5400 = vrot.lane.b32.xlu1 %v12089_v30, %s8713_s26  ;;  %5398 = vrot.lane.b32.xlu0 %v12049_v4, %s8713_s26  ;;  %v8037_v52 = vpack.c.bf16 %v6023_v63, %v5993_v32  ;;  %v12219_v30 = vcombine.high %v12076_v35, %v12076_v35  ;;  %v5992_v4 = vld [vmem:[#allocation3 + $0x820] sm:$0xff] }
 0x6ba   : > { %8034 = vmatprep.subr.bf16.mxu0 %v8033_v37  ;;  %v8039_v47 = vpack.c.bf16 %v6022_v44, %v5992_v4 }
 0x6bb   : > { %v4787_v28 = vpop.permute.xlu1 %4786  ;;  %v4785_v18 = vpop.permute.xlu0 %4784 }
 0x6bc   : > { %v4827_v45 = vsel %vm4808_vm5, %v12091_v53, %v4785_v18  ;;  %v4828_v62 = vsel %vm4808_vm5, %v4785_v18, %v4787_v28  ;;  %8036 = vmatpush1.bf16.msra.mxu0 %v8035_v55  ;;  %v12225_v53 = vld [vmem:[#allocation2 + $0x84] sm:$0xff]  ;;  %v4313_v18 = vld [vmem:[#allocation2 + $0x8c] sm:$0xf] }
 0x6bd   : > { %4887 = vst [vmem:[#allocation3 + $0xae0] sm:$0xf] %v4827_v45  ;;  %4888 = vst [vmem:[#allocation3 + $0xae8] sm:$0xf] %v4828_v62  ;;  %5600 = vrot.lane.b32.xlu1 %v12076_v35, %s8714_s9  ;;  %5598 = vrot.lane.b32.xlu0 %v12070_v26, %s8714_s9  ;;  %v12236_v26 = vcombine.low %v12225_v53, %v12225_v53  ;;  %v12246_v8 = vcombine.high %v12225_v53, %v12225_v53  ;;  %v8457_v62 = vld [vmem:[#allocation2 + $0x8c] ss:$0 sps:$4 sm:$0xff]  }
 0x6be   : > { %8038 = vmatprep.subr.bf16.mxu0 %v8037_v52 }
 0x6bf   : > { %v4988_v1 = vpop.permute.xlu1 %4987  ;;  %v4986_v24 = vpop.permute.xlu0 %4985 }
 0x6c0   : > { %v5028_v57 = vsel %vm5009_vm6, %v12100_v39, %v4986_v24  ;;  %v5029_v13 = vsel %vm5009_vm6, %v4986_v24, %v4988_v1  ;;  %8040 = vmatpush1.bf16.msra.mxu0 %v8039_v47  ;;  %v6051_v42 = vld [vmem:[#allocation3 + $0x9f8] sm:$0xff]  ;;  %v6050_v54 = vld [vmem:[#allocation3 + $0x9f0] sm:$0xff] }
 0x6c1   : > { %5088 = vst [vmem:[#allocation3 + $0xae0] sm:$0xf0] %v5028_v57  ;;  %5089 = vst [vmem:[#allocation3 + $0xae8] sm:$0xf0] %v5029_v13  ;;  %4000 = vrot.lane.b32.xlu1 %v12225_v53, %s8705_s14  ;;  %3998 = vrot.lane.b32.xlu0 %v12219_v30, %s8705_s14 }
 0x6c3   : > { %v12238_v23 = vpop.permute.xlu1 %4389  ;;  %v4388_v11 = vpop.permute.xlu0 %4387 }
 0x6c4   : > { %v4428_v39 = vsel %vm4407_vm3, %v12197_v51, %v4388_v11  ;;  %v4429_v56 = vsel %vm4407_vm3, %v4388_v11, %v12238_v23 }
 0x6c5   : > { %4488 = vst [vmem:[#allocation3 + $0xa00] sm:$0xf] %v4428_v39  ;;  %4489 = vst [vmem:[#allocation3 + $0xa08] sm:$0xf] %v4429_v56  ;;  %4201 = vrot.lane.b32.xlu1 %v12236_v26, %s8706_s7  ;;  %4199 = vrot.lane.b32.xlu0 %v12076_v35, %s8706_s7 }
 0x6c7   : > { %v12252_v59 = vpop.permute.xlu1 %4590  ;;  %v4589_v21 = vpop.permute.xlu0 %4588 }
 0x6c8   : > { %v4629_v50 = vsel %vm4608_vm4, %v4587_v46, %v4589_v21  ;;  %v4630_v9 = vsel %vm4608_vm4, %v4589_v21, %v12252_v59  ;;  %v6081_v5 = vld [vmem:[#allocation3 + $0xae8] sm:$0xff]  ;;  %v6080_v25 = vld [vmem:[#allocation3 + $0xae0] sm:$0xff]  ;;  %v4714_v21 = vld [vmem:[#allocation2 + $0x8c] sm:$0xf] }
 0x6c9   : > { %4689 = vst [vmem:[#allocation3 + $0xa00] sm:$0xf0] %v4629_v50  ;;  %4690 = vst [vmem:[#allocation3 + $0xa08] sm:$0xf0] %v4630_v9  ;;  %4004 = vrot.lane.b32.xlu1 %v3912_v33, %s8705_s14  ;;  %4002 = vrot.lane.b32.xlu0 %v12246_v8, %s8705_s14  ;;  %v8013_v22 = vpack.c.bf16 %v6081_v5, %v6051_v42  ;;  %v8015_v14 = vpack.c.bf16 %v6080_v25, %v6050_v54  ;;  %v5785_v33 = vld [vmem:[#allocation3 + $0x1a8] sm:$0xff]  ;;  %v5755_v9 = vld [vmem:[#allocation3 + $0xb8] sm:$0xff] }
 0x6ca   : > { %v5784_v5 = vld [vmem:[#allocation3 + $0x1a0] sm:$0xff]  ;;  %s8584_s14 = sshll.u32 %s8715_s21, 4  ;;  %s8585_s14 = int_to_ptr.vmem [resolvable:$false] %s8584_s14 }
 0x6cb   : > { %v12260_v7 = vpop.permute.xlu1 %4790  ;;  %8014 = vmatprep.subr.bf16.mxu1 %v8013_v22  ;;  %v4789_v58 = vpop.permute.xlu0 %4788  ;;  %v8049_v22 = vpack.c.bf16 %v5785_v33, %v5755_v9  ;;  %v5756_v33 = vld [vmem:[#allocation3 + $0xc0] sm:$0xff]  ;;  %p8587_p2 = scmp.lt.s32.totalorder %s7555_s17, %s8585_s14 }
 0x6cc   : > { %v4829_v48 = vsel %vm4808_vm5, %v4787_v28, %v4789_v58  ;;  %v4830_v51 = vsel %vm4808_vm5, %v4789_v58, %v12260_v7  ;;  %8016 = vmatpush1.bf16.msra.mxu1 %v8015_v14  ;;  %v5754_v14 = vld [vmem:[#allocation3 + $0xb0] sm:$0xff]  ;;  %v5845_v58 = vld [vmem:[#allocation3 + $0x388] sm:$0xff] }
 0x6cd   : > { %4889 = vst [vmem:[#allocation3 + $0xaf0] sm:$0xf] %v4829_v48  ;;  %4890 = vst [vmem:[#allocation3 + $0xaf8] sm:$0xf] %v4830_v51  ;;  %4205 = vrot.lane.b32.xlu1 %v8456_v3, %s8706_s7  ;;  %4203 = vrot.lane.b32.xlu0 %v12225_v53, %s8706_s7  ;;  %v8459_v3 = vld [vmem:[#allocation2 + $0x8c] ss:$0 sps:$4 sm:$0xff]   ;;  %v8051_v48 = vpack.c.bf16 %v5784_v5, %v5754_v14 }
 0x6ce   : > { %v5846_v14 = vld [vmem:[#allocation3 + $0x390] sm:$0xff]  ;;  %s8586_s7 = scalar_lea.vmem %s8585_s14, 7680 }
 0x6cf   : > { %v12268_v2 = vpop.permute.xlu1 %4991  ;;  %v4990_v16 = vpop.permute.xlu0 %4989  ;;  %p8588_p5 = scmp.lt.s32.totalorder %s8586_s7, %s8580_s0 }
 0x6d0   : > { %v5030_v12 = vsel %vm5009_vm6, %v4988_v1, %v4990_v16  ;;  %v5031_v61 = vsel %vm5009_vm6, %v4990_v16, %v12268_v2  ;;  %v6053_v49 = vld [vmem:[#allocation3 + $0xa08] sm:$0xff] }
 0x6d1   : > { %5090 = vst [vmem:[#allocation3 + $0xaf0] sm:$0xf0] %v5030_v12  ;;  %5091 = vst [vmem:[#allocation3 + $0xaf8] sm:$0xf0] %v5031_v61  ;;  %4401 = vrot.lane.b32.xlu1 %v12225_v53, %s8707_s11  ;;  %4399 = vrot.lane.b32.xlu0 %v12219_v30, %s8707_s11  ;;  %v5815_v12 = vld [vmem:[#allocation3 + $0x298] sm:$0xff]  ;;  %v5844_v61 = vld [vmem:[#allocation3 + $0x380] sm:$0xff]  ;;  %p8589_p8 = por %p8588_p5, %p8587_p2 }
 0x6d3   : > { %v5188_v40 = vpop.permute.xlu1 %5187  ;;  %v5186_v60 = vpop.permute.xlu0 %5185  ;;  %p8590_p9 = pnand %p8589_p8, %p8583_p3 }
 0x6d4   : > { %v5228_v43 = vsel %vm5209_vm7, %v12130_v20, %v5186_v60  ;;  %v5229_v15 = vsel %vm5209_vm7, %v5186_v60, %v5188_v40  ;;  %v6052_v20 = vld [vmem:[#allocation3 + $0xa00] sm:$0xff] }
 0x6d5   : > { %5288 = vst [vmem:[#allocation3 + $0xbd0] sm:$0xf] %v5228_v43  ;;  %5289 = vst [vmem:[#allocation3 + $0xbd8] sm:$0xf] %v5229_v15  ;;  %4602 = vrot.lane.b32.xlu1 %v12236_v26, %s8708_s8  ;;  %4600 = vrot.lane.b32.xlu0 %v12076_v35, %s8708_s8  ;;  %v8053_v43 = vpack.c.bf16 %v5845_v58, %v5815_v12  ;;  %v5814_v15 = vld [vmem:[#allocation3 + $0x290] sm:$0xff]  ;;  %v5995_v58 = vld [vmem:[#allocation3 + $0x838] sm:$0xff] }
 0x6d6   : > { %v5816_v12 = vld [vmem:[#allocation3 + $0x2a0] sm:$0xff] }
 0x6d7   : > { %v5389_v17 = vpop.permute.xlu1 %5388  ;;  %v5387_v46 = vpop.permute.xlu0 %5386 }
 0x6d8   : > { %v5429_v38 = vsel %vm5410_vm8, %v12139_v10, %v5387_v46  ;;  %v5430_v19 = vsel %vm5410_vm8, %v5387_v46, %v5389_v17  ;;  %v6083_v0 = vld [vmem:[#allocation3 + $0xaf8] sm:$0xff]  ;;  %v6082_v31 = vld [vmem:[#allocation3 + $0xaf0] sm:$0xff]  ;;  %v8055_v46 = vpack.c.bf16 %v5844_v61, %v5814_v15 }
 0x6d9   : > { %5489 = vst [vmem:[#allocation3 + $0xbd0] sm:$0xf0] %v5429_v38  ;;  %5490 = vst [vmem:[#allocation3 + $0xbd8] sm:$0xf0] %v5430_v19  ;;  %4802 = vrot.lane.b32.xlu1 %v12225_v53, %s8709_s28  ;;  %4800 = vrot.lane.b32.xlu0 %v12219_v30, %s8709_s28  ;;  %v8041_v37 = vpack.c.bf16 %v6083_v0, %v6053_v49  ;;  %v8043_v34 = vpack.c.bf16 %v6082_v31, %v6052_v20  ;;  %v5787_v49 = vld [vmem:[#allocation3 + $0x1b8] sm:$0xff]  ;;  %v5904_v20 = vld [vmem:[#allocation3 + $0x560] sm:$0xff] }
 0x6da   : > { %v5875_v19 = vld [vmem:[#allocation3 + $0x478] sm:$0xff] }
 0x6db   : > { %v5589_v63 = vpop.permute.xlu1 %5588  ;;  %v5587_v55 = vpop.permute.xlu0 %5586  ;;  %8042 = vmatprep.subr.bf16.mxu0 %v8041_v37  ;;  %v5907_v61 = vld [vmem:[#allocation3 + $0x578] sm:$0xff] }
 0x6dc   : > { %v5629_v10 = vsel %vm5610_vm9, %v12148_v6, %v5587_v55  ;;  %v5630_v28 = vsel %vm5610_vm9, %v5587_v55, %v5589_v63  ;;  %8044 = vmatpush1.bf16.msra.mxu0 %v8043_v34 }
 0x6dd   : > { %5689 = vst [vmem:[#allocation3 + $0xcc0] sm:$0xf] %v5629_v10  ;;  %5690 = vst [vmem:[#allocation3 + $0xcc8] sm:$0xf] %v5630_v28  ;;  %5003 = vrot.lane.b32.xlu1 %v12236_v26, %s8710_s16  ;;  %5001 = vrot.lane.b32.xlu0 %v12076_v35, %s8710_s16 }
 0x6df   : > { %v12298_v32 = vpop.permute.xlu1 %5191  ;;  %v5190_v44 = vpop.permute.xlu0 %5189 }
 0x6e0   : > { %v5230_v45 = vsel %vm5209_vm7, %v5188_v40, %v5190_v44  ;;  %v5231_v6 = vsel %vm5209_vm7, %v5190_v44, %v12298_v32  ;;  %v6111_v47 = vld [vmem:[#allocation3 + $0xbd8] sm:$0xff]  ;;  %v6110_v13 = vld [vmem:[#allocation3 + $0xbd0] sm:$0xff] }
 0x6e1   : > { %5290 = vst [vmem:[#allocation3 + $0xbe0] sm:$0xf] %v5230_v45  ;;  %5291 = vst [vmem:[#allocation3 + $0xbe8] sm:$0xf] %v5231_v6  ;;  %4405 = vrot.lane.b32.xlu1 %v4313_v18, %s8707_s11  ;;  %4403 = vrot.lane.b32.xlu0 %v12246_v8, %s8707_s11  ;;  %v5874_v44 = vld [vmem:[#allocation3 + $0x470] sm:$0xff]  ;;  %v5965_v45 = vld [vmem:[#allocation3 + $0x748] sm:$0xff] }
 0x6e2   : > { %v5757_v6 = vld [vmem:[#allocation3 + $0xc8] sm:$0xff] }
 0x6e3   : > { %v12306_v52 = vpop.permute.xlu1 %5392  ;;  %v5391_v4 = vpop.permute.xlu0 %5390 }
 0x6e4   : > { %v5431_v1 = vsel %vm5410_vm8, %v5389_v17, %v5391_v4  ;;  %v5432_v24 = vsel %vm5410_vm8, %v5391_v4, %v12306_v52  ;;  %v6141_v57 = vld [vmem:[#allocation3 + $0xcc8] sm:$0xff]  ;;  %v6140_v11 = vld [vmem:[#allocation3 + $0xcc0] sm:$0xff] }
 0x6e5   : > { %5491 = vst [vmem:[#allocation3 + $0xbe0] sm:$0xf0] %v5431_v1  ;;  %5492 = vst [vmem:[#allocation3 + $0xbe8] sm:$0xf0] %v5432_v24  ;;  %4606 = vrot.lane.b32.xlu1 %v8457_v62, %s8708_s8  ;;  %4604 = vrot.lane.b32.xlu0 %v12225_v53, %s8708_s8  ;;  %v8017_v39 = vpack.c.bf16 %v6141_v57, %v6111_v47  ;;  %v8019_v56 = vpack.c.bf16 %v6140_v11, %v6110_v13  ;;  %v5905_v17 = vld [vmem:[#allocation3 + $0x568] sm:$0xff]  ;;  %v5935_v47 = vld [vmem:[#allocation3 + $0x658] sm:$0xff] }
 0x6e6   : > { %v8057_v34 = vpack.c.bf16 %v5905_v17, %v5875_v19  ;;  %v8077_v1 = vpack.c.bf16 %v5787_v49, %v5757_v6  ;;  %v5964_v24 = vld [vmem:[#allocation3 + $0x740] sm:$0xff]  ;;  %v5786_v57 = vld [vmem:[#allocation3 + $0x1b0] sm:$0xff]  ;;  %v5877_v17 = vld [vmem:[#allocation3 + $0x488] sm:$0xff] }
 0x6e7   : > { %v12314_v42 = vpop.permute.xlu1 %5592  ;;  %8018 = vmatprep.subr.bf16.mxu1 %v8017_v39  ;;  %v5591_v50 = vpop.permute.xlu0 %5590  ;;  %v8061_v39 = vpack.c.bf16 %v5965_v45, %v5935_v47  ;;  %v8079_v9 = vpack.c.bf16 %v5786_v57, %v5756_v33  ;;  %v8461_v19 = vld [vmem:[#allocation2 + $0x8c] ss:$0 sps:$4 sm:$0xff]   ;;  %v5997_v6 = vld [vmem:[#allocation3 + $0x848] sm:$0xff] }
 0x6e8   : > { %v5631_v54 = vsel %vm5610_vm9, %v5589_v63, %v5591_v50  ;;  %v5632_v25 = vsel %vm5610_vm9, %v5591_v50, %v12314_v42  ;;  %8020 = vmatpush1.bf16.msra.mxu1 %v8019_v56  ;;  %v5934_v56 = vld [vmem:[#allocation3 + $0x650] sm:$0xff]  ;;  %v5516_v45 = vld [vmem:[#allocation2 + $0x8c] sm:$0xf]  ;;  %v6222_v33 = vpop.f32.mrb[0].mxu0 }
 0x6e9   : > { %5691 = vst [vmem:[#allocation3 + $0xcd0] sm:$0xf] %v5631_v54  ;;  %5692 = vst [vmem:[#allocation3 + $0xcd8] sm:$0xf] %v5632_v25  ;;  %4806 = vrot.lane.b32.xlu1 %v4714_v21, %s8709_s28  ;;  %4804 = vrot.lane.b32.xlu0 %v12246_v8, %s8709_s28  ;;  %v5847_v21 = vld [vmem:[#allocation3 + $0x398] sm:$0xff]  ;;  %v8063_v50 = vpack.c.bf16 %v5964_v24, %v5934_v56  ;;  %v5817_v25 = vld [vmem:[#allocation3 + $0x2a8] sm:$0xff] }
 0x6ea   : > { %8050 = vmatprep.subr.bf16.mxu1 %v8049_v22  ;;  %v5994_v22 = vld [vmem:[#allocation3 + $0x830] sm:$0xff]  ;;  %7221 = vst [vmem:[%s12397_s2] sm:$0xff] %v6222_v33 }
 0x6eb   : > { %v3993_v51 = vpop.permute.xlu1 %3992  ;;  %7729 = vmatmul.mubr.msk.f32.vlgmr.msra.gmra.mrb[8].mxu1 %vm6152_vm10, %v12185_v36  ;;  %v3991_v16 = vpop.permute.xlu0 %3990 }
 0x6ec   : > { %v4029_v40 = vsel %vm4006_vm1, %v12174_v41, %v3991_v16  ;;  %v4030_v60 = vsel %vm4006_vm1, %v3991_v16, %v3993_v51  ;;  %8052 = vmatpush1.bf16.msra.mxu1 %v8051_v48  ;;  %7001 = vmatprep.mubr.f32.mxu1 %v8712_v29  ;;  %v6113_v0 = vld [vmem:[#allocation3 + $0xbe8] sm:$0xff]  ;;  %v6112_v55 = vld [vmem:[#allocation3 + $0xbe0] sm:$0xff] }
 0x6ed   : > { %4089 = vst [vmem:[#allocation3 + $0x920] sm:$0xf] %v4029_v40  ;;  %4090 = vst [vmem:[#allocation3 + $0x928] sm:$0xf] %v4030_v60  ;;  %5007 = vrot.lane.b32.xlu1 %v8459_v3, %s8710_s16  ;;  %5005 = vrot.lane.b32.xlu0 %v12225_v53, %s8710_s16  ;;  %v8081_v3 = vpack.c.bf16 %v5847_v21, %v5817_v25  ;;  %v8083_v40 = vpack.c.bf16 %v5846_v14, %v5816_v12  ;;  %v5115_v60 = vld [vmem:[#allocation2 + $0x8c] sm:$0xf] }
 0x6ee   : > { %8054 = vmatprep.subr.bf16.mxu1 %v8053_v43  ;;  %v12393_v21 = vpop.f32.mrb[0].mxu1 }
 0x6ef   : > { %v4194_v38 = vpop.permute.xlu1 %4193  ;;  %v4192_v41 = vpop.permute.xlu0 %4191  ;;  %7223 = vst [vmem:[%s12397_s2 + $0x10] sm:$0xff] %v12393_v21 }
 0x6f0   : > { %v4230_v31 = vsel %vm4207_vm2, %v12183_v27, %v4192_v41  ;;  %v4231_v37 = vsel %vm4207_vm2, %v4192_v41, %v4194_v38  ;;  %8056 = vmatpush1.bf16.msra.mxu1 %v8055_v46  ;;  %v6143_v63 = vld [vmem:[#allocation3 + $0xcd8] sm:$0xff]  ;;  %v6142_v10 = vld [vmem:[#allocation3 + $0xcd0] sm:$0xff]  ;;  %v8059_v27 = vpack.c.bf16 %v5904_v20, %v5874_v44  ;;  %v5876_v41 = vld [vmem:[#allocation3 + $0x480] sm:$0xff] }
 0x6f1   : > { %4290 = vst [vmem:[#allocation3 + $0x920] sm:$0xf0] %v4230_v31  ;;  %4291 = vst [vmem:[#allocation3 + $0x928] sm:$0xf0] %v4231_v37  ;;  %5203 = vrot.lane.b32.xlu1 %v12225_v53, %s8711_s10  ;;  %5201 = vrot.lane.b32.xlu0 %v12219_v30, %s8711_s10  ;;  %v8045_v28 = vpack.c.bf16 %v6143_v63, %v6113_v0  ;;  %v8047_v18 = vpack.c.bf16 %v6142_v10, %v6112_v55  ;;  %v5906_v46 = vld [vmem:[#allocation3 + $0x570] sm:$0xff]  ;;  %v5967_v0 = vld [vmem:[#allocation3 + $0x758] sm:$0xff] }
 0x6f2   : > { %8058 = vmatprep.subr.bf16.mxu1 %v8057_v34  ;;  %v8087_v20 = vpack.c.bf16 %v5906_v46, %v5876_v41  ;;  %v5937_v37 = vld [vmem:[#allocation3 + $0x668] sm:$0xff]  ;;  %v5966_v34 = vld [vmem:[#allocation3 + $0x750] sm:$0xff] }
 0x6f3   : > { %v12338_v62 = vpop.permute.xlu1 %3996  ;;  %v3995_v4 = vpop.permute.xlu0 %3994  ;;  %8046 = vmatprep.subr.bf16.mxu0 %v8045_v28  ;;  %v8089_v10 = vpack.c.bf16 %v5967_v0, %v5937_v37  ;;  %v5936_v28 = vld [vmem:[#allocation3 + $0x660] sm:$0xff] }
 0x6f4   : > { %v4031_v13 = vsel %vm4006_vm1, %v3993_v51, %v3995_v4  ;;  %v4032_v11 = vsel %vm4006_vm1, %v3995_v4, %v12338_v62  ;;  %8048 = vmatpush1.bf16.msra.mxu0 %v8047_v18  ;;  %8060 = vmatpush1.bf16.msra.mxu1 %v8059_v27  ;;  %v8091_v44 = vpack.c.bf16 %v5966_v34, %v5936_v28 }
 0x6f5   : > { %4091 = vst [vmem:[#allocation3 + $0x930] sm:$0xf] %v4031_v13  ;;  %4092 = vst [vmem:[#allocation3 + $0x938] sm:$0xf] %v4032_v11  ;;  %5404 = vrot.lane.b32.xlu1 %v12236_v26, %s8713_s26  ;;  %5402 = vrot.lane.b32.xlu0 %v12076_v35, %s8713_s26 }
 0x6f6   : > { %8062 = vmatprep.subr.bf16.mxu1 %v8061_v39  ;;  %8078 = vmatprep.subr.bf16.mxu0 %v8077_v1 }
 0x6f7   : > { %v12347_v5 = vpop.permute.xlu1 %4197  ;;  %v4196_v54 = vpop.permute.xlu0 %4195  ;;  %7730 = vmatmul.mubr.msk.f32.vlgmr.msra.gmra.mrb[10].mxu0 %vm6152_vm10, %v12185_v36 }
 0x6f8   : > { %v4232_v26 = vsel %vm4207_vm2, %v4194_v38, %v4196_v54  ;;  %v4233_v35 = vsel %vm4207_vm2, %v4196_v54, %v12347_v5  ;;  %8064 = vmatpush1.bf16.msra.mxu1 %v8063_v50  ;;  %8080 = vmatpush1.bf16.msra.mxu0 %v8079_v9  ;;  %v6025_v48 = vld [vmem:[#allocation3 + $0x928] sm:$0xff]  ;;  %v6024_v51 = vld [vmem:[#allocation3 + $0x920] sm:$0xff]  ;;  %v8085_v38 = vpack.c.bf16 %v5907_v61, %v5877_v17  ;;  %v6224_v50 = vpop.f32.mrb[1].mxu0  ;;  %v12395_v9 = vpop.f32.mrb[1].mxu1 }
 0x6f9   : > { %4292 = vst [vmem:[#allocation3 + $0x930] sm:$0xf0] %v4232_v26  ;;  %4293 = vst [vmem:[#allocation3 + $0x938] sm:$0xf0] %v4233_v35  ;;  %5604 = vrot.lane.b32.xlu1 %v12225_v53, %s8714_s9  ;;  %5602 = vrot.lane.b32.xlu0 %v12219_v30, %s8714_s9  ;;  %v8065_v36 = vpack.c.bf16 %v6025_v48, %v5995_v58  ;;  %v8067_v16 = vpack.c.bf16 %v6024_v51, %v5994_v22  ;;  %v12408_v54 = vpop.f32.mrb[2].mxu0  ;;  %v12410_v25 = vpop.f32.mrb[2].mxu1 }
 0x6fa   : > { %8082 = vmatprep.subr.bf16.mxu0 %v8081_v3  ;;  %7072 = vmatprep.mubr.f32.mxu0 %v8712_v29  ;;  %7222 = vst [vmem:[%s12397_s2 + $0x8] sm:$0xff] %v6224_v50  ;;  %7224 = vst [vmem:[%s12397_s2 + $0x18] sm:$0xff] %v12395_v9  ;;  %v12436_v61 = vpop.f32.mrb[3].mxu1 }
 0x6fb   : > { %v12359_v43 = vpop.permute.xlu1 %4393  ;;  %8066 = vmatprep.subr.bf16.mxu1 %v8065_v36  ;;  %v4392_v15 = vpop.permute.xlu0 %4391  ;;  %7225 = vst [vmem:[%s12397_s2 + $0x20] sm:$0xff] %v12408_v54  ;;  %7227 = vst [vmem:[%s12397_s2 + $0x30] sm:$0xff] %v12410_v25 }
 0x6fc   : > { %v4430_v49 = vsel %vm4407_vm3, %v12238_v23, %v4392_v15  ;;  %v4431_v30 = vsel %vm4407_vm3, %v4392_v15, %v12359_v43  ;;  %8068 = vmatpush1.bf16.msra.mxu1 %v8067_v16  ;;  %8084 = vmatpush1.bf16.msra.mxu0 %v8083_v40  ;;  %v12432_v16 = vpop.f32.mrb[3].mxu0  ;;  %7228 = vst [vmem:[%s12397_s2 + $0x38] sm:$0xff] %v12436_v61 }
 0x6fd   : > { %4490 = vst [vmem:[#allocation3 + $0xa10] sm:$0xf] %v4430_v49  ;;  %4491 = vst [vmem:[#allocation3 + $0xa18] sm:$0xf] %v4431_v30  ;;  %5207 = vrot.lane.b32.xlu1 %v5115_v60, %s8711_s10  ;;  %5205 = vrot.lane.b32.xlu0 %v12246_v8, %s8711_s10  ;;  %v12450_v17 = vpop.f32.mrb[4].mxu0 }
 0x6fe   : > { %8086 = vmatprep.subr.bf16.mxu0 %v8085_v38  ;;  %7226 = vst [vmem:[%s12397_s2 + $0x28] sm:$0xff] %v12432_v16  ;;  %7229 = vst [vmem:[%s12397_s2 + $0x40] sm:$0xff] %v12450_v17  ;;  %v12460_v38 = vpop.f32.mrb[5].mxu0 }
 0x6ff   : > { %v12368_v31 = vpop.permute.xlu1 %4594  ;;  %v4593_v23 = vpop.permute.xlu0 %4592  ;;  %7230 = vst [vmem:[%s12397_s2 + $0x48] sm:$0xff] %v12460_v38 }
 0x700   : > { %v4631_v63 = vsel %vm4608_vm4, %v12252_v59, %v4593_v23  ;;  %v4632_v55 = vsel %vm4608_vm4, %v4593_v23, %v12368_v31  ;;  %8088 = vmatpush1.bf16.msra.mxu0 %v8087_v20  ;;  %v6027_v18 = vld [vmem:[#allocation3 + $0x938] sm:$0xff]  ;;  %v6026_v4 = vld [vmem:[#allocation3 + $0x930] sm:$0xff] }
 0x701   : > { %4691 = vst [vmem:[#allocation3 + $0xa10] sm:$0xf0] %v4631_v63  ;;  %4692 = vst [vmem:[#allocation3 + $0xa18] sm:$0xf0] %v4632_v55  ;;  %5408 = vrot.lane.b32.xlu1 %v8461_v19, %s8713_s26  ;;  %5406 = vrot.lane.b32.xlu0 %v12225_v53, %s8713_s26  ;;  %v8093_v24 = vpack.c.bf16 %v6027_v18, %v5997_v6  ;;  %v5996_v53 = vld [vmem:[#allocation3 + $0x840] sm:$0xff] }
 0x702   : > { %8090 = vmatprep.subr.bf16.mxu0 %v8089_v10  ;;  %v8095_v57 = vpack.c.bf16 %v6026_v4, %v5996_v53 }
 0x703   : > { %v12377_v27 = vpop.permute.xlu1 %4794  ;;  %v4793_v59 = vpop.permute.xlu0 %4792 }
 0x704   : > { %v4831_v47 = vsel %vm4808_vm5, %v12260_v7, %v4793_v59  ;;  %v4832_v1 = vsel %vm4808_vm5, %v4793_v59, %v12377_v27  ;;  %8092 = vmatpush1.bf16.msra.mxu0 %v8091_v44  ;;  %v7259_v7 = vlaneseq }
 0x705   : > { %4891 = vst [vmem:[#allocation3 + $0xb00] sm:$0xf] %v4831_v47  ;;  %4892 = vst [vmem:[#allocation3 + $0xb08] sm:$0xf] %v4832_v1  ;;  %5608 = vrot.lane.b32.xlu1 %v5516_v45, %s8714_s9  ;;  %5606 = vrot.lane.b32.xlu0 %v12246_v8, %s8714_s9 }
 0x706   : > { %8094 = vmatprep.subr.bf16.mxu0 %v8093_v24  ;;  %v7260_v8 = vshrl.u32 %v7259_v7, 7 }
 0x707   : > { %v12386_v13 = vpop.permute.xlu1 %4995  ;;  %v4994_v11 = vpop.permute.xlu0 %4993 }
 0x708   : > { %v5032_v39 = vsel %vm5009_vm6, %v12268_v2, %v4994_v11  ;;  %v5033_v56 = vsel %vm5009_vm6, %v4994_v11, %v12386_v13  ;;  %8096 = vmatpush1.bf16.msra.mxu0 %v8095_v57  ;;  %v12401_v2 = vld [vmem:[%s9005_s27] sm:$0xff]  ;;  %v12414_v26 = vsub.s32 0, %v7260_v8  ;;  %v12416_v35 = vsub.s32 1, %v7260_v8  ;;  %v6055_v0 = vld [vmem:[#allocation3 + $0xa18] sm:$0xff]  ;;  %v6054_v28 = vld [vmem:[#allocation3 + $0xa10] sm:$0xff] }
 0x709   : > { %5092 = vst [vmem:[#allocation3 + $0xb00] sm:$0xf0] %v5032_v39  ;;  %5093 = vst [vmem:[#allocation3 + $0xb08] sm:$0xf0] %v5033_v56  ;;  %v12418_v3 = vsub.s32 2, %v7260_v8  ;;  %v12420_v58 = vsub.s32 3, %v7260_v8 }
 0x70a   : > { %v12430_v36 = vsub.s32 4, %v7260_v8  ;;  %v12434_v12 = vsub.s32 5, %v7260_v8  ;;  %v7262_v40 = vrot.slane %v12401_v2, %v12414_v26  ;;  %v7266_v60 = vrot.slane %v12401_v2, %v12416_v35  ;;  %v12484_v56 = vld [vmem:[%s9005_s27 + $0x8] sm:$0xff] }
 0x70b   : > { %v12412_v22 = vpop.permute.xlu1 %4397  ;;  %v4396_v14 = vpop.permute.xlu0 %4395  ;;  %v7274_v15 = vrot.slane %v12401_v2, %v12420_v58  ;;  %v12456_v30 = vsub.s32 6, %v7260_v8  ;;  %v12465_v34 = vsub.s32 7, %v7260_v8 }
 0x70c   : > { %v4432_v48 = vsel %vm4407_vm3, %v12359_v43, %v4396_v14  ;;  %v4433_v51 = vsel %vm4407_vm3, %v4396_v14, %v12412_v22  ;;  %v7270_v43 = vrot.slane %v12401_v2, %v12418_v3  ;;  %v7278_v46 = vrot.slane %v12401_v2, %v12430_v36 }
 0x70d   : > { %4492 = vst [vmem:[#allocation3 + $0xa20] sm:$0xf] %v4432_v48  ;;  %4493 = vst [vmem:[#allocation3 + $0xa28] sm:$0xf] %v4433_v51  ;;  %v7282_v49 = vrot.slane %v12401_v2, %v12434_v12  ;;  %v7409_v20 = vmul.f32 %v7262_v40, %v6222_v33  ;;  %v7410_v23 = vmul.f32 %v7266_v60, %v6224_v50 }
 0x70e   : > { %v7411_v37 = vmul.f32 %v7270_v43, %v12393_v21  ;;  %v7412_v44 = vmul.f32 %v7274_v15, %v12395_v9  ;;  %v7286_v7 = vrot.slane %v12401_v2, %v12456_v30  ;;  %v7290_v39 = vrot.slane %v12401_v2, %v12465_v34 }
 0x70f   : > { %v12462_v41 = vpop.permute.xlu1 %4598  ;;  %v4597_v19 = vpop.permute.xlu0 %4596  ;;  %v7470_v6 = vmul.f32 %v7409_v20, %v6222_v33  ;;  %v7439_v4 = vadd.f32 %v7410_v23, %v7409_v20  ;;  %v7471_v47 = vmul.f32 %v7410_v23, %v6224_v50  ;;  %v7414_v11 = vmul.f32 %v7282_v49, %v12432_v16 }
 0x710   : > { %v4633_v63 = vsel %vm4608_vm4, %v12368_v31, %v4597_v19  ;;  %v4634_v55 = vsel %vm4608_vm4, %v4597_v19, %v12462_v41  ;;  %v6085_v10 = vld [vmem:[#allocation3 + $0xb08] sm:$0xff]  ;;  %v6084_v18 = vld [vmem:[#allocation3 + $0xb00] sm:$0xff]  ;;  %v7472_v1 = vmul.f32 %v7411_v37, %v12393_v21  ;;  %v7413_v31 = vmul.f32 %v7278_v46, %v12408_v54 }
 0x711   : > { %4693 = vst [vmem:[#allocation3 + $0xa20] sm:$0xf0] %v4633_v63  ;;  %4694 = vst [vmem:[#allocation3 + $0xa28] sm:$0xf0] %v4634_v55  ;;  %v8069_v45 = vpack.c.bf16 %v6085_v10, %v6055_v0  ;;  %v8071_v59 = vpack.c.bf16 %v6084_v18, %v6054_v28  ;;  %v7440_v57 = vadd.f32 %v7439_v4, %v7411_v37 }
 0x712   : > { %v7500_v8 = vadd.f32 %v7471_v47, %v7470_v6  ;;  %v7473_v50 = vmul.f32 %v7412_v44, %v12395_v9  ;;  %v7474_v51 = vmul.f32 %v7413_v31, %v12408_v54  ;;  %v7415_v2 = vmul.f32 %v7286_v7, %v12410_v25 }
 0x713   : > { %v12476_v24 = vpop.permute.xlu1 %4798  ;;  %8070 = vmatprep.subr.bf16.mxu1 %v8069_v45  ;;  %v4797_v53 = vpop.permute.xlu0 %4796  ;;  %v7441_v14 = vadd.f32 %v7440_v57, %v7412_v44  ;;  %v7294_v40 = vrot.slane %v12484_v56, %v12414_v26  ;;  %v7475_v15 = vmul.f32 %v7414_v11, %v12432_v16  ;;  %v7416_v46 = vmul.f32 %v7290_v39, %v12436_v61 }
 0x714   : > { %v4833_v33 = vsel %vm4808_vm5, %v12377_v27, %v4797_v53  ;;  %v4834_v21 = vsel %vm4808_vm5, %v4797_v53, %v12476_v24  ;;  %8072 = vmatpush1.bf16.msra.mxu1 %v8071_v59  ;;  %v7501_v48 = vadd.f32 %v7500_v8, %v7472_v1  ;;  %v7298_v19 = vrot.slane %v12484_v56, %v12416_v35 }
 0x715   : > { %4893 = vst [vmem:[#allocation3 + $0xb10] sm:$0xf] %v4833_v33  ;;  %4894 = vst [vmem:[#allocation3 + $0xb18] sm:$0xf] %v4834_v21  ;;  %v7442_v43 = vadd.f32 %v7441_v14, %v7413_v31  ;;  %v7476_v23 = vmul.f32 %v7415_v2, %v12410_v25  ;;  %v7417_v16 = vmul.f32 %v7294_v40, %v12450_v17 }
 0x716   : > { %v7502_v54 = vadd.f32 %v7501_v48, %v7473_v50  ;;  %v7418_v44 = vmul.f32 %v7298_v19, %v12460_v38 }
 0x717   : > { %v12495_v60 = vpop.permute.xlu1 %4999  ;;  %v4998_v27 = vpop.permute.xlu0 %4997  ;;  %v7443_v0 = vadd.f32 %v7442_v43, %v7414_v11  ;;  %v7478_v25 = vmul.f32 %v7417_v16, %v12450_v17 }
 0x718   : > { %v5034_v9 = vsel %vm5009_vm6, %v12386_v13, %v4998_v27  ;;  %v5035_v49 = vsel %vm5009_vm6, %v4998_v27, %v12495_v60  ;;  %v7503_v20 = vadd.f32 %v7502_v54, %v7474_v51  ;;  %v7477_v13 = vmul.f32 %v7416_v46, %v12436_v61  ;;  %v6057_v47 = vld [vmem:[#allocation3 + $0xa28] sm:$0xff]  ;;  %v6056_v53 = vld [vmem:[#allocation3 + $0xa20] sm:$0xff] }
 0x719   : > { %5094 = vst [vmem:[#allocation3 + $0xb10] sm:$0xf0] %v5034_v9  ;;  %5095 = vst [vmem:[#allocation3 + $0xb18] sm:$0xf0] %v5035_v49  ;;  %v7444_v55 = vadd.f32 %v7443_v0, %v7415_v2  ;;  %v7479_v7 = vmul.f32 %v7418_v44, %v12460_v38 }
 0x71a   : > { %v7504_v18 = vadd.f32 %v7503_v20, %v7475_v15  ;;  %v5789_v15 = vld [vmem:[#allocation3 + $0x1c8] sm:$0xff] }
 0x71b   : > { %v5196_v37 = vpop.permute.xlu1 %5195  ;;  %v5194_v63 = vpop.permute.xlu0 %5193  ;;  %v7445_v45 = vadd.f32 %v7444_v55, %v7416_v46  ;;  %v7302_v46 = vrot.slane %v12484_v56, %v12418_v3 }
 0x71c   : > { %v5232_v10 = vsel %vm5209_vm7, %v12298_v32, %v5194_v63  ;;  %v5233_v28 = vsel %vm5209_vm7, %v5194_v63, %v5196_v37  ;;  %v7505_v59 = vadd.f32 %v7504_v18, %v7476_v23 }
 0x71d   : > { %5292 = vst [vmem:[#allocation3 + $0xbf0] sm:$0xf] %v5232_v10  ;;  %5293 = vst [vmem:[#allocation3 + $0xbf8] sm:$0xf] %v5233_v28  ;;  %v7446_v1 = vadd.f32 %v7445_v45, %v7417_v16  ;;  %v7306_v16 = vrot.slane %v12484_v56, %v12420_v58  ;;  %v5788_v28 = vld [vmem:[#allocation3 + $0x1c0] sm:$0xff] }
 0x71e   : > { %v7506_v11 = vadd.f32 %v7505_v59, %v7477_v13  ;;  %v5849_v59 = vld [vmem:[#allocation3 + $0x3a8] sm:$0xff] }
 0x71f   : > { %v5397_v6 = vpop.permute.xlu1 %5396  ;;  %v5395_v4 = vpop.permute.xlu0 %5394  ;;  %v7447_v17 = vadd.f32 %v7446_v1, %v7418_v44 }
 0x720   : > { %v5433_v61 = vsel %vm5410_vm8, %v12306_v52, %v5395_v4  ;;  %v5434_v32 = vsel %vm5410_vm8, %v5395_v4, %v5397_v6  ;;  %v6087_v31 = vld [vmem:[#allocation3 + $0xb18] sm:$0xff]  ;;  %v6086_v57 = vld [vmem:[#allocation3 + $0xb10] sm:$0xff]  ;;  %v7507_v21 = vadd.f32 %v7506_v11, %v7478_v25 }
 0x721   : > { %5493 = vst [vmem:[#allocation3 + $0xbf0] sm:$0xf0] %v5433_v61  ;;  %5494 = vst [vmem:[#allocation3 + $0xbf8] sm:$0xf0] %v5434_v32  ;;  %v8097_v39 = vpack.c.bf16 %v6087_v31, %v6057_v47  ;;  %v8099_v33 = vpack.c.bf16 %v6086_v57, %v6056_v53  ;;  %v5819_v32 = vld [vmem:[#allocation3 + $0x2b8] sm:$0xff]  ;;  %v12541_v53 = vld [vmem:[#allocation9] sm:$0xff] }
 0x722   : > { %v7508_v48 = vadd.f32 %v7507_v21, %v7479_v7  ;;  %v8109_v11 = vpack.c.bf16 %v5849_v59, %v5819_v32  ;;  %v5848_v7 = vld [vmem:[#allocation3 + $0x3a0] sm:$0xff] }
 0x723   : > { %v5597_v8 = vpop.permute.xlu1 %5596  ;;  %v5595_v50 = vpop.permute.xlu0 %5594  ;;  %8098 = vmatprep.subr.bf16.mxu0 %v8097_v39 }
 0x724   : > { %v5633_v52 = vsel %vm5610_vm9, %v12314_v42, %v5595_v50  ;;  %v5634_v14 = vsel %vm5610_vm9, %v5595_v50, %v5597_v8  ;;  %8100 = vmatpush1.bf16.msra.mxu0 %v8099_v33  ;;  %v5909_v50 = vld [vmem:[#allocation3 + $0x588] sm:$0xff] }
 0x725   : > { %5693 = vst [vmem:[#allocation3 + $0xce0] sm:$0xf] %v5633_v52  ;;  %5694 = vst [vmem:[#allocation3 + $0xce8] sm:$0xf] %v5634_v14  ;;  %v5818_v52 = vld [vmem:[#allocation3 + $0x2b0] sm:$0xff] }
 0x727   : > { %v12520_v51 = vpop.permute.xlu1 %5199  ;;  %v5198_v38 = vpop.permute.xlu0 %5197 }
 0x728   : > { %v5234_v2 = vsel %vm5209_vm7, %v5196_v37, %v5198_v38  ;;  %v5235_v40 = vsel %vm5209_vm7, %v5198_v38, %v12520_v51  ;;  %v6115_v42 = vld [vmem:[#allocation3 + $0xbf8] sm:$0xff]  ;;  %v6114_v19 = vld [vmem:[#allocation3 + $0xbf0] sm:$0xff]  ;;  %v8111_v38 = vpack.c.bf16 %v5848_v7, %v5818_v52 }
 0x729   : > { %5294 = vst [vmem:[#allocation3 + $0xc00] sm:$0xf] %v5234_v2  ;;  %5295 = vst [vmem:[#allocation3 + $0xc08] sm:$0xf] %v5235_v40  ;;  %v5759_v37 = vld [vmem:[#allocation3 + $0xd8] sm:$0xff] }
 0x72a   : > { %v8105_v10 = vpack.c.bf16 %v5789_v15, %v5759_v37  ;;  %v5879_v2 = vld [vmem:[#allocation3 + $0x498] sm:$0xff]  ;;  %v5908_v15 = vld [vmem:[#allocation3 + $0x580] sm:$0xff]  ;;  %v5878_v37 = vld [vmem:[#allocation3 + $0x490] sm:$0xff] }
 0x72b   : > { %v12525_v27 = vpop.permute.xlu1 %5400  ;;  %v5399_v43 = vpop.permute.xlu0 %5398 }
 0x72c   : > { %v5435_v9 = vsel %vm5410_vm8, %v5397_v6, %v5399_v43  ;;  %v5436_v49 = vsel %vm5410_vm8, %v5399_v43, %v12525_v27  ;;  %v6145_v54 = vld [vmem:[#allocation3 + $0xce8] sm:$0xff]  ;;  %v6144_v0 = vld [vmem:[#allocation3 + $0xce0] sm:$0xff]  ;;  %v5758_v6 = vld [vmem:[#allocation3 + $0xd0] sm:$0xff] }
 0x72d   : > { %5495 = vst [vmem:[#allocation3 + $0xc00] sm:$0xf0] %v5435_v9  ;;  %5496 = vst [vmem:[#allocation3 + $0xc08] sm:$0xf0] %v5436_v49  ;;  %v8073_v20 = vpack.c.bf16 %v6145_v54, %v6115_v42  ;;  %v8075_v23 = vpack.c.bf16 %v6144_v0, %v6114_v19  ;;  %v8107_v61 = vpack.c.bf16 %v5788_v28, %v5758_v6  ;;  %v5790_v6 = vld [vmem:[#allocation3 + $0x1d0] sm:$0xff] }
 0x72e   : > { %v6577_v63 = vpop.f32.mrb[4].mxu1  ;;  %v8113_v42 = vpack.c.bf16 %v5909_v50, %v5879_v2  ;;  %v7310_v9 = vrot.slane %v12484_v56, %v12430_v36  ;;  %v5821_v50 = vld [vmem:[#allocation3 + $0x2c8] sm:$0xff]  ;;  %v5998_v2 = vld [vmem:[#allocation3 + $0x850] sm:$0xff] }
 0x72f   : > { %v12534_v55 = vpop.permute.xlu1 %5600  ;;  %8074 = vmatprep.subr.bf16.mxu1 %v8073_v20  ;;  %v5599_v13 = vpop.permute.xlu0 %5598  ;;  %7231 = vst [vmem:[%s12397_s2 + $0x50] sm:$0xff] %v6577_v63  ;;  %v7419_v18 = vmul.f32 %v7302_v46, %v6577_v63  ;;  %v5969_v46 = vld [vmem:[#allocation3 + $0x768] sm:$0xff] }
 0x730   : > { %v5635_v44 = vsel %vm5610_vm9, %v5597_v8, %v5599_v13  ;;  %v5636_v45 = vsel %vm5610_vm9, %v5599_v13, %v12534_v55  ;;  %8076 = vmatpush1.bf16.msra.mxu1 %v8075_v23  ;;  %v6579_v25 = vpop.f32.mrb[5].mxu1  ;;  %v8115_v13 = vpack.c.bf16 %v5908_v15, %v5878_v37 }
 0x731   : > { %5695 = vst [vmem:[#allocation3 + $0xcf0] sm:$0xf] %v5635_v44  ;;  %5696 = vst [vmem:[#allocation3 + $0xcf8] sm:$0xf] %v5636_v45  ;;  %8106 = vmatprep.subr.bf16.mxu1 %v8105_v10  ;;  %v7448_v4 = vadd.f32 %v7447_v17, %v7419_v18  ;;  %v7480_v47 = vmul.f32 %v7419_v18, %v6577_v63  ;;  %v7420_v1 = vmul.f32 %v7306_v16, %v6579_v25  ;;  %v5939_v10 = vld [vmem:[#allocation3 + $0x678] sm:$0xff] }
 0x732   : > { %7232 = vst [vmem:[%s12397_s2 + $0x58] sm:$0xff] %v6579_v25  ;;  %v7314_v63 = vrot.slane %v12484_v56, %v12434_v12  ;;  %v8117_v45 = vpack.c.bf16 %v5969_v46, %v5939_v10 }
 0x733   : > { %v4001_v31 = vpop.permute.xlu1 %4000  ;;  %7731 = vmatmul.mubr.msk.f32.vlgmr.msra.gmra.mrb[10].mxu1 %vm6152_vm10, %v12541_v53  ;;  %v3999_v57 = vpop.permute.xlu0 %3998  ;;  %v7509_v39 = vadd.f32 %v7508_v48, %v7480_v47  ;;  %v7449_v33 = vadd.f32 %v7448_v4, %v7420_v1  ;;  %v7481_v21 = vmul.f32 %v7420_v1, %v6579_v25  ;;  %v5791_v48 = vld [vmem:[#allocation3 + $0x1d8] sm:$0xff]  ;;  %v5968_v25 = vld [vmem:[#allocation3 + $0x760] sm:$0xff] }
 0x734   : > { %v4033_v17 = vsel %vm4006_vm1, %v12338_v62, %v3999_v57  ;;  %v4034_v8 = vsel %vm4006_vm1, %v3999_v57, %v4001_v31  ;;  %8108 = vmatpush1.bf16.msra.mxu1 %v8107_v61  ;;  %7143 = vmatprep.mubr.f32.mxu1 %v8712_v29  ;;  %v6117_v62 = vld [vmem:[#allocation3 + $0xc08] sm:$0xff]  ;;  %v6116_v0 = vld [vmem:[#allocation3 + $0xc00] sm:$0xff]  ;;  %v5851_v61 = vld [vmem:[#allocation3 + $0x3b8] sm:$0xff] }
 0x735   : > { %4093 = vst [vmem:[#allocation3 + $0x940] sm:$0xf] %v4033_v17  ;;  %4094 = vst [vmem:[#allocation3 + $0x948] sm:$0xf] %v4034_v8  ;;  %8110 = vmatprep.subr.bf16.mxu1 %v8109_v11  ;;  %v12549_v14 = vadd.f32 %v7509_v39, %v7481_v21  ;;  %v5938_v57 = vld [vmem:[#allocation3 + $0x670] sm:$0xff]  ;;  %v5760_v11 = vld [vmem:[#allocation3 + $0xe0] sm:$0xff] }
 0x736   : > { %v8119_v17 = vpack.c.bf16 %v5968_v25, %v5938_v57  ;;  %v8135_v8 = vpack.c.bf16 %v5790_v6, %v5760_v11  ;;  %v5970_v6 = vld [vmem:[#allocation3 + $0x770] sm:$0xff] }
 0x737   : > { %v12551_v40 = vpop.permute.xlu1 %4201  ;;  %v4200_v43 = vpop.permute.xlu0 %4199 }
 0x738   : > { %v4234_v49 = vsel %vm4207_vm2, %v12347_v5, %v4200_v43  ;;  %v4235_v54 = vsel %vm4207_vm2, %v4200_v43, %v12551_v40  ;;  %8112 = vmatpush1.bf16.msra.mxu1 %v8111_v38  ;;  %v6147_v19 = vld [vmem:[#allocation3 + $0xcf8] sm:$0xff]  ;;  %v6146_v20 = vld [vmem:[#allocation3 + $0xcf0] sm:$0xff]  ;;  %v5761_v5 = vld [vmem:[#allocation3 + $0xe8] sm:$0xff]  ;;  %v8137_v38 = vpack.c.bf16 %v5851_v61, %v5821_v50 }
 0x739   : > { %4294 = vst [vmem:[#allocation3 + $0x940] sm:$0xf0] %v4234_v49  ;;  %4295 = vst [vmem:[#allocation3 + $0x948] sm:$0xf0] %v4235_v54  ;;  %8114 = vmatprep.subr.bf16.mxu1 %v8113_v42  ;;  %v8101_v23 = vpack.c.bf16 %v6147_v19, %v6117_v62  ;;  %v8103_v16 = vpack.c.bf16 %v6146_v20, %v6116_v0  ;;  %v8133_v59 = vpack.c.bf16 %v5791_v48, %v5761_v5  ;;  %v5850_v48 = vld [vmem:[#allocation3 + $0x3b0] sm:$0xff]  ;;  %v5911_v43 = vld [vmem:[#allocation3 + $0x598] sm:$0xff] }
 0x73a   : > { %v6648_v28 = vpop.f32.mrb[6].mxu0  ;;  %v5820_v20 = vld [vmem:[#allocation3 + $0x2c0] sm:$0xff] }
 0x73b   : > { %v4005_v18 = vpop.permute.xlu1 %4004  ;;  %v4003_v44 = vpop.permute.xlu0 %4002  ;;  %8102 = vmatprep.subr.bf16.mxu0 %v8101_v23  ;;  %7233 = vst [vmem:[%s12397_s2 + $0x60] sm:$0xff] %v6648_v28  ;;  %v7421_v4 = vmul.f32 %v7310_v9, %v6648_v28  ;;  %v5999_v9 = vld [vmem:[#allocation3 + $0x858] sm:$0xff]  ;;  %v8139_v23 = vpack.c.bf16 %v5850_v48, %v5820_v20 }
 0x73c   : > { %v4035_v47 = vsel %vm4006_vm1, %v4001_v31, %v4003_v44  ;;  %v4036_v1 = vsel %vm4006_vm1, %v4003_v44, %v4005_v18  ;;  %8104 = vmatpush1.bf16.msra.mxu0 %v8103_v16  ;;  %8116 = vmatpush1.bf16.msra.mxu1 %v8115_v13  ;;  %v6650_v32 = vpop.f32.mrb[7].mxu0  ;;  %v5881_v16 = vld [vmem:[#allocation3 + $0x4a8] sm:$0xff]  ;;  %v5910_v13 = vld [vmem:[#allocation3 + $0x590] sm:$0xff] }
 0x73d   : > { %4095 = vst [vmem:[#allocation3 + $0x950] sm:$0xf] %v4035_v47  ;;  %4096 = vst [vmem:[#allocation3 + $0x958] sm:$0xf] %v4036_v1  ;;  %8118 = vmatprep.subr.bf16.mxu1 %v8117_v45  ;;  %8134 = vmatprep.subr.bf16.mxu0 %v8133_v59  ;;  %v7450_v7 = vadd.f32 %v7449_v33, %v7421_v4  ;;  %v7482_v39 = vmul.f32 %v7421_v4, %v6648_v28  ;;  %v5971_v28 = vld [vmem:[#allocation3 + $0x778] sm:$0xff]  ;;  %v5941_v44 = vld [vmem:[#allocation3 + $0x688] sm:$0xff] }
 0x73e   : > { %7234 = vst [vmem:[%s12397_s2 + $0x68] sm:$0xff] %v6650_v32  ;;  %v7422_v21 = vmul.f32 %v7314_v63, %v6650_v32  ;;  %v8141_v63 = vpack.c.bf16 %v5911_v43, %v5881_v16  ;;  %v8145_v25 = vpack.c.bf16 %v5971_v28, %v5941_v44  ;;  %v5940_v1 = vld [vmem:[#allocation3 + $0x680] sm:$0xff] }
 0x73f   : > { %v4206_v31 = vpop.permute.xlu1 %4205  ;;  %v4204_v52 = vpop.permute.xlu0 %4203  ;;  %7732 = vmatmul.mubr.msk.f32.vlgmr.msra.gmra.mrb[12].mxu0 %vm6152_vm10, %v12541_v53  ;;  %v7511_v42 = vadd.f32 %v12549_v14, %v7482_v39  ;;  %v8147_v61 = vpack.c.bf16 %v5970_v6, %v5940_v1 }
 0x740   : > { %v12568_v62 = vadd.f32 %v7450_v7, %v7422_v21  ;;  %v7483_v33 = vmul.f32 %v7422_v21, %v6650_v32  ;;  %v4236_v15 = vsel %vm4207_vm2, %v12551_v40, %v4204_v52  ;;  %v4237_v46 = vsel %vm4207_vm2, %v4204_v52, %v4206_v31  ;;  %8120 = vmatpush1.bf16.msra.mxu1 %v8119_v17  ;;  %v6029_v49 = vld [vmem:[#allocation3 + $0x948] sm:$0xff]  ;;  %v6028_v54 = vld [vmem:[#allocation3 + $0x940] sm:$0xff] }
 0x741   : > { %8136 = vmatpush1.bf16.msra.mxu0 %v8135_v8  ;;  %4296 = vst [vmem:[#allocation3 + $0x950] sm:$0xf0] %v4236_v15  ;;  %4297 = vst [vmem:[#allocation3 + $0x958] sm:$0xf0] %v4237_v46  ;;  %v8121_v19 = vpack.c.bf16 %v6029_v49, %v5999_v9  ;;  %v8123_v0 = vpack.c.bf16 %v6028_v54, %v5998_v2  ;;  %7214 = vmatprep.mubr.f32.mxu0 %v8712_v29  ;;  %v5880_v29 = vld [vmem:[#allocation3 + $0x4a0] sm:$0xff]  ;;  %v6001_v32 = vld [vmem:[#allocation3 + $0x868] sm:$0xff] }
 0x742   : > { %8138 = vmatprep.subr.bf16.mxu0 %v8137_v38  ;;  %v12574_v14 = vadd.f32 %v7511_v42, %v7483_v33  ;;  %v8143_v18 = vpack.c.bf16 %v5910_v13, %v5880_v29 }
 0x743   : > { %v4402_v40 = vpop.permute.xlu1 %4401  ;;  %8122 = vmatprep.subr.bf16.mxu1 %v8121_v19  ;;  %v4400_v37 = vpop.permute.xlu0 %4399 }
 0x744   : > { %v4434_v10 = vsel %vm4407_vm3, %v12412_v22, %v4400_v37  ;;  %v4435_v5 = vsel %vm4407_vm3, %v4400_v37, %v4402_v40  ;;  %8124 = vmatpush1.bf16.msra.mxu1 %v8123_v0 }
 0x745   : > { %8140 = vmatpush1.bf16.msra.mxu0 %v8139_v23  ;;  %4494 = vst [vmem:[#allocation3 + $0xa30] sm:$0xf] %v4434_v10  ;;  %4495 = vst [vmem:[#allocation3 + $0xa38] sm:$0xf] %v4435_v5 }
 0x746   : > { %8142 = vmatprep.subr.bf16.mxu0 %v8141_v63 }
 0x747   : > { %v4603_v45 = vpop.permute.xlu1 %4602  ;;  %v4601_v59 = vpop.permute.xlu0 %4600 }
 0x748   : > { %v4635_v4 = vsel %vm4608_vm4, %v12462_v41, %v4601_v59  ;;  %v4636_v22 = vsel %vm4608_vm4, %v4601_v59, %v4603_v45  ;;  %v6031_v47 = vld [vmem:[#allocation3 + $0x958] sm:$0xff]  ;;  %v6030_v39 = vld [vmem:[#allocation3 + $0x950] sm:$0xff]  ;;  %v6000_v41 = vld [vmem:[#allocation3 + $0x860] sm:$0xff] }
 0x749   : > { %8144 = vmatpush1.bf16.msra.mxu0 %v8143_v18  ;;  %4695 = vst [vmem:[#allocation3 + $0xa30] sm:$0xf0] %v4635_v4  ;;  %4696 = vst [vmem:[#allocation3 + $0xa38] sm:$0xf0] %v4636_v22  ;;  %v8149_v7 = vpack.c.bf16 %v6031_v47, %v6001_v32  ;;  %v8151_v8 = vpack.c.bf16 %v6030_v39, %v6000_v41 }
 0x74a   : > { %8146 = vmatprep.subr.bf16.mxu0 %v8145_v25 }
 0x74b   : > { %v4803_v57 = vpop.permute.xlu1 %4802  ;;  %v4801_v11 = vpop.permute.xlu0 %4800 }
 0x74c   : > { %v4835_v21 = vsel %vm4808_vm5, %v12476_v24, %v4801_v11  ;;  %v4836_v17 = vsel %vm4808_vm5, %v4801_v11, %v4803_v57 }
 0x74d   : > { %8148 = vmatpush1.bf16.msra.mxu0 %v8147_v61  ;;  %4895 = vst [vmem:[#allocation3 + $0xb20] sm:$0xf] %v4835_v21  ;;  %4896 = vst [vmem:[#allocation3 + $0xb28] sm:$0xf] %v4836_v17 }
 0x74e   : > { %8150 = vmatprep.subr.bf16.mxu0 %v8149_v7 }
 0x74f   : > { %v5004_v50 = vpop.permute.xlu1 %5003  ;;  %v5002_v31 = vpop.permute.xlu0 %5001 }
 0x750   : > { %v5036_v52 = vsel %vm5009_vm6, %v12495_v60, %v5002_v31  ;;  %v5037_v38 = vsel %vm5009_vm6, %v5002_v31, %v5004_v50  ;;  %v6059_v15 = vld [vmem:[#allocation3 + $0xa38] sm:$0xff]  ;;  %v6058_v49 = vld [vmem:[#allocation3 + $0xa30] sm:$0xff] }
 0x751   : > { %8152 = vmatpush1.bf16.msra.mxu0 %v8151_v8  ;;  %5096 = vst [vmem:[#allocation3 + $0xb20] sm:$0xf0] %v5036_v52  ;;  %5097 = vst [vmem:[#allocation3 + $0xb28] sm:$0xf0] %v5037_v38 }
 0x753   : > { %v4406_v2 = vpop.permute.xlu1 %4405  ;;  %v4404_v24 = vpop.permute.xlu0 %4403 }
 0x754   : > { %v4436_v48 = vsel %vm4407_vm3, %v4402_v40, %v4404_v24  ;;  %v4437_v43 = vsel %vm4407_vm3, %v4404_v24, %v4406_v2 }
 0x755   : > { %4496 = vst [vmem:[#allocation3 + $0xa40] sm:$0xf] %v4436_v48  ;;  %4497 = vst [vmem:[#allocation3 + $0xa48] sm:$0xf] %v4437_v43  ;;  %v7322_v43 = vrot.slane %v12484_v56, %v12465_v34 }
 0x757   : > { %v4607_v42 = vpop.permute.xlu1 %4606  ;;  %v4605_v33 = vpop.permute.xlu0 %4604 }
 0x758   : > { %v4637_v46 = vsel %vm4608_vm4, %v4603_v45, %v4605_v33  ;;  %v4638_v60 = vsel %vm4608_vm4, %v4605_v33, %v4607_v42  ;;  %v6089_v9 = vld [vmem:[#allocation3 + $0xb28] sm:$0xff]  ;;  %v6088_v54 = vld [vmem:[#allocation3 + $0xb20] sm:$0xff] }
 0x759   : > { %4697 = vst [vmem:[#allocation3 + $0xa40] sm:$0xf0] %v4637_v46  ;;  %4698 = vst [vmem:[#allocation3 + $0xa48] sm:$0xf0] %v4638_v60  ;;  %v8125_v19 = vpack.c.bf16 %v6089_v9, %v6059_v15  ;;  %v8127_v0 = vpack.c.bf16 %v6088_v54, %v6058_v49 }
 0x75b   : > { %v4807_v20 = vpop.permute.xlu1 %4806  ;;  %8126 = vmatprep.subr.bf16.mxu1 %v8125_v19  ;;  %v4805_v23 = vpop.permute.xlu0 %4804 }
 0x75c   : > { %v4837_v16 = vsel %vm4808_vm5, %v4803_v57, %v4805_v23  ;;  %v4838_v40 = vsel %vm4808_vm5, %v4805_v23, %v4807_v20  ;;  %8128 = vmatpush1.bf16.msra.mxu1 %v8127_v0 }
 0x75d   : > { %4897 = vst [vmem:[#allocation3 + $0xb30] sm:$0xf] %v4837_v16  ;;  %4898 = vst [vmem:[#allocation3 + $0xb38] sm:$0xf] %v4838_v40  ;;  %v7253_v16 = vld [vmem:[%s9005_s27 + $0x10] sm:$0xff] }
 0x75f   : > { %v5008_v37 = vpop.permute.xlu1 %5007  ;;  %v5006_v63 = vpop.permute.xlu0 %5005 }
 0x760   : > { %v5038_v13 = vsel %vm5009_vm6, %v5004_v50, %v5006_v63  ;;  %v5039_v10 = vsel %vm5009_vm6, %v5006_v63, %v5008_v37  ;;  %v6061_v59 = vld [vmem:[#allocation3 + $0xa48] sm:$0xff]  ;;  %v6060_v22 = vld [vmem:[#allocation3 + $0xa40] sm:$0xff]  ;;  %v7326_v63 = vrot.slane %v7253_v16, %v12414_v26 }
 0x761   : > { %5098 = vst [vmem:[#allocation3 + $0xb30] sm:$0xf0] %v5038_v13  ;;  %5099 = vst [vmem:[#allocation3 + $0xb38] sm:$0xf0] %v5039_v10 }
 0x763   : > { %v5204_v5 = vpop.permute.xlu1 %5203  ;;  %v5202_v28 = vpop.permute.xlu0 %5201 }
 0x764   : > { %v5236_v29 = vsel %vm5209_vm7, %v12520_v51, %v5202_v28  ;;  %v5237_v18 = vsel %vm5209_vm7, %v5202_v28, %v5204_v5 }
 0x765   : > { %5296 = vst [vmem:[#allocation3 + $0xc10] sm:$0xf] %v5236_v29  ;;  %5297 = vst [vmem:[#allocation3 + $0xc18] sm:$0xf] %v5237_v18 }
 0x767   : > { %v5405_v44 = vpop.permute.xlu1 %5404  ;;  %v5403_v45 = vpop.permute.xlu0 %5402 }
 0x768   : > { %v5437_v25 = vsel %vm5410_vm8, %v12525_v27, %v5403_v45  ;;  %v5438_v6 = vsel %vm5410_vm8, %v5403_v45, %v5405_v44  ;;  %v6091_v4 = vld [vmem:[#allocation3 + $0xb38] sm:$0xff]  ;;  %v6090_v47 = vld [vmem:[#allocation3 + $0xb30] sm:$0xff] }
 0x769   : > { %5497 = vst [vmem:[#allocation3 + $0xc10] sm:$0xf0] %v5437_v25  ;;  %5498 = vst [vmem:[#allocation3 + $0xc18] sm:$0xf0] %v5438_v6  ;;  %v8153_v1 = vpack.c.bf16 %v6091_v4, %v6061_v59  ;;  %v8155_v61 = vpack.c.bf16 %v6090_v47, %v6060_v22 }
 0x76b   : > { %v5605_v51 = vpop.permute.xlu1 %5604  ;;  %v5603_v32 = vpop.permute.xlu0 %5602  ;;  %8154 = vmatprep.subr.bf16.mxu0 %v8153_v1  ;;  %v7334_v1 = vrot.slane %v7253_v16, %v12418_v3 }
 0x76c   : > { %v5637_v57 = vsel %vm5610_vm9, %v12534_v55, %v5603_v32  ;;  %v5638_v11 = vsel %vm5610_vm9, %v5603_v32, %v5605_v51  ;;  %8156 = vmatpush1.bf16.msra.mxu0 %v8155_v61  ;;  %v7318_v55 = vrot.slane %v12484_v56, %v12456_v30  ;;  %v7338_v61 = vrot.slane %v7253_v16, %v12420_v58 }
 0x76d   : > { %5697 = vst [vmem:[#allocation3 + $0xd00] sm:$0xf] %v5637_v57  ;;  %5698 = vst [vmem:[#allocation3 + $0xd08] sm:$0xf] %v5638_v11 }
 0x76f   : > { %v5208_v27 = vpop.permute.xlu1 %5207  ;;  %v5206_v7 = vpop.permute.xlu0 %5205 }
 0x770   : > { %v5238_v39 = vsel %vm5209_vm7, %v5204_v5, %v5206_v7  ;;  %v5239_v21 = vsel %vm5209_vm7, %v5206_v7, %v5208_v27  ;;  %v6119_v8 = vld [vmem:[#allocation3 + $0xc18] sm:$0xff]  ;;  %v6118_v38 = vld [vmem:[#allocation3 + $0xc10] sm:$0xff]  ;;  %v7330_v5 = vrot.slane %v7253_v16, %v12416_v35 }
 0x771   : > { %5298 = vst [vmem:[#allocation3 + $0xc20] sm:$0xf] %v5238_v39  ;;  %5299 = vst [vmem:[#allocation3 + $0xc28] sm:$0xf] %v5239_v21 }
 0x773   : > { %v5409_v17 = vpop.permute.xlu1 %5408  ;;  %v5407_v41 = vpop.permute.xlu0 %5406 }
 0x774   : > { %v5439_v50 = vsel %vm5410_vm8, %v5405_v44, %v5407_v41  ;;  %v5440_v31 = vsel %vm5410_vm8, %v5407_v41, %v5409_v17  ;;  %v6149_v52 = vld [vmem:[#allocation3 + $0xd08] sm:$0xff]  ;;  %v6148_v2 = vld [vmem:[#allocation3 + $0xd00] sm:$0xff]  ;;  %v7342_v41 = vrot.slane %v7253_v16, %v12430_v36 }
 0x775   : > { %5499 = vst [vmem:[#allocation3 + $0xc20] sm:$0xf0] %v5439_v50  ;;  %5500 = vst [vmem:[#allocation3 + $0xc28] sm:$0xf0] %v5440_v31  ;;  %v8129_v24 = vpack.c.bf16 %v6149_v52, %v6119_v8  ;;  %v8131_v48 = vpack.c.bf16 %v6148_v2, %v6118_v38  ;;  %v7346_v8 = vrot.slane %v7253_v16, %v12434_v12 }
 0x776   : > { %v6719_v42 = vpop.f32.mrb[6].mxu1 }
 0x777   : > { %v5609_v33 = vpop.permute.xlu1 %5608  ;;  %8130 = vmatprep.subr.bf16.mxu1 %v8129_v24  ;;  %v5607_v15 = vpop.permute.xlu0 %5606  ;;  %7235 = vst [vmem:[%s12397_s2 + $0x70] sm:$0xff] %v6719_v42  ;;  %v7423_v46 = vmul.f32 %v7318_v55, %v6719_v42 }
 0x778   : > { %v5639_v60 = vsel %vm5610_vm9, %v5605_v51, %v5607_v15  ;;  %v5640_v9 = vsel %vm5610_vm9, %v5607_v15, %v5609_v33  ;;  %8132 = vmatpush1.bf16.msra.mxu1 %v8131_v48  ;;  %v6721_v49 = vpop.f32.mrb[7].mxu1  ;;  %v7350_v33 = vrot.slane %v7253_v16, %v12456_v30  ;;  %v7354_v15 = vrot.slane %v7253_v16, %v12465_v34 }
 0x779   : > { %5699 = vst [vmem:[#allocation3 + $0xd10] sm:$0xf] %v5639_v60  ;;  %5700 = vst [vmem:[#allocation3 + $0xd18] sm:$0xf] %v5640_v9  ;;  %v7452_v54 = vadd.f32 %v12568_v62, %v7423_v46  ;;  %v7484_v19 = vmul.f32 %v7423_v46, %v6719_v42  ;;  %v7424_v56 = vmul.f32 %v7322_v43, %v6721_v49 }
 0x77a   : > { %7236 = vst [vmem:[%s12397_s2 + $0x78] sm:$0xff] %v6721_v49 }
 0x77b   : > { %7733 = vmatmul.mubr.msk.f32.vlgmr.msra.gmra.mrb[12].mxu1 %vm6152_vm10, %v12541_v53  ;;  %v7513_v0 = vadd.f32 %v12574_v14, %v7484_v19  ;;  %v7453_v20 = vadd.f32 %v7452_v54, %v7424_v56  ;;  %v7485_v23 = vmul.f32 %v7424_v56, %v6721_v49 }
 0x77c   : > { %v6121_v37 = vld [vmem:[#allocation3 + $0xc28] sm:$0xff]  ;;  %v6120_v10 = vld [vmem:[#allocation3 + $0xc20] sm:$0xff] }
 0x77d   : > { %v7514_v40 = vadd.f32 %v7513_v0, %v7485_v23  ;;  %v7254_v23 = vld [vmem:[%s9005_s27 + $0x18] sm:$0x3f]  ;;  %s7740_s27 = smul.u32 3840, %s8782_s25 }
 0x77e   : > { %v7362_v30 = vrot.slane %v7254_v23, %v12416_v35 }
 0x77f   : > { %s12658_s30 = scalar_lea.hbm %s12714_s4, %s7740_s27 }
 0x780   : > { %v6151_v13 = vld [vmem:[#allocation3 + $0xd18] sm:$0xff]  ;;  %v6150_v62 = vld [vmem:[#allocation3 + $0xd10] sm:$0xff] }
 0x781   : > { %v8157_v28 = vpack.c.bf16 %v6151_v13, %v6121_v37  ;;  %v8159_v29 = vpack.c.bf16 %v6150_v62, %v6120_v10  ;;  %v7358_v37 = vrot.slane %v7254_v23, %v12414_v26  ;;  %v7370_v26 = vrot.slane %v7254_v23, %v12420_v58 }
 0x782   : > { %v6790_v18 = vpop.f32.mrb[8].mxu0 }
 0x783   : > { %8158 = vmatprep.subr.bf16.mxu0 %v8157_v28  ;;  %7237 = vst [vmem:[%s12397_s2 + $0x80] sm:$0xff] %v6790_v18  ;;  %v7425_v14 = vmul.f32 %v7326_v63, %v6790_v18  ;;  %v6792_v44 = vpop.f32.mrb[9].mxu0 }
 0x784   : > { %8160 = vmatpush1.bf16.msra.mxu0 %v8159_v29  ;;  %7238 = vst [vmem:[%s12397_s2 + $0x88] sm:$0xff] %v6792_v44  ;;  %v7426_v45 = vmul.f32 %v7330_v5, %v6792_v44 }
 0x785   : > { %v7454_v59 = vadd.f32 %v7453_v20, %v7425_v14  ;;  %v7486_v25 = vmul.f32 %v7425_v14, %v6790_v18  ;;  %v7366_v14 = vrot.slane %v7254_v23, %v12418_v3  ;;  %v7378_v3 = vrot.slane %v7254_v23, %v12434_v12 }
 0x786   : > { %v7487_v6 = vmul.f32 %v7426_v45, %v6792_v44 }
 0x787   : > { %7734 = vmatmul.mubr.msk.f32.vlgmr.msra.gmra.mrb[14].mxu0 %vm6152_vm10, %v12541_v53  ;;  %v7515_v4 = vadd.f32 %v7514_v40, %v7486_v25  ;;  %v7455_v22 = vadd.f32 %v7454_v59, %v7426_v45 }
 0x789   : > { %v7516_v47 = vadd.f32 %v7515_v4, %v7487_v6 }
 0x7be   : > { %v6861_v51 = vpop.f32.mrb[8].mxu1 }
 0x7bf   : > { %7239 = vst [vmem:[%s12397_s2 + $0x90] sm:$0xff] %v6861_v51  ;;  %v7427_v32 = vmul.f32 %v7334_v1, %v6861_v51  ;;  %v6863_v57 = vpop.f32.mrb[9].mxu1 }
 0x7c0   : > { %7240 = vst [vmem:[%s12397_s2 + $0x98] sm:$0xff] %v6863_v57  ;;  %v7428_v11 = vmul.f32 %v7338_v61, %v6863_v57  ;;  %v7374_v61 = vrot.slane %v7254_v23, %v12430_v36 }
 0x7c1   : > { %v7456_v27 = vadd.f32 %v7455_v22, %v7427_v32  ;;  %v7488_v7 = vmul.f32 %v7427_v32, %v6861_v51 }
 0x7c2   : > { %v7489_v39 = vmul.f32 %v7428_v11, %v6863_v57 }
 0x7c3   : > { %v7517_v21 = vadd.f32 %v7516_v47, %v7488_v7  ;;  %v7457_v53 = vadd.f32 %v7456_v27, %v7428_v11 }
 0x7c5   : > { %v7518_v17 = vadd.f32 %v7517_v21, %v7489_v39 }
 0x7ca   : > { %v6932_v55 = vpop.f32.mrb[10].mxu0 }
 0x7cb   : > { %7241 = vst [vmem:[%s12397_s2 + $0xa0] sm:$0xff] %v6932_v55  ;;  %v7429_v50 = vmul.f32 %v7342_v41, %v6932_v55  ;;  %v6934_v31 = vpop.f32.mrb[11].mxu0 }
 0x7cc   : > { %7242 = vst [vmem:[%s12397_s2 + $0xa8] sm:$0xff] %v6934_v31  ;;  %v7430_v52 = vmul.f32 %v7346_v8, %v6934_v31 }
 0x7cd   : > { %v7458_v38 = vadd.f32 %v7457_v53, %v7429_v50  ;;  %v7490_v2 = vmul.f32 %v7429_v50, %v6932_v55 }
 0x7ce   : > { %v7491_v24 = vmul.f32 %v7430_v52, %v6934_v31 }
 0x7cf   : > { %v7519_v48 = vadd.f32 %v7518_v17, %v7490_v2  ;;  %v7459_v43 = vadd.f32 %v7458_v38, %v7430_v52 }
 0x7d1   : > { %v7520_v42 = vadd.f32 %v7519_v48, %v7491_v24 }
 0x806   : > { %v7003_v46 = vpop.f32.mrb[10].mxu1 }
 0x807   : > { %7243 = vst [vmem:[%s12397_s2 + $0xb0] sm:$0xff] %v7003_v46  ;;  %v7431_v60 = vmul.f32 %v7350_v33, %v7003_v46  ;;  %v7005_v9 = vpop.f32.mrb[11].mxu1 }
 0x808   : > { %7244 = vst [vmem:[%s12397_s2 + $0xb8] sm:$0xff] %v7005_v9  ;;  %v7432_v49 = vmul.f32 %v7354_v15, %v7005_v9 }
 0x809   : > { %v7460_v54 = vadd.f32 %v7459_v43, %v7431_v60  ;;  %v7492_v19 = vmul.f32 %v7431_v60, %v7003_v46 }
 0x80a   : > { %v7493_v56 = vmul.f32 %v7432_v49, %v7005_v9 }
 0x80b   : > { %v7521_v0 = vadd.f32 %v7520_v42, %v7492_v19  ;;  %v7461_v20 = vadd.f32 %v7460_v54, %v7432_v49 }
 0x80d   : > { %v7522_v40 = vadd.f32 %v7521_v0, %v7493_v56 }
 0x812   : > { %v7074_v34 = vpop.f32.mrb[12].mxu0 }
 0x813   : > { %7245 = vst [vmem:[%s12397_s2 + $0xc0] sm:$0xff] %v7074_v34  ;;  %v7433_v16 = vmul.f32 %v7358_v37, %v7074_v34  ;;  %v7076_v63 = vpop.f32.mrb[13].mxu0 }
 0x814   : > { %7246 = vst [vmem:[%s12397_s2 + $0xc8] sm:$0xff] %v7076_v63  ;;  %v7434_v13 = vmul.f32 %v7362_v30, %v7076_v63 }
 0x815   : > { %v7462_v10 = vadd.f32 %v7461_v20, %v7433_v16  ;;  %v7494_v62 = vmul.f32 %v7433_v16, %v7074_v34 }
 0x816   : > { %v7495_v5 = vmul.f32 %v7434_v13, %v7076_v63 }
 0x817   : > { %v7523_v28 = vadd.f32 %v7522_v40, %v7494_v62  ;;  %v7463_v29 = vadd.f32 %v7462_v10, %v7434_v13 }
 0x819   : > { %v7524_v18 = vadd.f32 %v7523_v28, %v7495_v5 }
 0x84e   : > { %v7145_v35 = vpop.f32.mrb[12].mxu1 }
 0x84f   : > { %7247 = vst [vmem:[%s12397_s2 + $0xd0] sm:$0xff] %v7145_v35  ;;  %v7435_v44 = vmul.f32 %v7366_v14, %v7145_v35  ;;  %v7147_v45 = vpop.f32.mrb[13].mxu1 }
 0x850   : > { %7248 = vst [vmem:[%s12397_s2 + $0xd8] sm:$0xff] %v7147_v45  ;;  %v7436_v59 = vmul.f32 %v7370_v26, %v7147_v45 }
 0x851   : > { %v7464_v25 = vadd.f32 %v7463_v29, %v7435_v44  ;;  %v7496_v6 = vmul.f32 %v7435_v44, %v7145_v35 }
 0x852   : > { %v7497_v4 = vmul.f32 %v7436_v59, %v7147_v45 }
 0x853   : > { %v7525_v22 = vadd.f32 %v7524_v18, %v7496_v6  ;;  %v7465_v47 = vadd.f32 %v7464_v25, %v7436_v59 }
 0x855   : > { %v7526_v1 = vadd.f32 %v7525_v22, %v7497_v4 }
 0x85a   : > { %v7216_v58 = vpop.f32.mrb[14].mxu0 }
 0x85b   : > { %7249 = vst [vmem:[%s12397_s2 + $0xe0] sm:$0xff] %v7216_v58  ;;  %v7437_v51 = vmul.f32 %v7374_v61, %v7216_v58  ;;  %v7218_v32 = vpop.f32.mrb[15].mxu0 }
 0x85c   : > { %7250 = vst [vmem:[%s12397_s2 + $0xe8] sm:$0xff] %v7218_v32  ;;  %v7438_v57 = vmul.f32 %v7378_v3, %v7218_v32 }
 0x85d   : > { %v7466_v11 = vadd.f32 %v7465_v47, %v7437_v51  ;;  %v7498_v27 = vmul.f32 %v7437_v51, %v7216_v58 }
 0x85e   : > { %v7499_v7 = vmul.f32 %v7438_v57, %v7218_v32 }
 0x85f   : > { %v7527_v39 = vadd.f32 %v7526_v1, %v7498_v27  ;;  %v7467_v21 = vadd.f32 %v7466_v11, %v7438_v57 }
 0x861   : > { %v7528_v53 = vadd.f32 %v7527_v39, %v7499_v7  ;;  %7468 = vadd.xlane.f32.xlu0 %v7467_v21 }
 0x863   : > { %7529 = vadd.xlane.f32.xlu1 %v7528_v53 }
 0x864   : > { %8593 = shalt.err (!%p8590_p9)
}
 0x865   : > { %s8594_s12 = scalar_lea.hbm %s12658_s30, 3840  ;;  %s8598_s28 = scalar_lea.hbm %s12714_s4, 7680 }
 0x866   : > { %p8595_p0 = scmp.ne.s32.totalorder %s12658_s30, %s8594_s12  ;;  %p8599_p11 = scmp.lt.u32.totalorder %s12658_s30, %s12714_s4 }
 0x867   : > { %p8600_p6 = scmp.lt.u32.totalorder %s8598_s28, %s8594_s12  ;;  %p8602_p12 = scmp.lt.u32.totalorder %s8594_s12, %s12658_s30 }
 0x868   : > { %p8596_p10 = pnand %p8595_p0, %p12755_p13 }
 0x869   : > { %p8601_p4 = por %p8600_p6, %p8599_p11 }
 0x86a   : > { %p8597_p1 = pneg %p8596_p10 }
 0x86b   : > { %p8603_p7 = por %p8602_p12, %p8601_p4 }
 0x86d   : > { %p8604_p3 = pnand %p8603_p7, %p8597_p1 }
 0x86f   : > { %8607 = shalt.err (!%p8604_p3)
}
 0x870   : > { %8177 = dma.vmem_to_hbm [thread:$0]  (%p12755_p13), %s7555_s17, 3840, %s12658_s30, %s7536_s13   ;;  %vm7531_vm11 = vcmask 7168   ;;  %vm7533_vm12 = vcmask 15360  }
 0x871   : > { %p358_p2 = scmp.lt.s32.totalorder %s8782_s25, 1 }
 0x873   : > { %s12772_s25 = smov (!%p358_p2, %s8782_s25), 1 }
 0x874   : > { %s7719_s26 = sshll.u32 %s12772_s25, 3 }
 0x875   : > { %s361_s2 = scalar_lea.vmem %s12715_s5, %s7719_s26 }
 0x8ee   : > { %v7469_v36 = vpop.xlane.xlu0 %7468 }
 0x8f0   : > { %v7530_v12 = vpop.xlane.xlu1 %7529 }
 0x8f1   : > { %v7532_v17 = vsel %vm7531_vm11, %v7469_v36, %v7530_v12 }
 0x8f2   : > { %7534 = vst.msk [vmem:[%s361_s2] sm:$0xff] %vm7533_vm12, %v7532_v17 }
 0x8f3 PF: > { %s12756_s27 = sld [smem:[#allocation18_spill]]  ;;  %s12757_s15 = sld [smem:[#allocation22_spill]] }
 0x8f4   : > { %p12759_p13 = scmp.ge.s32.totalorder %s8682_s24, 2 }
 0x8f9   : > { %s7569_s6 = sand.u32 1, %s12756_s27   ;;  %p12758_p5 = scmp.ne.s32.totalorder %s12757_s15, 0 }
 0x8fa   : > { %s7570_s17 = scalar_lea.sflag [#allocation6], %s7569_s6 }
 0x8fb   : > { %p8184_p8 = pnand %p12759_p13, %p12758_p5 }
 0x8fd   : > { %8653 = dma.done.wait (!%p8184_p8), %s7570_s17, 3840  }
 0x8fe   : > { %8655 = vsyncadd (!%p8184_p8), %s7570_s17, 4294963456  ;;  %s12760_s24 = sld [smem:[#allocation19_spill]]  ;;  %s12761_s25 = sld [smem:[#allocation21_spill]] }
 0x8ff   : > { %s12762_s30 = sld [smem:[#allocation20_spill]]  ;;  %s12763_s18 = smov %s8662_s19 }
 0x900   : > { %s12764_s19 = smov %s8666_s20  ;;  %s12766_s21 = smov %s8674_s22 }
 0x901   : > { %s12767_s22 = smov %s8678_s23 }
 0x904   : > { %p25_p9 = scmp.ge.s32.totalorder %s12760_s24, 4   ;;  %s12765_s20 = smov %s12761_s25 }
 0x905   : > { %s12768_s23 = smov %s12762_s30 }
 0x906   :  { %27 = sbr.rel (!%p25_p9) target bundleno = 14 (0xe), region = 123 }
 0x90d   :  { %7582 = vsyncpa [#allocation5], 1 }
 0x90e   :  { %7584 = vsyncpa [#allocation5 + $0x1], 1 }
 0x90f   :  { %7585 = vsyncpa [#allocation8], 1 }
 0x910   :  { %7587 = vsyncpa [#allocation8 + $0x1], 1 }
 0x911   :  { %7588 = vsyncpa [#allocation11], 1 }
 0x912   :  { %7590 = vsyncpa [#allocation11 + $0x1], 1 }
 0x913   :  { %7591 = vsyncpa [#allocation6], 1 }
 0x914   :  { %7593 = vsyncpa [#allocation6 + $0x1], 1 }

</bundles_post_ra>
